<compile_context>
chip_gen: v7x
topology: tpu7x:2x2x1
jax: 0.10.0
libtpu: 0.0.40
codegen_flags: <defaults>
</compile_context>

<pallas_src>
import math
import numpy as np

import jax
import jax.numpy as jnp
from jax.experimental import pallas as pl
from jax.experimental.pallas import tpu as pltpu

# ----------------------------- configuration (small) -----------------------------
CHANNELS = 8        # coupling channels (must be even)
HIDDEN = 64         # hidden_channels
FILTER = 256        # filter_channels
N_HEADS = 4
N_LAYERS = 2        # FFT layers per coupling layer
KERNEL_SIZE = 3     # FFN causal conv kernel size
N_FLOWS = 4
GIN = 32            # gin_channels

_PAD_ROWS = 8       # sublane-aligned left padding for the causal-conv windows

assert CHANNELS % 2 == 0
assert HIDDEN % N_HEADS == 0
assert KERNEL_SIZE - 1 <= _PAD_ROWS


# ----------------------------- in-kernel helpers -----------------------------
def _layer_norm(h, gamma, beta):
    mu = jnp.mean(h, axis=-1, keepdims=True)
    var = jnp.mean(jnp.square(h - mu), axis=-1, keepdims=True)
    return (h - mu) * jax.lax.rsqrt(var + 1e-5) * gamma + beta


# ----------------------------- the fused kernel -----------------------------
def _coupling_flow_kernel(x_ref, m_ref, g_ref,
                          pre_w_ref, pre_b_ref, cond_w_ref, cond_b_ref,
                          cpre_w_ref, cpre_b_ref,
                          qkv_w_ref, qkv_b_ref, o_w_ref, o_b_ref,
                          ln0_g_ref, ln0_b_ref,
                          w1_ref, b1_ref, w2_ref, b2_ref,
                          ln1_g_ref, ln1_b_ref,
                          post_w_ref, post_b_ref,
                          o_ref,
                          xc_ref, xpad_ref, mpad_ref):
    f = pl.program_id(1)                      # flow index (grid: (batch, flow))
    T, C = x_ref.shape
    H = HIDDEN
    Fd = FILTER
    KP = KERNEL_SIZE - 1
    OFF = _PAD_ROWS
    half = C // 2
    Dh = H // N_HEADS
    bf16 = jnp.bfloat16

    # Flow 0 loads the NTC input into the VMEM-resident carry; later flows reuse it.
    @pl.when(f == 0)
    def _():
        xc_ref[...] = x_ref[...]

    # Zero the left-padding rows of the causal-conv staging windows (data is always written
    # at sublane-aligned offset OFF below, so these rows stay zero).
    xpad_ref[pl.ds(0, OFF), :] = jnp.zeros((OFF, H), jnp.float32)
    mpad_ref[pl.ds(0, OFF), :] = jnp.zeros((OFF, Fd), jnp.float32)

    mask = m_ref[...]                         # [T, 1] f32
    z = xc_ref[...]                           # [T, C] carried coupling state (f32)

    # ---- pre(x0) * mask.  The inter-flow channel Flip is folded into pre_w's rows at
    #      init, so x0 is read straight out of the un-flipped carried state. ----
    h = (jnp.dot(z.astype(bf16), pre_w_ref[...],
                 preferred_element_type=jnp.float32) + pre_b_ref[...]) * mask   # [T, H]

    # ---- cond_layer(g): per-layer conditioning [1, 2H*L] (weight_norm folded at init) ----
    g_cond = (jnp.dot(g_ref[...].astype(bf16), cond_w_ref[...],
                      preferred_element_type=jnp.float32) + cond_b_ref[...])

    # causal self-attention mask built in-kernel (no HBM bias tensor)
    row = jax.lax.broadcasted_iota(jnp.int32, (T, T), 0)
    col = jax.lax.broadcasted_iota(jnp.int32, (T, T), 1)
    causal = col <= row

    for l in range(N_LAYERS):                 # attentions.FFT layers (static unroll)
        # cond_pre(x) + g_l -> fused tanh/sigmoid gate
        g_l = g_cond[:, l * 2 * H:(l + 1) * 2 * H]                 # [1, 2H]
        pre_act = (jnp.dot(h.astype(bf16), cpre_w_ref[...],
                           preferred_element_type=jnp.float32)
                   + cpre_b_ref[...] + g_l)                        # [T, 2H]
        xg = jnp.tanh(pre_act[:, :H]) * jax.nn.sigmoid(pre_act[:, H:])

        # causal MHA.  Single fused [T,3H] qkv projection; heads are static lane slices of
        # the packed VMEM value.  1/sqrt(Dh) is folded into the q columns of qkv_w at init;
        # head-concat + o-projection are folded into per-head row slices of o_w.
        qkv = (jnp.dot(xg.astype(bf16), qkv_w_ref[l],
                       preferred_element_type=jnp.float32) + qkv_b_ref[l])     # [T, 3H]
        ow = o_w_ref[l]                                            # [H, H] bf16
        y = jnp.zeros((T, H), jnp.float32) + o_b_ref[l]
        for n in range(N_HEADS):
            q_h = qkv[:, n * Dh:(n + 1) * Dh].astype(bf16)
            k_h = qkv[:, H + n * Dh:H + (n + 1) * Dh].astype(bf16)
            v_h = qkv[:, 2 * H + n * Dh:2 * H + (n + 1) * Dh].astype(bf16)
            s = jax.lax.dot_general(q_h, k_h, (((1,), (1,)), ((), ())),
                                    preferred_element_type=jnp.float32)        # [T, T]
            s = jnp.where(causal, s, -1e4)     # masked_fill(attn_mask == 0, -1e4)
            s = s - jnp.max(s, axis=-1, keepdims=True)
            p = jnp.exp(s)
            p = p * pl.reciprocal(jnp.sum(p, axis=-1, keepdims=True), approx=True)
            ctx = jnp.dot(p.astype(bf16), v_h, preferred_element_type=jnp.float32)
            y = y + jnp.dot(ctx.astype(bf16), ow[n * Dh:(n + 1) * Dh, :],
                            preferred_element_type=jnp.float32)
        # TODO(synk): dropout treated as eval-mode identity.
        h = _layer_norm(xg + y, ln0_g_ref[l], ln0_b_ref[l])

        # causal FFN: Conv1d(H,F,k) -> ReLU -> Conv1d(F,H,k).  Masked input is staged into a
        # zero-left-padded VMEM window; each causal tap is a static sublane-offset read
        # (no HBM im2col / concat temporaries; the [T, F] intermediate never leaves VMEM).
        xpad_ref[pl.ds(OFF, T), :] = h * mask
        acc1 = jnp.zeros((T, Fd), jnp.float32) + b1_ref[l]
        for j in range(KERNEL_SIZE):
            win = xpad_ref[pl.ds(OFF - KP + j, T), :]              # rows t -> x[t-(k-1)+j]
            acc1 = acc1 + jnp.dot(win.astype(bf16), w1_ref[l, j],
                                  preferred_element_type=jnp.float32)
        mpad_ref[pl.ds(OFF, T), :] = jnp.maximum(acc1, 0.0) * mask
        acc2 = jnp.zeros((T, H), jnp.float32) + b2_ref[l]
        for j in range(KERNEL_SIZE):
            win = mpad_ref[pl.ds(OFF - KP + j, T), :]
            acc2 = acc2 + jnp.dot(win.astype(bf16), w2_ref[l, j],
                                  preferred_element_type=jnp.float32)
        h = _layer_norm(h + acc2 * mask, ln1_g_ref[l], ln1_b_ref[l])

    h = h * mask                              # FFT epilogue: x = x * x_mask

    # ---- post + affine coupling (mean_only => logs == 0) + Flip ----
    # post_w's columns are pre-permuted at init for odd flows, so the update always targets
    # a contiguous half of the carried state and the Flip itself costs nothing.
    stats = (jnp.dot(h.astype(bf16), post_w_ref[...],
                     preferred_element_type=jnp.float32) + post_b_ref[...]) * mask
    z0 = z[:, :half]
    z1 = z[:, half:]
    is_even = (f % 2) == 0

    @pl.when(is_even)                          # even flow: x1 lives in the upper half
    def _():
        xc_ref[...] = jnp.concatenate([z0, stats + z1 * mask], axis=-1)

    @pl.when(jnp.logical_not(is_even))         # odd flow (Flip folded): lower half
    def _():
        xc_ref[...] = jnp.concatenate([stats + z0 * mask, z1], axis=-1)

    @pl.when(f == pl.num_programs(1) - 1)
    def _():
        o_ref[...] = xc_ref[...]


# ----------------------------- module forward -----------------------------
_WEIGHT_ORDER = ['pre_w', 'pre_b', 'cond_w', 'cond_b', 'cpre_w', 'cpre_b',
                 'qkv_w', 'qkv_b', 'o_w', 'o_b', 'ln0_g', 'ln0_b',
                 'w1', 'b1', 'w2', 'b2', 'ln1_g', 'ln1_b', 'post_w', 'post_b']


@jax.jit
def transformer_coupling_block_forward(params, x_nct, x_mask_n1t, g_nc1):
    # TransformerCouplingBlock.forward(x, x_mask, g, reverse=False)
    B, C, T = x_nct.shape
    x = jnp.transpose(x_nct, (0, 2, 1))               # NCT -> NTC (channels on lanes)
    m = jnp.transpose(x_mask_n1t, (0, 2, 1))          # [B, T, 1]
    g = jnp.transpose(g_nc1, (0, 2, 1))               # [B, 1, GIN]

    def bspec(tail):                                   # per-batch block, constant over flows
        n = len(tail)
        return pl.BlockSpec((None,) + tuple(tail), lambda b, f, n=n: (b,) + (0,) * n)

    def fspec(arr):                                    # per-flow stacked weight block
        tail = arr.shape[1:]
        n = len(tail)
        return pl.BlockSpec((None,) + tuple(tail), lambda b, f, n=n: (f,) + (0,) * n)

    weights = [params[k] for k in _WEIGHT_ORDER]

    out = pl.pallas_call(
        _coupling_flow_kernel,
        grid=(B, N_FLOWS),
        in_specs=[bspec((T, C)), bspec((T, 1)), bspec((1, GIN))] + [fspec(w) for w in weights],
        out_specs=pl.BlockSpec((None, T, C), lambda b, f: (b, 0, 0)),
        out_shape=jax.ShapeDtypeStruct((B, T, C), jnp.float32),
        scratch_shapes=[
            pltpu.VMEM((T, C), jnp.float32),                       # carried coupling state
            pltpu.VMEM((T + _PAD_ROWS, HIDDEN), jnp.float32),      # causal-conv window (H)
            pltpu.VMEM((T + _PAD_ROWS, FILTER), jnp.float32),      # causal-conv window (F)
        ],
        compiler_params=pltpu.CompilerParams(
            dimension_semantics=("parallel", "arbitrary")),
    )(x, m, g, *weights)

    if N_FLOWS % 2 == 1:                               # undo the one un-applied Flip
        out = out[..., ::-1]
    return jnp.transpose(out, (0, 2, 1))               # back to NCT


# ----------------------------- deterministic parameter init -----------------------------
class KeyGen:
    def __init__(self, key):
        self.key = key

    def __call__(self):
        self.key, sub = jax.random.split(self.key)
        return sub


def init_params(key):
    kg = KeyGen(key)
    NF, L, K = N_FLOWS, N_LAYERS, KERNEL_SIZE
    C, Ch, H, Fd, G = CHANNELS, CHANNELS // 2, HIDDEN, FILTER, GIN
    att_scale = 1.0 / math.sqrt(H // N_HEADS)

    def rnd(shape, s=0.02):
        return jax.random.normal(kg(), shape, jnp.float32) * s

    pre_w, pre_b, cond_w, cond_b, cpre_w, cpre_b = [], [], [], [], [], []
    qkv_w, qkv_b, o_w, o_b = [], [], [], []
    ln0_g, ln0_b, ln1_g, ln1_b = [], [], [], []
    w1, b1, w2, b2 = [], [], [], []
    post_w, post_b = [], []

    for fl in range(NF):
        # pre: the Flip of the previous flow is folded into the rows (even flows read
        # channels [0:Ch] of the carried state, odd flows read channels [C-1 .. Ch] reversed).
        pw = rnd((Ch, H))
        eff = jnp.zeros((C, H), jnp.float32)
        eff = eff.at[:Ch].set(pw) if fl % 2 == 0 else eff.at[Ch:].set(pw[::-1])
        pre_w.append(eff)
        pre_b.append(jnp.zeros((1, H), jnp.float32))

        cond_w.append(rnd((G, 2 * H * L)))             # weight_norm folded (init-time only)
        cond_b.append(jnp.zeros((1, 2 * H * L), jnp.float32))
        cpre_w.append(rnd((H, 2 * H)))                 # cond_pre shared across FFT layers
        cpre_b.append(jnp.zeros((1, 2 * H), jnp.float32))

        qw_l, qb_l, ow_l, ob_l = [], [], [], []
        l0g, l0b, l1g, l1b = [], [], [], []
        w1_l, b1_l, w2_l, b2_l = [], [], [], []
        for _ in range(L):
            wq = rnd((H, H))
            wk = wq                                    # proximal_init: conv_k copies conv_q
            wv = rnd((H, H))
            # softmax 1/sqrt(Dh) folded into the q columns (q bias is zero here)
            qw_l.append(jnp.concatenate([wq * att_scale, wk, wv], axis=1))
            qb_l.append(jnp.zeros((1, 3 * H), jnp.float32))
            ow_l.append(rnd((H, H)))
            ob_l.append(jnp.zeros((1, H), jnp.float32))
            l0g.append(jnp.ones((1, H), jnp.float32)); l0b.append(jnp.zeros((1, H), jnp.float32))
            l1g.append(jnp.ones((1, H), jnp.float32)); l1b.append(jnp.zeros((1, H), jnp.float32))
            w1_l.append(rnd((K, H, Fd))); b1_l.append(jnp.zeros((1, Fd), jnp.float32))
            w2_l.append(rnd((K, Fd, H))); b2_l.append(jnp.zeros((1, H), jnp.float32))
        qkv_w.append(jnp.stack(qw_l)); qkv_b.append(jnp.stack(qb_l))
        o_w.append(jnp.stack(ow_l)); o_b.append(jnp.stack(ob_l))
        ln0_g.append(jnp.stack(l0g)); ln0_b.append(jnp.stack(l0b))
        ln1_g.append(jnp.stack(l1g)); ln1_b.append(jnp.stack(l1b))
        w1.append(jnp.stack(w1_l)); b1.append(jnp.stack(b1_l))
        w2.append(jnp.stack(w2_l)); b2.append(jnp.stack(b2_l))

        # post: zero-initialised exactly like PyTorch (each flow starts as identity coupling).
        # The column reversal folds the Flip for odd flows (trivial for zeros, kept for parity
        # if real weights are loaded).
        pwp = jnp.zeros((H, Ch), jnp.float32)
        pbp = jnp.zeros((1, Ch), jnp.float32)
        if fl % 2 == 1:
            pwp = pwp[:, ::-1]
            pbp = pbp[:, ::-1]
        post_w.append(pwp); post_b.append(pbp)

    bf = jnp.bfloat16                                   # pre-cast all matmul weights once
    return {
        'pre_w': jnp.stack(pre_w).astype(bf), 'pre_b': jnp.stack(pre_b),
        'cond_w': jnp.stack(cond_w).astype(bf), 'cond_b': jnp.stack(cond_b),
        'cpre_w': jnp.stack(cpre_w).astype(bf), 'cpre_b': jnp.stack(cpre_b),
        'qkv_w': jnp.stack(qkv_w).astype(bf), 'qkv_b': jnp.stack(qkv_b),
        'o_w': jnp.stack(o_w).astype(bf), 'o_b': jnp.stack(o_b),
        'ln0_g': jnp.stack(ln0_g), 'ln0_b': jnp.stack(ln0_b),
        'w1': jnp.stack(w1).astype(bf), 'b1': jnp.stack(b1),
        'w2': jnp.stack(w2).astype(bf), 'b2': jnp.stack(b2),
        'ln1_g': jnp.stack(ln1_g), 'ln1_b': jnp.stack(ln1_b),
        'post_w': jnp.stack(post_w).astype(bf), 'post_b': jnp.stack(post_b),
    }


# ----------------------------- driver -----------------------------
if __name__ == "__main__":
    root = jax.random.PRNGKey(0)
    pkey, xkey, gkey = jax.random.split(root, 3)
    params = init_params(pkey)

    B, T = 2, 64
    x = jax.random.normal(xkey, (B, CHANNELS, T), jnp.float32)      # [B, C, T] (torch layout)
    g = jax.random.normal(gkey, (B, GIN, 1), jnp.float32)           # [B, gin, 1]
    lengths = jnp.array([T, 3 * T // 4], jnp.int32)
    x_mask = (jnp.arange(T)[None, :] < lengths[:, None]).astype(jnp.float32)[:, None, :]

    y = transformer_coupling_block_forward(params, x, x_mask, g)
    y = jax.block_until_ready(y)

    assert y.shape == (B, CHANNELS, T), y.shape
    assert np.isfinite(np.asarray(y)).all()
    print("KERNEL_OK")
</pallas_src>

<mosaic_0001>
module attributes {stable_mosaic.version = 11 : i64} {
  func.func @_coupling_flow_kernel(%arg0: i32, %arg1: i32, %arg2: memref<1x64x8xf32, #tpu.memory_space<vmem>>, %arg3: memref<1x64x1xf32, #tpu.memory_space<vmem>>, %arg4: memref<1x1x32xf32, #tpu.memory_space<vmem>>, %arg5: memref<1x8x64xbf16, #tpu.memory_space<vmem>>, %arg6: memref<1x1x64xf32, #tpu.memory_space<vmem>>, %arg7: memref<1x32x256xbf16, #tpu.memory_space<vmem>>, %arg8: memref<1x1x256xf32, #tpu.memory_space<vmem>>, %arg9: memref<1x64x128xbf16, #tpu.memory_space<vmem>>, %arg10: memref<1x1x128xf32, #tpu.memory_space<vmem>>, %arg11: memref<1x2x64x192xbf16, #tpu.memory_space<vmem>>, %arg12: memref<1x2x1x192xf32, #tpu.memory_space<vmem>>, %arg13: memref<1x2x64x64xbf16, #tpu.memory_space<vmem>>, %arg14: memref<1x2x1x64xf32, #tpu.memory_space<vmem>>, %arg15: memref<1x2x1x64xf32, #tpu.memory_space<vmem>>, %arg16: memref<1x2x1x64xf32, #tpu.memory_space<vmem>>, %arg17: memref<1x2x3x64x256xbf16, #tpu.memory_space<vmem>>, %arg18: memref<1x2x1x256xf32, #tpu.memory_space<vmem>>, %arg19: memref<1x2x3x256x64xbf16, #tpu.memory_space<vmem>>, %arg20: memref<1x2x1x64xf32, #tpu.memory_space<vmem>>, %arg21: memref<1x2x1x64xf32, #tpu.memory_space<vmem>>, %arg22: memref<1x2x1x64xf32, #tpu.memory_space<vmem>>, %arg23: memref<1x64x4xbf16, #tpu.memory_space<vmem>>, %arg24: memref<1x1x4xf32, #tpu.memory_space<vmem>>, %arg25: memref<1x64x8xf32, #tpu.memory_space<vmem>>, %arg26: memref<64x8xf32, #tpu.memory_space<vmem>>, %arg27: memref<72x64xf32, #tpu.memory_space<vmem>>, %arg28: memref<72x256xf32, #tpu.memory_space<vmem>>) attributes {dimension_semantics = [#tpu.dimension_semantics<parallel>, #tpu.dimension_semantics<arbitrary>], iteration_bounds = array<i64: 2, 4>, scalar_prefetch = 0 : i64, scratch_operands = 3 : i64, tpu.core_type = #tpu.core_type<tc>, window_params = [{transform_indices = @transform_0, window_bounds = array<i64: 1, 64, 8>}, {transform_indices = @transform_1, window_bounds = array<i64: 1, 64, 1>}, {transform_indices = @transform_2, window_bounds = array<i64: 1, 1, 32>}, {transform_indices = @transform_3, window_bounds = array<i64: 1, 8, 64>}, {transform_indices = @transform_4, window_bounds = array<i64: 1, 1, 64>}, {transform_indices = @transform_5, window_bounds = array<i64: 1, 32, 256>}, {transform_indices = @transform_6, window_bounds = array<i64: 1, 1, 256>}, {transform_indices = @transform_7, window_bounds = array<i64: 1, 64, 128>}, {transform_indices = @transform_8, window_bounds = array<i64: 1, 1, 128>}, {transform_indices = @transform_9, window_bounds = array<i64: 1, 2, 64, 192>}, {transform_indices = @transform_10, window_bounds = array<i64: 1, 2, 1, 192>}, {transform_indices = @transform_11, window_bounds = array<i64: 1, 2, 64, 64>}, {transform_indices = @transform_12, window_bounds = array<i64: 1, 2, 1, 64>}, {transform_indices = @transform_13, window_bounds = array<i64: 1, 2, 1, 64>}, {transform_indices = @transform_14, window_bounds = array<i64: 1, 2, 1, 64>}, {transform_indices = @transform_15, window_bounds = array<i64: 1, 2, 3, 64, 256>}, {transform_indices = @transform_16, window_bounds = array<i64: 1, 2, 1, 256>}, {transform_indices = @transform_17, window_bounds = array<i64: 1, 2, 3, 256, 64>}, {transform_indices = @transform_18, window_bounds = array<i64: 1, 2, 1, 64>}, {transform_indices = @transform_19, window_bounds = array<i64: 1, 2, 1, 64>}, {transform_indices = @transform_20, window_bounds = array<i64: 1, 2, 1, 64>}, {transform_indices = @transform_21, window_bounds = array<i64: 1, 64, 4>}, {transform_indices = @transform_22, window_bounds = array<i64: 1, 1, 4>}, {transform_indices = @transform_23, window_bounds = array<i64: 1, 64, 8>}]} {
    %c0_i32 = arith.constant 0 : i32
    %0 = arith.cmpi eq, %arg1, %c0_i32 : i32
    %1 = arith.extui %0 : i1 to i32
    %c0_i32_0 = arith.constant 0 : i32
    %2 = arith.cmpi ne, %1, %c0_i32_0 : i32
    scf.if %2 {
      %c0_315 = arith.constant 0 : index
      %c0_316 = arith.constant 0 : index
      %c0_317 = arith.constant 0 : index
      %555 = vector.load %arg2[%c0_315, %c0_316, %c0_317] : memref<1x64x8xf32, #tpu.memory_space<vmem>>, vector<1x64x8xf32>
      %556 = vector.shape_cast %555 : vector<1x64x8xf32> to vector<64x8xf32>
      %c0_318 = arith.constant 0 : index
      %c0_319 = arith.constant 0 : index
      %557 = vector.load %arg26[%c0_318, %c0_319] : memref<64x8xf32, #tpu.memory_space<vmem>>, vector<64x8xf32>
      tpu.vector_store %arg26[%c0_318, %c0_319], %556 {strides = array<i32>} : memref<64x8xf32, #tpu.memory_space<vmem>>, vector<64x8xf32>,
    } else {
    }
    %cst = arith.constant 0.000000e+00 : f32
    %3 = vector.broadcast %cst : f32 to vector<8x64xf32>
    %c0 = arith.constant 0 : index
    %c0_1 = arith.constant 0 : index
    %4 = vector.load %arg27[%c0, %c0_1] : memref<72x64xf32, #tpu.memory_space<vmem>>, vector<8x64xf32>
    tpu.vector_store %arg27[%c0, %c0_1], %3 {strides = array<i32>} : memref<72x64xf32, #tpu.memory_space<vmem>>, vector<8x64xf32>,
    %cst_2 = arith.constant 0.000000e+00 : f32
    %5 = vector.broadcast %cst_2 : f32 to vector<8x256xf32>
    %c0_3 = arith.constant 0 : index
    %c0_4 = arith.constant 0 : index
    %6 = vector.load %arg28[%c0_3, %c0_4] : memref<72x256xf32, #tpu.memory_space<vmem>>, vector<8x256xf32>
    tpu.vector_store %arg28[%c0_3, %c0_4], %5 {strides = array<i32>} : memref<72x256xf32, #tpu.memory_space<vmem>>, vector<8x256xf32>,
    %c0_5 = arith.constant 0 : index
    %c0_6 = arith.constant 0 : index
    %c0_7 = arith.constant 0 : index
    %7 = vector.load %arg3[%c0_5, %c0_6, %c0_7] : memref<1x64x1xf32, #tpu.memory_space<vmem>>, vector<1x64x1xf32>
    %8 = vector.shape_cast %7 : vector<1x64x1xf32> to vector<64x1xf32>
    %c0_8 = arith.constant 0 : index
    %c0_9 = arith.constant 0 : index
    %9 = vector.load %arg26[%c0_8, %c0_9] : memref<64x8xf32, #tpu.memory_space<vmem>>, vector<64x8xf32>
    %10 = arith.truncf %9 : vector<64x8xf32> to vector<64x8xbf16>
    %c0_10 = arith.constant 0 : index
    %c0_11 = arith.constant 0 : index
    %c0_12 = arith.constant 0 : index
    %11 = vector.load %arg5[%c0_10, %c0_11, %c0_12] : memref<1x8x64xbf16, #tpu.memory_space<vmem>>, vector<1x8x64xbf16>
    %12 = vector.shape_cast %11 : vector<1x8x64xbf16> to vector<8x64xbf16>
    %cst_13 = arith.constant dense<0.000000e+00> : vector<64x64xf32>
    %13 = tpu.matmul %10, %12, %cst_13 {dimension_numbers = #tpu.dot_dimension_numbers<[1], [0], [0], [1], [0, 0, 1, 1], [], []>} : vector<64x8xbf16>, vector<8x64xbf16>, vector<64x64xf32> -> vector<64x64xf32>
    %c0_14 = arith.constant 0 : index
    %c0_15 = arith.constant 0 : index
    %c0_16 = arith.constant 0 : index
    %14 = vector.load %arg6[%c0_14, %c0_15, %c0_16] : memref<1x1x64xf32, #tpu.memory_space<vmem>>, vector<1x1x64xf32>
    %15 = vector.shape_cast %14 : vector<1x1x64xf32> to vector<1x64xf32>
    %16 = vector.broadcast %15 : vector<1x64xf32> to vector<64x64xf32>
    %17 = arith.addf %13, %16 : vector<64x64xf32>
    %18 = vector.broadcast %8 : vector<64x1xf32> to vector<64x64xf32>
    %19 = arith.mulf %17, %18 : vector<64x64xf32>
    %c0_17 = arith.constant 0 : index
    %c0_18 = arith.constant 0 : index
    %c0_19 = arith.constant 0 : index
    %20 = vector.load %arg4[%c0_17, %c0_18, %c0_19] : memref<1x1x32xf32, #tpu.memory_space<vmem>>, vector<1x1x32xf32>
    %21 = vector.shape_cast %20 : vector<1x1x32xf32> to vector<1x32xf32>
    %22 = arith.truncf %21 : vector<1x32xf32> to vector<1x32xbf16>
    %c0_20 = arith.constant 0 : index
    %c0_21 = arith.constant 0 : index
    %c0_22 = arith.constant 0 : index
    %23 = vector.load %arg7[%c0_20, %c0_21, %c0_22] : memref<1x32x256xbf16, #tpu.memory_space<vmem>>, vector<1x32x256xbf16>
    %24 = vector.shape_cast %23 : vector<1x32x256xbf16> to vector<32x256xbf16>
    %cst_23 = arith.constant dense<0.000000e+00> : vector<1x256xf32>
    %25 = tpu.matmul %22, %24, %cst_23 {dimension_numbers = #tpu.dot_dimension_numbers<[1], [0], [0], [1], [0, 0, 1, 1], [], []>} : vector<1x32xbf16>, vector<32x256xbf16>, vector<1x256xf32> -> vector<1x256xf32>
    %c0_24 = arith.constant 0 : index
    %c0_25 = arith.constant 0 : index
    %c0_26 = arith.constant 0 : index
    %26 = vector.load %arg8[%c0_24, %c0_25, %c0_26] : memref<1x1x256xf32, #tpu.memory_space<vmem>>, vector<1x1x256xf32>
    %27 = vector.shape_cast %26 : vector<1x1x256xf32> to vector<1x256xf32>
    %28 = arith.addf %25, %27 : vector<1x256xf32>
    %29 = tpu.iota {dimensions = array<i32: 0>} : vector<64x64xi32>
    %30 = tpu.iota {dimensions = array<i32: 1>} : vector<64x64xi32>
    %31 = arith.cmpi sle, %30, %29 : vector<64x64xi32>
    %32 = vector.extract_strided_slice %28 {offsets = [0, 0], sizes = [1, 128], strides = [1, 1]} : vector<1x256xf32> to vector<1x128xf32>
    %33 = arith.truncf %19 : vector<64x64xf32> to vector<64x64xbf16>
    %c0_27 = arith.constant 0 : index
    %c0_28 = arith.constant 0 : index
    %c0_29 = arith.constant 0 : index
    %34 = vector.load %arg9[%c0_27, %c0_28, %c0_29] : memref<1x64x128xbf16, #tpu.memory_space<vmem>>, vector<1x64x128xbf16>
    %35 = vector.shape_cast %34 : vector<1x64x128xbf16> to vector<64x128xbf16>
    %cst_30 = arith.constant dense<0.000000e+00> : vector<64x128xf32>
    %36 = tpu.matmul %33, %35, %cst_30 {dimension_numbers = #tpu.dot_dimension_numbers<[1], [0], [0], [1], [0, 0, 1, 1], [], []>} : vector<64x64xbf16>, vector<64x128xbf16>, vector<64x128xf32> -> vector<64x128xf32>
    %c0_31 = arith.constant 0 : index
    %c0_32 = arith.constant 0 : index
    %c0_33 = arith.constant 0 : index
    %37 = vector.load %arg10[%c0_31, %c0_32, %c0_33] : memref<1x1x128xf32, #tpu.memory_space<vmem>>, vector<1x1x128xf32>
    %38 = vector.shape_cast %37 : vector<1x1x128xf32> to vector<1x128xf32>
    %39 = vector.broadcast %38 : vector<1x128xf32> to vector<64x128xf32>
    %40 = arith.addf %36, %39 : vector<64x128xf32>
    %41 = vector.broadcast %32 : vector<1x128xf32> to vector<64x128xf32>
    %42 = arith.addf %40, %41 : vector<64x128xf32>
    %43 = vector.extract_strided_slice %42 {offsets = [0, 0], sizes = [64, 64], strides = [1, 1]} : vector<64x128xf32> to vector<64x64xf32>
    %44 = math.tanh %43 : vector<64x64xf32>
    %45 = vector.extract_strided_slice %42 {offsets = [0, 64], sizes = [64, 64], strides = [1, 1]} : vector<64x128xf32> to vector<64x64xf32>
    %46 = arith.negf %45 : vector<64x64xf32>
    %47 = math.exp %46 : vector<64x64xf32>
    %cst_34 = arith.constant 1.000000e+00 : f32
    %48 = vector.broadcast %cst_34 : f32 to vector<64x64xf32>
    %49 = arith.addf %48, %47 : vector<64x64xf32>
    %50 = arith.divf %48, %49 : vector<64x64xf32>
    %51 = arith.mulf %44, %50 : vector<64x64xf32>
    %52 = arith.truncf %51 : vector<64x64xf32> to vector<64x64xbf16>
    %c0_35 = arith.constant 0 : index
    %c0_36 = arith.constant 0 : index
    %c0_37 = arith.constant 0 : index
    %c0_38 = arith.constant 0 : index
    %53 = vector.load %arg11[%c0_35, %c0_36, %c0_37, %c0_38] : memref<1x2x64x192xbf16, #tpu.memory_space<vmem>>, vector<1x1x64x192xbf16>
    %54 = vector.shape_cast %53 : vector<1x1x64x192xbf16> to vector<64x192xbf16>
    %cst_39 = arith.constant dense<0.000000e+00> : vector<64x192xf32>
    %55 = tpu.matmul %52, %54, %cst_39 {dimension_numbers = #tpu.dot_dimension_numbers<[1], [0], [0], [1], [0, 0, 1, 1], [], []>} : vector<64x64xbf16>, vector<64x192xbf16>, vector<64x192xf32> -> vector<64x192xf32>
    %c0_40 = arith.constant 0 : index
    %c0_41 = arith.constant 0 : index
    %c0_42 = arith.constant 0 : index
    %c0_43 = arith.constant 0 : index
    %56 = vector.load %arg12[%c0_40, %c0_41, %c0_42, %c0_43] : memref<1x2x1x192xf32, #tpu.memory_space<vmem>>, vector<1x1x1x192xf32>
    %57 = vector.shape_cast %56 : vector<1x1x1x192xf32> to vector<1x192xf32>
    %58 = vector.broadcast %57 : vector<1x192xf32> to vector<64x192xf32>
    %59 = arith.addf %55, %58 : vector<64x192xf32>
    %c0_44 = arith.constant 0 : index
    %c0_45 = arith.constant 0 : index
    %c0_46 = arith.constant 0 : index
    %c0_47 = arith.constant 0 : index
    %60 = vector.load %arg13[%c0_44, %c0_45, %c0_46, %c0_47] : memref<1x2x64x64xbf16, #tpu.memory_space<vmem>>, vector<1x1x64x64xbf16>
    %61 = vector.shape_cast %60 : vector<1x1x64x64xbf16> to vector<64x64xbf16>
    %cst_48 = arith.constant 0.000000e+00 : f32
    %62 = vector.broadcast %cst_48 : f32 to vector<64x64xf32>
    %c0_49 = arith.constant 0 : index
    %c0_50 = arith.constant 0 : index
    %c0_51 = arith.constant 0 : index
    %c0_52 = arith.constant 0 : index
    %63 = vector.load %arg14[%c0_49, %c0_50, %c0_51, %c0_52] : memref<1x2x1x64xf32, #tpu.memory_space<vmem>>, vector<1x1x1x64xf32>
    %64 = vector.shape_cast %63 : vector<1x1x1x64xf32> to vector<1x64xf32>
    %65 = vector.broadcast %64 : vector<1x64xf32> to vector<64x64xf32>
    %66 = arith.addf %62, %65 : vector<64x64xf32>
    %67 = vector.extract_strided_slice %59 {offsets = [0, 0], sizes = [64, 16], strides = [1, 1]} : vector<64x192xf32> to vector<64x16xf32>
    %68 = arith.truncf %67 : vector<64x16xf32> to vector<64x16xbf16>
    %69 = vector.extract_strided_slice %59 {offsets = [0, 64], sizes = [64, 16], strides = [1, 1]} : vector<64x192xf32> to vector<64x16xf32>
    %70 = arith.truncf %69 : vector<64x16xf32> to vector<64x16xbf16>
    %71 = vector.extract_strided_slice %59 {offsets = [0, 128], sizes = [64, 16], strides = [1, 1]} : vector<64x192xf32> to vector<64x16xf32>
    %72 = arith.truncf %71 : vector<64x16xf32> to vector<64x16xbf16>
    %cst_53 = arith.constant dense<0.000000e+00> : vector<64x64xf32>
    %73 = tpu.matmul %68, %70, %cst_53 {dimension_numbers = #tpu.dot_dimension_numbers<[1], [1], [0], [0], [0, 0, 1, 0], [], []>} : vector<64x16xbf16>, vector<64x16xbf16>, vector<64x64xf32> -> vector<64x64xf32>
    %cst_54 = arith.constant -1.000000e+04 : f32
    %74 = vector.broadcast %cst_54 : f32 to vector<64x64xf32>
    %75 = arith.select %31, %73, %74 : vector<64x64xi1>, vector<64x64xf32>
    %cst_55 = arith.constant dense<0xFF800000> : vector<64xf32>
    %76 = vector.multi_reduction <maximumf>, %75, %cst_55 [1] : vector<64x64xf32> to vector<64xf32>
    %77 = vector.shape_cast %76 : vector<64xf32> to vector<64x1xf32>
    %78 = vector.broadcast %77 : vector<64x1xf32> to vector<64x64xf32>
    %79 = arith.subf %75, %78 : vector<64x64xf32>
    %80 = math.exp %79 : vector<64x64xf32>
    %cst_56 = arith.constant dense<0.000000e+00> : vector<64xf32>
    %81 = vector.multi_reduction <add>, %80, %cst_56 [1] : vector<64x64xf32> to vector<64xf32>
    %82 = vector.shape_cast %81 : vector<64xf32> to vector<64x1xf32>
    %83 = tpu.reciprocal %82 {approx = true} : vector<64x1xf32> -> vector<64x1xf32>
    %84 = vector.broadcast %83 : vector<64x1xf32> to vector<64x64xf32>
    %85 = arith.mulf %80, %84 : vector<64x64xf32>
    %86 = arith.truncf %85 : vector<64x64xf32> to vector<64x64xbf16>
    %cst_57 = arith.constant dense<0.000000e+00> : vector<64x16xf32>
    %87 = tpu.matmul %86, %72, %cst_57 {dimension_numbers = #tpu.dot_dimension_numbers<[1], [0], [0], [1], [0, 0, 1, 1], [], []>} : vector<64x64xbf16>, vector<64x16xbf16>, vector<64x16xf32> -> vector<64x16xf32>
    %88 = arith.truncf %87 : vector<64x16xf32> to vector<64x16xbf16>
    %89 = vector.extract_strided_slice %61 {offsets = [0, 0], sizes = [16, 64], strides = [1, 1]} : vector<64x64xbf16> to vector<16x64xbf16>
    %cst_58 = arith.constant dense<0.000000e+00> : vector<64x64xf32>
    %90 = tpu.matmul %88, %89, %cst_58 {dimension_numbers = #tpu.dot_dimension_numbers<[1], [0], [0], [1], [0, 0, 1, 1], [], []>} : vector<64x16xbf16>, vector<16x64xbf16>, vector<64x64xf32> -> vector<64x64xf32>
    %91 = arith.addf %66, %90 : vector<64x64xf32>
    %92 = vector.extract_strided_slice %59 {offsets = [0, 16], sizes = [64, 16], strides = [1, 1]} : vector<64x192xf32> to vector<64x16xf32>
    %93 = arith.truncf %92 : vector<64x16xf32> to vector<64x16xbf16>
    %94 = vector.extract_strided_slice %59 {offsets = [0, 80], sizes = [64, 16], strides = [1, 1]} : vector<64x192xf32> to vector<64x16xf32>
    %95 = arith.truncf %94 : vector<64x16xf32> to vector<64x16xbf16>
    %96 = vector.extract_strided_slice %59 {offsets = [0, 144], sizes = [64, 16], strides = [1, 1]} : vector<64x192xf32> to vector<64x16xf32>
    %97 = arith.truncf %96 : vector<64x16xf32> to vector<64x16xbf16>
    %cst_59 = arith.constant dense<0.000000e+00> : vector<64x64xf32>
    %98 = tpu.matmul %93, %95, %cst_59 {dimension_numbers = #tpu.dot_dimension_numbers<[1], [1], [0], [0], [0, 0, 1, 0], [], []>} : vector<64x16xbf16>, vector<64x16xbf16>, vector<64x64xf32> -> vector<64x64xf32>
    %cst_60 = arith.constant -1.000000e+04 : f32
    %99 = vector.broadcast %cst_60 : f32 to vector<64x64xf32>
    %100 = arith.select %31, %98, %99 : vector<64x64xi1>, vector<64x64xf32>
    %cst_61 = arith.constant dense<0xFF800000> : vector<64xf32>
    %101 = vector.multi_reduction <maximumf>, %100, %cst_61 [1] : vector<64x64xf32> to vector<64xf32>
    %102 = vector.shape_cast %101 : vector<64xf32> to vector<64x1xf32>
    %103 = vector.broadcast %102 : vector<64x1xf32> to vector<64x64xf32>
    %104 = arith.subf %100, %103 : vector<64x64xf32>
    %105 = math.exp %104 : vector<64x64xf32>
    %cst_62 = arith.constant dense<0.000000e+00> : vector<64xf32>
    %106 = vector.multi_reduction <add>, %105, %cst_62 [1] : vector<64x64xf32> to vector<64xf32>
    %107 = vector.shape_cast %106 : vector<64xf32> to vector<64x1xf32>
    %108 = tpu.reciprocal %107 {approx = true} : vector<64x1xf32> -> vector<64x1xf32>
    %109 = vector.broadcast %108 : vector<64x1xf32> to vector<64x64xf32>
    %110 = arith.mulf %105, %109 : vector<64x64xf32>
    %111 = arith.truncf %110 : vector<64x64xf32> to vector<64x64xbf16>
    %cst_63 = arith.constant dense<0.000000e+00> : vector<64x16xf32>
    %112 = tpu.matmul %111, %97, %cst_63 {dimension_numbers = #tpu.dot_dimension_numbers<[1], [0], [0], [1], [0, 0, 1, 1], [], []>} : vector<64x64xbf16>, vector<64x16xbf16>, vector<64x16xf32> -> vector<64x16xf32>
    %113 = arith.truncf %112 : vector<64x16xf32> to vector<64x16xbf16>
    %114 = vector.extract_strided_slice %61 {offsets = [16, 0], sizes = [16, 64], strides = [1, 1]} : vector<64x64xbf16> to vector<16x64xbf16>
    %cst_64 = arith.constant dense<0.000000e+00> : vector<64x64xf32>
    %115 = tpu.matmul %113, %114, %cst_64 {dimension_numbers = #tpu.dot_dimension_numbers<[1], [0], [0], [1], [0, 0, 1, 1], [], []>} : vector<64x16xbf16>, vector<16x64xbf16>, vector<64x64xf32> -> vector<64x64xf32>
    %116 = arith.addf %91, %115 : vector<64x64xf32>
    %117 = vector.extract_strided_slice %59 {offsets = [0, 32], sizes = [64, 16], strides = [1, 1]} : vector<64x192xf32> to vector<64x16xf32>
    %118 = arith.truncf %117 : vector<64x16xf32> to vector<64x16xbf16>
    %119 = vector.extract_strided_slice %59 {offsets = [0, 96], sizes = [64, 16], strides = [1, 1]} : vector<64x192xf32> to vector<64x16xf32>
    %120 = arith.truncf %119 : vector<64x16xf32> to vector<64x16xbf16>
    %121 = vector.extract_strided_slice %59 {offsets = [0, 160], sizes = [64, 16], strides = [1, 1]} : vector<64x192xf32> to vector<64x16xf32>
    %122 = arith.truncf %121 : vector<64x16xf32> to vector<64x16xbf16>
    %cst_65 = arith.constant dense<0.000000e+00> : vector<64x64xf32>
    %123 = tpu.matmul %118, %120, %cst_65 {dimension_numbers = #tpu.dot_dimension_numbers<[1], [1], [0], [0], [0, 0, 1, 0], [], []>} : vector<64x16xbf16>, vector<64x16xbf16>, vector<64x64xf32> -> vector<64x64xf32>
    %cst_66 = arith.constant -1.000000e+04 : f32
    %124 = vector.broadcast %cst_66 : f32 to vector<64x64xf32>
    %125 = arith.select %31, %123, %124 : vector<64x64xi1>, vector<64x64xf32>
    %cst_67 = arith.constant dense<0xFF800000> : vector<64xf32>
    %126 = vector.multi_reduction <maximumf>, %125, %cst_67 [1] : vector<64x64xf32> to vector<64xf32>
    %127 = vector.shape_cast %126 : vector<64xf32> to vector<64x1xf32>
    %128 = vector.broadcast %127 : vector<64x1xf32> to vector<64x64xf32>
    %129 = arith.subf %125, %128 : vector<64x64xf32>
    %130 = math.exp %129 : vector<64x64xf32>
    %cst_68 = arith.constant dense<0.000000e+00> : vector<64xf32>
    %131 = vector.multi_reduction <add>, %130, %cst_68 [1] : vector<64x64xf32> to vector<64xf32>
    %132 = vector.shape_cast %131 : vector<64xf32> to vector<64x1xf32>
    %133 = tpu.reciprocal %132 {approx = true} : vector<64x1xf32> -> vector<64x1xf32>
    %134 = vector.broadcast %133 : vector<64x1xf32> to vector<64x64xf32>
    %135 = arith.mulf %130, %134 : vector<64x64xf32>
    %136 = arith.truncf %135 : vector<64x64xf32> to vector<64x64xbf16>
    %cst_69 = arith.constant dense<0.000000e+00> : vector<64x16xf32>
    %137 = tpu.matmul %136, %122, %cst_69 {dimension_numbers = #tpu.dot_dimension_numbers<[1], [0], [0], [1], [0, 0, 1, 1], [], []>} : vector<64x64xbf16>, vector<64x16xbf16>, vector<64x16xf32> -> vector<64x16xf32>
    %138 = arith.truncf %137 : vector<64x16xf32> to vector<64x16xbf16>
    %139 = vector.extract_strided_slice %61 {offsets = [32, 0], sizes = [16, 64], strides = [1, 1]} : vector<64x64xbf16> to vector<16x64xbf16>
    %cst_70 = arith.constant dense<0.000000e+00> : vector<64x64xf32>
    %140 = tpu.matmul %138, %139, %cst_70 {dimension_numbers = #tpu.dot_dimension_numbers<[1], [0], [0], [1], [0, 0, 1, 1], [], []>} : vector<64x16xbf16>, vector<16x64xbf16>, vector<64x64xf32> -> vector<64x64xf32>
    %141 = arith.addf %116, %140 : vector<64x64xf32>
    %142 = vector.extract_strided_slice %59 {offsets = [0, 48], sizes = [64, 16], strides = [1, 1]} : vector<64x192xf32> to vector<64x16xf32>
    %143 = arith.truncf %142 : vector<64x16xf32> to vector<64x16xbf16>
    %144 = vector.extract_strided_slice %59 {offsets = [0, 112], sizes = [64, 16], strides = [1, 1]} : vector<64x192xf32> to vector<64x16xf32>
    %145 = arith.truncf %144 : vector<64x16xf32> to vector<64x16xbf16>
    %146 = vector.extract_strided_slice %59 {offsets = [0, 176], sizes = [64, 16], strides = [1, 1]} : vector<64x192xf32> to vector<64x16xf32>
    %147 = arith.truncf %146 : vector<64x16xf32> to vector<64x16xbf16>
    %cst_71 = arith.constant dense<0.000000e+00> : vector<64x64xf32>
    %148 = tpu.matmul %143, %145, %cst_71 {dimension_numbers = #tpu.dot_dimension_numbers<[1], [1], [0], [0], [0, 0, 1, 0], [], []>} : vector<64x16xbf16>, vector<64x16xbf16>, vector<64x64xf32> -> vector<64x64xf32>
    %cst_72 = arith.constant -1.000000e+04 : f32
    %149 = vector.broadcast %cst_72 : f32 to vector<64x64xf32>
    %150 = arith.select %31, %148, %149 : vector<64x64xi1>, vector<64x64xf32>
    %cst_73 = arith.constant dense<0xFF800000> : vector<64xf32>
    %151 = vector.multi_reduction <maximumf>, %150, %cst_73 [1] : vector<64x64xf32> to vector<64xf32>
    %152 = vector.shape_cast %151 : vector<64xf32> to vector<64x1xf32>
    %153 = vector.broadcast %152 : vector<64x1xf32> to vector<64x64xf32>
    %154 = arith.subf %150, %153 : vector<64x64xf32>
    %155 = math.exp %154 : vector<64x64xf32>
    %cst_74 = arith.constant dense<0.000000e+00> : vector<64xf32>
    %156 = vector.multi_reduction <add>, %155, %cst_74 [1] : vector<64x64xf32> to vector<64xf32>
    %157 = vector.shape_cast %156 : vector<64xf32> to vector<64x1xf32>
    %158 = tpu.reciprocal %157 {approx = true} : vector<64x1xf32> -> vector<64x1xf32>
    %159 = vector.broadcast %158 : vector<64x1xf32> to vector<64x64xf32>
    %160 = arith.mulf %155, %159 : vector<64x64xf32>
    %161 = arith.truncf %160 : vector<64x64xf32> to vector<64x64xbf16>
    %cst_75 = arith.constant dense<0.000000e+00> : vector<64x16xf32>
    %162 = tpu.matmul %161, %147, %cst_75 {dimension_numbers = #tpu.dot_dimension_numbers<[1], [0], [0], [1], [0, 0, 1, 1], [], []>} : vector<64x64xbf16>, vector<64x16xbf16>, vector<64x16xf32> -> vector<64x16xf32>
    %163 = arith.truncf %162 : vector<64x16xf32> to vector<64x16xbf16>
    %164 = vector.extract_strided_slice %61 {offsets = [48, 0], sizes = [16, 64], strides = [1, 1]} : vector<64x64xbf16> to vector<16x64xbf16>
    %cst_76 = arith.constant dense<0.000000e+00> : vector<64x64xf32>
    %165 = tpu.matmul %163, %164, %cst_76 {dimension_numbers = #tpu.dot_dimension_numbers<[1], [0], [0], [1], [0, 0, 1, 1], [], []>} : vector<64x16xbf16>, vector<16x64xbf16>, vector<64x64xf32> -> vector<64x64xf32>
    %166 = arith.addf %141, %165 : vector<64x64xf32>
    %167 = arith.addf %51, %166 : vector<64x64xf32>
    %c0_77 = arith.constant 0 : index
    %c0_78 = arith.constant 0 : index
    %c0_79 = arith.constant 0 : index
    %c0_80 = arith.constant 0 : index
    %168 = vector.load %arg15[%c0_77, %c0_78, %c0_79, %c0_80] : memref<1x2x1x64xf32, #tpu.memory_space<vmem>>, vector<1x1x1x64xf32>
    %169 = vector.shape_cast %168 : vector<1x1x1x64xf32> to vector<1x64xf32>
    %c0_81 = arith.constant 0 : index
    %c0_82 = arith.constant 0 : index
    %c0_83 = arith.constant 0 : index
    %c0_84 = arith.constant 0 : index
    %170 = vector.load %arg16[%c0_81, %c0_82, %c0_83, %c0_84] : memref<1x2x1x64xf32, #tpu.memory_space<vmem>>, vector<1x1x1x64xf32>
    %171 = vector.shape_cast %170 : vector<1x1x1x64xf32> to vector<1x64xf32>
    %cst_85 = arith.constant dense<0.000000e+00> : vector<64xf32>
    %172 = vector.multi_reduction <add>, %167, %cst_85 [1] : vector<64x64xf32> to vector<64xf32>
    %173 = vector.shape_cast %172 : vector<64xf32> to vector<64x1xf32>
    %cst_86 = arith.constant 6.400000e+01 : f32
    %174 = vector.broadcast %cst_86 : f32 to vector<64x1xf32>
    %175 = arith.divf %173, %174 : vector<64x1xf32>
    %176 = vector.broadcast %175 : vector<64x1xf32> to vector<64x64xf32>
    %177 = arith.subf %167, %176 : vector<64x64xf32>
    %178 = arith.mulf %177, %177 : vector<64x64xf32>
    %cst_87 = arith.constant dense<0.000000e+00> : vector<64xf32>
    %179 = vector.multi_reduction <add>, %178, %cst_87 [1] : vector<64x64xf32> to vector<64xf32>
    %180 = vector.shape_cast %179 : vector<64xf32> to vector<64x1xf32>
    %cst_88 = arith.constant 6.400000e+01 : f32
    %181 = vector.broadcast %cst_88 : f32 to vector<64x1xf32>
    %182 = arith.divf %180, %181 : vector<64x1xf32>
    %183 = vector.broadcast %175 : vector<64x1xf32> to vector<64x64xf32>
    %184 = arith.subf %167, %183 : vector<64x64xf32>
    %cst_89 = arith.constant 9.99999974E-6 : f32
    %185 = vector.broadcast %cst_89 : f32 to vector<64x1xf32>
    %186 = arith.addf %182, %185 : vector<64x1xf32>
    %187 = math.rsqrt %186 : vector<64x1xf32>
    %188 = vector.broadcast %187 : vector<64x1xf32> to vector<64x64xf32>
    %189 = arith.mulf %184, %188 : vector<64x64xf32>
    %190 = vector.broadcast %169 : vector<1x64xf32> to vector<64x64xf32>
    %191 = arith.mulf %189, %190 : vector<64x64xf32>
    %192 = vector.broadcast %171 : vector<1x64xf32> to vector<64x64xf32>
    %193 = arith.addf %191, %192 : vector<64x64xf32>
    %194 = vector.broadcast %8 : vector<64x1xf32> to vector<64x64xf32>
    %195 = arith.mulf %193, %194 : vector<64x64xf32>
    %c8 = arith.constant 8 : index
    %c0_90 = arith.constant 0 : index
    %196 = vector.load %arg27[%c8, %c0_90] : memref<72x64xf32, #tpu.memory_space<vmem>>, vector<64x64xf32>
    tpu.vector_store %arg27[%c8, %c0_90], %195 {strides = array<i32>} : memref<72x64xf32, #tpu.memory_space<vmem>>, vector<64x64xf32>,
    %cst_91 = arith.constant 0.000000e+00 : f32
    %197 = vector.broadcast %cst_91 : f32 to vector<64x256xf32>
    %c0_92 = arith.constant 0 : index
    %c0_93 = arith.constant 0 : index
    %c0_94 = arith.constant 0 : index
    %c0_95 = arith.constant 0 : index
    %198 = vector.load %arg18[%c0_92, %c0_93, %c0_94, %c0_95] : memref<1x2x1x256xf32, #tpu.memory_space<vmem>>, vector<1x1x1x256xf32>
    %199 = vector.shape_cast %198 : vector<1x1x1x256xf32> to vector<1x256xf32>
    %200 = vector.broadcast %199 : vector<1x256xf32> to vector<64x256xf32>
    %201 = arith.addf %197, %200 : vector<64x256xf32>
    %c6 = arith.constant 6 : index
    %c0_96 = arith.constant 0 : index
    %202 = vector.load %arg27[%c6, %c0_96] : memref<72x64xf32, #tpu.memory_space<vmem>>, vector<64x64xf32>
    %203 = arith.truncf %202 : vector<64x64xf32> to vector<64x64xbf16>
    %c0_97 = arith.constant 0 : index
    %c0_98 = arith.constant 0 : index
    %c0_99 = arith.constant 0 : index
    %c0_100 = arith.constant 0 : index
    %c0_101 = arith.constant 0 : index
    %204 = vector.load %arg17[%c0_97, %c0_98, %c0_99, %c0_100, %c0_101] : memref<1x2x3x64x256xbf16, #tpu.memory_space<vmem>>, vector<1x1x1x64x256xbf16>
    %205 = vector.shape_cast %204 : vector<1x1x1x64x256xbf16> to vector<64x256xbf16>
    %cst_102 = arith.constant dense<0.000000e+00> : vector<64x256xf32>
    %206 = tpu.matmul %203, %205, %cst_102 {dimension_numbers = #tpu.dot_dimension_numbers<[1], [0], [0], [1], [0, 0, 1, 1], [], []>} : vector<64x64xbf16>, vector<64x256xbf16>, vector<64x256xf32> -> vector<64x256xf32>
    %207 = arith.addf %201, %206 : vector<64x256xf32>
    %c7 = arith.constant 7 : index
    %c0_103 = arith.constant 0 : index
    %208 = vector.load %arg27[%c7, %c0_103] : memref<72x64xf32, #tpu.memory_space<vmem>>, vector<64x64xf32>
    %209 = arith.truncf %208 : vector<64x64xf32> to vector<64x64xbf16>
    %c0_104 = arith.constant 0 : index
    %c0_105 = arith.constant 0 : index
    %c1 = arith.constant 1 : index
    %c0_106 = arith.constant 0 : index
    %c0_107 = arith.constant 0 : index
    %210 = vector.load %arg17[%c0_104, %c0_105, %c1, %c0_106, %c0_107] : memref<1x2x3x64x256xbf16, #tpu.memory_space<vmem>>, vector<1x1x1x64x256xbf16>
    %211 = vector.shape_cast %210 : vector<1x1x1x64x256xbf16> to vector<64x256xbf16>
    %cst_108 = arith.constant dense<0.000000e+00> : vector<64x256xf32>
    %212 = tpu.matmul %209, %211, %cst_108 {dimension_numbers = #tpu.dot_dimension_numbers<[1], [0], [0], [1], [0, 0, 1, 1], [], []>} : vector<64x64xbf16>, vector<64x256xbf16>, vector<64x256xf32> -> vector<64x256xf32>
    %213 = arith.addf %207, %212 : vector<64x256xf32>
    %c8_109 = arith.constant 8 : index
    %c0_110 = arith.constant 0 : index
    %214 = vector.load %arg27[%c8_109, %c0_110] : memref<72x64xf32, #tpu.memory_space<vmem>>, vector<64x64xf32>
    %215 = arith.truncf %214 : vector<64x64xf32> to vector<64x64xbf16>
    %c0_111 = arith.constant 0 : index
    %c0_112 = arith.constant 0 : index
    %c2 = arith.constant 2 : index
    %c0_113 = arith.constant 0 : index
    %c0_114 = arith.constant 0 : index
    %216 = vector.load %arg17[%c0_111, %c0_112, %c2, %c0_113, %c0_114] : memref<1x2x3x64x256xbf16, #tpu.memory_space<vmem>>, vector<1x1x1x64x256xbf16>
    %217 = vector.shape_cast %216 : vector<1x1x1x64x256xbf16> to vector<64x256xbf16>
    %cst_115 = arith.constant dense<0.000000e+00> : vector<64x256xf32>
    %218 = tpu.matmul %215, %217, %cst_115 {dimension_numbers = #tpu.dot_dimension_numbers<[1], [0], [0], [1], [0, 0, 1, 1], [], []>} : vector<64x64xbf16>, vector<64x256xbf16>, vector<64x256xf32> -> vector<64x256xf32>
    %219 = arith.addf %213, %218 : vector<64x256xf32>
    %cst_116 = arith.constant 0.000000e+00 : f32
    %220 = vector.broadcast %cst_116 : f32 to vector<64x256xf32>
    %221 = arith.maximumf %219, %220 : vector<64x256xf32>
    %222 = vector.broadcast %8 : vector<64x1xf32> to vector<64x256xf32>
    %223 = arith.mulf %221, %222 : vector<64x256xf32>
    %c8_117 = arith.constant 8 : index
    %c0_118 = arith.constant 0 : index
    %224 = vector.load %arg28[%c8_117, %c0_118] : memref<72x256xf32, #tpu.memory_space<vmem>>, vector<64x256xf32>
    tpu.vector_store %arg28[%c8_117, %c0_118], %223 {strides = array<i32>} : memref<72x256xf32, #tpu.memory_space<vmem>>, vector<64x256xf32>,
    %cst_119 = arith.constant 0.000000e+00 : f32
    %225 = vector.broadcast %cst_119 : f32 to vector<64x64xf32>
    %c0_120 = arith.constant 0 : index
    %c0_121 = arith.constant 0 : index
    %c0_122 = arith.constant 0 : index
    %c0_123 = arith.constant 0 : index
    %226 = vector.load %arg20[%c0_120, %c0_121, %c0_122, %c0_123] : memref<1x2x1x64xf32, #tpu.memory_space<vmem>>, vector<1x1x1x64xf32>
    %227 = vector.shape_cast %226 : vector<1x1x1x64xf32> to vector<1x64xf32>
    %228 = vector.broadcast %227 : vector<1x64xf32> to vector<64x64xf32>
    %229 = arith.addf %225, %228 : vector<64x64xf32>
    %c6_124 = arith.constant 6 : index
    %c0_125 = arith.constant 0 : index
    %230 = vector.load %arg28[%c6_124, %c0_125] : memref<72x256xf32, #tpu.memory_space<vmem>>, vector<64x256xf32>
    %231 = arith.truncf %230 : vector<64x256xf32> to vector<64x256xbf16>
    %c0_126 = arith.constant 0 : index
    %c0_127 = arith.constant 0 : index
    %c0_128 = arith.constant 0 : index
    %c0_129 = arith.constant 0 : index
    %c0_130 = arith.constant 0 : index
    %232 = vector.load %arg19[%c0_126, %c0_127, %c0_128, %c0_129, %c0_130] : memref<1x2x3x256x64xbf16, #tpu.memory_space<vmem>>, vector<1x1x1x256x64xbf16>
    %233 = vector.shape_cast %232 : vector<1x1x1x256x64xbf16> to vector<256x64xbf16>
    %cst_131 = arith.constant dense<0.000000e+00> : vector<64x64xf32>
    %234 = tpu.matmul %231, %233, %cst_131 {dimension_numbers = #tpu.dot_dimension_numbers<[1], [0], [0], [1], [0, 0, 1, 1], [], []>} : vector<64x256xbf16>, vector<256x64xbf16>, vector<64x64xf32> -> vector<64x64xf32>
    %235 = arith.addf %229, %234 : vector<64x64xf32>
    %c7_132 = arith.constant 7 : index
    %c0_133 = arith.constant 0 : index
    %236 = vector.load %arg28[%c7_132, %c0_133] : memref<72x256xf32, #tpu.memory_space<vmem>>, vector<64x256xf32>
    %237 = arith.truncf %236 : vector<64x256xf32> to vector<64x256xbf16>
    %c0_134 = arith.constant 0 : index
    %c0_135 = arith.constant 0 : index
    %c1_136 = arith.constant 1 : index
    %c0_137 = arith.constant 0 : index
    %c0_138 = arith.constant 0 : index
    %238 = vector.load %arg19[%c0_134, %c0_135, %c1_136, %c0_137, %c0_138] : memref<1x2x3x256x64xbf16, #tpu.memory_space<vmem>>, vector<1x1x1x256x64xbf16>
    %239 = vector.shape_cast %238 : vector<1x1x1x256x64xbf16> to vector<256x64xbf16>
    %cst_139 = arith.constant dense<0.000000e+00> : vector<64x64xf32>
    %240 = tpu.matmul %237, %239, %cst_139 {dimension_numbers = #tpu.dot_dimension_numbers<[1], [0], [0], [1], [0, 0, 1, 1], [], []>} : vector<64x256xbf16>, vector<256x64xbf16>, vector<64x64xf32> -> vector<64x64xf32>
    %241 = arith.addf %235, %240 : vector<64x64xf32>
    %c8_140 = arith.constant 8 : index
    %c0_141 = arith.constant 0 : index
    %242 = vector.load %arg28[%c8_140, %c0_141] : memref<72x256xf32, #tpu.memory_space<vmem>>, vector<64x256xf32>
    %243 = arith.truncf %242 : vector<64x256xf32> to vector<64x256xbf16>
    %c0_142 = arith.constant 0 : index
    %c0_143 = arith.constant 0 : index
    %c2_144 = arith.constant 2 : index
    %c0_145 = arith.constant 0 : index
    %c0_146 = arith.constant 0 : index
    %244 = vector.load %arg19[%c0_142, %c0_143, %c2_144, %c0_145, %c0_146] : memref<1x2x3x256x64xbf16, #tpu.memory_space<vmem>>, vector<1x1x1x256x64xbf16>
    %245 = vector.shape_cast %244 : vector<1x1x1x256x64xbf16> to vector<256x64xbf16>
    %cst_147 = arith.constant dense<0.000000e+00> : vector<64x64xf32>
    %246 = tpu.matmul %243, %245, %cst_147 {dimension_numbers = #tpu.dot_dimension_numbers<[1], [0], [0], [1], [0, 0, 1, 1], [], []>} : vector<64x256xbf16>, vector<256x64xbf16>, vector<64x64xf32> -> vector<64x64xf32>
    %247 = arith.addf %241, %246 : vector<64x64xf32>
    %248 = vector.broadcast %8 : vector<64x1xf32> to vector<64x64xf32>
    %249 = arith.mulf %247, %248 : vector<64x64xf32>
    %250 = arith.addf %193, %249 : vector<64x64xf32>
    %c0_148 = arith.constant 0 : index
    %c0_149 = arith.constant 0 : index
    %c0_150 = arith.constant 0 : index
    %c0_151 = arith.constant 0 : index
    %251 = vector.load %arg21[%c0_148, %c0_149, %c0_150, %c0_151] : memref<1x2x1x64xf32, #tpu.memory_space<vmem>>, vector<1x1x1x64xf32>
    %252 = vector.shape_cast %251 : vector<1x1x1x64xf32> to vector<1x64xf32>
    %c0_152 = arith.constant 0 : index
    %c0_153 = arith.constant 0 : index
    %c0_154 = arith.constant 0 : index
    %c0_155 = arith.constant 0 : index
    %253 = vector.load %arg22[%c0_152, %c0_153, %c0_154, %c0_155] : memref<1x2x1x64xf32, #tpu.memory_space<vmem>>, vector<1x1x1x64xf32>
    %254 = vector.shape_cast %253 : vector<1x1x1x64xf32> to vector<1x64xf32>
    %cst_156 = arith.constant dense<0.000000e+00> : vector<64xf32>
    %255 = vector.multi_reduction <add>, %250, %cst_156 [1] : vector<64x64xf32> to vector<64xf32>
    %256 = vector.shape_cast %255 : vector<64xf32> to vector<64x1xf32>
    %cst_157 = arith.constant 6.400000e+01 : f32
    %257 = vector.broadcast %cst_157 : f32 to vector<64x1xf32>
    %258 = arith.divf %256, %257 : vector<64x1xf32>
    %259 = vector.broadcast %258 : vector<64x1xf32> to vector<64x64xf32>
    %260 = arith.subf %250, %259 : vector<64x64xf32>
    %261 = arith.mulf %260, %260 : vector<64x64xf32>
    %cst_158 = arith.constant dense<0.000000e+00> : vector<64xf32>
    %262 = vector.multi_reduction <add>, %261, %cst_158 [1] : vector<64x64xf32> to vector<64xf32>
    %263 = vector.shape_cast %262 : vector<64xf32> to vector<64x1xf32>
    %cst_159 = arith.constant 6.400000e+01 : f32
    %264 = vector.broadcast %cst_159 : f32 to vector<64x1xf32>
    %265 = arith.divf %263, %264 : vector<64x1xf32>
    %266 = vector.broadcast %258 : vector<64x1xf32> to vector<64x64xf32>
    %267 = arith.subf %250, %266 : vector<64x64xf32>
    %cst_160 = arith.constant 9.99999974E-6 : f32
    %268 = vector.broadcast %cst_160 : f32 to vector<64x1xf32>
    %269 = arith.addf %265, %268 : vector<64x1xf32>
    %270 = math.rsqrt %269 : vector<64x1xf32>
    %271 = vector.broadcast %270 : vector<64x1xf32> to vector<64x64xf32>
    %272 = arith.mulf %267, %271 : vector<64x64xf32>
    %273 = vector.broadcast %252 : vector<1x64xf32> to vector<64x64xf32>
    %274 = arith.mulf %272, %273 : vector<64x64xf32>
    %275 = vector.broadcast %254 : vector<1x64xf32> to vector<64x64xf32>
    %276 = arith.addf %274, %275 : vector<64x64xf32>
    %277 = vector.extract_strided_slice %28 {offsets = [0, 128], sizes = [1, 128], strides = [1, 1]} : vector<1x256xf32> to vector<1x128xf32>
    %278 = arith.truncf %276 : vector<64x64xf32> to vector<64x64xbf16>
    %c0_161 = arith.constant 0 : index
    %c0_162 = arith.constant 0 : index
    %c0_163 = arith.constant 0 : index
    %279 = vector.load %arg9[%c0_161, %c0_162, %c0_163] : memref<1x64x128xbf16, #tpu.memory_space<vmem>>, vector<1x64x128xbf16>
    %280 = vector.shape_cast %279 : vector<1x64x128xbf16> to vector<64x128xbf16>
    %cst_164 = arith.constant dense<0.000000e+00> : vector<64x128xf32>
    %281 = tpu.matmul %278, %280, %cst_164 {dimension_numbers = #tpu.dot_dimension_numbers<[1], [0], [0], [1], [0, 0, 1, 1], [], []>} : vector<64x64xbf16>, vector<64x128xbf16>, vector<64x128xf32> -> vector<64x128xf32>
    %c0_165 = arith.constant 0 : index
    %c0_166 = arith.constant 0 : index
    %c0_167 = arith.constant 0 : index
    %282 = vector.load %arg10[%c0_165, %c0_166, %c0_167] : memref<1x1x128xf32, #tpu.memory_space<vmem>>, vector<1x1x128xf32>
    %283 = vector.shape_cast %282 : vector<1x1x128xf32> to vector<1x128xf32>
    %284 = vector.broadcast %283 : vector<1x128xf32> to vector<64x128xf32>
    %285 = arith.addf %281, %284 : vector<64x128xf32>
    %286 = vector.broadcast %277 : vector<1x128xf32> to vector<64x128xf32>
    %287 = arith.addf %285, %286 : vector<64x128xf32>
    %288 = vector.extract_strided_slice %287 {offsets = [0, 0], sizes = [64, 64], strides = [1, 1]} : vector<64x128xf32> to vector<64x64xf32>
    %289 = math.tanh %288 : vector<64x64xf32>
    %290 = vector.extract_strided_slice %287 {offsets = [0, 64], sizes = [64, 64], strides = [1, 1]} : vector<64x128xf32> to vector<64x64xf32>
    %291 = arith.negf %290 : vector<64x64xf32>
    %292 = math.exp %291 : vector<64x64xf32>
    %cst_168 = arith.constant 1.000000e+00 : f32
    %293 = vector.broadcast %cst_168 : f32 to vector<64x64xf32>
    %294 = arith.addf %293, %292 : vector<64x64xf32>
    %295 = arith.divf %293, %294 : vector<64x64xf32>
    %296 = arith.mulf %289, %295 : vector<64x64xf32>
    %297 = arith.truncf %296 : vector<64x64xf32> to vector<64x64xbf16>
    %c0_169 = arith.constant 0 : index
    %c1_170 = arith.constant 1 : index
    %c0_171 = arith.constant 0 : index
    %c0_172 = arith.constant 0 : index
    %298 = vector.load %arg11[%c0_169, %c1_170, %c0_171, %c0_172] : memref<1x2x64x192xbf16, #tpu.memory_space<vmem>>, vector<1x1x64x192xbf16>
    %299 = vector.shape_cast %298 : vector<1x1x64x192xbf16> to vector<64x192xbf16>
    %cst_173 = arith.constant dense<0.000000e+00> : vector<64x192xf32>
    %300 = tpu.matmul %297, %299, %cst_173 {dimension_numbers = #tpu.dot_dimension_numbers<[1], [0], [0], [1], [0, 0, 1, 1], [], []>} : vector<64x64xbf16>, vector<64x192xbf16>, vector<64x192xf32> -> vector<64x192xf32>
    %c0_174 = arith.constant 0 : index
    %c1_175 = arith.constant 1 : index
    %c0_176 = arith.constant 0 : index
    %c0_177 = arith.constant 0 : index
    %301 = vector.load %arg12[%c0_174, %c1_175, %c0_176, %c0_177] : memref<1x2x1x192xf32, #tpu.memory_space<vmem>>, vector<1x1x1x192xf32>
    %302 = vector.shape_cast %301 : vector<1x1x1x192xf32> to vector<1x192xf32>
    %303 = vector.broadcast %302 : vector<1x192xf32> to vector<64x192xf32>
    %304 = arith.addf %300, %303 : vector<64x192xf32>
    %c0_178 = arith.constant 0 : index
    %c1_179 = arith.constant 1 : index
    %c0_180 = arith.constant 0 : index
    %c0_181 = arith.constant 0 : index
    %305 = vector.load %arg13[%c0_178, %c1_179, %c0_180, %c0_181] : memref<1x2x64x64xbf16, #tpu.memory_space<vmem>>, vector<1x1x64x64xbf16>
    %306 = vector.shape_cast %305 : vector<1x1x64x64xbf16> to vector<64x64xbf16>
    %cst_182 = arith.constant 0.000000e+00 : f32
    %307 = vector.broadcast %cst_182 : f32 to vector<64x64xf32>
    %c0_183 = arith.constant 0 : index
    %c1_184 = arith.constant 1 : index
    %c0_185 = arith.constant 0 : index
    %c0_186 = arith.constant 0 : index
    %308 = vector.load %arg14[%c0_183, %c1_184, %c0_185, %c0_186] : memref<1x2x1x64xf32, #tpu.memory_space<vmem>>, vector<1x1x1x64xf32>
    %309 = vector.shape_cast %308 : vector<1x1x1x64xf32> to vector<1x64xf32>
    %310 = vector.broadcast %309 : vector<1x64xf32> to vector<64x64xf32>
    %311 = arith.addf %307, %310 : vector<64x64xf32>
    %312 = vector.extract_strided_slice %304 {offsets = [0, 0], sizes = [64, 16], strides = [1, 1]} : vector<64x192xf32> to vector<64x16xf32>
    %313 = arith.truncf %312 : vector<64x16xf32> to vector<64x16xbf16>
    %314 = vector.extract_strided_slice %304 {offsets = [0, 64], sizes = [64, 16], strides = [1, 1]} : vector<64x192xf32> to vector<64x16xf32>
    %315 = arith.truncf %314 : vector<64x16xf32> to vector<64x16xbf16>
    %316 = vector.extract_strided_slice %304 {offsets = [0, 128], sizes = [64, 16], strides = [1, 1]} : vector<64x192xf32> to vector<64x16xf32>
    %317 = arith.truncf %316 : vector<64x16xf32> to vector<64x16xbf16>
    %cst_187 = arith.constant dense<0.000000e+00> : vector<64x64xf32>
    %318 = tpu.matmul %313, %315, %cst_187 {dimension_numbers = #tpu.dot_dimension_numbers<[1], [1], [0], [0], [0, 0, 1, 0], [], []>} : vector<64x16xbf16>, vector<64x16xbf16>, vector<64x64xf32> -> vector<64x64xf32>
    %cst_188 = arith.constant -1.000000e+04 : f32
    %319 = vector.broadcast %cst_188 : f32 to vector<64x64xf32>
    %320 = arith.select %31, %318, %319 : vector<64x64xi1>, vector<64x64xf32>
    %cst_189 = arith.constant dense<0xFF800000> : vector<64xf32>
    %321 = vector.multi_reduction <maximumf>, %320, %cst_189 [1] : vector<64x64xf32> to vector<64xf32>
    %322 = vector.shape_cast %321 : vector<64xf32> to vector<64x1xf32>
    %323 = vector.broadcast %322 : vector<64x1xf32> to vector<64x64xf32>
    %324 = arith.subf %320, %323 : vector<64x64xf32>
    %325 = math.exp %324 : vector<64x64xf32>
    %cst_190 = arith.constant dense<0.000000e+00> : vector<64xf32>
    %326 = vector.multi_reduction <add>, %325, %cst_190 [1] : vector<64x64xf32> to vector<64xf32>
    %327 = vector.shape_cast %326 : vector<64xf32> to vector<64x1xf32>
    %328 = tpu.reciprocal %327 {approx = true} : vector<64x1xf32> -> vector<64x1xf32>
    %329 = vector.broadcast %328 : vector<64x1xf32> to vector<64x64xf32>
    %330 = arith.mulf %325, %329 : vector<64x64xf32>
    %331 = arith.truncf %330 : vector<64x64xf32> to vector<64x64xbf16>
    %cst_191 = arith.constant dense<0.000000e+00> : vector<64x16xf32>
    %332 = tpu.matmul %331, %317, %cst_191 {dimension_numbers = #tpu.dot_dimension_numbers<[1], [0], [0], [1], [0, 0, 1, 1], [], []>} : vector<64x64xbf16>, vector<64x16xbf16>, vector<64x16xf32> -> vector<64x16xf32>
    %333 = arith.truncf %332 : vector<64x16xf32> to vector<64x16xbf16>
    %334 = vector.extract_strided_slice %306 {offsets = [0, 0], sizes = [16, 64], strides = [1, 1]} : vector<64x64xbf16> to vector<16x64xbf16>
    %cst_192 = arith.constant dense<0.000000e+00> : vector<64x64xf32>
    %335 = tpu.matmul %333, %334, %cst_192 {dimension_numbers = #tpu.dot_dimension_numbers<[1], [0], [0], [1], [0, 0, 1, 1], [], []>} : vector<64x16xbf16>, vector<16x64xbf16>, vector<64x64xf32> -> vector<64x64xf32>
    %336 = arith.addf %311, %335 : vector<64x64xf32>
    %337 = vector.extract_strided_slice %304 {offsets = [0, 16], sizes = [64, 16], strides = [1, 1]} : vector<64x192xf32> to vector<64x16xf32>
    %338 = arith.truncf %337 : vector<64x16xf32> to vector<64x16xbf16>
    %339 = vector.extract_strided_slice %304 {offsets = [0, 80], sizes = [64, 16], strides = [1, 1]} : vector<64x192xf32> to vector<64x16xf32>
    %340 = arith.truncf %339 : vector<64x16xf32> to vector<64x16xbf16>
    %341 = vector.extract_strided_slice %304 {offsets = [0, 144], sizes = [64, 16], strides = [1, 1]} : vector<64x192xf32> to vector<64x16xf32>
    %342 = arith.truncf %341 : vector<64x16xf32> to vector<64x16xbf16>
    %cst_193 = arith.constant dense<0.000000e+00> : vector<64x64xf32>
    %343 = tpu.matmul %338, %340, %cst_193 {dimension_numbers = #tpu.dot_dimension_numbers<[1], [1], [0], [0], [0, 0, 1, 0], [], []>} : vector<64x16xbf16>, vector<64x16xbf16>, vector<64x64xf32> -> vector<64x64xf32>
    %cst_194 = arith.constant -1.000000e+04 : f32
    %344 = vector.broadcast %cst_194 : f32 to vector<64x64xf32>
    %345 = arith.select %31, %343, %344 : vector<64x64xi1>, vector<64x64xf32>
    %cst_195 = arith.constant dense<0xFF800000> : vector<64xf32>
    %346 = vector.multi_reduction <maximumf>, %345, %cst_195 [1] : vector<64x64xf32> to vector<64xf32>
    %347 = vector.shape_cast %346 : vector<64xf32> to vector<64x1xf32>
    %348 = vector.broadcast %347 : vector<64x1xf32> to vector<64x64xf32>
    %349 = arith.subf %345, %348 : vector<64x64xf32>
    %350 = math.exp %349 : vector<64x64xf32>
    %cst_196 = arith.constant dense<0.000000e+00> : vector<64xf32>
    %351 = vector.multi_reduction <add>, %350, %cst_196 [1] : vector<64x64xf32> to vector<64xf32>
    %352 = vector.shape_cast %351 : vector<64xf32> to vector<64x1xf32>
    %353 = tpu.reciprocal %352 {approx = true} : vector<64x1xf32> -> vector<64x1xf32>
    %354 = vector.broadcast %353 : vector<64x1xf32> to vector<64x64xf32>
    %355 = arith.mulf %350, %354 : vector<64x64xf32>
    %356 = arith.truncf %355 : vector<64x64xf32> to vector<64x64xbf16>
    %cst_197 = arith.constant dense<0.000000e+00> : vector<64x16xf32>
    %357 = tpu.matmul %356, %342, %cst_197 {dimension_numbers = #tpu.dot_dimension_numbers<[1], [0], [0], [1], [0, 0, 1, 1], [], []>} : vector<64x64xbf16>, vector<64x16xbf16>, vector<64x16xf32> -> vector<64x16xf32>
    %358 = arith.truncf %357 : vector<64x16xf32> to vector<64x16xbf16>
    %359 = vector.extract_strided_slice %306 {offsets = [16, 0], sizes = [16, 64], strides = [1, 1]} : vector<64x64xbf16> to vector<16x64xbf16>
    %cst_198 = arith.constant dense<0.000000e+00> : vector<64x64xf32>
    %360 = tpu.matmul %358, %359, %cst_198 {dimension_numbers = #tpu.dot_dimension_numbers<[1], [0], [0], [1], [0, 0, 1, 1], [], []>} : vector<64x16xbf16>, vector<16x64xbf16>, vector<64x64xf32> -> vector<64x64xf32>
    %361 = arith.addf %336, %360 : vector<64x64xf32>
    %362 = vector.extract_strided_slice %304 {offsets = [0, 32], sizes = [64, 16], strides = [1, 1]} : vector<64x192xf32> to vector<64x16xf32>
    %363 = arith.truncf %362 : vector<64x16xf32> to vector<64x16xbf16>
    %364 = vector.extract_strided_slice %304 {offsets = [0, 96], sizes = [64, 16], strides = [1, 1]} : vector<64x192xf32> to vector<64x16xf32>
    %365 = arith.truncf %364 : vector<64x16xf32> to vector<64x16xbf16>
    %366 = vector.extract_strided_slice %304 {offsets = [0, 160], sizes = [64, 16], strides = [1, 1]} : vector<64x192xf32> to vector<64x16xf32>
    %367 = arith.truncf %366 : vector<64x16xf32> to vector<64x16xbf16>
    %cst_199 = arith.constant dense<0.000000e+00> : vector<64x64xf32>
    %368 = tpu.matmul %363, %365, %cst_199 {dimension_numbers = #tpu.dot_dimension_numbers<[1], [1], [0], [0], [0, 0, 1, 0], [], []>} : vector<64x16xbf16>, vector<64x16xbf16>, vector<64x64xf32> -> vector<64x64xf32>
    %cst_200 = arith.constant -1.000000e+04 : f32
    %369 = vector.broadcast %cst_200 : f32 to vector<64x64xf32>
    %370 = arith.select %31, %368, %369 : vector<64x64xi1>, vector<64x64xf32>
    %cst_201 = arith.constant dense<0xFF800000> : vector<64xf32>
    %371 = vector.multi_reduction <maximumf>, %370, %cst_201 [1] : vector<64x64xf32> to vector<64xf32>
    %372 = vector.shape_cast %371 : vector<64xf32> to vector<64x1xf32>
    %373 = vector.broadcast %372 : vector<64x1xf32> to vector<64x64xf32>
    %374 = arith.subf %370, %373 : vector<64x64xf32>
    %375 = math.exp %374 : vector<64x64xf32>
    %cst_202 = arith.constant dense<0.000000e+00> : vector<64xf32>
    %376 = vector.multi_reduction <add>, %375, %cst_202 [1] : vector<64x64xf32> to vector<64xf32>
    %377 = vector.shape_cast %376 : vector<64xf32> to vector<64x1xf32>
    %378 = tpu.reciprocal %377 {approx = true} : vector<64x1xf32> -> vector<64x1xf32>
    %379 = vector.broadcast %378 : vector<64x1xf32> to vector<64x64xf32>
    %380 = arith.mulf %375, %379 : vector<64x64xf32>
    %381 = arith.truncf %380 : vector<64x64xf32> to vector<64x64xbf16>
    %cst_203 = arith.constant dense<0.000000e+00> : vector<64x16xf32>
    %382 = tpu.matmul %381, %367, %cst_203 {dimension_numbers = #tpu.dot_dimension_numbers<[1], [0], [0], [1], [0, 0, 1, 1], [], []>} : vector<64x64xbf16>, vector<64x16xbf16>, vector<64x16xf32> -> vector<64x16xf32>
    %383 = arith.truncf %382 : vector<64x16xf32> to vector<64x16xbf16>
    %384 = vector.extract_strided_slice %306 {offsets = [32, 0], sizes = [16, 64], strides = [1, 1]} : vector<64x64xbf16> to vector<16x64xbf16>
    %cst_204 = arith.constant dense<0.000000e+00> : vector<64x64xf32>
    %385 = tpu.matmul %383, %384, %cst_204 {dimension_numbers = #tpu.dot_dimension_numbers<[1], [0], [0], [1], [0, 0, 1, 1], [], []>} : vector<64x16xbf16>, vector<16x64xbf16>, vector<64x64xf32> -> vector<64x64xf32>
    %386 = arith.addf %361, %385 : vector<64x64xf32>
    %387 = vector.extract_strided_slice %304 {offsets = [0, 48], sizes = [64, 16], strides = [1, 1]} : vector<64x192xf32> to vector<64x16xf32>
    %388 = arith.truncf %387 : vector<64x16xf32> to vector<64x16xbf16>
    %389 = vector.extract_strided_slice %304 {offsets = [0, 112], sizes = [64, 16], strides = [1, 1]} : vector<64x192xf32> to vector<64x16xf32>
    %390 = arith.truncf %389 : vector<64x16xf32> to vector<64x16xbf16>
    %391 = vector.extract_strided_slice %304 {offsets = [0, 176], sizes = [64, 16], strides = [1, 1]} : vector<64x192xf32> to vector<64x16xf32>
    %392 = arith.truncf %391 : vector<64x16xf32> to vector<64x16xbf16>
    %cst_205 = arith.constant dense<0.000000e+00> : vector<64x64xf32>
    %393 = tpu.matmul %388, %390, %cst_205 {dimension_numbers = #tpu.dot_dimension_numbers<[1], [1], [0], [0], [0, 0, 1, 0], [], []>} : vector<64x16xbf16>, vector<64x16xbf16>, vector<64x64xf32> -> vector<64x64xf32>
    %cst_206 = arith.constant -1.000000e+04 : f32
    %394 = vector.broadcast %cst_206 : f32 to vector<64x64xf32>
    %395 = arith.select %31, %393, %394 : vector<64x64xi1>, vector<64x64xf32>
    %cst_207 = arith.constant dense<0xFF800000> : vector<64xf32>
    %396 = vector.multi_reduction <maximumf>, %395, %cst_207 [1] : vector<64x64xf32> to vector<64xf32>
    %397 = vector.shape_cast %396 : vector<64xf32> to vector<64x1xf32>
    %398 = vector.broadcast %397 : vector<64x1xf32> to vector<64x64xf32>
    %399 = arith.subf %395, %398 : vector<64x64xf32>
    %400 = math.exp %399 : vector<64x64xf32>
    %cst_208 = arith.constant dense<0.000000e+00> : vector<64xf32>
    %401 = vector.multi_reduction <add>, %400, %cst_208 [1] : vector<64x64xf32> to vector<64xf32>
    %402 = vector.shape_cast %401 : vector<64xf32> to vector<64x1xf32>
    %403 = tpu.reciprocal %402 {approx = true} : vector<64x1xf32> -> vector<64x1xf32>
    %404 = vector.broadcast %403 : vector<64x1xf32> to vector<64x64xf32>
    %405 = arith.mulf %400, %404 : vector<64x64xf32>
    %406 = arith.truncf %405 : vector<64x64xf32> to vector<64x64xbf16>
    %cst_209 = arith.constant dense<0.000000e+00> : vector<64x16xf32>
    %407 = tpu.matmul %406, %392, %cst_209 {dimension_numbers = #tpu.dot_dimension_numbers<[1], [0], [0], [1], [0, 0, 1, 1], [], []>} : vector<64x64xbf16>, vector<64x16xbf16>, vector<64x16xf32> -> vector<64x16xf32>
    %408 = arith.truncf %407 : vector<64x16xf32> to vector<64x16xbf16>
    %409 = vector.extract_strided_slice %306 {offsets = [48, 0], sizes = [16, 64], strides = [1, 1]} : vector<64x64xbf16> to vector<16x64xbf16>
    %cst_210 = arith.constant dense<0.000000e+00> : vector<64x64xf32>
    %410 = tpu.matmul %408, %409, %cst_210 {dimension_numbers = #tpu.dot_dimension_numbers<[1], [0], [0], [1], [0, 0, 1, 1], [], []>} : vector<64x16xbf16>, vector<16x64xbf16>, vector<64x64xf32> -> vector<64x64xf32>
    %411 = arith.addf %386, %410 : vector<64x64xf32>
    %412 = arith.addf %296, %411 : vector<64x64xf32>
    %c0_211 = arith.constant 0 : index
    %c1_212 = arith.constant 1 : index
    %c0_213 = arith.constant 0 : index
    %c0_214 = arith.constant 0 : index
    %413 = vector.load %arg15[%c0_211, %c1_212, %c0_213, %c0_214] : memref<1x2x1x64xf32, #tpu.memory_space<vmem>>, vector<1x1x1x64xf32>
    %414 = vector.shape_cast %413 : vector<1x1x1x64xf32> to vector<1x64xf32>
    %c0_215 = arith.constant 0 : index
    %c1_216 = arith.constant 1 : index
    %c0_217 = arith.constant 0 : index
    %c0_218 = arith.constant 0 : index
    %415 = vector.load %arg16[%c0_215, %c1_216, %c0_217, %c0_218] : memref<1x2x1x64xf32, #tpu.memory_space<vmem>>, vector<1x1x1x64xf32>
    %416 = vector.shape_cast %415 : vector<1x1x1x64xf32> to vector<1x64xf32>
    %cst_219 = arith.constant dense<0.000000e+00> : vector<64xf32>
    %417 = vector.multi_reduction <add>, %412, %cst_219 [1] : vector<64x64xf32> to vector<64xf32>
    %418 = vector.shape_cast %417 : vector<64xf32> to vector<64x1xf32>
    %cst_220 = arith.constant 6.400000e+01 : f32
    %419 = vector.broadcast %cst_220 : f32 to vector<64x1xf32>
    %420 = arith.divf %418, %419 : vector<64x1xf32>
    %421 = vector.broadcast %420 : vector<64x1xf32> to vector<64x64xf32>
    %422 = arith.subf %412, %421 : vector<64x64xf32>
    %423 = arith.mulf %422, %422 : vector<64x64xf32>
    %cst_221 = arith.constant dense<0.000000e+00> : vector<64xf32>
    %424 = vector.multi_reduction <add>, %423, %cst_221 [1] : vector<64x64xf32> to vector<64xf32>
    %425 = vector.shape_cast %424 : vector<64xf32> to vector<64x1xf32>
    %cst_222 = arith.constant 6.400000e+01 : f32
    %426 = vector.broadcast %cst_222 : f32 to vector<64x1xf32>
    %427 = arith.divf %425, %426 : vector<64x1xf32>
    %428 = vector.broadcast %420 : vector<64x1xf32> to vector<64x64xf32>
    %429 = arith.subf %412, %428 : vector<64x64xf32>
    %cst_223 = arith.constant 9.99999974E-6 : f32
    %430 = vector.broadcast %cst_223 : f32 to vector<64x1xf32>
    %431 = arith.addf %427, %430 : vector<64x1xf32>
    %432 = math.rsqrt %431 : vector<64x1xf32>
    %433 = vector.broadcast %432 : vector<64x1xf32> to vector<64x64xf32>
    %434 = arith.mulf %429, %433 : vector<64x64xf32>
    %435 = vector.broadcast %414 : vector<1x64xf32> to vector<64x64xf32>
    %436 = arith.mulf %434, %435 : vector<64x64xf32>
    %437 = vector.broadcast %416 : vector<1x64xf32> to vector<64x64xf32>
    %438 = arith.addf %436, %437 : vector<64x64xf32>
    %439 = vector.broadcast %8 : vector<64x1xf32> to vector<64x64xf32>
    %440 = arith.mulf %438, %439 : vector<64x64xf32>
    %c8_224 = arith.constant 8 : index
    %c0_225 = arith.constant 0 : index
    %441 = vector.load %arg27[%c8_224, %c0_225] : memref<72x64xf32, #tpu.memory_space<vmem>>, vector<64x64xf32>
    tpu.vector_store %arg27[%c8_224, %c0_225], %440 {strides = array<i32>} : memref<72x64xf32, #tpu.memory_space<vmem>>, vector<64x64xf32>,
    %cst_226 = arith.constant 0.000000e+00 : f32
    %442 = vector.broadcast %cst_226 : f32 to vector<64x256xf32>
    %c0_227 = arith.constant 0 : index
    %c1_228 = arith.constant 1 : index
    %c0_229 = arith.constant 0 : index
    %c0_230 = arith.constant 0 : index
    %443 = vector.load %arg18[%c0_227, %c1_228, %c0_229, %c0_230] : memref<1x2x1x256xf32, #tpu.memory_space<vmem>>, vector<1x1x1x256xf32>
    %444 = vector.shape_cast %443 : vector<1x1x1x256xf32> to vector<1x256xf32>
    %445 = vector.broadcast %444 : vector<1x256xf32> to vector<64x256xf32>
    %446 = arith.addf %442, %445 : vector<64x256xf32>
    %c6_231 = arith.constant 6 : index
    %c0_232 = arith.constant 0 : index
    %447 = vector.load %arg27[%c6_231, %c0_232] : memref<72x64xf32, #tpu.memory_space<vmem>>, vector<64x64xf32>
    %448 = arith.truncf %447 : vector<64x64xf32> to vector<64x64xbf16>
    %c0_233 = arith.constant 0 : index
    %c1_234 = arith.constant 1 : index
    %c0_235 = arith.constant 0 : index
    %c0_236 = arith.constant 0 : index
    %c0_237 = arith.constant 0 : index
    %449 = vector.load %arg17[%c0_233, %c1_234, %c0_235, %c0_236, %c0_237] : memref<1x2x3x64x256xbf16, #tpu.memory_space<vmem>>, vector<1x1x1x64x256xbf16>
    %450 = vector.shape_cast %449 : vector<1x1x1x64x256xbf16> to vector<64x256xbf16>
    %cst_238 = arith.constant dense<0.000000e+00> : vector<64x256xf32>
    %451 = tpu.matmul %448, %450, %cst_238 {dimension_numbers = #tpu.dot_dimension_numbers<[1], [0], [0], [1], [0, 0, 1, 1], [], []>} : vector<64x64xbf16>, vector<64x256xbf16>, vector<64x256xf32> -> vector<64x256xf32>
    %452 = arith.addf %446, %451 : vector<64x256xf32>
    %c7_239 = arith.constant 7 : index
    %c0_240 = arith.constant 0 : index
    %453 = vector.load %arg27[%c7_239, %c0_240] : memref<72x64xf32, #tpu.memory_space<vmem>>, vector<64x64xf32>
    %454 = arith.truncf %453 : vector<64x64xf32> to vector<64x64xbf16>
    %c0_241 = arith.constant 0 : index
    %c1_242 = arith.constant 1 : index
    %c1_243 = arith.constant 1 : index
    %c0_244 = arith.constant 0 : index
    %c0_245 = arith.constant 0 : index
    %455 = vector.load %arg17[%c0_241, %c1_242, %c1_243, %c0_244, %c0_245] : memref<1x2x3x64x256xbf16, #tpu.memory_space<vmem>>, vector<1x1x1x64x256xbf16>
    %456 = vector.shape_cast %455 : vector<1x1x1x64x256xbf16> to vector<64x256xbf16>
    %cst_246 = arith.constant dense<0.000000e+00> : vector<64x256xf32>
    %457 = tpu.matmul %454, %456, %cst_246 {dimension_numbers = #tpu.dot_dimension_numbers<[1], [0], [0], [1], [0, 0, 1, 1], [], []>} : vector<64x64xbf16>, vector<64x256xbf16>, vector<64x256xf32> -> vector<64x256xf32>
    %458 = arith.addf %452, %457 : vector<64x256xf32>
    %c8_247 = arith.constant 8 : index
    %c0_248 = arith.constant 0 : index
    %459 = vector.load %arg27[%c8_247, %c0_248] : memref<72x64xf32, #tpu.memory_space<vmem>>, vector<64x64xf32>
    %460 = arith.truncf %459 : vector<64x64xf32> to vector<64x64xbf16>
    %c0_249 = arith.constant 0 : index
    %c1_250 = arith.constant 1 : index
    %c2_251 = arith.constant 2 : index
    %c0_252 = arith.constant 0 : index
    %c0_253 = arith.constant 0 : index
    %461 = vector.load %arg17[%c0_249, %c1_250, %c2_251, %c0_252, %c0_253] : memref<1x2x3x64x256xbf16, #tpu.memory_space<vmem>>, vector<1x1x1x64x256xbf16>
    %462 = vector.shape_cast %461 : vector<1x1x1x64x256xbf16> to vector<64x256xbf16>
    %cst_254 = arith.constant dense<0.000000e+00> : vector<64x256xf32>
    %463 = tpu.matmul %460, %462, %cst_254 {dimension_numbers = #tpu.dot_dimension_numbers<[1], [0], [0], [1], [0, 0, 1, 1], [], []>} : vector<64x64xbf16>, vector<64x256xbf16>, vector<64x256xf32> -> vector<64x256xf32>
    %464 = arith.addf %458, %463 : vector<64x256xf32>
    %cst_255 = arith.constant 0.000000e+00 : f32
    %465 = vector.broadcast %cst_255 : f32 to vector<64x256xf32>
    %466 = arith.maximumf %464, %465 : vector<64x256xf32>
    %467 = vector.broadcast %8 : vector<64x1xf32> to vector<64x256xf32>
    %468 = arith.mulf %466, %467 : vector<64x256xf32>
    %c8_256 = arith.constant 8 : index
    %c0_257 = arith.constant 0 : index
    %469 = vector.load %arg28[%c8_256, %c0_257] : memref<72x256xf32, #tpu.memory_space<vmem>>, vector<64x256xf32>
    tpu.vector_store %arg28[%c8_256, %c0_257], %468 {strides = array<i32>} : memref<72x256xf32, #tpu.memory_space<vmem>>, vector<64x256xf32>,
    %cst_258 = arith.constant 0.000000e+00 : f32
    %470 = vector.broadcast %cst_258 : f32 to vector<64x64xf32>
    %c0_259 = arith.constant 0 : index
    %c1_260 = arith.constant 1 : index
    %c0_261 = arith.constant 0 : index
    %c0_262 = arith.constant 0 : index
    %471 = vector.load %arg20[%c0_259, %c1_260, %c0_261, %c0_262] : memref<1x2x1x64xf32, #tpu.memory_space<vmem>>, vector<1x1x1x64xf32>
    %472 = vector.shape_cast %471 : vector<1x1x1x64xf32> to vector<1x64xf32>
    %473 = vector.broadcast %472 : vector<1x64xf32> to vector<64x64xf32>
    %474 = arith.addf %470, %473 : vector<64x64xf32>
    %c6_263 = arith.constant 6 : index
    %c0_264 = arith.constant 0 : index
    %475 = vector.load %arg28[%c6_263, %c0_264] : memref<72x256xf32, #tpu.memory_space<vmem>>, vector<64x256xf32>
    %476 = arith.truncf %475 : vector<64x256xf32> to vector<64x256xbf16>
    %c0_265 = arith.constant 0 : index
    %c1_266 = arith.constant 1 : index
    %c0_267 = arith.constant 0 : index
    %c0_268 = arith.constant 0 : index
    %c0_269 = arith.constant 0 : index
    %477 = vector.load %arg19[%c0_265, %c1_266, %c0_267, %c0_268, %c0_269] : memref<1x2x3x256x64xbf16, #tpu.memory_space<vmem>>, vector<1x1x1x256x64xbf16>
    %478 = vector.shape_cast %477 : vector<1x1x1x256x64xbf16> to vector<256x64xbf16>
    %cst_270 = arith.constant dense<0.000000e+00> : vector<64x64xf32>
    %479 = tpu.matmul %476, %478, %cst_270 {dimension_numbers = #tpu.dot_dimension_numbers<[1], [0], [0], [1], [0, 0, 1, 1], [], []>} : vector<64x256xbf16>, vector<256x64xbf16>, vector<64x64xf32> -> vector<64x64xf32>
    %480 = arith.addf %474, %479 : vector<64x64xf32>
    %c7_271 = arith.constant 7 : index
    %c0_272 = arith.constant 0 : index
    %481 = vector.load %arg28[%c7_271, %c0_272] : memref<72x256xf32, #tpu.memory_space<vmem>>, vector<64x256xf32>
    %482 = arith.truncf %481 : vector<64x256xf32> to vector<64x256xbf16>
    %c0_273 = arith.constant 0 : index
    %c1_274 = arith.constant 1 : index
    %c1_275 = arith.constant 1 : index
    %c0_276 = arith.constant 0 : index
    %c0_277 = arith.constant 0 : index
    %483 = vector.load %arg19[%c0_273, %c1_274, %c1_275, %c0_276, %c0_277] : memref<1x2x3x256x64xbf16, #tpu.memory_space<vmem>>, vector<1x1x1x256x64xbf16>
    %484 = vector.shape_cast %483 : vector<1x1x1x256x64xbf16> to vector<256x64xbf16>
    %cst_278 = arith.constant dense<0.000000e+00> : vector<64x64xf32>
    %485 = tpu.matmul %482, %484, %cst_278 {dimension_numbers = #tpu.dot_dimension_numbers<[1], [0], [0], [1], [0, 0, 1, 1], [], []>} : vector<64x256xbf16>, vector<256x64xbf16>, vector<64x64xf32> -> vector<64x64xf32>
    %486 = arith.addf %480, %485 : vector<64x64xf32>
    %c8_279 = arith.constant 8 : index
    %c0_280 = arith.constant 0 : index
    %487 = vector.load %arg28[%c8_279, %c0_280] : memref<72x256xf32, #tpu.memory_space<vmem>>, vector<64x256xf32>
    %488 = arith.truncf %487 : vector<64x256xf32> to vector<64x256xbf16>
    %c0_281 = arith.constant 0 : index
    %c1_282 = arith.constant 1 : index
    %c2_283 = arith.constant 2 : index
    %c0_284 = arith.constant 0 : index
    %c0_285 = arith.constant 0 : index
    %489 = vector.load %arg19[%c0_281, %c1_282, %c2_283, %c0_284, %c0_285] : memref<1x2x3x256x64xbf16, #tpu.memory_space<vmem>>, vector<1x1x1x256x64xbf16>
    %490 = vector.shape_cast %489 : vector<1x1x1x256x64xbf16> to vector<256x64xbf16>
    %cst_286 = arith.constant dense<0.000000e+00> : vector<64x64xf32>
    %491 = tpu.matmul %488, %490, %cst_286 {dimension_numbers = #tpu.dot_dimension_numbers<[1], [0], [0], [1], [0, 0, 1, 1], [], []>} : vector<64x256xbf16>, vector<256x64xbf16>, vector<64x64xf32> -> vector<64x64xf32>
    %492 = arith.addf %486, %491 : vector<64x64xf32>
    %493 = vector.broadcast %8 : vector<64x1xf32> to vector<64x64xf32>
    %494 = arith.mulf %492, %493 : vector<64x64xf32>
    %495 = arith.addf %438, %494 : vector<64x64xf32>
    %c0_287 = arith.constant 0 : index
    %c1_288 = arith.constant 1 : index
    %c0_289 = arith.constant 0 : index
    %c0_290 = arith.constant 0 : index
    %496 = vector.load %arg21[%c0_287, %c1_288, %c0_289, %c0_290] : memref<1x2x1x64xf32, #tpu.memory_space<vmem>>, vector<1x1x1x64xf32>
    %497 = vector.shape_cast %496 : vector<1x1x1x64xf32> to vector<1x64xf32>
    %c0_291 = arith.constant 0 : index
    %c1_292 = arith.constant 1 : index
    %c0_293 = arith.constant 0 : index
    %c0_294 = arith.constant 0 : index
    %498 = vector.load %arg22[%c0_291, %c1_292, %c0_293, %c0_294] : memref<1x2x1x64xf32, #tpu.memory_space<vmem>>, vector<1x1x1x64xf32>
    %499 = vector.shape_cast %498 : vector<1x1x1x64xf32> to vector<1x64xf32>
    %cst_295 = arith.constant dense<0.000000e+00> : vector<64xf32>
    %500 = vector.multi_reduction <add>, %495, %cst_295 [1] : vector<64x64xf32> to vector<64xf32>
    %501 = vector.shape_cast %500 : vector<64xf32> to vector<64x1xf32>
    %cst_296 = arith.constant 6.400000e+01 : f32
    %502 = vector.broadcast %cst_296 : f32 to vector<64x1xf32>
    %503 = arith.divf %501, %502 : vector<64x1xf32>
    %504 = vector.broadcast %503 : vector<64x1xf32> to vector<64x64xf32>
    %505 = arith.subf %495, %504 : vector<64x64xf32>
    %506 = arith.mulf %505, %505 : vector<64x64xf32>
    %cst_297 = arith.constant dense<0.000000e+00> : vector<64xf32>
    %507 = vector.multi_reduction <add>, %506, %cst_297 [1] : vector<64x64xf32> to vector<64xf32>
    %508 = vector.shape_cast %507 : vector<64xf32> to vector<64x1xf32>
    %cst_298 = arith.constant 6.400000e+01 : f32
    %509 = vector.broadcast %cst_298 : f32 to vector<64x1xf32>
    %510 = arith.divf %508, %509 : vector<64x1xf32>
    %511 = vector.broadcast %503 : vector<64x1xf32> to vector<64x64xf32>
    %512 = arith.subf %495, %511 : vector<64x64xf32>
    %cst_299 = arith.constant 9.99999974E-6 : f32
    %513 = vector.broadcast %cst_299 : f32 to vector<64x1xf32>
    %514 = arith.addf %510, %513 : vector<64x1xf32>
    %515 = math.rsqrt %514 : vector<64x1xf32>
    %516 = vector.broadcast %515 : vector<64x1xf32> to vector<64x64xf32>
    %517 = arith.mulf %512, %516 : vector<64x64xf32>
    %518 = vector.broadcast %497 : vector<1x64xf32> to vector<64x64xf32>
    %519 = arith.mulf %517, %518 : vector<64x64xf32>
    %520 = vector.broadcast %499 : vector<1x64xf32> to vector<64x64xf32>
    %521 = arith.addf %519, %520 : vector<64x64xf32>
    %522 = vector.broadcast %8 : vector<64x1xf32> to vector<64x64xf32>
    %523 = arith.mulf %521, %522 : vector<64x64xf32>
    %524 = arith.truncf %523 : vector<64x64xf32> to vector<64x64xbf16>
    %c0_300 = arith.constant 0 : index
    %c0_301 = arith.constant 0 : index
    %c0_302 = arith.constant 0 : index
    %525 = vector.load %arg23[%c0_300, %c0_301, %c0_302] : memref<1x64x4xbf16, #tpu.memory_space<vmem>>, vector<1x64x4xbf16>
    %526 = vector.shape_cast %525 : vector<1x64x4xbf16> to vector<64x4xbf16>
    %cst_303 = arith.constant dense<0.000000e+00> : vector<64x4xf32>
    %527 = tpu.matmul %524, %526, %cst_303 {dimension_numbers = #tpu.dot_dimension_numbers<[1], [0], [0], [1], [0, 0, 1, 1], [], []>} : vector<64x64xbf16>, vector<64x4xbf16>, vector<64x4xf32> -> vector<64x4xf32>
    %c0_304 = arith.constant 0 : index
    %c0_305 = arith.constant 0 : index
    %c0_306 = arith.constant 0 : index
    %528 = vector.load %arg24[%c0_304, %c0_305, %c0_306] : memref<1x1x4xf32, #tpu.memory_space<vmem>>, vector<1x1x4xf32>
    %529 = vector.shape_cast %528 : vector<1x1x4xf32> to vector<1x4xf32>
    %530 = vector.broadcast %529 : vector<1x4xf32> to vector<64x4xf32>
    %531 = arith.addf %527, %530 : vector<64x4xf32>
    %532 = vector.broadcast %8 : vector<64x1xf32> to vector<64x4xf32>
    %533 = arith.mulf %531, %532 : vector<64x4xf32>
    %534 = vector.extract_strided_slice %9 {offsets = [0, 0], sizes = [64, 4], strides = [1, 1]} : vector<64x8xf32> to vector<64x4xf32>
    %535 = vector.extract_strided_slice %9 {offsets = [0, 4], sizes = [64, 4], strides = [1, 1]} : vector<64x8xf32> to vector<64x4xf32>
    %c2_i32 = arith.constant 2 : i32
    %c0_i32_307 = arith.constant 0 : i32
    %536 = arith.cmpi eq, %c2_i32, %c0_i32_307 : i32
    %c1_i32 = arith.constant 1 : i32
    %537 = arith.select %536, %c1_i32, %c2_i32 : i32
    %538 = arith.remsi %arg1, %537 : i32
    %c0_i32_308 = arith.constant 0 : i32
    %539 = arith.cmpi ne, %538, %c0_i32_308 : i32
    %c0_i32_309 = arith.constant 0 : i32
    %540 = arith.cmpi slt, %538, %c0_i32_309 : i32
    %c0_i32_310 = arith.constant 0 : i32
    %541 = arith.cmpi slt, %537, %c0_i32_310 : i32
    %542 = arith.xori %540, %541 : i1
    %543 = arith.andi %542, %539 : i1
    %544 = arith.addi %538, %537 : i32
    %545 = arith.select %543, %544, %538 : i32
    %c0_i32_311 = arith.constant 0 : i32
    %546 = arith.cmpi eq, %545, %c0_i32_311 : i32
    %547 = arith.extui %546 : i1 to i32
    %c0_i32_312 = arith.constant 0 : i32
    %548 = arith.cmpi ne, %547, %c0_i32_312 : i32
    scf.if %548 {
      %555 = vector.broadcast %8 : vector<64x1xf32> to vector<64x4xf32>
      %556 = arith.mulf %535, %555 : vector<64x4xf32>
      %557 = arith.addf %533, %556 : vector<64x4xf32>
      %558 = tpu.concatenate %534, %557 in 1 : vector<64x4xf32>, vector<64x4xf32> -> vector<64x8xf32>
      %c0_315 = arith.constant 0 : index
      %c0_316 = arith.constant 0 : index
      %559 = vector.load %arg26[%c0_315, %c0_316] : memref<64x8xf32, #tpu.memory_space<vmem>>, vector<64x8xf32>
      tpu.vector_store %arg26[%c0_315, %c0_316], %558 {strides = array<i32>} : memref<64x8xf32, #tpu.memory_space<vmem>>, vector<64x8xf32>,
    } else {
    }
    %true = arith.constant true
    %549 = arith.xori %546, %true : i1
    %550 = arith.extui %549 : i1 to i32
    %c0_i32_313 = arith.constant 0 : i32
    %551 = arith.cmpi ne, %550, %c0_i32_313 : i32
    scf.if %551 {
      %555 = vector.broadcast %8 : vector<64x1xf32> to vector<64x4xf32>
      %556 = arith.mulf %534, %555 : vector<64x4xf32>
      %557 = arith.addf %533, %556 : vector<64x4xf32>
      %558 = tpu.concatenate %557, %535 in 1 : vector<64x4xf32>, vector<64x4xf32> -> vector<64x8xf32>
      %c0_315 = arith.constant 0 : index
      %c0_316 = arith.constant 0 : index
      %559 = vector.load %arg26[%c0_315, %c0_316] : memref<64x8xf32, #tpu.memory_space<vmem>>, vector<64x8xf32>
      tpu.vector_store %arg26[%c0_315, %c0_316], %558 {strides = array<i32>} : memref<64x8xf32, #tpu.memory_space<vmem>>, vector<64x8xf32>,
    } else {
    }
    %c3_i32 = arith.constant 3 : i32
    %552 = arith.cmpi eq, %arg1, %c3_i32 : i32
    %553 = arith.extui %552 : i1 to i32
    %c0_i32_314 = arith.constant 0 : i32
    %554 = arith.cmpi ne, %553, %c0_i32_314 : i32
    scf.if %554 {
      %c0_315 = arith.constant 0 : index
      %c0_316 = arith.constant 0 : index
      %555 = vector.load %arg26[%c0_315, %c0_316] : memref<64x8xf32, #tpu.memory_space<vmem>>, vector<64x8xf32>
      %c0_317 = arith.constant 0 : index
      %c0_318 = arith.constant 0 : index
      %c0_319 = arith.constant 0 : index
      %556 = vector.load %arg25[%c0_317, %c0_318, %c0_319] : memref<1x64x8xf32, #tpu.memory_space<vmem>>, vector<1x64x8xf32>
      %557 = vector.shape_cast %556 : vector<1x64x8xf32> to vector<64x8xf32>
      %558 = vector.shape_cast %555 : vector<64x8xf32> to vector<1x64x8xf32>
      tpu.vector_store %arg25[%c0_317, %c0_318, %c0_319], %558 {strides = array<i32>} : memref<1x64x8xf32, #tpu.memory_space<vmem>>, vector<1x64x8xf32>,
    } else {
    }
    return
  }
  func.func @transform_0(%arg0: i32, %arg1: i32) -> (i32, i32, i32) {
    %c0_i32 = arith.constant 0 : i32
    %c0_i32_0 = arith.constant 0 : i32
    %c0_i32_1 = arith.constant 0 : i32
    return %arg0, %c0_i32, %c0_i32_0 : i32, i32, i32
  }
  func.func @transform_1(%arg0: i32, %arg1: i32) -> (i32, i32, i32) {
    %c0_i32 = arith.constant 0 : i32
    %c0_i32_0 = arith.constant 0 : i32
    %c0_i32_1 = arith.constant 0 : i32
    return %arg0, %c0_i32, %c0_i32_0 : i32, i32, i32
  }
  func.func @transform_2(%arg0: i32, %arg1: i32) -> (i32, i32, i32) {
    %c0_i32 = arith.constant 0 : i32
    %c0_i32_0 = arith.constant 0 : i32
    %c0_i32_1 = arith.constant 0 : i32
    return %arg0, %c0_i32, %c0_i32_0 : i32, i32, i32
  }
  func.func @transform_3(%arg0: i32, %arg1: i32) -> (i32, i32, i32) {
    %c0_i32 = arith.constant 0 : i32
    %c0_i32_0 = arith.constant 0 : i32
    %c0_i32_1 = arith.constant 0 : i32
    return %arg1, %c0_i32, %c0_i32_0 : i32, i32, i32
  }
  func.func @transform_4(%arg0: i32, %arg1: i32) -> (i32, i32, i32) {
    %c0_i32 = arith.constant 0 : i32
    %c0_i32_0 = arith.constant 0 : i32
    %c0_i32_1 = arith.constant 0 : i32
    return %arg1, %c0_i32, %c0_i32_0 : i32, i32, i32
  }
  func.func @transform_5(%arg0: i32, %arg1: i32) -> (i32, i32, i32) {
    %c0_i32 = arith.constant 0 : i32
    %c0_i32_0 = arith.constant 0 : i32
    %c0_i32_1 = arith.constant 0 : i32
    return %arg1, %c0_i32, %c0_i32_0 : i32, i32, i32
  }
  func.func @transform_6(%arg0: i32, %arg1: i32) -> (i32, i32, i32) {
    %c0_i32 = arith.constant 0 : i32
    %c0_i32_0 = arith.constant 0 : i32
    %c0_i32_1 = arith.constant 0 : i32
    return %arg1, %c0_i32, %c0_i32_0 : i32, i32, i32
  }
  func.func @transform_7(%arg0: i32, %arg1: i32) -> (i32, i32, i32) {
    %c0_i32 = arith.constant 0 : i32
    %c0_i32_0 = arith.constant 0 : i32
    %c0_i32_1 = arith.constant 0 : i32
    return %arg1, %c0_i32, %c0_i32_0 : i32, i32, i32
  }
  func.func @transform_8(%arg0: i32, %arg1: i32) -> (i32, i32, i32) {
    %c0_i32 = arith.constant 0 : i32
    %c0_i32_0 = arith.constant 0 : i32
    %c0_i32_1 = arith.constant 0 : i32
    return %arg1, %c0_i32, %c0_i32_0 : i32, i32, i32
  }
  func.func @transform_9(%arg0: i32, %arg1: i32) -> (i32, i32, i32, i32) {
    %c0_i32 = arith.constant 0 : i32
    %c0_i32_0 = arith.constant 0 : i32
    %c0_i32_1 = arith.constant 0 : i32
    %c0_i32_2 = arith.constant 0 : i32
    return %arg1, %c0_i32, %c0_i32_0, %c0_i32_1 : i32, i32, i32, i32
  }
  func.func @transform_10(%arg0: i32, %arg1: i32) -> (i32, i32, i32, i32) {
    %c0_i32 = arith.constant 0 : i32
    %c0_i32_0 = arith.constant 0 : i32
    %c0_i32_1 = arith.constant 0 : i32
    %c0_i32_2 = arith.constant 0 : i32
    return %arg1, %c0_i32, %c0_i32_0, %c0_i32_1 : i32, i32, i32, i32
  }
  func.func @transform_11(%arg0: i32, %arg1: i32) -> (i32, i32, i32, i32) {
    %c0_i32 = arith.constant 0 : i32
    %c0_i32_0 = arith.constant 0 : i32
    %c0_i32_1 = arith.constant 0 : i32
    %c0_i32_2 = arith.constant 0 : i32
    return %arg1, %c0_i32, %c0_i32_0, %c0_i32_1 : i32, i32, i32, i32
  }
  func.func @transform_12(%arg0: i32, %arg1: i32) -> (i32, i32, i32, i32) {
    %c0_i32 = arith.constant 0 : i32
    %c0_i32_0 = arith.constant 0 : i32
    %c0_i32_1 = arith.constant 0 : i32
    %c0_i32_2 = arith.constant 0 : i32
    return %arg1, %c0_i32, %c0_i32_0, %c0_i32_1 : i32, i32, i32, i32
  }
  func.func @transform_13(%arg0: i32, %arg1: i32) -> (i32, i32, i32, i32) {
    %c0_i32 = arith.constant 0 : i32
    %c0_i32_0 = arith.constant 0 : i32
    %c0_i32_1 = arith.constant 0 : i32
    %c0_i32_2 = arith.constant 0 : i32
    return %arg1, %c0_i32, %c0_i32_0, %c0_i32_1 : i32, i32, i32, i32
  }
  func.func @transform_14(%arg0: i32, %arg1: i32) -> (i32, i32, i32, i32) {
    %c0_i32 = arith.constant 0 : i32
    %c0_i32_0 = arith.constant 0 : i32
    %c0_i32_1 = arith.constant 0 : i32
    %c0_i32_2 = arith.constant 0 : i32
    return %arg1, %c0_i32, %c0_i32_0, %c0_i32_1 : i32, i32, i32, i32
  }
  func.func @transform_15(%arg0: i32, %arg1: i32) -> (i32, i32, i32, i32, i32) {
    %c0_i32 = arith.constant 0 : i32
    %c0_i32_0 = arith.constant 0 : i32
    %c0_i32_1 = arith.constant 0 : i32
    %c0_i32_2 = arith.constant 0 : i32
    %c0_i32_3 = arith.constant 0 : i32
    return %arg1, %c0_i32, %c0_i32_0, %c0_i32_1, %c0_i32_2 : i32, i32, i32, i32, i32
  }
  func.func @transform_16(%arg0: i32, %arg1: i32) -> (i32, i32, i32, i32) {
    %c0_i32 = arith.constant 0 : i32
    %c0_i32_0 = arith.constant 0 : i32
    %c0_i32_1 = arith.constant 0 : i32
    %c0_i32_2 = arith.constant 0 : i32
    return %arg1, %c0_i32, %c0_i32_0, %c0_i32_1 : i32, i32, i32, i32
  }
  func.func @transform_17(%arg0: i32, %arg1: i32) -> (i32, i32, i32, i32, i32) {
    %c0_i32 = arith.constant 0 : i32
    %c0_i32_0 = arith.constant 0 : i32
    %c0_i32_1 = arith.constant 0 : i32
    %c0_i32_2 = arith.constant 0 : i32
    %c0_i32_3 = arith.constant 0 : i32
    return %arg1, %c0_i32, %c0_i32_0, %c0_i32_1, %c0_i32_2 : i32, i32, i32, i32, i32
  }
  func.func @transform_18(%arg0: i32, %arg1: i32) -> (i32, i32, i32, i32) {
    %c0_i32 = arith.constant 0 : i32
    %c0_i32_0 = arith.constant 0 : i32
    %c0_i32_1 = arith.constant 0 : i32
    %c0_i32_2 = arith.constant 0 : i32
    return %arg1, %c0_i32, %c0_i32_0, %c0_i32_1 : i32, i32, i32, i32
  }
  func.func @transform_19(%arg0: i32, %arg1: i32) -> (i32, i32, i32, i32) {
    %c0_i32 = arith.constant 0 : i32
    %c0_i32_0 = arith.constant 0 : i32
    %c0_i32_1 = arith.constant 0 : i32
    %c0_i32_2 = arith.constant 0 : i32
    return %arg1, %c0_i32, %c0_i32_0, %c0_i32_1 : i32, i32, i32, i32
  }
  func.func @transform_20(%arg0: i32, %arg1: i32) -> (i32, i32, i32, i32) {
    %c0_i32 = arith.constant 0 : i32
    %c0_i32_0 = arith.constant 0 : i32
    %c0_i32_1 = arith.constant 0 : i32
    %c0_i32_2 = arith.constant 0 : i32
    return %arg1, %c0_i32, %c0_i32_0, %c0_i32_1 : i32, i32, i32, i32
  }
  func.func @transform_21(%arg0: i32, %arg1: i32) -> (i32, i32, i32) {
    %c0_i32 = arith.constant 0 : i32
    %c0_i32_0 = arith.constant 0 : i32
    %c0_i32_1 = arith.constant 0 : i32
    return %arg1, %c0_i32, %c0_i32_0 : i32, i32, i32
  }
  func.func @transform_22(%arg0: i32, %arg1: i32) -> (i32, i32, i32) {
    %c0_i32 = arith.constant 0 : i32
    %c0_i32_0 = arith.constant 0 : i32
    %c0_i32_1 = arith.constant 0 : i32
    return %arg1, %c0_i32, %c0_i32_0 : i32, i32, i32
  }
  func.func @transform_23(%arg0: i32, %arg1: i32) -> (i32, i32, i32) {
    %c0_i32 = arith.constant 0 : i32
    %c0_i32_0 = arith.constant 0 : i32
    %c0_i32_1 = arith.constant 0 : i32
    return %arg0, %c0_i32, %c0_i32_0 : i32, i32, i32
  }
}

</mosaic_0001>

<bundles_post_ra>
// kernel: transformer_coupling_block_forward.1
= control target key start
LH: loop header
LB: loop body
LE: loop exit
PB: predicated region body
PF: predicated region fallthrough
CT: control target
= control target key end

     0   :  { %s11739_s30 = smov 0   ;;  %s11741_s24 = smov 0   ;;  %s14380_s0 = inlined_call_operand.vmem [shape: f32[2,64,8], index: 0, kind: input, shape index: {}]   ;;  %s14381_s1 = inlined_call_operand.vmem [shape: f32[2,64,1], index: 1, kind: input, shape index: {}]   ;;  %s14382_s2 = inlined_call_operand.vmem [shape: f32[2,1,32], index: 2, kind: input, shape index: {}]   ;;  %s14383_s3 = inlined_call_operand.vmem [shape: bf16[4,8,64], index: 3, kind: input, shape index: {}]   ;;  %s14384_s4 = inlined_call_operand.vmem [shape: f32[4,1,64], index: 4, kind: input, shape index: {}]   ;;  %s14385_s5 = inlined_call_operand.vmem [shape: bf16[4,32,256], index: 5, kind: input, shape index: {}]   ;;  %s14386_s6 = inlined_call_operand.vmem [shape: f32[4,1,256], index: 6, kind: input, shape index: {}]   ;;  %s14387_s7 = inlined_call_operand.vmem [shape: bf16[4,64,128], index: 7, kind: input, shape index: {}]   ;;  %s14388_s8 = inlined_call_operand.vmem [shape: f32[4,1,128], index: 8, kind: input, shape index: {}]   ;;  %s14389_s9 = inlined_call_operand.vmem [shape: bf16[4,2,64,192], index: 9, kind: input, shape index: {}]   ;;  %s14390_s10 = inlined_call_operand.vmem [shape: f32[4,2,1,192], index: 10, kind: input, shape index: {}]   ;;  %s14391_s11 = inlined_call_operand.vmem [shape: bf16[4,2,64,64], index: 11, kind: input, shape index: {}]   ;;  %s14392_s12 = inlined_call_operand.vmem [shape: f32[4,2,1,64], index: 12, kind: input, shape index: {}]   ;;  %s14393_s13 = inlined_call_operand.vmem [shape: f32[4,2,1,64], index: 13, kind: input, shape index: {}]   ;;  %s14394_s14 = inlined_call_operand.vmem [shape: f32[4,2,1,64], index: 14, kind: input, shape index: {}]   ;;  %s14395_s15 = inlined_call_operand.vmem [shape: bf16[4,2,3,64,256], index: 15, kind: input, shape index: {}]   ;;  %s14396_s16 = inlined_call_operand.vmem [shape: f32[4,2,1,256], index: 16, kind: input, shape index: {}]   ;;  %s14397_s17 = inlined_call_operand.vmem [shape: bf16[4,2,3,256,64], index: 17, kind: input, shape index: {}]   ;;  %s14398_s18 = inlined_call_operand.vmem [shape: f32[4,2,1,64], index: 18, kind: input, shape index: {}]   ;;  %s14399_s19 = inlined_call_operand.vmem [shape: f32[4,2,1,64], index: 19, kind: input, shape index: {}]   ;;  %s14400_s20 = inlined_call_operand.vmem [shape: f32[4,2,1,64], index: 20, kind: input, shape index: {}]   ;;  %s14401_s21 = inlined_call_operand.vmem [shape: bf16[4,64,4], index: 21, kind: input, shape index: {}]   ;;  %s14402_s22 = inlined_call_operand.vmem [shape: f32[4,1,4], index: 22, kind: input, shape index: {}]   ;;  %s14403_s23 = inlined_call_operand.vmem [shape: f32[2,64,8], index: 23, kind: output, shape index: {}]  }
   0x1   :  { %14469 = sst [smem:[#allocation40_spill]] %s14380_s0  ;;  %s11743_s25 = smov 0  }
   0x2   :  { %14470 = sst [smem:[#allocation41_spill]] %s14381_s1 }
   0x3   :  { %14471 = sst [smem:[#allocation42_spill]] %s14382_s2 }
   0x4   :  { %14472 = sst [smem:[#allocation43_spill]] %s14383_s3 }
   0x5   :  { %14473 = sst [smem:[#allocation44_spill]] %s14384_s4  ;;  %s11737_s4 = smov 0  }
   0x6   :  { %14474 = sst [smem:[#allocation45_spill]] %s14385_s5  ;;  %s11745_s5 = smov 0  }
   0x7   :  { %14475 = sst [smem:[#allocation46_spill]] %s14386_s6 }
   0x8   :  { %14476 = sst [smem:[#allocation47_spill]] %s14387_s7 }
   0x9   :  { %14477 = sst [smem:[#allocation48_spill]] %s14388_s8 }
   0xa   :  { %14478 = sst [smem:[#allocation49_spill]] %s14389_s9 }
   0xb   :  { %14479 = sst [smem:[#allocation50_spill]] %s14390_s10 }
   0xc   :  { %14480 = sst [smem:[#allocation51_spill]] %s14391_s11 }
   0xd   :  { %14481 = sst [smem:[#allocation52_spill]] %s14392_s12 }
   0xe   :  { %14482 = sst [smem:[#allocation53_spill]] %s14393_s13 }
   0xf   :  { %14483 = sst [smem:[#allocation54_spill]] %s14394_s14 }
  0x10   :  { %14484 = sst [smem:[#allocation55_spill]] %s14395_s15 }
  0x11   :  { %14485 = sst [smem:[#allocation56_spill]] %s14396_s16 }
  0x12   :  { %14486 = sst [smem:[#allocation57_spill]] %s14397_s17 }
  0x13   :  { %14487 = sst [smem:[#allocation58_spill]] %s14398_s18 }
  0x14   :  { %14488 = sst [smem:[#allocation59_spill]] %s14399_s19 }
  0x15   :  { %14489 = sst [smem:[#allocation60_spill]] %s14400_s20 }
  0x16   :  { %14490 = sst [smem:[#allocation61_spill]] %s14401_s21 }
  0x17   :  { %14491 = sst [smem:[#allocation62_spill]] %s14402_s22 }
  0x18   :  { %14492 = sst [smem:[#allocation63_spill]] %s14403_s23 }
  0x19 LB: > { %14493 = sst [smem:[#allocation5_spill]] %s11588_s4  ;;  %s42_s1 = sadd.s32 1, %s11596_s24  ;;  %s11604_s5 = sphi %s11745_s5, %s33_s5   ;;  %s11600_s25 = sphi %s11743_s25, %s14636_s25   ;;  %s11596_s24 = sphi %s11741_s24, %s14635_s24   ;;  %s11592_s30 = sphi %s11739_s30, %s14634_s30   ;;  %s11588_s4 = sphi %s11737_s4, %s14633_s4  }
  0x1a   : > { %14494 = sst [smem:[#allocation6_spill]] %s11596_s24  ;;  %s45_s26 = sadd.s32 1, %s11600_s25 }
  0x1b   : > { %14495 = sst [smem:[#allocation7_spill]] %s11600_s25  ;;  %p43_p0 = scmp.ge.s32.totalorder %s42_s1, 4 }
  0x1c   : > { %14496 = sst [smem:[#allocation8_spill]] %s11604_s5  ;;  %p9221_p1 = scmp.ge.s32.totalorder %s11604_s5, 1 }
  0x1d   : > { %p851_p2 = scmp.lt.s32.totalorder %s11604_s5, 9  ;;  %s14638_s1 = smov (%p43_p0, %s42_s1), 0 }
  0x1e   : > { %14497 = sst [smem:[#allocation9_spill]] %s14638_s1  ;;  %s14640_s26 = smov (!%p43_p0, %s45_s26), %s11600_s25 }
  0x1f   : > { %p852_p3 = pnand %p9221_p1, %p851_p2  ;;  %p47_p4 = scmp.ge.s32.totalorder %s14640_s26, 2 }
  0x21   : > { %s14642_s26 = smov (%p47_p4, %s14640_s26), 0  ;;  %855 = sbr.rel (%p852_p3) target bundleno = 9099 (0x238b), region = 112 }
  0x22   : > { %14498 = sst [smem:[#allocation10_spill]] %s14642_s26 }
  0x28   : > { %p1007_p5 = scmp.lt.s32.totalorder %s11592_s30, 1  ;;  %p1020_p6 = scmp.lt.s32.totalorder %s11588_s4, 3 }
  0x29   : > { %s14501_s26 = sld [smem:[#allocation40_spill]]  ;;  %s14503_s5 = sld [smem:[#allocation41_spill]] }
  0x2a   : > { %s14644_s30 = smov (!%p1007_p5, %s11592_s30), 1  ;;  %s14507_s24 = sld [smem:[#allocation45_spill]] }
  0x2b   : > { %14499 = sst [smem:[#allocation11_spill]] %s14644_s30  ;;  %s11776_s6 = sshll.u32 %s14644_s30, 6 }
  0x2c   : > { %s11773_s2 = scalar_select %p1020_p6, %s11588_s4, 3 }
  0x2d   : > { %s14509_s21 = sld [smem:[#allocation46_spill]]  ;;  %s14510_s19 = sld [smem:[#allocation47_spill]] }
  0x2e   : > { %s11795_s23 = sshll.u32 %s11773_s2, 2  ;;  %s14511_s8 = sld [smem:[#allocation48_spill]] }
  0x2f   : > { %s11786_s1 = scalar_lea.vmem %s14501_s26, %s11776_s6  ;;  %s11792_s4 = scalar_lea.vmem %s14503_s5, %s11776_s6 }
  0x30   : > { %14502 = sst [smem:[#allocation12_spill]] %s11786_s1  ;;  %s9846_s26 = sshll.u32 %s11773_s2, 5 }
  0x31   : > { %14504 = sst [smem:[#allocation13_spill]] %s11792_s4  ;;  %s11809_s25 = scalar_lea.vmem %s14507_s24, %s9846_s26 }
  0x32   : > { %14508 = sst [smem:[#allocation14_spill]] %s11809_s25  ;;  %s9229_s5 = sshll.u32 %s11773_s2, 1 }
  0x33   : > { %s11815_s22 = scalar_lea.vmem %s14509_s21, %s9229_s5  ;;  %s11820_s7 = scalar_lea.vmem %s14510_s19, %s9846_s26 }
  0x34   : > { %s11826_s3 = scalar_lea.vmem %s14511_s8, %s11773_s2  ;;  %s9848_s30 = sshll.u32 %s11773_s2, 7 }
  0x35   : > { %s14512_s9 = sld [smem:[#allocation49_spill]]  ;;  %s14513_s10 = sld [smem:[#allocation50_spill]] }
  0x36   : > { %s9849_s19 = sshll.u32 %s11773_s2, 6  ;;  %s14515_s12 = sld [smem:[#allocation52_spill]] }
  0x37   : > { %s14516_s11 = sld [smem:[#allocation51_spill]]  ;;  %s14517_s13 = sld [smem:[#allocation53_spill]] }
  0x38   : > { %s14519_s14 = sld [smem:[#allocation54_spill]]  ;;  %s14521_s16 = sld [smem:[#allocation56_spill]] }
  0x39   : > { %s14523_s15 = sld [smem:[#allocation55_spill]]  ;;  %s14524_s18 = sld [smem:[#allocation58_spill]] }
  0x3a   : > { %s14528_s27 = sld [smem:[#allocation59_spill]]  ;;  %s14529_s29 = sld [smem:[#allocation60_spill]] }
  0x3b   : > { %s11832_s25 = scalar_lea.vmem %s14512_s9, %s9848_s30  ;;  %s11838_s1 = scalar_lea.vmem %s14513_s10, %s11795_s23 }
  0x3c   : > { %14514 = sst [smem:[#allocation15_spill]] %s11838_s1  ;;  %s11844_s20 = scalar_lea.vmem %s14515_s12, %s9229_s5 }
  0x3d   : > { %s11849_s8 = scalar_lea.vmem %s14516_s11, %s9849_s19  ;;  %s11854_s24 = scalar_lea.vmem %s14517_s13, %s9229_s5 }
  0x3e   : > { %14518 = sst [smem:[#allocation16_spill]] %s11854_s24  ;;  %s11859_s9 = scalar_lea.vmem %s14519_s14, %s9229_s5 }
  0x3f   : > { %14520 = sst [smem:[#allocation17_spill]] %s11859_s9  ;;  %s10876_s10 = smul.u32 384, %s11773_s2 }
  0x40   : > { %s11866_s21 = scalar_lea.vmem %s14521_s16, %s11795_s23  ;;  %s10877_s12 = smul.u32 768, %s11773_s2 }
  0x41   : > { %14522 = sst [smem:[#allocation18_spill]] %s11866_s21  ;;  %s11872_s28 = scalar_lea.vmem %s14523_s15, %s10876_s10 }
  0x42   : > { %s11877_s11 = scalar_lea.vmem %s14524_s18, %s9229_s5  ;;  %s14526_s13 = sld [smem:[#allocation57_spill]] }
  0x43   : > { %14525 = sst [smem:[#allocation19_spill]] %s11877_s11  ;;  %s11887_s16 = scalar_lea.vmem %s14528_s27, %s9229_s5 }
  0x44   : > { %s11892_s10 = scalar_lea.vmem %s14529_s29, %s9229_s5  ;;  %s14530_s30 = sld [smem:[#allocation61_spill]] }
  0x45   : > { %s14531_s17 = sld [smem:[#allocation62_spill]]  ;;  %s14533_s1 = sld [smem:[#allocation5_spill]] }
  0x48   : > { %s11882_s14 = scalar_lea.vmem %s14526_s13, %s10877_s12 }
  0x49   : > { %14527 = sst [smem:[#allocation20_spill]] %s11882_s14  ;;  %s14532_s14 = sld [smem:[#allocation63_spill]] }
  0x4a   : > { %s11897_s0 = scalar_lea.vmem %s14530_s30, %s9846_s26 }
  0x4b   : > { %s1103_s12 = scalar_lea.vmem %s14531_s17, %s11773_s2  ;;  %p9250_p7 = scmp.ne.s32.totalorder %s14533_s1, 0 }
  0x4c   : > { %s14534_s24 = sld [smem:[#allocation12_spill]] (!%p9250_p7)  ;;  %vm1122_vm0 = vcmask (!%p9250_p7), 64512  }
  0x4d   : > { %1113 = sbr.rel (%p9250_p7) target bundleno = 87 (0x57), region = 116 }
  0x4f   : > { %s11907_s9 = scalar_lea.vmem %s14532_s14, %s11776_s6 }
  0x52   : > { %v1114_v0 = vld [vmem:[%s14534_s24] sm:$0xff] (!%p9250_p7)  ;;  %v1115_v1 = vld [vmem:[%s14534_s24 + $0x8] sm:$0xff] (!%p9250_p7)  ;;  %v1116_v2 = vld [vmem:[%s14534_s24 + $0x10] sm:$0xff] (!%p9250_p7) }
  0x53   : > { %1123 = vst.msk [vmem:[#allocation2] sm:$0xff] (!%p9250_p7), %vm1122_vm0, %v1114_v0  ;;  %1124 = vst.msk [vmem:[#allocation2 + $0x8] sm:$0xff] (!%p9250_p7), %vm1122_vm0, %v1115_v1  ;;  %v1117_v3 = vld [vmem:[%s14534_s24 + $0x18] sm:$0xff] (!%p9250_p7)  ;;  %v1118_v4 = vld [vmem:[%s14534_s24 + $0x20] sm:$0xff] (!%p9250_p7) }
  0x54   : > { %1125 = vst.msk [vmem:[#allocation2 + $0x10] sm:$0xff] %vm1122_vm0, %v1116_v2  ;;  %v1119_v5 = vld [vmem:[%s14534_s24 + $0x28] sm:$0xff]  ;;  %1126 = vst.msk [vmem:[#allocation2 + $0x18] sm:$0xff] %vm1122_vm0, %v1117_v3  ;;  %v1120_v6 = vld [vmem:[%s14534_s24 + $0x30] sm:$0xff] }
  0x55   : > { %1127 = vst.msk [vmem:[#allocation2 + $0x20] sm:$0xff] %vm1122_vm0, %v1118_v4  ;;  %1128 = vst.msk [vmem:[#allocation2 + $0x28] sm:$0xff] %vm1122_vm0, %v1119_v5  ;;  %v1121_v7 = vld [vmem:[%s14534_s24 + $0x38] sm:$0xff] }
  0x56   : > { %1129 = vst.msk [vmem:[#allocation2 + $0x30] sm:$0xff] %vm1122_vm0, %v1120_v6  ;;  %1130 = vst.msk [vmem:[#allocation2 + $0x38] sm:$0xff] %vm1122_vm0, %v1121_v7 }
  0x57 PF: > { %s14535_s15 = sld [smem:[#allocation43_spill]]  ;;  %vm1176_vm1 = vcmask 1043456   ;;  %vm1163_vm2 = vcmask 64512   ;;  %v14419_v18 = vmov 0   ;;  %v10931_v28 = vld [vmem:[%s11820_s7] sm:$0xff]   ;;  %v10932_v32 = vld [vmem:[%s11820_s7 + $0x8] sm:$0xff]  }
  0x58   : > { %s14539_s6 = sld [smem:[#allocation13_spill]]  ;;  %10929 = vset.pattern.permute.xlu0 %v14419_v18  ;;  %10930 = vset.pattern.permute.xlu1 %v14419_v18  ;;  %s14547_s26 = sld [smem:[#allocation11_spill]]  ;;  %v10936_v35 = vld [vmem:[%s11820_s7 + $0x10] sm:$0xff]   ;;  %v10940_v38 = vld [vmem:[%s11820_s7 + $0x18] sm:$0xff]   ;;  %vm1331_vm3 = vcmask 261120   ;;  %vm1131_vm4 = vcmask 523264  }
  0x59   : > { %1367 = vmatprep.mubr.bf16.mxu1 %v14419_v18  ;;  %s14548_s27 = sld [smem:[#allocation42_spill]]  ;;  %s14550_s17 = sld [smem:[#allocation44_spill]]  ;;  %vm1808_vm5 = vcmask 130048   ;;  %vm4125_vm14 = vcmask 1044480   ;;  %vm4362_vm15 = vsmask.f32 4352 }
  0x5a   : > { %s11607_s4 = smov 64   ;;  %s14557_s1 = sld [smem:[#allocation15_spill]] }
  0x5b   : > { %s11608_s24 = smov 48   ;;  %s11609_s11 = smov 112  }
  0x5c   : > { %v11933_v15 = vld [vmem:[#allocation2 + $0x20] sm:$0xff]  ;;  %v11937_v17 = vld [vmem:[#allocation2 + $0x28] sm:$0xff]  ;;  %s11610_s14 = smov 32   ;;  %s14583_s5 = sld [smem:[#allocation17_spill]] }
  0x5d   : > { %s14536_s18 = scalar_lea.vmem %s14535_s15, %s11795_s23  ;;  %v11923_v9 = vld [vmem:[#allocation2] sm:$0xff]  ;;  %v11925_v10 = vld [vmem:[#allocation2 + $0x8] sm:$0xff]  ;;  %14542 = vst [vmem:[#allocation25_spill] sm:$0xff] %v11933_v15  ;;  %14543 = vst [vmem:[#allocation26_spill] sm:$0xff] %v11937_v17  ;;  %v1153_v19 = vpack.c.bf16 %v11937_v17, %v11933_v15  ;;  %s14546_s23 = sld [smem:[#allocation14_spill]] }
  0x5e   : > { %v1155_v8 = vld [vmem:[%s14536_s18] sm:$0xf]  ;;  %14537 = vst [vmem:[#allocation21_spill] sm:$0xff] %v11923_v9  ;;  %14538 = vst [vmem:[#allocation22_spill] sm:$0xff] %v11925_v10  ;;  %v1151_v12 = vpack.c.bf16 %v11925_v10, %v11923_v9  ;;  %v11929_v13 = vld [vmem:[#allocation2 + $0x10] sm:$0xff]  ;;  %s11611_s15 = smov 96  }
  0x5f   : > { %10843 = vmatprep.subr.msk.bf16.mxu0 %vm1176_vm1, %v1155_v8  ;;  %v1178_v11 = vsel %vm1176_vm1, %v1155_v8, 0  ;;  %14540 = vst [vmem:[#allocation23_spill] sm:$0xff] %v11929_v13  ;;  %v11931_v14 = vld [vmem:[#allocation2 + $0x18] sm:$0xff]  ;;  %v1135_v20 = vld [vmem:[%s14539_s6] sm:$0xff]  ;;  %v1137_v21 = vld [vmem:[%s14539_s6 + $0x10] sm:$0xff]  ;;  %s14549_s29 = scalar_lea.vmem %s14548_s27, %s14547_s26  ;;  %s14551_s13 = scalar_lea.vmem %s14550_s17, %s11773_s2 }
  0x60   : > { %14541 = vst [vmem:[#allocation24_spill] sm:$0xff] %v11931_v14  ;;  %10290 = vmatpush3.bf16.msra.mxu0 %v1178_v11  ;;  %v1152_v16 = vpack.c.bf16 %v11931_v14, %v11929_v13  ;;  %10291 = vmatprep.mubr.msk.bf16.mxu0 %vm1163_vm2, %v1151_v12  ;;  %v11946_v22 = vld [vmem:[#allocation2 + $0x30] sm:$0xff]  ;;  %v11948_v23 = vld [vmem:[#allocation2 + $0x38] sm:$0xff]  ;;  %v1136_v24 = vld [vmem:[%s14539_s6 + $0x8] sm:$0xff]  ;;  %s11612_s18 = smov 16   ;;  %s14582_s26 = sld [smem:[#allocation16_spill]] }
  0x61   : > { %14544 = vst [vmem:[#allocation27_spill] sm:$0xff] %v11946_v22  ;;  %14545 = vst [vmem:[#allocation28_spill] sm:$0xff] %v11948_v23  ;;  %1247 = vperm.xlu0 %10929, %v1135_v20   ;;  %1257 = vperm.xlu1 %10930, %v1137_v21   ;;  %v1138_v25 = vld [vmem:[%s14539_s6 + $0x18] sm:$0xff]  ;;  %v1139_v26 = vld [vmem:[%s14539_s6 + $0x20] sm:$0xff]  ;;  %v1154_v29 = vpack.c.bf16 %v11948_v23, %v11946_v22  ;;  %s14586_s21 = sld [smem:[#allocation18_spill]]  ;;  %s14595_s27 = sld [smem:[#allocation19_spill]] }
  0x62   : > { %v1140_v27 = vld [vmem:[%s14539_s6 + $0x28] sm:$0xff]  ;;  %10299 = vmatprep.subr.bf16.mxu0 %v10931_v28  ;;  %v1141_v30 = vld [vmem:[%s14539_s6 + $0x30] sm:$0xff]  ;;  %v1142_v31 = vld [vmem:[%s14539_s6 + $0x38] sm:$0xff]  ;;  %s11613_s6 = smov 80  }
  0x63   : > { %10292 = vmatmul.mubr.msk.bf16.vlgmr.msra.gmra.mrb[0].mxu0 %vm1163_vm2, %v1152_v16  ;;  %v10933_v33 = vld [vmem:[%s14546_s23 + $0x4] ss:$8 sps:$4 sm:$0xff]   ;;  %v10935_v34 = vld [vmem:[%s14546_s23] ss:$8 sps:$4 sm:$0xff]   ;;  %v10937_v36 = vld [vmem:[%s14546_s23 + $0x14] ss:$8 sps:$4 sm:$0xff]  }
  0x64   : > { %10295 = vmatprep.mubr.msk.bf16.mxu0 %vm1163_vm2, %v1153_v19  ;;  %10300 = vmatpush3.bf16.msra.mxu0 %v10931_v28  ;;  %v10939_v37 = vld [vmem:[%s14546_s23 + $0x10] ss:$8 sps:$4 sm:$0xff]   ;;  %v1293_v39 = vld [vmem:[%s14549_s29] sm:$0x1]  ;;  %v10943_v28 = vld [vmem:[%s11832_s25 + $0x4] ss:$8 sps:$4 sm:$0xff]  }
  0x65   : > { %1252 = vperm.xlu0 %10929, %v1136_v24   ;;  %1262 = vperm.xlu1 %10930, %v1138_v25   ;;  %v1294_v40 = vpack.c.bf16 %v1293_v39, %v1293_v39  ;;  %v9251_v43 = vld [vmem:[%s14551_s13] ss:$0 sm:$0xff]  ;;  %s14581_s23 = sld [smem:[#allocation20_spill]] }
  0x66   : > { %10301 = vmatprep.subr.bf16.mxu0 %v10932_v32  ;;  %1335 = vmatprep.subr.bf16.mxu1 %v10933_v33  ;;  %v1321_v33 = vlaneseq  ;;  %v9261_v39 = vld [vmem:[%s11826_s3] ss:$0 sm:$0xff] }
  0x67   : > { %1336 = vmatpush1.bf16.msra.mxu1 %v10935_v34 }
  0x68   : > { %10302 = vmatpush3.bf16.msra.mxu0 %v10932_v32  ;;  %1337 = vmatprep.subr.bf16.mxu1 %v10937_v36  ;;  %v10947_v32 = vld [vmem:[%s11832_s25 + $0x20] ss:$8 sps:$4 sm:$0xff]   ;;  %v12018_v34 = vshrl.u32 %v1321_v33, 7 }
  0x69   : > { %1267 = vperm.xlu0 %10929, %v1139_v26   ;;  %1272 = vperm.xlu1 %10930, %v1140_v27   ;;  %v10941_v27 = vld [vmem:[%s11832_s25] ss:$8 sps:$4 sm:$0xff]  }
  0x6a   : > { %10303 = vmatprep.subr.bf16.mxu0 %v10936_v35  ;;  %v1299_v36 = vld [vmem:[%s11815_s22] sm:$0x3] }
  0x6b   : > { %10296 = vmatmul.mubr.msk.bf16.gmra.mrb[4].mxu0 %vm1163_vm2, %v1154_v29  ;;  %1338 = vmatpush1.bf16.msra.mxu1 %v10939_v37  ;;  %v10946_v29 = vld [vmem:[%s11832_s25 + $0x14] ss:$8 sps:$4 sm:$0xff]  }
  0x6c   : > { %10304 = vmatpush3.bf16.msra.mxu0 %v10936_v35  ;;  %1699 = vmatprep.subr.bf16.mxu1 %v10943_v28  ;;  %v12021_v35 = vsub.s32 0, %v12018_v34 }
  0x6d   : > { %1277 = vperm.xlu0 %10929, %v1141_v30   ;;  %1282 = vperm.xlu1 %10930, %v1142_v31   ;;  %v10944_v30 = vld [vmem:[%s11832_s25 + $0x10] ss:$8 sps:$4 sm:$0xff]   ;;  %v10949_v31 = vld [vmem:[%s11832_s25 + $0x24] ss:$8 sps:$4 sm:$0xff]  }
  0x6e   : > { %10305 = vmatprep.subr.bf16.mxu0 %v10940_v38  ;;  %9260 = vmatmul.mubr.msk.bf16.vlgmr.msra.gmra.mrb[0].mxu1 %vm1331_vm3, %v1294_v40  ;;  %14556 = vst [vmem:[#allocation33_spill] sm:$0xff] %v12021_v35  ;;  %v1324_v37 = vrot.slane %v1299_v36, %v12021_v35 }
  0x6f   : > { %1731 = vmatprep.mubr.bf16.mxu1 %v14419_v18  ;;  %1700 = vmatpush1.bf16.msra.mxu1 %v10941_v27 }
  0x70   : > { %10306 = vmatpush3.bf16.msra.mxu0 %v10940_v38  ;;  %1701 = vmatprep.subr.bf16.mxu1 %v10946_v29 }
  0x73   : > { %1702 = vmatpush1.bf16.msra.mxu1 %v10944_v30 }
  0x74   : > { %1703 = vmatprep.subr.bf16.mxu1 %v10949_v31 }
  0x77   : > { %1704 = vmatpush1.bf16.msra.mxu1 %v10947_v32 }
  0xe0   : > { %v11976_v41 = vpop.permute.xlu0 %1247  ;;  %v11978_v42 = vpop.permute.xlu1 %1257 }
  0xe4   : > { %v11985_v44 = vpop.permute.xlu0 %1252  ;;  %v11987_v45 = vpop.permute.xlu1 %1262 }
  0xe8   : > { %v11991_v56 = vpop.permute.xlu0 %1267  ;;  %v11993_v57 = vpop.permute.xlu1 %1272 }
  0xe9   : > { %14552 = vst [vmem:[#allocation29_spill] sm:$0xff] %v11993_v57 }
  0xec   : > { %v11999_v5 = vpop.permute.xlu0 %1277  ;;  %v12001_v6 = vpop.permute.xlu1 %1282 }
  0xed   : > { %14553 = vst [vmem:[#allocation30_spill] sm:$0xff] %v11999_v5  ;;  %14554 = vst [vmem:[#allocation31_spill] sm:$0xff] %v12001_v6 }
 0x136   : > { %v10293_v46 = vpop.f32.mrb[0].mxu0 }
 0x137   : > { %v1223_v47 = vadd.f32 %v10293_v46, %v9251_v43  ;;  %v1214_v48 = vpop.f32.mrb[1].mxu0 }
 0x138   : > { %v1215_v49 = vadd.f32 %v9251_v43, %v1214_v48  ;;  %v10294_v50 = vpop.f32.mrb[2].mxu0 }
 0x139   : > { %v1226_v51 = vadd.f32 %v10294_v50, %v9251_v43  ;;  %v1217_v52 = vpop.f32.mrb[3].mxu0  ;;  %v1287_v54 = vmul.f32 %v11978_v42, %v1223_v47 }
 0x13a   : > { %v1218_v53 = vadd.f32 %v9251_v43, %v1217_v52  ;;  %v1285_v58 = vmul.f32 %v11976_v41, %v1215_v49 }
 0x13b   : > { %v1288_v55 = vmul.f32 %v11987_v45, %v1226_v51 }
 0x13c   : > { %v1286_v59 = vmul.f32 %v11985_v44, %v1218_v53 }
 0x13d   : > { %v1396_v60 = vpack.c.bf16 %v1288_v55, %v1287_v54 }
 0x13e   : > { %v1395_v61 = vpack.c.bf16 %v1286_v59, %v1285_v58  ;;  %v10297_v62 = vpop.f32.mrb[4].mxu0 }
 0x13f   : > { %v1239_v63 = vadd.f32 %v10297_v62, %v9251_v43  ;;  %v1230_v0 = vpop.f32.mrb[5].mxu0 }
 0x140   : > { %v1231_v1 = vadd.f32 %v9251_v43, %v1230_v0  ;;  %v10298_v2 = vpop.f32.mrb[6].mxu0  ;;  %10307 = vmatprep.mubr.msk.bf16.mxu0 %vm1131_vm4, %v1395_v61 }
 0x141   : > { %v1242_v3 = vadd.f32 %v10298_v2, %v9251_v43  ;;  %v1233_v4 = vpop.f32.mrb[7].mxu0  ;;  %10308 = vmatmul.mubr.msk.bf16.vlgmr.msra.gmra.mrb[8].mxu0 %vm1131_vm4, %v1396_v60  ;;  %v1291_v8 = vmul.f32 %v11999_v5, %v1239_v63  ;;  %v1369_v21 = vpop.f32.mrb[0].mxu1 }
 0x142   : > { %v1234_v7 = vadd.f32 %v9251_v43, %v1233_v4  ;;  %v1289_v12 = vmul.f32 %v11991_v56, %v1231_v1  ;;  %v12009_v24 = vpop.f32.mrb[1].mxu1  ;;  %v1370_v38 = vadd.f32 %v1369_v21, %v1324_v37  ;;  %v10952_v37 = vld [vmem:[%s11832_s25 + $0x34] ss:$8 sps:$4 sm:$0xff]  }
 0x143   : > { %v1292_v11 = vmul.f32 %v12001_v6, %v1242_v3  ;;  %14555 = vst [vmem:[#allocation32_spill] sm:$0xff] %v12009_v24  ;;  %v1373_v25 = vpop.f32.mrb[2].mxu1  ;;  %1705 = vmatprep.subr.bf16.mxu1 %v10952_v37 }
 0x144   : > { %v1290_v16 = vmul.f32 %v11993_v57, %v1234_v7  ;;  %v1374_v26 = vpop.f32.mrb[3].mxu1  ;;  %v1518_v40 = vrot.slane %v1370_v38, %v12021_v35 }
 0x145   : > { %v1398_v19 = vpack.c.bf16 %v1292_v11, %v1291_v8 }
 0x146   : > { %v1397_v20 = vpack.c.bf16 %v1290_v16, %v1289_v12 }
 0x148   : > { %10311 = vmatprep.mubr.msk.bf16.mxu0 %vm1131_vm4, %v1397_v20 }
 0x149   : > { %10312 = vmatmul.mubr.msk.bf16.gmra.mrb[12].mxu0 %vm1131_vm4, %v1398_v19 }
 0x214   : > { %v10309_v43 = vpop.f32.mrb[8].mxu0 }
 0x215   : > { %v1493_v46 = vadd.f32 %v10309_v43, %v9261_v39  ;;  %v1484_v47 = vpop.f32.mrb[9].mxu0 }
 0x216   : > { %v1485_v48 = vadd.f32 %v9261_v39, %v1484_v47  ;;  %v10310_v49 = vpop.f32.mrb[10].mxu0 }
 0x217   : > { %v12027_v50 = vadd.f32 %v1518_v40, %v1493_v46  ;;  %v1496_v51 = vadd.f32 %v10310_v49, %v9261_v39  ;;  %v1487_v52 = vpop.f32.mrb[11].mxu0 }
 0x218   : > { %v12029_v53 = vadd.f32 %v1518_v40, %v1485_v48  ;;  %v1488_v54 = vadd.f32 %v9261_v39, %v1487_v52 }
 0x219   : > { %v9272_v55 = vmul.f32 -1.442695, %v12027_v50  ;;  %v12032_v58 = vadd.f32 %v1518_v40, %v1496_v51 }
 0x21a   : > { %v9270_v59 = vmul.f32 -1.442695, %v12029_v53  ;;  %v12035_v60 = vadd.f32 %v1518_v40, %v1488_v54 }
 0x21b   : > { %11149 = vpow2.f32 %v9272_v55  ;;  %v9273_v61 = vmul.f32 -1.442695, %v12032_v58 }
 0x21c   : > { %11151 = vpow2.f32 %v9270_v59  ;;  %v9271_v62 = vmul.f32 -1.442695, %v12035_v60  ;;  %v10313_v63 = vpop.f32.mrb[12].mxu0 }
 0x21d   : > { %v1509_v0 = vadd.f32 %v10313_v63, %v9261_v39  ;;  %v1500_v1 = vpop.f32.mrb[13].mxu0  ;;  %11153 = vpow2.f32 %v9273_v61 }
 0x21e   : > { %v1501_v2 = vadd.f32 %v9261_v39, %v1500_v1  ;;  %v10314_v3 = vpop.f32.mrb[14].mxu0  ;;  %11155 = vpow2.f32 %v9271_v62 }
 0x21f   : > { %v12039_v4 = vadd.f32 %v1518_v40, %v1509_v0  ;;  %v1512_v7 = vadd.f32 %v10314_v3, %v9261_v39  ;;  %v1503_v8 = vpop.f32.mrb[15].mxu0 }
 0x220   : > { %v12041_v11 = vadd.f32 %v1518_v40, %v1501_v2  ;;  %v1504_v12 = vadd.f32 %v9261_v39, %v1503_v8  ;;  %v10950_v39 = vld [vmem:[%s11832_s25 + $0x30] ss:$8 sps:$4 sm:$0xff]  }
 0x221   : > { %v9276_v16 = vmul.f32 -1.442695, %v12039_v4  ;;  %v12044_v19 = vadd.f32 %v1518_v40, %v1512_v7  ;;  %1706 = vmatpush1.bf16.msra.mxu1 %v10950_v39 }
 0x222   : > { %v9274_v20 = vmul.f32 -1.442695, %v12041_v11  ;;  %v12047_v21 = vadd.f32 %v1518_v40, %v1504_v12 }
 0x223   : > { %11157 = vpow2.f32 %v9276_v16  ;;  %v9277_v25 = vmul.f32 -1.442695, %v12044_v19 }
 0x224   : > { %11159 = vpow2.f32 %v9274_v20  ;;  %v9275_v28 = vmul.f32 -1.442695, %v12047_v21 }
 0x225   : > { %v11150_v26 = vpop.eup %11149  ;;  %11161 = vpow2.f32 %v9277_v25 }
 0x226   : > { %v11152_v27 = vpop.eup %11151  ;;  %v1561_v30 = vadd.f32 1.0, %v11150_v26 }
 0x227   : > { %v1559_v29 = vadd.f32 1.0, %v11152_v27  ;;  %v11154_v31 = vpop.eup %11153 }
 0x228   : > { %v11156_v32 = vpop.eup %11155  ;;  %v1562_v38 = vadd.f32 1.0, %v11154_v31 }
 0x229   : > { %11163 = vrcp.f32 %v1559_v29  ;;  %v1560_v36 = vadd.f32 1.0, %v11156_v32 }
 0x22a   : > { %11165 = vpow2.f32 %v9275_v28 }
 0x22b   : > { %11167 = vrcp.f32 %v1561_v30 }
 0x22c   : > { %11169 = vrcp.f32 %v1560_v36 }
 0x22d   : > { %v11158_v40 = vpop.eup %11157  ;;  %11171 = vrcp.f32 %v1562_v38 }
 0x22e   : > { %v11160_v43 = vpop.eup %11159  ;;  %v1565_v47 = vadd.f32 1.0, %v11158_v40 }
 0x22f   : > { %v1563_v46 = vadd.f32 1.0, %v11160_v43  ;;  %v11162_v48 = vpop.eup %11161  ;;  %v1635_v43 = vld [vmem:[%s14557_s1] sm:$0x3] }
 0x230   : > { %v1566_v59 = vadd.f32 1.0, %v11162_v48 }
 0x231   : > { %11173 = vrcp.f32 %v1563_v46  ;;  %v12102_v46 = vsub.s32 1, %v12018_v34 }
 0x232   : > { %11175 = vrcp.f32 %v1565_v47  ;;  %v1640_v47 = vrot.slane %v1635_v43, %v12021_v35 }
 0x233   : > { %v11164_v49 = vpop.eup %11163  ;;  %14558 = vst [vmem:[#allocation34_spill] sm:$0xff] %v12102_v46 }
 0x234   : > { %v11166_v51 = vpop.eup %11165  ;;  %1591 = vrot.lane.b32.xlu0 %v11164_v49, %s11607_s4  ;;  %v1644_v49 = vrot.slane %v1635_v43, %v12102_v46 }
 0x235   : > { %v1564_v52 = vadd.f32 1.0, %v11166_v51  ;;  %v11168_v54 = vpop.eup %11167 }
 0x236   : > { %v11170_v55 = vpop.eup %11169 }
 0x237   : > { %11177 = vrcp.f32 %v1564_v52  ;;  %1593 = vrot.lane.b32.xlu1 %v11170_v55, %s11607_s4  ;;  %v11172_v61 = vpop.eup %11171 }
 0x238   : > { %1595 = vrot.lane.b32.xlu0 %v11168_v54, %s11607_s4  ;;  %11179 = vrcp.f32 %v1566_v59 }
 0x239   : > { %11181 = vtanh.f32 %v12029_v53 }
 0x23a   : > { %11183 = vtanh.f32 %v12035_v60 }
 0x23b   : > { %v11174_v62 = vpop.eup %11173  ;;  %1597 = vrot.lane.b32.xlu1 %v11172_v61, %s11607_s4  ;;  %11185 = vtanh.f32 %v12032_v58 }
 0x23c   : > { %1599 = vrot.lane.b32.xlu0 %v11174_v62, %s11607_s4  ;;  %v11176_v63 = vpop.eup %11175  ;;  %11187 = vtanh.f32 %v12027_v50 }
 0x23d   : > { %11189 = vtanh.f32 %v12047_v21 }
 0x23e   : > { %11191 = vtanh.f32 %v12041_v11 }
 0x23f   : > { %11193 = vtanh.f32 %v12044_v19 }
 0x240   : > { %1603 = vrot.lane.b32.xlu0 %v11176_v63, %s11607_s4  ;;  %11195 = vtanh.f32 %v12039_v4 }
 0x241   : > { %v11178_v0 = vpop.eup %11177 }
 0x242   : > { %1601 = vrot.lane.b32.xlu1 %v11178_v0, %s11607_s4  ;;  %v11180_v1 = vpop.eup %11179 }
 0x243   : > { %v11182_v3 = vpop.eup %11181 }
 0x244   : > { %v11184_v7 = vpop.eup %11183 }
 0x245   : > { %v11186_v60 = vpop.eup %11185 }
 0x246   : > { %1605 = vrot.lane.b32.xlu1 %v11180_v1, %s11607_s4  ;;  %v11188_v25 = vpop.eup %11187 }
 0x247   : > { %v11190_v28 = vpop.eup %11189 }
 0x248   : > { %v11192_v30 = vpop.eup %11191 }
 0x249   : > { %v11194_v19 = vpop.eup %11193 }
 0x24a   : > { %v11196_v38 = vpop.eup %11195 }
 0x2a6   : > { %v1592_v2 = vpop.permute.xlu0 %1591 }
 0x2a7   : > { %v12065_v12 = vmul.f32 %v11182_v3, %v1592_v2 }
 0x2a9   : > { %v1594_v8 = vpop.permute.xlu1 %1593 }
 0x2aa   : > { %v12067_v16 = vmul.f32 %v11184_v7, %v1594_v8  ;;  %v1596_v50 = vpop.permute.xlu0 %1595 }
 0x2ab   : > { %v12077_v26 = vmul.f32 %v11188_v25, %v1596_v50 }
 0x2ac   : > { %v1623_v20 = vpack.c.bf16 %v12067_v16, %v12065_v12 }
 0x2ad   : > { %v1598_v53 = vpop.permute.xlu1 %1597 }
 0x2ae   : > { %9286 = vmatmul.mubr.msk.bf16.vlgmr.msra.gmra.mrb[4].mxu1 %vm1131_vm4, %v1623_v20  ;;  %v12075_v58 = vmul.f32 %v11186_v60, %v1598_v53  ;;  %v1600_v11 = vpop.permute.xlu0 %1599 }
 0x2af   : > { %1741 = vmatprep.mubr.bf16.mxu1 %v14419_v18  ;;  %v12087_v31 = vmul.f32 %v11192_v30, %v1600_v11 }
 0x2b0   : > { %v1624_v27 = vpack.c.bf16 %v12075_v58, %v12077_v26 }
 0x2b2   : > { %v1604_v37 = vpop.permute.xlu0 %1603 }
 0x2b3   : > { %v12095_v39 = vmul.f32 %v11196_v38, %v1604_v37 }
 0x2b4   : > { %v1602_v21 = vpop.permute.xlu1 %1601 }
 0x2b5   : > { %v12085_v29 = vmul.f32 %v11190_v28, %v1602_v21 }
 0x2b6   : > { %9287 = vmatmul.mubr.msk.bf16.gmra.mrb[8].mxu1 %vm1131_vm4, %v1624_v27 }
 0x2b7   : > { %1751 = vmatprep.mubr.bf16.mxu1 %v14419_v18  ;;  %v1625_v32 = vpack.c.bf16 %v12085_v29, %v12087_v31 }
 0x2b8   : > { %v1606_v36 = vpop.permute.xlu1 %1605 }
 0x2b9   : > { %v12093_v4 = vmul.f32 %v11194_v19, %v1606_v36 }
 0x2bb   : > { %v1626_v40 = vpack.c.bf16 %v12093_v4, %v12095_v39 }
 0x2be   : > { %9288 = vmatmul.mubr.msk.bf16.gmra.mrb[12].mxu1 %vm1131_vm4, %v1625_v32 }
 0x2bf   : > { %1761 = vmatprep.mubr.bf16.mxu1 %v14419_v18 }
 0x2c6   : > { %9289 = vmatmul.mubr.msk.bf16.gmra.mrb[16].mxu1 %vm1131_vm4, %v1626_v40 }
 0x381   : > { %v1733_v48 = vpop.f32.mrb[4].mxu1 }
 0x382   : > { %v1735_v51 = vpop.f32.mrb[5].mxu1  ;;  %v1734_v54 = vadd.f32 %v1733_v48, %v1640_v47 }
 0x383   : > { %v1737_v52 = vpop.f32.mrb[6].mxu1  ;;  %v1736_v61 = vadd.f32 %v1735_v51, %v1644_v49 }
 0x384   : > { %v1738_v55 = vadd.f32 %v1737_v52, %v1640_v47  ;;  %v1739_v59 = vpop.f32.mrb[7].mxu1 }
 0x385   : > { %v1740_v62 = vadd.f32 %v1739_v59, %v1644_v49 }
 0x386   : > { %v12106_v63 = vpack.c.bf16 %v1738_v55, %v1734_v54 }
 0x387   : > { %v12108_v0 = vpack.c.bf16 %v1740_v62, %v1736_v61 }
 0x388   : > { %1800 = vrot.lane.b32.xlu0 %v12106_v63, %s11607_s4  ;;  %10323 = vmatprep.mubr.msk.bf16.mxu0 %vm1808_vm5, %v12106_v63 }
 0x389   : > { %v1743_v1 = vpop.f32.mrb[8].mxu1  ;;  %10331 = vmatprep.subr.bf16.mxu1 %v12108_v0 }
 0x38a   : > { %v1745_v2 = vpop.f32.mrb[9].mxu1  ;;  %10332 = vmatpush3.bf16.msra.mxu1 %v12108_v0  ;;  %v1744_v7 = vadd.f32 %v1743_v1, %v1640_v47 }
 0x38b   : > { %v1747_v3 = vpop.f32.mrb[10].mxu1  ;;  %v1746_v53 = vadd.f32 %v1745_v2, %v1644_v49 }
 0x38c   : > { %v1748_v8 = vadd.f32 %v1747_v3, %v1640_v47  ;;  %v1749_v20 = vpop.f32.mrb[11].mxu1 }
 0x38d   : > { %v1750_v60 = vadd.f32 %v1749_v20, %v1644_v49 }
 0x38e   : > { %v12116_v50 = vpack.c.bf16 %v1748_v8, %v1744_v7 }
 0x38f   : > { %v12118_v25 = vpack.c.bf16 %v1750_v60, %v1746_v53  ;;  %v1386_v53 = vand.u32 127, %v1321_v33  ;;  %v1379_v60 = vadd.s32 16, %v12018_v34 }
 0x390   : > { %1802 = vrot.lane.b32.xlu1 %v12116_v50, %s11607_s4 }
 0x391   : > { %v1753_v27 = vpop.f32.mrb[12].mxu1  ;;  %10333 = vmatprep.subr.bf16.mxu1 %v12118_v25  ;;  %vm12158_vm6 = vcmp.le.s32.totalorder %v1386_v53, %v12018_v34  ;;  %vm12162_vm7 = vcmp.le.s32.totalorder %v1386_v53, %v1379_v60  ;;  %v14574_v60 = vmov 0 }
 0x392   : > { %v1755_v21 = vpop.f32.mrb[13].mxu1  ;;  %10334 = vmatpush3.bf16.msra.mxu1 %v12118_v25  ;;  %v1754_v11 = vadd.f32 %v1753_v27, %v1640_v47  ;;  %v1378_v27 = vadd.s32 8, %v12018_v34 }
 0x393   : > { %v1757_v28 = vpop.f32.mrb[14].mxu1  ;;  %v1756_v36 = vadd.f32 %v1755_v21, %v1644_v49 }
 0x394   : > { %v1758_v30 = vadd.f32 %v1757_v28, %v1640_v47  ;;  %v1759_v32 = vpop.f32.mrb[15].mxu1  ;;  %vm12167_vm8 = vcmp.le.s32.totalorder %v1386_v53, %v1378_v27 }
 0x395   : > { %v1760_v19 = vadd.f32 %v1759_v32, %v1644_v49  ;;  %v1380_v32 = vadd.s32 24, %v12018_v34 }
 0x396   : > { %v12124_v37 = vpack.c.bf16 %v1758_v30, %v1754_v11 }
 0x397   : > { %v12126_v38 = vpack.c.bf16 %v1760_v19, %v1756_v36  ;;  %vm12179_vm9 = vcmp.le.s32.totalorder %v1386_v53, %v1380_v32 }
 0x398   : > { %1804 = vrot.lane.b32.xlu0 %v12124_v37, %s11607_s4 }
 0x399   : > { %v1763_v40 = vpop.f32.mrb[16].mxu1  ;;  %10335 = vmatprep.subr.bf16.mxu1 %v12126_v38 }
 0x39a   : > { %v1765_v43 = vpop.f32.mrb[17].mxu1  ;;  %10336 = vmatpush3.bf16.msra.mxu1 %v12126_v38  ;;  %v1764_v51 = vadd.f32 %v1763_v40, %v1640_v47 }
 0x39b   : > { %v1767_v48 = vpop.f32.mrb[18].mxu1  ;;  %v1766_v55 = vadd.f32 %v1765_v43, %v1644_v49 }
 0x39c   : > { %v1768_v52 = vadd.f32 %v1767_v48, %v1640_v47  ;;  %v1769_v54 = vpop.f32.mrb[19].mxu1  ;;  %v1381_v48 = vadd.s32 32, %v12018_v34 }
 0x39d   : > { %v1770_v59 = vadd.f32 %v1769_v54, %v1644_v49  ;;  %v14565_v54 = vmov 0 }
 0x39e   : > { %v12132_v61 = vpack.c.bf16 %v1768_v52, %v1764_v51  ;;  %v14566_v54 = vsel %vm12179_vm9, 4294967295, %v14565_v54  ;;  %vm12187_vm10 = vcmp.le.s32.totalorder %v1386_v53, %v1381_v48 }
 0x39f   : > { %v12134_v62 = vpack.c.bf16 %v1770_v59, %v1766_v55  ;;  %14567 = vst [vmem:[#allocation35_spill] sm:$0xff] %v14566_v54  ;;  %v1383_v59 = vadd.s32 48, %v12018_v34 }
 0x3a0   : > { %1806 = vrot.lane.b32.xlu1 %v12132_v61, %s11607_s4 }
 0x3a1   : > { %10337 = vmatprep.subr.bf16.mxu1 %v12134_v62  ;;  %vm12193_vm11 = vcmp.le.s32.totalorder %v1386_v53, %v1383_v59 }
 0x3a2   : > { %10338 = vmatpush3.bf16.msra.mxu1 %v12134_v62 }
 0x3fa   : > { %v1801_v1 = vpop.permute.xlu0 %1800 }
 0x3fb   : > { %10844 = vmatprep.subr.msk.bf16.mxu0 %vm1808_vm5, %v1801_v1  ;;  %v1822_v2 = vsel %vm1808_vm5, %v1801_v1, 0  ;;  %v1382_v1 = vadd.s32 40, %v12018_v34 }
 0x3fc   : > { %10316 = vmatpush3.bf16.xpose.msra.mxu0 %v1822_v2 }
 0x3fd   : > { %vm12198_vm12 = vcmp.le.s32.totalorder %v1386_v53, %v1382_v1 }
 0x3fe   : > { %v14575_v60 = vsel %vm12198_vm12, 4294967295, %v14574_v60 }
 0x3ff   : > { %14576 = vst [vmem:[#allocation38_spill] sm:$0xff] %v14575_v60 }
 0x402   : > { %v1803_v47 = vpop.permute.xlu1 %1802 }
 0x403   : > { %10845 = vmatprep.subr.msk.bf16.mxu0 %vm1808_vm5, %v1803_v47  ;;  %v1825_v49 = vsel %vm1808_vm5, %v1803_v47, 0  ;;  %v14568_v47 = vmov 0 }
 0x404   : > { %10318 = vmatpush3.bf16.xpose.msra.mxu0 %v1825_v49  ;;  %v14569_v47 = vsel %vm12187_vm10, 4294967295, %v14568_v47 }
 0x405   : > { %14570 = vst [vmem:[#allocation36_spill] sm:$0xff] %v14569_v47  ;;  %v11015_v47 = vld [vmem:[%s14581_s23 + $0xd8] sm:$0xff]  }
 0x40a   : > { %v1805_v3 = vpop.permute.xlu0 %1804 }
 0x40b   : > { %10846 = vmatprep.subr.msk.bf16.mxu0 %vm1808_vm5, %v1805_v3  ;;  %v1828_v7 = vsel %vm1808_vm5, %v1805_v3, 0 }
 0x40c   : > { %10320 = vmatpush3.bf16.xpose.msra.mxu0 %v1828_v7  ;;  %v14571_v7 = vmov 0 }
 0x40d   : > { %v14572_v7 = vsel %vm12193_vm11, 4294967295, %v14571_v7 }
 0x40e   : > { %14573 = vst [vmem:[#allocation37_spill] sm:$0xff] %v14572_v7 }
 0x412   : > { %v1807_v8 = vpop.permute.xlu1 %1806 }
 0x413   : > { %10847 = vmatprep.subr.msk.bf16.mxu0 %vm1808_vm5, %v1807_v8  ;;  %v1831_v20 = vsel %vm1808_vm5, %v1807_v8, 0 }
 0x414   : > { %10322 = vmatpush3.bf16.xpose.msra.mxu0 %v1831_v20  ;;  %v1384_v20 = vadd.s32 56, %v12018_v34 }
 0x416   : > { %vm12213_vm13 = vcmp.le.s32.totalorder %v1386_v53, %v1384_v20 }
 0x41b   : > { %10324 = vmatmul.mubr.msk.bf16.vlgmr.msra.gmra.mrb[16].mxu0 %vm1808_vm5, %v12116_v50 }
 0x41c   : > { %10327 = vmatprep.mubr.msk.bf16.mxu0 %vm1808_vm5, %v12124_v37 }
 0x423   : > { %10328 = vmatmul.mubr.msk.bf16.gmra.mrb[20].mxu0 %vm1808_vm5, %v12132_v61 }
 0x4ee   : > { %v10325_v28 = vpop.f32.mrb[16].mxu0 }
 0x4ef   : > { %v1867_v30 = vpop.f32.mrb[17].mxu0  ;;  %v1900_v51 = vsel %vm12162_vm7, %v10325_v28, -10000.0 }
 0x4f0   : > { %v1898_v33 = vsel %vm12158_vm6, %v1867_v30, -10000.0  ;;  %v10326_v19 = vpop.f32.mrb[18].mxu0  ;;  %v1912_v2 = vsel %vm1131_vm4, %v1900_v51, -inf }
 0x4f1   : > { %v1870_v40 = vpop.f32.mrb[19].mxu0  ;;  %v1906_v43 = vsel %vm1131_vm4, %v1898_v33, -inf  ;;  %v1901_v49 = vsel %vm12179_vm9, %v10326_v19, -10000.0 }
 0x4f2   : > { %v1899_v52 = vsel %vm12167_vm8, %v1870_v40, -10000.0  ;;  %1907 = vmax.xlane.f32.xlu0 %v1906_v43  ;;  %v1915_v32 = vsel %vm1131_vm4, %v1901_v49, -inf  ;;  %v14577_v43 = vmov 0 }
 0x4f3   : > { %v1909_v55 = vsel %vm1131_vm4, %v1899_v52, -inf  ;;  %v14578_v43 = vsel %vm12213_vm13, 4294967295, %v14577_v43 }
 0x4f4   : > { %1910 = vmax.xlane.f32.xlu1 %v1909_v55  ;;  %14579 = vst [vmem:[#allocation39_spill] sm:$0xff] %v14578_v43 }
 0x4f6   : > { %1913 = vmax.xlane.f32.xlu0 %v1912_v2  ;;  %v10329_v3 = vpop.f32.mrb[20].mxu0 }
 0x4f7   : > { %v1883_v8 = vpop.f32.mrb[21].mxu0  ;;  %v1904_v40 = vsel %vm12193_vm11, %v10329_v3, -10000.0 }
 0x4f8   : > { %v12204_v27 = vsel %vm12187_vm10, %v1883_v8, -10000.0  ;;  %v10330_v28 = vpop.f32.mrb[22].mxu0  ;;  %v1924_v48 = vsel %vm1131_vm4, %v1904_v40, -inf }
 0x4f9   : > { %v1886_v30 = vpop.f32.mrb[23].mxu0  ;;  %v1918_v19 = vsel %vm1131_vm4, %v12204_v27, -inf  ;;  %v1905_v59 = vsel %vm12213_vm13, %v10330_v28, -10000.0 }
 0x4fa   : > { %v1903_v34 = vsel %vm12198_vm12, %v1886_v30, -10000.0  ;;  %1916 = vmax.xlane.f32.xlu0 %v1915_v32  ;;  %1919 = vmax.xlane.f32.xlu1 %v1918_v19  ;;  %v1927_v1 = vsel %vm1131_vm4, %v1905_v59, -inf }
 0x4fb   : > { %v1921_v55 = vsel %vm1131_vm4, %v1903_v34, -inf }
 0x4fe   : > { %1925 = vmax.xlane.f32.xlu1 %v1924_v48  ;;  %1922 = vmax.xlane.f32.xlu0 %v1921_v55 }
 0x502   : > { %1928 = vmax.xlane.f32.xlu0 %v1927_v1 }
 0x57f   : > { %v1908_v2 = vpop.xlane.xlu0 %1907 }
 0x580   : > { %v1930_v3 = vsub.f32 %v1898_v33, %v1908_v2 }
 0x581   : > { %v1911_v8 = vpop.xlane.xlu1 %1910 }
 0x582   : > { %v1938_v20 = vmul.f32 1.442695, %v1930_v3  ;;  %v1931_v32 = vsub.f32 %v1899_v52, %v1911_v8 }
 0x583   : > { %v1914_v30 = vpop.xlane.xlu0 %1913 }
 0x584   : > { %v1932_v53 = vsub.f32 %v1900_v51, %v1914_v30  ;;  %v1940_v23 = vmul.f32 1.442695, %v1931_v32 }
 0x586   : > { %v1942_v19 = vmul.f32 1.442695, %v1932_v53 }
 0x587   : > { %v1917_v18 = vpop.xlane.xlu0 %1916  ;;  %v1920_v30 = vpop.xlane.xlu1 %1919 }
 0x588   : > { %11197 = vpow2.f32 %v1942_v19  ;;  %v1933_v22 = vsub.f32 %v1901_v49, %v1917_v18  ;;  %v1934_v32 = vsub.f32 %v12204_v27, %v1920_v30 }
 0x589   : > { %11199 = vpow2.f32 %v1938_v20 }
 0x58a   : > { %v1944_v15 = vmul.f32 1.442695, %v1933_v22 }
 0x58b   : > { %v1923_v28 = vpop.xlane.xlu0 %1922  ;;  %v1926_v53 = vpop.xlane.xlu1 %1925 }
 0x58c   : > { %11201 = vpow2.f32 %v1944_v15  ;;  %v1935_v48 = vsub.f32 %v1903_v34, %v1923_v28  ;;  %v1936_v20 = vsub.f32 %v1904_v40, %v1926_v53  ;;  %v1946_v28 = vmul.f32 1.442695, %v1934_v32 }
 0x58d   : > { %11203 = vpow2.f32 %v1940_v23 }
 0x58e   : > { %v1948_v33 = vmul.f32 1.442695, %v1935_v48  ;;  %v1950_v19 = vmul.f32 1.442695, %v1936_v20 }
 0x58f   : > { %v1929_v55 = vpop.xlane.xlu0 %1928 }
 0x590   : > { %v1937_v1 = vsub.f32 %v1905_v59, %v1929_v55 }
 0x592   : > { %v12222_v17 = vpop.eup %11197  ;;  %v1952_v2 = vmul.f32 1.442695, %v1937_v1 }
 0x593   : > { %v1960_v51 = vsel %vm1131_vm4, %v12222_v17, 0.0  ;;  %v12226_v52 = vpop.eup %11199 }
 0x594   : > { %11205 = vpow2.f32 %v1952_v2  ;;  %1961 = vadd.xlane.f32.xlu1 %v1960_v51  ;;  %v1954_v15 = vsel %vm1131_vm4, %v12226_v52, 0.0 }
 0x595   : > { %11207 = vpow2.f32 %v1948_v33 }
 0x596   : > { %v12228_v18 = vpop.eup %11201  ;;  %11209 = vpow2.f32 %v1950_v19 }
 0x597   : > { %v1963_v22 = vsel %vm1131_vm4, %v12228_v18, 0.0  ;;  %v12234_v23 = vpop.eup %11203  ;;  %11211 = vpow2.f32 %v1946_v28 }
 0x598   : > { %1955 = vadd.xlane.f32.xlu1 %v1954_v15  ;;  %1964 = vadd.xlane.f32.xlu0 %v1963_v22  ;;  %v1957_v49 = vsel %vm1131_vm4, %v12234_v23, 0.0 }
 0x59c   : > { %1958 = vadd.xlane.f32.xlu0 %v1957_v49 }
 0x59e   : > { %v12238_v34 = vpop.eup %11205 }
 0x59f   : > { %v1975_v59 = vsel %vm1131_vm4, %v12238_v34, 0.0  ;;  %v12242_v3 = vpop.eup %11207 }
 0x5a0   : > { %1976 = vadd.xlane.f32.xlu0 %v1975_v59  ;;  %v1969_v8 = vsel %vm1131_vm4, %v12242_v3, 0.0  ;;  %v12257_v40 = vpop.eup %11209 }
 0x5a1   : > { %v1972_v27 = vsel %vm1131_vm4, %v12257_v40, 0.0  ;;  %v12263_v48 = vpop.eup %11211 }
 0x5a2   : > { %v1966_v55 = vsel %vm1131_vm4, %v12263_v48, 0.0 }
 0x5a4   : > { %1970 = vadd.xlane.f32.xlu0 %v1969_v8 }
 0x5a9   : > { %2178 = vrot.lane.b32.xlu1 %v12106_v63, %s11608_s24 }
 0x5ba   : > { %2180 = vrot.lane.b32.xlu0 %v12116_v50, %s11608_s24 }
 0x5be   : > { %2170 = vrot.lane.b32.xlu0 %v12106_v63, %s11609_s11 }
 0x5c2   : > { %2174 = vrot.lane.b32.xlu0 %v12124_v37, %s11609_s11 }
 0x5c6   : > { %2571 = vrot.lane.b32.xlu0 %v12106_v63, %s11610_s14 }
 0x5ca   : > { %2575 = vrot.lane.b32.xlu0 %v12124_v37, %s11610_s14 }
 0x5cd   : > { %1973 = vadd.xlane.f32.xlu1 %v1972_v27 }
 0x5ce   : > { %2563 = vrot.lane.b32.xlu0 %v12106_v63, %s11611_s15 }
 0x5d1   : > { %1967 = vadd.xlane.f32.xlu1 %v1966_v55 }
 0x5d2   : > { %2567 = vrot.lane.b32.xlu0 %v12124_v37, %s11611_s15 }
 0x5e2   : > { %2182 = vrot.lane.b32.xlu1 %v12124_v37, %s11608_s24 }
 0x5e6   : > { %2184 = vrot.lane.b32.xlu1 %v12132_v61, %s11608_s24 }
 0x5ea   : > { %2172 = vrot.lane.b32.xlu1 %v12116_v50, %s11609_s11 }
 0x5ee   : > { %2176 = vrot.lane.b32.xlu1 %v12132_v61, %s11609_s11 }
 0x5f2   : > { %2573 = vrot.lane.b32.xlu1 %v12116_v50, %s11610_s14 }
 0x5f6   : > { %2577 = vrot.lane.b32.xlu1 %v12132_v61, %s11610_s14 }
 0x5fa   : > { %2565 = vrot.lane.b32.xlu1 %v12116_v50, %s11611_s15 }
 0x5fe   : > { %2569 = vrot.lane.b32.xlu1 %v12132_v61, %s11611_s15 }
 0x621   : > { %v1962_v1 = vpop.xlane.xlu1 %1961 }
 0x625   : > { %v1956_v33 = vpop.xlane.xlu1 %1955  ;;  %v1965_v2 = vpop.xlane.xlu0 %1964 }
 0x626   : > { %11213 = vrcp.f32 %v1965_v2 }
 0x627   : > { %11215 = vrcp.f32 %v1956_v33 }
 0x628   : > { %11217 = vrcp.f32 %v1962_v1 }
 0x629   : > { %v2179_v51 = vpop.permute.xlu1 %2178  ;;  %v1959_v15 = vpop.xlane.xlu0 %1958 }
 0x62a   : > { %11219 = vrcp.f32 %v1959_v15  ;;  %10848 = vmatprep.subr.msk.bf16.mxu1 %vm1808_vm5, %v2179_v51  ;;  %v2199_v1 = vsel %vm1808_vm5, %v2179_v51, 0 }
 0x62d   : > { %v1977_v22 = vpop.xlane.xlu0 %1976 }
 0x630   : > { %v11214_v49 = vpop.eup %11213 }
 0x631   : > { %v11216_v59 = vpop.eup %11215  ;;  %v1989_v53 = vmul.f32 %v11214_v49, %v12228_v18  ;;  %v1971_v20 = vpop.xlane.xlu0 %1970 }
 0x632   : > { %v11218_v8 = vpop.eup %11217  ;;  %v1986_v32 = vmul.f32 %v11216_v59, %v12226_v52 }
 0x633   : > { %v1988_v28 = vmul.f32 %v11218_v8, %v12222_v17 }
 0x634   : > { %v11220_v30 = vpop.eup %11219 }
 0x635   : > { %v1987_v19 = vmul.f32 %v11220_v30, %v12234_v23  ;;  %v1995_v55 = vpack.c.bf16 %v1989_v53, %v1988_v28  ;;  %v2181_v33 = vpop.permute.xlu0 %2180 }
 0x636   : > { %v2202_v18 = vsel %vm1808_vm5, %v2181_v33, 0 }
 0x637   : > { %v1994_v27 = vpack.c.bf16 %v1987_v19, %v1986_v32 }
 0x639   : > { %10339 = vmatprep.mubr.msk.bf16.mxu1 %vm1131_vm4, %v1994_v27  ;;  %v2171_v23 = vpop.permute.xlu0 %2170 }
 0x63a   : > { %10340 = vmatmul.mubr.msk.bf16.vlgmr.msra.gmra.mrb[20].mxu1 %vm1131_vm4, %v1995_v55 }
 0x63b   : > { %10358 = vmatpush3.bf16.xpose.msra.mxu1 %v2199_v1 }
 0x63c   : > { %10849 = vmatprep.subr.msk.bf16.mxu1 %vm1808_vm5, %v2181_v33 }
 0x63d   : > { %v2175_v49 = vpop.permute.xlu0 %2174 }
 0x641   : > { %v2572_v27 = vpop.permute.xlu0 %2571 }
 0x643   : > { %10360 = vmatpush3.bf16.xpose.msra.mxu1 %v2202_v18 }
 0x65a   : > { %v1974_v52 = vpop.xlane.xlu1 %1973 }
 0x65b   : > { %11221 = vrcp.f32 %v1974_v52 }
 0x65c   : > { %11223 = vrcp.f32 %v1971_v20 }
 0x65d   : > { %11225 = vrcp.f32 %v1977_v22 }
 0x65e   : > { %v1968_v17 = vpop.xlane.xlu1 %1967 }
 0x65f   : > { %11227 = vrcp.f32 %v1968_v17 }
 0x662   : > { %v2183_v2 = vpop.permute.xlu1 %2182 }
 0x663   : > { %10850 = vmatprep.subr.msk.bf16.mxu1 %vm1808_vm5, %v2183_v2  ;;  %v2205_v15 = vsel %vm1808_vm5, %v2183_v2, 0 }
 0x664   : > { %10362 = vmatpush3.bf16.xpose.msra.mxu1 %v2205_v15  ;;  %v10953_v15 = vld [vmem:[%s11849_s8] sm:$0xff]  }
 0x665   : > { %v11222_v51 = vpop.eup %11221  ;;  %10347 = vmatprep.subr.bf16.mxu0 %v10953_v15 }
 0x666   : > { %v2185_v59 = vpop.permute.xlu1 %2184  ;;  %v11224_v8 = vpop.eup %11223  ;;  %v1992_v20 = vmul.f32 %v11222_v51, %v12257_v40  ;;  %10348 = vmatpush3.bf16.msra.mxu0 %v10953_v15 }
 0x667   : > { %10851 = vmatprep.subr.msk.bf16.mxu1 %vm1808_vm5, %v2185_v59  ;;  %v11226_v30 = vpop.eup %11225  ;;  %v1991_v32 = vmul.f32 %v11224_v8, %v12242_v3  ;;  %v2208_v19 = vsel %vm1808_vm5, %v2185_v59, 0  ;;  %v2592_v3 = vsel %vm1808_vm5, %v2572_v27, 0 }
 0x668   : > { %v1993_v28 = vmul.f32 %v11226_v30, %v12238_v34  ;;  %v2576_v34 = vpop.permute.xlu0 %2575 }
 0x669   : > { %v11228_v53 = vpop.eup %11227  ;;  %v2598_v17 = vsel %vm1808_vm5, %v2576_v34, 0 }
 0x66a   : > { %v1990_v22 = vmul.f32 %v11228_v53, %v12263_v48  ;;  %v2173_v55 = vpop.permute.xlu1 %2172  ;;  %v1997_v33 = vpack.c.bf16 %v1993_v28, %v1992_v20 }
 0x66c   : > { %10364 = vmatpush3.bf16.xpose.msra.mxu1 %v2208_v19  ;;  %v1996_v1 = vpack.c.bf16 %v1991_v32, %v1990_v22  ;;  %v2564_v18 = vpop.permute.xlu0 %2563 }
 0x66d   : > { %10852 = vmatprep.subr.msk.bf16.mxu1 %vm1808_vm5, %v2572_v27 }
 0x66e   : > { %10343 = vmatprep.mubr.msk.bf16.mxu1 %vm1131_vm4, %v1996_v1  ;;  %v2177_v40 = vpop.permute.xlu1 %2176 }
 0x66f   : > { %10344 = vmatmul.mubr.msk.bf16.gmra.mrb[24].mxu1 %vm1131_vm4, %v1997_v33 }
 0x670   : > { %10365 = vmatprep.mubr.msk.bf16.mxu1 %vm1808_vm5, %v2171_v23 }
 0x672   : > { %v2574_v48 = vpop.permute.xlu1 %2573 }
 0x673   : > { %v2595_v52 = vsel %vm1808_vm5, %v2574_v48, 0 }
 0x676   : > { %v2578_v23 = vpop.permute.xlu1 %2577 }
 0x677   : > { %10366 = vmatmul.mubr.msk.bf16.vlgmr.msra.gmra.mrb[28].mxu1 %vm1808_vm5, %v2173_v55  ;;  %v2601_v2 = vsel %vm1808_vm5, %v2578_v23, 0 }
 0x678   : > { %10400 = vmatpush3.bf16.xpose.msra.mxu1 %v2592_v3  ;;  %10369 = vmatprep.mubr.msk.bf16.mxu1 %vm1808_vm5, %v2175_v49  ;;  %v2568_v49 = vpop.permute.xlu0 %2567 }
 0x679   : > { %10853 = vmatprep.subr.msk.bf16.mxu1 %vm1808_vm5, %v2574_v48 }
 0x67a   : > { %v2566_v51 = vpop.permute.xlu1 %2565 }
 0x67e   : > { %v2570_v59 = vpop.permute.xlu1 %2569 }
 0x67f   : > { %10370 = vmatmul.mubr.msk.bf16.gmra.mrb[32].mxu1 %vm1808_vm5, %v2177_v40 }
 0x680   : > { %10402 = vmatpush3.bf16.xpose.msra.mxu1 %v2595_v52  ;;  %10407 = vmatprep.mubr.msk.bf16.mxu1 %vm1808_vm5, %v2564_v18 }
 0x681   : > { %10854 = vmatprep.subr.msk.bf16.mxu1 %vm1808_vm5, %v2576_v34 }
 0x688   : > { %10404 = vmatpush3.bf16.xpose.msra.mxu1 %v2598_v17 }
 0x689   : > { %10855 = vmatprep.subr.msk.bf16.mxu1 %vm1808_vm5, %v2578_v23 }
 0x690   : > { %10406 = vmatpush3.bf16.xpose.msra.mxu1 %v2601_v2 }
 0x697   : > { %10408 = vmatmul.mubr.msk.bf16.vlgmr.msra.gmra.mrb[36].mxu1 %vm1808_vm5, %v2566_v51 }
 0x698   : > { %10411 = vmatprep.mubr.msk.bf16.mxu1 %vm1808_vm5, %v2568_v49 }
 0x69f   : > { %10412 = vmatmul.mubr.msk.bf16.gmra.mrb[40].mxu1 %vm1808_vm5, %v2570_v59 }
 0x70d   : > { %v10341_v8 = vpop.f32.mrb[20].mxu1 }
 0x70e   : > { %v2044_v30 = vpop.f32.mrb[21].mxu1 }
 0x70f   : > { %v10342_v53 = vpop.f32.mrb[22].mxu1 }
 0x710   : > { %v2076_v20 = vpack.c.bf16 %v10342_v53, %v10341_v8  ;;  %v2047_v22 = vpop.f32.mrb[23].mxu1 }
 0x711   : > { %v2075_v32 = vpack.c.bf16 %v2047_v22, %v2044_v30 }
 0x713   : > { %10349 = vmatprep.mubr.msk.bf16.mxu0 %vm1808_vm5, %v2075_v32 }
 0x714   : > { %10350 = vmatmul.mubr.msk.bf16.vlgmr.msra.gmra.mrb[24].mxu0 %vm1808_vm5, %v2076_v20 }
 0x742   : > { %v10345_v19 = vpop.f32.mrb[24].mxu1 }
 0x743   : > { %v2060_v28 = vpop.f32.mrb[25].mxu1 }
 0x744   : > { %v10346_v27 = vpop.f32.mrb[26].mxu1 }
 0x745   : > { %v2078_v55 = vpack.c.bf16 %v10346_v27, %v10345_v19  ;;  %v2063_v1 = vpop.f32.mrb[27].mxu1 }
 0x746   : > { %v2077_v33 = vpack.c.bf16 %v2063_v1, %v2060_v28 }
 0x748   : > { %10353 = vmatprep.mubr.msk.bf16.mxu0 %vm1808_vm5, %v2077_v33 }
 0x749   : > { %10354 = vmatmul.mubr.msk.bf16.gmra.mrb[28].mxu0 %vm1808_vm5, %v2078_v55 }
 0x74a   : > { %v10367_v40 = vpop.f32.mrb[28].mxu1 }
 0x74b   : > { %v2244_v3 = vpop.f32.mrb[29].mxu1  ;;  %v2277_v17 = vsel %vm12162_vm7, %v10367_v40, -10000.0 }
 0x74c   : > { %v2275_v48 = vsel %vm12158_vm6, %v2244_v3, -10000.0  ;;  %v10368_v34 = vpop.f32.mrb[30].mxu1  ;;  %v2289_v15 = vsel %vm1131_vm4, %v2277_v17, -inf }
 0x74d   : > { %v2247_v18 = vpop.f32.mrb[31].mxu1  ;;  %v2283_v52 = vsel %vm1131_vm4, %v2275_v48, -inf  ;;  %v2278_v51 = vsel %vm12179_vm9, %v10368_v34, -10000.0 }
 0x74e   : > { %v2276_v23 = vsel %vm12167_vm8, %v2247_v18, -10000.0  ;;  %2284 = vmax.xlane.f32.xlu0 %v2283_v52  ;;  %v2292_v20 = vsel %vm1131_vm4, %v2278_v51, -inf }
 0x74f   : > { %v2286_v2 = vsel %vm1131_vm4, %v2276_v23, -inf }
 0x750   : > { %2287 = vmax.xlane.f32.xlu1 %v2286_v2 }
 0x752   : > { %2290 = vmax.xlane.f32.xlu0 %v2289_v15  ;;  %v10371_v49 = vpop.f32.mrb[32].mxu1 }
 0x753   : > { %v2260_v59 = vpop.f32.mrb[33].mxu1  ;;  %v2281_v32 = vsel %vm12193_vm11, %v10371_v49, -10000.0 }
 0x754   : > { %v2279_v8 = vsel %vm12187_vm10, %v2260_v59, -10000.0  ;;  %v10372_v30 = vpop.f32.mrb[34].mxu1  ;;  %v2301_v28 = vsel %vm1131_vm4, %v2281_v32, -inf }
 0x755   : > { %v2263_v53 = vpop.f32.mrb[35].mxu1  ;;  %v2295_v22 = vsel %vm1131_vm4, %v2279_v8, -inf  ;;  %v2282_v55 = vsel %vm12213_vm13, %v10372_v30, -10000.0 }
 0x756   : > { %v2280_v19 = vsel %vm12198_vm12, %v2263_v53, -10000.0  ;;  %2293 = vmax.xlane.f32.xlu0 %v2292_v20  ;;  %2296 = vmax.xlane.f32.xlu1 %v2295_v22  ;;  %v2304_v1 = vsel %vm1131_vm4, %v2282_v55, -inf }
 0x757   : > { %v2298_v27 = vsel %vm1131_vm4, %v2280_v19, -inf }
 0x75a   : > { %2302 = vmax.xlane.f32.xlu1 %v2301_v28  ;;  %2299 = vmax.xlane.f32.xlu0 %v2298_v27 }
 0x75e   : > { %2305 = vmax.xlane.f32.xlu0 %v2304_v1 }
 0x76a   : > { %v12352_v33 = vpop.f32.mrb[36].mxu1 }
 0x76b   : > { %v12354_v40 = vpop.f32.mrb[37].mxu1  ;;  %2379 = vrot.lane.b32.xlu1 %v12108_v0, %s11609_s11 }
 0x76c   : > { %v12358_v3 = vpop.f32.mrb[38].mxu1 }
 0x76d   : > { %v12360_v34 = vpop.f32.mrb[39].mxu1 }
 0x772   : > { %v12362_v18 = vpop.f32.mrb[40].mxu1 }
 0x773   : > { %v12364_v52 = vpop.f32.mrb[41].mxu1 }
 0x774   : > { %v12366_v2 = vpop.f32.mrb[42].mxu1 }
 0x775   : > { %v12368_v15 = vpop.f32.mrb[43].mxu1 }
 0x7db   : > { %v2285_v49 = vpop.xlane.xlu0 %2284 }
 0x7dc   : > { %v2307_v59 = vsub.f32 %v2275_v48, %v2285_v49 }
 0x7dd   : > { %v2288_v30 = vpop.xlane.xlu1 %2287 }
 0x7de   : > { %v2315_v22 = vmul.f32 1.442695, %v2307_v59  ;;  %v2308_v27 = vsub.f32 %v2276_v23, %v2288_v30 }
 0x7df   : > { %v2291_v53 = vpop.xlane.xlu0 %2290 }
 0x7e0   : > { %v2309_v20 = vsub.f32 %v2277_v17, %v2291_v53  ;;  %v2317_v24 = vmul.f32 1.442695, %v2308_v27 }
 0x7e2   : > { %v2319_v28 = vmul.f32 1.442695, %v2309_v20 }
 0x7e3   : > { %v2297_v1 = vpop.xlane.xlu1 %2296  ;;  %v2294_v14 = vpop.xlane.xlu0 %2293 }
 0x7e4   : > { %11229 = vpow2.f32 %v2319_v28  ;;  %v2310_v10 = vsub.f32 %v2278_v51, %v2294_v14  ;;  %v2311_v13 = vsub.f32 %v2279_v8, %v2297_v1  ;;  %v12427_v28 = vsel %vm12167_vm8, %v12360_v34, -10000.0 }
 0x7e5   : > { %11231 = vpow2.f32 %v2315_v22  ;;  %v2679_v27 = vsel %vm1131_vm4, %v12427_v28, -inf  ;;  %v12453_v34 = vsel %vm12193_vm11, %v12362_v18, -10000.0  ;;  %v12460_v1 = vsel %vm12179_vm9, %v12358_v3, -10000.0 }
 0x7e6   : > { %v2321_v9 = vmul.f32 1.442695, %v2310_v10  ;;  %v2323_v5 = vmul.f32 1.442695, %v2311_v13  ;;  %v12469_v18 = vsel %vm12198_vm12, %v12368_v15, -10000.0  ;;  %v12476_v3 = vsel %vm12213_vm13, %v12366_v2, -10000.0 }
 0x7e7   : > { %v2303_v46 = vpop.xlane.xlu1 %2302  ;;  %v2300_v35 = vpop.xlane.xlu0 %2299 }
 0x7e8   : > { %v2313_v6 = vsub.f32 %v2281_v32, %v2303_v46  ;;  %11233 = vpow2.f32 %v2321_v9  ;;  %v2312_v49 = vsub.f32 %v2280_v19, %v2300_v35 }
 0x7e9   : > { %11235 = vpow2.f32 %v2317_v24 }
 0x7ea   : > { %v2327_v48 = vmul.f32 1.442695, %v2313_v6  ;;  %v2325_v10 = vmul.f32 1.442695, %v2312_v49  ;;  %v2691_v49 = vsel %vm1131_vm4, %v12469_v18, -inf }
 0x7eb   : > { %v2380_v17 = vpop.permute.xlu1 %2379  ;;  %v2306_v59 = vpop.xlane.xlu0 %2305 }
 0x7ec   : > { %11237 = vpow2.f32 %v2327_v48  ;;  %v2314_v23 = vsub.f32 %v2282_v55, %v2306_v59  ;;  %10373 = vmatprep.subr.bf16.mxu0 %v2380_v17  ;;  %v2685_v48 = vsel %vm1131_vm4, %v12460_v1, -inf }
 0x7ed   : > { %10374 = vmatpush3.bf16.msra.mxu0 %v2380_v17  ;;  %11239 = vpow2.f32 %v2323_v5  ;;  %v2697_v17 = vsel %vm1131_vm4, %v12476_v3, -inf }
 0x7ee   : > { %v12370_v30 = vpop.eup %11229  ;;  %v2329_v14 = vmul.f32 1.442695, %v2314_v23 }
 0x7ef   : > { %v2337_v51 = vsel %vm1131_vm4, %v12370_v30, 0.0  ;;  %v12374_v46 = vpop.eup %11231 }
 0x7f0   : > { %11241 = vpow2.f32 %v2329_v14  ;;  %2338 = vadd.xlane.f32.xlu1 %v2337_v51  ;;  %v2331_v13 = vsel %vm1131_vm4, %v12374_v46, 0.0 }
 0x7f1   : > { %11243 = vpow2.f32 %v2325_v10 }
 0x7f2   : > { %v12376_v9 = vpop.eup %11233 }
 0x7f3   : > { %v2340_v6 = vsel %vm1131_vm4, %v12376_v9, 0.0  ;;  %v12382_v5 = vpop.eup %11235 }
 0x7f4   : > { %2332 = vadd.xlane.f32.xlu1 %v2331_v13  ;;  %2341 = vadd.xlane.f32.xlu0 %v2340_v6  ;;  %v2334_v32 = vsel %vm1131_vm4, %v12382_v5, 0.0 }
 0x7f6   : > { %v12384_v24 = vpop.eup %11237 }
 0x7f7   : > { %v2349_v35 = vsel %vm1131_vm4, %v12384_v24, 0.0  ;;  %v12388_v8 = vpop.eup %11239 }
 0x7f8   : > { %2350 = vadd.xlane.f32.xlu1 %v2349_v35  ;;  %2335 = vadd.xlane.f32.xlu0 %v2334_v32  ;;  %v2343_v55 = vsel %vm1131_vm4, %v12388_v8, 0.0 }
 0x7fa   : > { %v12392_v19 = vpop.eup %11241 }
 0x7fb   : > { %v2352_v53 = vsel %vm1131_vm4, %v12392_v19, 0.0  ;;  %v12398_v20 = vpop.eup %11243 }
 0x7fc   : > { %2344 = vadd.xlane.f32.xlu1 %v2343_v55  ;;  %2353 = vadd.xlane.f32.xlu0 %v2352_v53  ;;  %v2346_v22 = vsel %vm1131_vm4, %v12398_v20, 0.0 }
 0x800   : > { %2347 = vadd.xlane.f32.xlu0 %v2346_v22 }
 0x80d   : > { %2383 = vrot.lane.b32.xlu1 %v12126_v38, %s11609_s11 }
 0x811   : > { %2385 = vrot.lane.b32.xlu1 %v12134_v62, %s11609_s11 }
 0x815   : > { %2962 = vrot.lane.b32.xlu1 %v12116_v50, %s11612_s18 }
 0x816   : > { %2381 = vrot.lane.b32.xlu0 %v12118_v25, %s11609_s11 }
 0x819   : > { %2966 = vrot.lane.b32.xlu1 %v12132_v61, %s11612_s18 }
 0x81a   : > { %2960 = vrot.lane.b32.xlu0 %v12106_v63, %s11612_s18 }
 0x81d   : > { %2954 = vrot.lane.b32.xlu1 %v12116_v50, %s11613_s6  ;;  %v12432_v50 = vsel %vm12158_vm6, %v12354_v40, -10000.0 }
 0x81e   : > { %2964 = vrot.lane.b32.xlu0 %v12124_v37, %s11612_s18 }
 0x821   : > { %2958 = vrot.lane.b32.xlu1 %v12132_v61, %s11613_s6  ;;  %v12446_v61 = vsel %vm12162_vm7, %v12352_v33, -10000.0  ;;  %v2694_v33 = vsel %vm1131_vm4, %v12453_v34, -inf }
 0x822   : > { %2952 = vrot.lane.b32.xlu0 %v12106_v63, %s11613_s6  ;;  %v12439_v63 = vsel %vm12187_vm10, %v12364_v52, -10000.0  ;;  %v2682_v52 = vsel %vm1131_vm4, %v12446_v61, -inf }
 0x823   : > { %v2688_v40 = vsel %vm1131_vm4, %v12439_v63, -inf }
 0x826   : > { %2956 = vrot.lane.b32.xlu0 %v12124_v37, %s11613_s6  ;;  %v2676_v37 = vsel %vm1131_vm4, %v12432_v50, -inf }
 0x845   : > { %2680 = vmax.xlane.f32.xlu1 %v2679_v27  ;;  %2677 = vmax.xlane.f32.xlu0 %v2676_v37 }
 0x849   : > { %2689 = vmax.xlane.f32.xlu1 %v2688_v40  ;;  %2683 = vmax.xlane.f32.xlu0 %v2682_v52 }
 0x84d   : > { %2695 = vmax.xlane.f32.xlu1 %v2694_v33  ;;  %2686 = vmax.xlane.f32.xlu0 %v2685_v48 }
 0x851   : > { %2692 = vmax.xlane.f32.xlu0 %v2691_v49 }
 0x855   : > { %2698 = vmax.xlane.f32.xlu0 %v2697_v17 }
 0x85e   : > { %2768 = vrot.lane.b32.xlu1 %v12108_v0, %s11611_s15 }
 0x87d   : > { %v2339_v59 = vpop.xlane.xlu1 %2338 }
 0x881   : > { %v2333_v15 = vpop.xlane.xlu1 %2332  ;;  %v2342_v23 = vpop.xlane.xlu0 %2341 }
 0x882   : > { %11245 = vrcp.f32 %v2333_v15 }
 0x885   : > { %v2351_v14 = vpop.xlane.xlu1 %2350  ;;  %v2336_v10 = vpop.xlane.xlu0 %2335 }
 0x886   : > { %11247 = vrcp.f32 %v2336_v10 }
 0x887   : > { %11249 = vrcp.f32 %v2342_v23 }
 0x888   : > { %11251 = vrcp.f32 %v2339_v59  ;;  %v10954_v59 = vld [vmem:[%s11849_s8 + $0x8] sm:$0xff]  }
 0x889   : > { %v2345_v51 = vpop.xlane.xlu1 %2344  ;;  %v2354_v13 = vpop.xlane.xlu0 %2353 }
 0x88a   : > { %11253 = vrcp.f32 %v2345_v51 }
 0x88c   : > { %v11246_v35 = vpop.eup %11245 }
 0x88d   : > { %v2384_v2 = vpop.permute.xlu1 %2383  ;;  %v2348_v6 = vpop.xlane.xlu0 %2347  ;;  %v2363_v22 = vmul.f32 %v11246_v35, %v12374_v46 }
 0x88e   : > { %11255 = vrcp.f32 %v2348_v6 }
 0x88f   : > { %11257 = vrcp.f32 %v2354_v13 }
 0x890   : > { %v11248_v32 = vpop.eup %11247  ;;  %11259 = vrcp.f32 %v2351_v14 }
 0x891   : > { %v2386_v55 = vpop.permute.xlu1 %2385  ;;  %v2382_v53 = vpop.permute.xlu0 %2381  ;;  %v2364_v27 = vmul.f32 %v11248_v32, %v12382_v5 }
 0x892   : > { %10375 = vmatprep.subr.bf16.mxu0 %v2382_v53  ;;  %v11250_v40 = vpop.eup %11249 }
 0x893   : > { %10376 = vmatpush3.bf16.msra.mxu0 %v2382_v53  ;;  %v2371_v37 = vpack.c.bf16 %v2364_v27, %v2363_v22  ;;  %v11252_v33 = vpop.eup %11251  ;;  %v2366_v17 = vmul.f32 %v11250_v40, %v12376_v9 }
 0x894   : > { %10377 = vmatprep.subr.bf16.mxu0 %v2384_v2  ;;  %v11254_v49 = vpop.eup %11253  ;;  %v2365_v14 = vmul.f32 %v11252_v33, %v12370_v30 }
 0x895   : > { %10381 = vmatprep.mubr.msk.bf16.mxu0 %vm1131_vm4, %v2371_v37  ;;  %v2961_v52 = vpop.permute.xlu0 %2960  ;;  %v2963_v46 = vpop.permute.xlu1 %2962  ;;  %v2367_v10 = vmul.f32 %v11254_v49, %v12388_v8 }
 0x896   : > { %10856 = vmatprep.subr.msk.bf16.mxu1 %vm1808_vm5, %v2961_v52  ;;  %v2981_v48 = vsel %vm1808_vm5, %v2961_v52, 0  ;;  %v2372_v51 = vpack.c.bf16 %v2366_v17, %v2365_v14  ;;  %v2984_v9 = vsel %vm1808_vm5, %v2963_v46, 0 }
 0x897   : > { %10378 = vmatpush3.bf16.msra.mxu0 %v2384_v2  ;;  %10442 = vmatpush3.bf16.xpose.msra.mxu1 %v2981_v48 }
 0x898   : > { %v11256_v5 = vpop.eup %11255  ;;  %10379 = vmatprep.subr.bf16.mxu0 %v2386_v55  ;;  %10857 = vmatprep.subr.msk.bf16.mxu1 %vm1808_vm5, %v2963_v46 }
 0x899   : > { %v2965_v15 = vpop.permute.xlu0 %2964  ;;  %v2368_v23 = vmul.f32 %v11256_v5, %v12398_v20  ;;  %v11258_v13 = vpop.eup %11257 }
 0x89a   : > { %v11260_v35 = vpop.eup %11259  ;;  %v2370_v30 = vmul.f32 %v11258_v13, %v12392_v19  ;;  %v2987_v32 = vsel %vm1808_vm5, %v2965_v15, 0 }
 0x89b   : > { %10380 = vmatpush3.bf16.msra.mxu0 %v2386_v55  ;;  %v2373_v6 = vpack.c.bf16 %v2368_v23, %v2367_v10  ;;  %v2369_v8 = vmul.f32 %v11260_v35, %v12384_v24  ;;  %v2967_v55 = vpop.permute.xlu1 %2966  ;;  %v14580_v24 = vmov 0  }
 0x89c   : > { %10389 = vmatprep.subr.bf16.mxu0 %v10954_v59  ;;  %v2990_v53 = vsel %vm1808_vm5, %v2967_v55, 0 }
 0x89d   : > { %v2953_v2 = vpop.permute.xlu0 %2952  ;;  %v2374_v20 = vpack.c.bf16 %v2370_v30, %v2369_v8 }
 0x89e   : > { %10382 = vmatmul.mubr.msk.bf16.vlgmr.msra.gmra.mrb[32].mxu0 %vm1131_vm4, %v2372_v51  ;;  %10449 = vmatprep.mubr.msk.bf16.mxu1 %vm1808_vm5, %v2953_v2 }
 0x89f   : > { %10385 = vmatprep.mubr.msk.bf16.mxu0 %vm1131_vm4, %v2373_v6  ;;  %10444 = vmatpush3.bf16.xpose.msra.mxu1 %v2984_v9  ;;  %v2955_v22 = vpop.permute.xlu1 %2954 }
 0x8a0   : > { %10858 = vmatprep.subr.msk.bf16.mxu1 %vm1808_vm5, %v2965_v15  ;;  %10390 = vmatpush3.bf16.msra.mxu0 %v10954_v59 }
 0x8a1   : > { %v2957_v27 = vpop.permute.xlu0 %2956 }
 0x8a3   : > { %v2959_v19 = vpop.permute.xlu1 %2958 }
 0x8a6   : > { %10386 = vmatmul.mubr.msk.bf16.gmra.mrb[36].mxu0 %vm1131_vm4, %v2374_v20 }
 0x8a7   : > { %10446 = vmatpush3.bf16.xpose.msra.mxu1 %v2987_v32 }
 0x8a8   : > { %10859 = vmatprep.subr.msk.bf16.mxu1 %vm1808_vm5, %v2967_v55 }
 0x8af   : > { %10448 = vmatpush3.bf16.xpose.msra.mxu1 %v2990_v53 }
 0x8b6   : > { %10450 = vmatmul.mubr.msk.bf16.vlgmr.msra.gmra.mrb[44].mxu1 %vm1808_vm5, %v2955_v22 }
 0x8b7   : > { %10453 = vmatprep.mubr.msk.bf16.mxu1 %vm1808_vm5, %v2957_v27 }
 0x8be   : > { %10454 = vmatmul.mubr.msk.bf16.gmra.mrb[48].mxu1 %vm1808_vm5, %v2959_v19 }
 0x8bf   : > { %3618 = vmatprep.mubr.bf16.mxu1 %v14580_v24 }
 0x8d2   : > { %v2681_v37 = vpop.xlane.xlu1 %2680  ;;  %v2678_v40 = vpop.xlane.xlu0 %2677 }
 0x8d3   : > { %v2700_v52 = vsub.f32 %v12432_v50, %v2678_v40  ;;  %v2701_v46 = vsub.f32 %v12427_v28, %v2681_v37 }
 0x8d5   : > { %v2708_v5 = vmul.f32 1.442695, %v2700_v52  ;;  %v2710_v10 = vmul.f32 1.442695, %v2701_v46 }
 0x8d6   : > { %v2690_v33 = vpop.xlane.xlu1 %2689  ;;  %v2684_v48 = vpop.xlane.xlu0 %2683 }
 0x8d7   : > { %v2702_v49 = vsub.f32 %v12446_v61, %v2684_v48  ;;  %v2704_v51 = vsub.f32 %v12439_v63, %v2690_v33 }
 0x8d9   : > { %v2712_v17 = vmul.f32 1.442695, %v2702_v49  ;;  %v2716_v28 = vmul.f32 1.442695, %v2704_v51 }
 0x8da   : > { %v2696_v59 = vpop.xlane.xlu1 %2695  ;;  %v2687_v23 = vpop.xlane.xlu0 %2686 }
 0x8db   : > { %v2706_v15 = vsub.f32 %v12453_v34, %v2696_v59  ;;  %11261 = vpow2.f32 %v2712_v17  ;;  %v2703_v14 = vsub.f32 %v12460_v1, %v2687_v23 }
 0x8dc   : > { %11263 = vpow2.f32 %v2708_v5 }
 0x8dd   : > { %v2720_v50 = vmul.f32 1.442695, %v2706_v15  ;;  %v2714_v13 = vmul.f32 1.442695, %v2703_v14 }
 0x8de   : > { %v2769_v2 = vpop.permute.xlu1 %2768  ;;  %v2693_v6 = vpop.xlane.xlu0 %2692 }
 0x8df   : > { %10415 = vmatprep.subr.bf16.mxu0 %v2769_v2  ;;  %11265 = vpow2.f32 %v2714_v13  ;;  %v2705_v61 = vsub.f32 %v12469_v18, %v2693_v6 }
 0x8e0   : > { %11267 = vpow2.f32 %v2710_v10 }
 0x8e1   : > { %11269 = vpow2.f32 %v2720_v50  ;;  %v2718_v1 = vmul.f32 1.442695, %v2705_v61 }
 0x8e2   : > { %v2699_v34 = vpop.xlane.xlu0 %2698  ;;  %11271 = vpow2.f32 %v2716_v28 }
 0x8e3   : > { %v2707_v9 = vsub.f32 %v12476_v3, %v2699_v34 }
 0x8e5   : > { %v12516_v35 = vpop.eup %11261  ;;  %v2722_v30 = vmul.f32 1.442695, %v2707_v9 }
 0x8e6   : > { %v2730_v63 = vsel %vm1131_vm4, %v12516_v35, 0.0  ;;  %v12520_v8 = vpop.eup %11263 }
 0x8e7   : > { %11273 = vpow2.f32 %v2722_v30  ;;  %2731 = vadd.xlane.f32.xlu1 %v2730_v63  ;;  %v2724_v18 = vsel %vm1131_vm4, %v12520_v8, 0.0 }
 0x8e8   : > { %11275 = vpow2.f32 %v2718_v1 }
 0x8e9   : > { %v12522_v20 = vpop.eup %11265 }
 0x8ea   : > { %v11268_v32 = vpop.eup %11267  ;;  %v2733_v3 = vsel %vm1131_vm4, %v12522_v20, 0.0 }
 0x8eb   : > { %v12528_v55 = vpop.eup %11269  ;;  %2725 = vadd.xlane.f32.xlu1 %v2724_v18  ;;  %2734 = vadd.xlane.f32.xlu0 %v2733_v3  ;;  %v2727_v22 = vsel %vm1131_vm4, %v11268_v32, 0.0 }
 0x8ec   : > { %v2742_v53 = vsel %vm1131_vm4, %v12528_v55, 0.0  ;;  %v12533_v27 = vpop.eup %11271 }
 0x8ed   : > { %v2736_v37 = vsel %vm1131_vm4, %v12533_v27, 0.0 }
 0x8ef   : > { %2743 = vadd.xlane.f32.xlu1 %v2742_v53  ;;  %2728 = vadd.xlane.f32.xlu0 %v2727_v22 }
 0x8f1   : > { %v12535_v19 = vpop.eup %11273 }
 0x8f2   : > { %v2745_v40 = vsel %vm1131_vm4, %v12535_v19, 0.0  ;;  %v12541_v52 = vpop.eup %11275 }
 0x8f3   : > { %2737 = vadd.xlane.f32.xlu1 %v2736_v37  ;;  %2746 = vadd.xlane.f32.xlu0 %v2745_v40  ;;  %v2739_v33 = vsel %vm1131_vm4, %v12541_v52, 0.0 }
 0x8f7   : > { %2740 = vadd.xlane.f32.xlu0 %v2739_v33 }
 0x904   : > { %2772 = vrot.lane.b32.xlu1 %v12126_v38, %s11611_s15 }
 0x908   : > { %2774 = vrot.lane.b32.xlu1 %v12134_v62, %s11611_s15 }
 0x90d   : > { %2770 = vrot.lane.b32.xlu0 %v12118_v25, %s11611_s15 }
 0x971   : > { %v10383_v48 = vpop.f32.mrb[32].mxu0 }
 0x972   : > { %v2437_v49 = vpop.f32.mrb[33].mxu0 }
 0x973   : > { %v10384_v46 = vpop.f32.mrb[34].mxu0 }
 0x974   : > { %v2469_v5 = vpack.c.bf16 %v10384_v46, %v10383_v48  ;;  %v2440_v17 = vpop.f32.mrb[35].mxu0  ;;  %v2732_v59 = vpop.xlane.xlu1 %2731 }
 0x975   : > { %v2468_v15 = vpack.c.bf16 %v2440_v17, %v2437_v49 }
 0x977   : > { %10391 = vmatprep.mubr.msk.bf16.mxu0 %vm1808_vm5, %v2468_v15 }
 0x978   : > { %10392 = vmatmul.mubr.msk.bf16.vlgmr.msra.gmra.mrb[24].mxu0 %vm1808_vm5, %v2469_v5  ;;  %v2726_v23 = vpop.xlane.xlu1 %2725  ;;  %v2735_v14 = vpop.xlane.xlu0 %2734 }
 0x979   : > { %10416 = vmatpush3.bf16.msra.mxu0 %v2769_v2  ;;  %v10387_v10 = vpop.f32.mrb[36].mxu0  ;;  %11277 = vrcp.f32 %v2726_v23 }
 0x97a   : > { %v2453_v51 = vpop.f32.mrb[37].mxu0 }
 0x97b   : > { %v10388_v50 = vpop.f32.mrb[38].mxu0 }
 0x97c   : > { %v2471_v13 = vpack.c.bf16 %v10388_v50, %v10387_v10  ;;  %v2456_v6 = vpop.f32.mrb[39].mxu0  ;;  %v2744_v28 = vpop.xlane.xlu1 %2743 }
 0x97d   : > { %v2470_v61 = vpack.c.bf16 %v2456_v6, %v2453_v51  ;;  %v2729_v34 = vpop.xlane.xlu0 %2728 }
 0x97e   : > { %11279 = vrcp.f32 %v2729_v34 }
 0x97f   : > { %10395 = vmatprep.mubr.msk.bf16.mxu0 %vm1808_vm5, %v2470_v61  ;;  %11281 = vrcp.f32 %v2735_v14 }
 0x980   : > { %10396 = vmatmul.mubr.msk.bf16.gmra.mrb[28].mxu0 %vm1808_vm5, %v2471_v13  ;;  %v2738_v1 = vpop.xlane.xlu1 %2737  ;;  %11283 = vrcp.f32 %v2732_v59 }
 0x981   : > { %v2747_v9 = vpop.xlane.xlu0 %2746  ;;  %11285 = vrcp.f32 %v2738_v1 }
 0x983   : > { %v11278_v30 = vpop.eup %11277 }
 0x984   : > { %v2773_v18 = vpop.permute.xlu1 %2772  ;;  %v2756_v22 = vmul.f32 %v11278_v30, %v12520_v8 }
 0x985   : > { %v2741_v2 = vpop.xlane.xlu0 %2740 }
 0x986   : > { %11287 = vrcp.f32 %v2741_v2 }
 0x987   : > { %11289 = vrcp.f32 %v2747_v9 }
 0x988   : > { %v11280_v63 = vpop.eup %11279  ;;  %11291 = vrcp.f32 %v2744_v28  ;;  %v2775_v14 = vpop.permute.xlu1 %2774 }
 0x989   : > { %v2771_v3 = vpop.permute.xlu0 %2770  ;;  %v10451_v53 = vpop.f32.mrb[44].mxu1  ;;  %v2757_v37 = vmul.f32 %v11280_v63, %v11268_v32 }
 0x98a   : > { %10417 = vmatprep.subr.bf16.mxu0 %v2771_v3  ;;  %v3026_v40 = vpop.f32.mrb[45].mxu1  ;;  %v11282_v17 = vpop.eup %11281  ;;  %v3059_v8 = vsel %vm12162_vm7, %v10451_v53, -10000.0 }
 0x98b   : > { %10418 = vmatpush3.bf16.msra.mxu0 %v2771_v3  ;;  %v12558_v33 = vsel %vm12158_vm6, %v3026_v40, -10000.0  ;;  %v10452_v48 = vpop.f32.mrb[46].mxu1  ;;  %v2764_v49 = vpack.c.bf16 %v2757_v37, %v2756_v22  ;;  %v11284_v59 = vpop.eup %11283  ;;  %v2759_v51 = vmul.f32 %v11282_v17, %v12522_v20  ;;  %v3071_v50 = vsel %vm1131_vm4, %v3059_v8, -inf  ;;  %v10955_v17 = vld [vmem:[%s11849_s8 + $0x10] sm:$0xff]  }
 0x98c   : > { %v3065_v46 = vsel %vm1131_vm4, %v12558_v33, -inf  ;;  %10419 = vmatprep.subr.bf16.mxu0 %v2773_v18  ;;  %v3029_v5 = vpop.f32.mrb[47].mxu1  ;;  %v11286_v23 = vpop.eup %11285  ;;  %v3060_v13 = vsel %vm12179_vm9, %v10452_v48, -10000.0  ;;  %v2758_v61 = vmul.f32 %v11284_v59, %v12516_v35 }
 0x98d   : > { %10423 = vmatprep.mubr.msk.bf16.mxu0 %vm1131_vm4, %v2764_v49  ;;  %v12567_v32 = vsel %vm12167_vm8, %v3029_v5, -10000.0  ;;  %3066 = vmax.xlane.f32.xlu0 %v3065_v46  ;;  %v2760_v20 = vmul.f32 %v11286_v23, %v12533_v27  ;;  %v3074_v30 = vsel %vm1131_vm4, %v3060_v13, -inf }
 0x98e   : > { %v3068_v15 = vsel %vm1131_vm4, %v12567_v32, -inf  ;;  %v2765_v2 = vpack.c.bf16 %v2759_v51, %v2758_v61 }
 0x98f   : > { %10420 = vmatpush3.bf16.msra.mxu0 %v2773_v18  ;;  %3069 = vmax.xlane.f32.xlu1 %v3068_v15 }
 0x990   : > { %v11288_v10 = vpop.eup %11287  ;;  %10421 = vmatprep.subr.bf16.mxu0 %v2775_v14 }
 0x991   : > { %v10455_v6 = vpop.f32.mrb[48].mxu1  ;;  %3072 = vmax.xlane.f32.xlu0 %v3071_v50  ;;  %v2761_v28 = vmul.f32 %v11288_v10, %v12541_v52  ;;  %v11290_v3 = vpop.eup %11289 }
 0x992   : > { %v3042_v34 = vpop.f32.mrb[49].mxu1  ;;  %v3063_v52 = vsel %vm12193_vm11, %v10455_v6, -10000.0  ;;  %v11292_v27 = vpop.eup %11291  ;;  %v2763_v40 = vmul.f32 %v11290_v3, %v12535_v19 }
 0x993   : > { %10422 = vmatpush3.bf16.msra.mxu0 %v2775_v14  ;;  %v3061_v9 = vsel %vm12187_vm10, %v3042_v34, -10000.0  ;;  %v10456_v1 = vpop.f32.mrb[50].mxu1  ;;  %v2766_v53 = vpack.c.bf16 %v2761_v28, %v2760_v20  ;;  %v3083_v22 = vsel %vm1131_vm4, %v3063_v52, -inf  ;;  %v2762_v49 = vmul.f32 %v11292_v27, %v12528_v55 }
 0x994   : > { %v3077_v63 = vsel %vm1131_vm4, %v3061_v9, -inf  ;;  %v3045_v18 = vpop.f32.mrb[51].mxu1  ;;  %v3064_v48 = vsel %vm12213_vm13, %v10456_v1, -10000.0  ;;  %10431 = vmatprep.subr.bf16.mxu0 %v10955_v17 }
 0x995   : > { %v12586_v35 = vsel %vm12198_vm12, %v3045_v18, -10000.0  ;;  %3078 = vmax.xlane.f32.xlu1 %v3077_v63  ;;  %3075 = vmax.xlane.f32.xlu0 %v3074_v30  ;;  %v3086_v46 = vsel %vm1131_vm4, %v3064_v48, -inf  ;;  %v2767_v5 = vpack.c.bf16 %v2763_v40, %v2762_v49 }
 0x996   : > { %10424 = vmatmul.mubr.msk.bf16.vlgmr.msra.gmra.mrb[40].mxu0 %vm1131_vm4, %v2765_v2  ;;  %v3080_v37 = vsel %vm1131_vm4, %v12586_v35, -inf }
 0x997   : > { %10427 = vmatprep.mubr.msk.bf16.mxu0 %vm1131_vm4, %v2766_v53  ;;  %10432 = vmatpush3.bf16.msra.mxu0 %v10955_v17 }
 0x999   : > { %3084 = vmax.xlane.f32.xlu1 %v3083_v22  ;;  %3081 = vmax.xlane.f32.xlu0 %v3080_v37 }
 0x99d   : > { %3087 = vmax.xlane.f32.xlu0 %v3086_v46 }
 0x99e   : > { %10428 = vmatmul.mubr.msk.bf16.gmra.mrb[44].mxu0 %vm1131_vm4, %v2767_v5 }
 0x9aa   : > { %3157 = vrot.lane.b32.xlu1 %v12108_v0, %s11613_s6 }
 0x9ae   : > { %3159 = vrot.lane.b32.xlu1 %v12118_v25, %s11613_s6 }
 0xa1a   : > { %v3067_v19 = vpop.xlane.xlu0 %3066 }
 0xa1b   : > { %v3089_v59 = vsub.f32 %v12558_v33, %v3067_v19 }
 0xa1c   : > { %v3070_v15 = vpop.xlane.xlu1 %3069 }
 0xa1d   : > { %v3097_v14 = vmul.f32 1.442695, %v3089_v59  ;;  %v3090_v51 = vsub.f32 %v12567_v32, %v3070_v15 }
 0xa1e   : > { %v3073_v55 = vpop.xlane.xlu0 %3072 }
 0xa1f   : > { %v3091_v23 = vsub.f32 %v3059_v8, %v3073_v55  ;;  %v3099_v61 = vmul.f32 1.442695, %v3090_v51 }
 0xa21   : > { %v3101_v10 = vmul.f32 1.442695, %v3091_v23 }
 0xa22   : > { %v3079_v50 = vpop.xlane.xlu1 %3078  ;;  %v3076_v6 = vpop.xlane.xlu0 %3075 }
 0xa23   : > { %11293 = vpow2.f32 %v3101_v10  ;;  %v3092_v28 = vsub.f32 %v3060_v13, %v3076_v6  ;;  %v3093_v33 = vsub.f32 %v3061_v9, %v3079_v50 }
 0xa24   : > { %11295 = vpow2.f32 %v3097_v14 }
 0xa25   : > { %v3103_v0 = vmul.f32 1.442695, %v3092_v28  ;;  %v3105_v32 = vmul.f32 1.442695, %v3093_v33 }
 0xa26   : > { %v3085_v34 = vpop.xlane.xlu1 %3084  ;;  %v3082_v1 = vpop.xlane.xlu0 %3081 }
 0xa27   : > { %v3095_v25 = vsub.f32 %v3063_v52, %v3085_v34  ;;  %11297 = vpow2.f32 %v3103_v0  ;;  %v3094_v9 = vsub.f32 %v12586_v35, %v3082_v1 }
 0xa28   : > { %11299 = vpow2.f32 %v3099_v61 }
 0xa29   : > { %v3109_v20 = vmul.f32 1.442695, %v3095_v25  ;;  %v3107_v37 = vmul.f32 1.442695, %v3094_v9 }
 0xa2a   : > { %v3158_v2 = vpop.permute.xlu1 %3157  ;;  %v3088_v8 = vpop.xlane.xlu0 %3087 }
 0xa2b   : > { %10457 = vmatprep.subr.bf16.mxu0 %v3158_v2  ;;  %11301 = vpow2.f32 %v3109_v20  ;;  %v3096_v63 = vsub.f32 %v3064_v48, %v3088_v8 }
 0xa2c   : > { %11303 = vpow2.f32 %v3105_v32 }
 0xa2d   : > { %v12606_v30 = vpop.eup %11293  ;;  %v3111_v52 = vmul.f32 1.442695, %v3096_v63 }
 0xa2e   : > { %v3119_v13 = vsel %vm1131_vm4, %v12606_v30, 0.0  ;;  %v12610_v18 = vpop.eup %11295  ;;  %v3160_v50 = vpop.permute.xlu1 %3159 }
 0xa2f   : > { %3120 = vadd.xlane.f32.xlu1 %v3119_v13  ;;  %v3113_v53 = vsel %vm1131_vm4, %v12610_v18, 0.0  ;;  %11305 = vpow2.f32 %v3111_v52 }
 0xa30   : > { %11307 = vpow2.f32 %v3107_v37 }
 0xa31   : > { %v12612_v3 = vpop.eup %11297 }
 0xa32   : > { %v3122_v27 = vsel %vm1131_vm4, %v12612_v3, 0.0  ;;  %v11300_v22 = vpop.eup %11299 }
 0xa33   : > { %3114 = vadd.xlane.f32.xlu1 %v3113_v53  ;;  %3123 = vadd.xlane.f32.xlu0 %v3122_v27  ;;  %v3116_v40 = vsel %vm1131_vm4, %v11300_v22, 0.0 }
 0xa35   : > { %v12620_v48 = vpop.eup %11301 }
 0xa36   : > { %v3131_v35 = vsel %vm1131_vm4, %v12620_v48, 0.0  ;;  %v12624_v49 = vpop.eup %11303 }
 0xa37   : > { %3117 = vadd.xlane.f32.xlu0 %v3116_v40  ;;  %v3125_v46 = vsel %vm1131_vm4, %v12624_v49, 0.0 }
 0xa39   : > { %v12628_v5 = vpop.eup %11305 }
 0xa3a   : > { %v3134_v17 = vsel %vm1131_vm4, %v12628_v5, 0.0  ;;  %v12632_v19 = vpop.eup %11307 }
 0xa3b   : > { %3132 = vadd.xlane.f32.xlu0 %v3131_v35  ;;  %v3128_v59 = vsel %vm1131_vm4, %v12632_v19, 0.0 }
 0xa3f   : > { %3126 = vadd.xlane.f32.xlu0 %v3125_v46 }
 0xa43   : > { %3135 = vadd.xlane.f32.xlu0 %v3134_v17 }
 0xa44   : > { %3163 = vrot.lane.b32.xlu1 %v12134_v62, %s11613_s6 }
 0xa47   : > { %3129 = vadd.xlane.f32.xlu0 %v3128_v59 }
 0xa5d   : > { %3161 = vrot.lane.b32.xlu0 %v12126_v38, %s11613_s6 }
 0xa69   : > { %v10425_v15 = vpop.f32.mrb[40].mxu0 }
 0xa6a   : > { %v2826_v55 = vpop.f32.mrb[41].mxu0 }
 0xa6b   : > { %v10426_v23 = vpop.f32.mrb[42].mxu0 }
 0xa6c   : > { %v2858_v14 = vpack.c.bf16 %v10426_v23, %v10425_v15  ;;  %v2829_v10 = vpop.f32.mrb[43].mxu0 }
 0xa6d   : > { %v2857_v51 = vpack.c.bf16 %v2829_v10, %v2826_v55 }
 0xa6f   : > { %10433 = vmatprep.mubr.msk.bf16.mxu0 %vm1808_vm5, %v2857_v51 }
 0xa70   : > { %10434 = vmatmul.mubr.msk.bf16.vlgmr.msra.gmra.mrb[24].mxu0 %vm1808_vm5, %v2858_v14 }
 0xa71   : > { %10458 = vmatpush3.bf16.msra.mxu0 %v3158_v2  ;;  %v10429_v62 = vpop.f32.mrb[44].mxu0 }
 0xa72   : > { %10459 = vmatprep.subr.bf16.mxu0 %v3160_v50  ;;  %v2842_v6 = vpop.f32.mrb[45].mxu0 }
 0xa73   : > { %v10430_v28 = vpop.f32.mrb[46].mxu0 }
 0xa74   : > { %v2860_v0 = vpack.c.bf16 %v10430_v28, %v10429_v62  ;;  %v2845_v61 = vpop.f32.mrb[47].mxu0 }
 0xa75   : > { %v2859_v34 = vpack.c.bf16 %v2845_v61, %v2842_v6  ;;  %10460 = vmatpush3.bf16.msra.mxu0 %v3160_v50 }
 0xa77   : > { %10437 = vmatprep.mubr.msk.bf16.mxu0 %vm1808_vm5, %v2859_v34 }
 0xa78   : > { %10438 = vmatmul.mubr.msk.bf16.gmra.mrb[28].mxu0 %vm1808_vm5, %v2860_v0 }
 0xabc   : > { %v3121_v38 = vpop.xlane.xlu1 %3120 }
 0xac0   : > { %v3115_v1 = vpop.xlane.xlu1 %3114  ;;  %v3124_v25 = vpop.xlane.xlu0 %3123 }
 0xac1   : > { %11309 = vrcp.f32 %v3115_v1 }
 0xac4   : > { %v3118_v33 = vpop.xlane.xlu0 %3117  ;;  %v3164_v35 = vpop.permute.xlu1 %3163 }
 0xac5   : > { %11311 = vrcp.f32 %v3118_v33 }
 0xac6   : > { %11313 = vrcp.f32 %v3124_v25  ;;  %v9290_v25 = vld [vmem:[%s11844_s20] ss:$0 sm:$0xff] }
 0xac7   : > { %11315 = vrcp.f32 %v3121_v38 }
 0xac8   : > { %v3133_v20 = vpop.xlane.xlu0 %3132 }
 0xacb   : > { %v11310_v8 = vpop.eup %11309 }
 0xacc   : > { %v3127_v2 = vpop.xlane.xlu0 %3126  ;;  %v3145_v13 = vmul.f32 %v11310_v8, %v12610_v18  ;;  %v10956_v18 = vld [vmem:[%s11849_s8 + $0x18] sm:$0xff]  }
 0xacd   : > { %11317 = vrcp.f32 %v3127_v2 }
 0xacf   : > { %v11312_v32 = vpop.eup %11311 }
 0xad0   : > { %v3136_v63 = vpop.xlane.xlu0 %3135  ;;  %v3146_v9 = vmul.f32 %v11312_v32, %v11300_v22  ;;  %v11314_v27 = vpop.eup %11313 }
 0xad1   : > { %v11316_v40 = vpop.eup %11315  ;;  %v3148_v46 = vmul.f32 %v11314_v27, %v12612_v3 }
 0xad2   : > { %v3153_v52 = vpack.c.bf16 %v3146_v9, %v3145_v13  ;;  %v3147_v17 = vmul.f32 %v11316_v40, %v12606_v30 }
 0xad4   : > { %10465 = vmatprep.mubr.msk.bf16.mxu0 %vm1131_vm4, %v3153_v52  ;;  %v3130_v53 = vpop.xlane.xlu0 %3129  ;;  %v3154_v15 = vpack.c.bf16 %v3148_v46, %v3147_v17 }
 0xad5   : > { %11319 = vrcp.f32 %v3130_v53 }
 0xad6   : > { %11321 = vrcp.f32 %v3136_v63 }
 0xad7   : > { %11323 = vrcp.f32 %v3133_v20  ;;  %v11318_v22 = vpop.eup %11317 }
 0xad8   : > { %v3162_v37 = vpop.permute.xlu0 %3161  ;;  %v3149_v23 = vmul.f32 %v11318_v22, %v12624_v49 }
 0xad9   : > { %10461 = vmatprep.subr.bf16.mxu0 %v3162_v37 }
 0xada   : > { %10462 = vmatpush3.bf16.msra.mxu0 %v3162_v37 }
 0xadb   : > { %10463 = vmatprep.subr.bf16.mxu0 %v3164_v35 }
 0xade   : > { %10464 = vmatpush3.bf16.msra.mxu0 %v3164_v35 }
 0xadf   : > { %v11320_v59 = vpop.eup %11319  ;;  %10473 = vmatprep.subr.bf16.mxu0 %v10956_v18 }
 0xae0   : > { %v11322_v55 = vpop.eup %11321  ;;  %v3150_v14 = vmul.f32 %v11320_v59, %v12632_v19 }
 0xae1   : > { %10466 = vmatmul.mubr.msk.bf16.vlgmr.msra.gmra.mrb[48].mxu0 %vm1131_vm4, %v3154_v15  ;;  %v11324_v10 = vpop.eup %11323  ;;  %v3152_v3 = vmul.f32 %v11322_v55, %v12628_v5 }
 0xae2   : > { %v3155_v51 = vpack.c.bf16 %v3150_v14, %v3149_v23  ;;  %10474 = vmatpush3.bf16.msra.mxu0 %v10956_v18  ;;  %v3151_v30 = vmul.f32 %v11324_v10, %v12620_v48 }
 0xae4   : > { %10469 = vmatprep.mubr.msk.bf16.mxu0 %vm1131_vm4, %v3155_v51  ;;  %v3156_v50 = vpack.c.bf16 %v3152_v3, %v3151_v30 }
 0xae9   : > { %10470 = vmatmul.mubr.msk.bf16.gmra.mrb[52].mxu0 %vm1131_vm4, %v3156_v50 }
 0xbb4   : > { %v10467_v62 = vpop.f32.mrb[48].mxu0 }
 0xbb5   : > { %v3215_v6 = vpop.f32.mrb[49].mxu0 }
 0xbb6   : > { %v10468_v49 = vpop.f32.mrb[50].mxu0 }
 0xbb7   : > { %v3247_v28 = vpack.c.bf16 %v10468_v49, %v10467_v62  ;;  %v3218_v19 = vpop.f32.mrb[51].mxu0 }
 0xbb8   : > { %v3246_v0 = vpack.c.bf16 %v3218_v19, %v3215_v6 }
 0xbba   : > { %10475 = vmatprep.mubr.msk.bf16.mxu0 %vm1808_vm5, %v3246_v0 }
 0xbbb   : > { %10476 = vmatmul.mubr.msk.bf16.vlgmr.msra.gmra.mrb[24].mxu0 %vm1808_vm5, %v3247_v28 }
 0xbbc   : > { %v10471_v61 = vpop.f32.mrb[52].mxu0 }
 0xbbd   : > { %v3231_v5 = vpop.f32.mrb[53].mxu0 }
 0xbbe   : > { %v10472_v34 = vpop.f32.mrb[54].mxu0 }
 0xbbf   : > { %v3249_v38 = vpack.c.bf16 %v10472_v34, %v10471_v61  ;;  %v3234_v1 = vpop.f32.mrb[55].mxu0 }
 0xbc0   : > { %v3248_v48 = vpack.c.bf16 %v3234_v1, %v3231_v5 }
 0xbc2   : > { %10479 = vmatprep.mubr.msk.bf16.mxu0 %vm1808_vm5, %v3248_v48 }
 0xbc3   : > { %10480 = vmatmul.mubr.msk.bf16.gmra.mrb[28].mxu0 %vm1808_vm5, %v3249_v38 }
 0xc8e   : > { %v10477_v33 = vpop.f32.mrb[24].mxu0 }
 0xc8f   : > { %v3302_v20 = vpop.f32.mrb[25].mxu0  ;;  %v10683_v2 = vadd.f32 %v10477_v33, %v9290_v25 }
 0xc90   : > { %v10684_v8 = vadd.f32 %v9290_v25, %v3302_v20  ;;  %v10478_v32 = vpop.f32.mrb[26].mxu0 }
 0xc91   : > { %v3305_v63 = vpop.f32.mrb[27].mxu0  ;;  %v3343_v52 = vadd.f32 %v10683_v2, %v12077_v26  ;;  %v10685_v53 = vadd.f32 %v10478_v32, %v9290_v25 }
 0xc92   : > { %v3341_v13 = vadd.f32 %v10684_v8, %v12065_v12  ;;  %v10686_v9 = vadd.f32 %v9290_v25, %v3305_v63 }
 0xc93   : > { %v3344_v18 = vadd.f32 %v10685_v53, %v12075_v58  ;;  %v3357_v12 = vsel %vm1131_vm4, %v3343_v52, 0.0 }
 0xc94   : > { %v3342_v27 = vadd.f32 %v10686_v9, %v12067_v16  ;;  %v3351_v37 = vsel %vm1131_vm4, %v3341_v13, 0.0 }
 0xc95   : > { %3352 = vadd.xlane.f32.xlu1 %v3351_v37  ;;  %v3360_v14 = vsel %vm1131_vm4, %v3344_v18, 0.0 }
 0xc96   : > { %v10481_v40 = vpop.f32.mrb[28].mxu0  ;;  %v3354_v35 = vsel %vm1131_vm4, %v3342_v27, 0.0 }
 0xc97   : > { %3355 = vadd.xlane.f32.xlu0 %v3354_v35  ;;  %v3318_v46 = vpop.f32.mrb[29].mxu0  ;;  %v10687_v55 = vadd.f32 %v10481_v40, %v9290_v25 }
 0xc98   : > { %v10688_v22 = vadd.f32 %v9290_v25, %v3318_v46  ;;  %v10482_v17 = vpop.f32.mrb[30].mxu0 }
 0xc99   : > { %3358 = vadd.xlane.f32.xlu1 %v3357_v12  ;;  %v3321_v59 = vpop.f32.mrb[31].mxu0  ;;  %v10689_v26 = vadd.f32 %v10482_v17, %v9290_v25  ;;  %v3347_v51 = vadd.f32 %v10687_v55, %v12095_v39 }
 0xc9a   : > { %v10690_v15 = vadd.f32 %v9290_v25, %v3321_v59  ;;  %v3345_v16 = vadd.f32 %v10688_v22, %v12087_v31 }
 0xc9b   : > { %v3348_v10 = vadd.f32 %v10689_v26, %v12093_v4  ;;  %v3369_v31 = vsel %vm1131_vm4, %v3347_v51, 0.0 }
 0xc9c   : > { %v3346_v23 = vadd.f32 %v10690_v15, %v12085_v29  ;;  %v3363_v3 = vsel %vm1131_vm4, %v3345_v16, 0.0 }
 0xc9d   : > { %3361 = vadd.xlane.f32.xlu1 %v3360_v14  ;;  %v3372_v30 = vsel %vm1131_vm4, %v3348_v10, 0.0  ;;  %v10962_v14 = vld [vmem:[%s11872_s28 + $0x14] ss:$8 sps:$4 sm:$0xff]  }
 0xc9e   : > { %v3366_v58 = vsel %vm1131_vm4, %v3346_v23, 0.0 }
 0xc9f   : > { %3367 = vadd.xlane.f32.xlu0 %v3366_v58  ;;  %v11614_v58 = vmov 0.0  }
 0xca0   : > { %1132 = vst.msk [vmem:[#allocation3] sm:$0xff] %vm1131_vm4, %v11614_v58  ;;  %1133 = vst [vmem:[#allocation4] sm:$0xff] %v11614_v58 }
 0xca1   : > { %3364 = vadd.xlane.f32.xlu1 %v3363_v3  ;;  %1134 = vst [vmem:[#allocation4 + $0x8] sm:$0xff] %v11614_v58  ;;  %v10963_v3 = vld [vmem:[%s11872_s28 + $0x20] ss:$8 sps:$4 sm:$0xff]  }
 0xca3   : > { %3373 = vadd.xlane.f32.xlu0 %v3372_v30  ;;  %v10968_v30 = vld [vmem:[%s11872_s28 + $0x34] ss:$8 sps:$4 sm:$0xff]  }
 0xca5   : > { %3370 = vadd.xlane.f32.xlu1 %v3369_v31  ;;  %v10966_v31 = vld [vmem:[%s11872_s28 + $0x30] ss:$8 sps:$4 sm:$0xff]  }
 0xd22   : > { %v3353_v29 = vpop.xlane.xlu1 %3352 }
 0xd23   : > { %v3376_v50 = vmul.f32 0.015625, %v3353_v29  ;;  %v10971_v29 = vld [vmem:[%s11872_s28 + $0x44] ss:$8 sps:$4 sm:$0xff]  }
 0xd24   : > { %v3356_v62 = vpop.xlane.xlu0 %3355 }
 0xd25   : > { %v12677_v6 = vsub.f32 %v3341_v13, %v3376_v50  ;;  %v3377_v4 = vmul.f32 0.015625, %v3356_v62  ;;  %v10993_v50 = vld [vmem:[%s14581_s23 + $0x40] sm:$0xff]  }
 0xd26   : > { %v3359_v49 = vpop.xlane.xlu1 %3358  ;;  %v10994_v62 = vld [vmem:[%s14581_s23] sm:$0xff]   ;;  %9949 = vmatprep.subr.bf16.mxu0 %v10993_v50 }
 0xd27   : > { %v12679_v28 = vsub.f32 %v3342_v27, %v3377_v4  ;;  %v3378_v19 = vmul.f32 0.015625, %v3359_v49  ;;  %v3392_v39 = vmul.f32 %v12677_v6, %v12677_v6  ;;  %9950 = vmatpush3.bf16.msra.mxu0 %v10994_v62 }
 0xd29   : > { %v12683_v0 = vsub.f32 %v3343_v52, %v3378_v19  ;;  %v3400_v61 = vsel %vm1131_vm4, %v3392_v39, 0.0  ;;  %v3393_v5 = vmul.f32 %v12679_v28, %v12679_v28 }
 0xd2a   : > { %v3362_v34 = vpop.xlane.xlu1 %3361  ;;  %3401 = vadd.xlane.f32.xlu1 %v3400_v61 }
 0xd2b   : > { %v3379_v38 = vmul.f32 0.015625, %v3362_v34  ;;  %v3403_v1 = vsel %vm1131_vm4, %v3393_v5, 0.0  ;;  %v3394_v48 = vmul.f32 %v12683_v0, %v12683_v0 }
 0xd2c   : > { %3404 = vadd.xlane.f32.xlu0 %v3403_v1  ;;  %v3368_v25 = vpop.xlane.xlu0 %3367 }
 0xd2d   : > { %v12691_v33 = vsub.f32 %v3344_v18, %v3379_v38  ;;  %v3381_v20 = vmul.f32 0.015625, %v3368_v25  ;;  %v3406_v2 = vsel %vm1131_vm4, %v3394_v48, 0.0 }
 0xd2e   : > { %3407 = vadd.xlane.f32.xlu1 %v3406_v2  ;;  %v3365_v8 = vpop.xlane.xlu1 %3364 }
 0xd2f   : > { %v12694_v32 = vsub.f32 %v3346_v23, %v3381_v20  ;;  %v3380_v63 = vmul.f32 0.015625, %v3365_v8  ;;  %v3395_v13 = vmul.f32 %v12691_v33, %v12691_v33  ;;  %v10957_v23 = vld [vmem:[%s11872_s28] ss:$8 sps:$4 sm:$0xff]  }
 0xd30   : > { %v3374_v9 = vpop.xlane.xlu0 %3373 }
 0xd31   : > { %v12698_v52 = vsub.f32 %v3345_v16, %v3380_v63  ;;  %v3383_v53 = vmul.f32 0.015625, %v3374_v9  ;;  %v3409_v27 = vsel %vm1131_vm4, %v3395_v13, 0.0  ;;  %v3397_v37 = vmul.f32 %v12694_v32, %v12694_v32  ;;  %v10959_v16 = vld [vmem:[%s11872_s28 + $0x4] ss:$8 sps:$4 sm:$0xff]  }
 0xd32   : > { %v3371_v40 = vpop.xlane.xlu1 %3370  ;;  %3410 = vadd.xlane.f32.xlu0 %v3409_v27  ;;  %3586 = vmatprep.subr.bf16.mxu1 %v10959_v16 }
 0xd33   : > { %v12703_v35 = vsub.f32 %v3348_v10, %v3383_v53  ;;  %v3382_v46 = vmul.f32 0.015625, %v3371_v40  ;;  %v3396_v18 = vmul.f32 %v12698_v52, %v12698_v52  ;;  %v3415_v12 = vsel %vm1131_vm4, %v3397_v37, 0.0  ;;  %3587 = vmatpush1.bf16.msra.mxu1 %v10957_v23  ;;  %v10960_v10 = vld [vmem:[%s11872_s28 + $0x10] ss:$8 sps:$4 sm:$0xff]   ;;  %v9343_v53 = vld [vmem:[%s14582_s26] ss:$0 sm:$0xff] }
 0xd34   : > { %3588 = vmatprep.subr.bf16.mxu1 %v10962_v14 }
 0xd35   : > { %v12707_v22 = vsub.f32 %v3347_v51, %v3382_v46  ;;  %v3412_v17 = vsel %vm1131_vm4, %v3396_v18, 0.0  ;;  %v3399_v59 = vmul.f32 %v12703_v35, %v12703_v35  ;;  %v10965_v51 = vld [vmem:[%s11872_s28 + $0x24] ss:$8 sps:$4 sm:$0xff]  }
 0xd36   : > { %3413 = vadd.xlane.f32.xlu1 %v3412_v17  ;;  %3416 = vadd.xlane.f32.xlu0 %v3415_v12  ;;  %v9344_v12 = vld [vmem:[%s14583_s5] ss:$0 sm:$0xff] }
 0xd37   : > { %v3398_v26 = vmul.f32 %v12707_v22, %v12707_v22  ;;  %v3421_v55 = vsel %vm1131_vm4, %v3399_v59, 0.0  ;;  %3589 = vmatpush1.bf16.msra.mxu1 %v10960_v10 }
 0xd38   : > { %3590 = vmatprep.subr.bf16.mxu1 %v10965_v51 }
 0xd39   : > { %v3418_v15 = vsel %vm1131_vm4, %v3398_v26, 0.0 }
 0xd3a   : > { %3419 = vadd.xlane.f32.xlu1 %v3418_v15  ;;  %3422 = vadd.xlane.f32.xlu0 %v3421_v55 }
 0xd3b   : > { %3591 = vmatpush1.bf16.msra.mxu1 %v10963_v3 }
 0xd3c   : > { %3592 = vmatprep.subr.bf16.mxu1 %v10968_v30 }
 0xd3f   : > { %3593 = vmatpush1.bf16.msra.mxu1 %v10966_v31 }
 0xd40   : > { %3748 = vmatprep.subr.bf16.mxu1 %v10971_v29 }
 0xdb7   : > { %v3402_v4 = vpop.xlane.xlu1 %3401 }
 0xdb8   : > { %v3424_v49 = vmul.f32 0.015625, %v3402_v4 }
 0xdb9   : > { %v3405_v19 = vpop.xlane.xlu0 %3404 }
 0xdba   : > { %v3432_v39 = vadd.f32 1e-05, %v3424_v49  ;;  %v3425_v61 = vmul.f32 0.015625, %v3405_v19 }
 0xdbb   : > { %v3408_v5 = vpop.xlane.xlu1 %3407 }
 0xdbc   : > { %11325 = vrsqrt.f32 %v3432_v39  ;;  %v3433_v34 = vadd.f32 1e-05, %v3425_v61  ;;  %v3426_v38 = vmul.f32 0.015625, %v3408_v5 }
 0xdbe   : > { %11327 = vrsqrt.f32 %v3433_v34  ;;  %v3434_v1 = vadd.f32 1e-05, %v3426_v38 }
 0xdbf   : > { %v3411_v48 = vpop.xlane.xlu0 %3410 }
 0xdc0   : > { %11329 = vrsqrt.f32 %v3434_v1  ;;  %v3427_v25 = vmul.f32 0.015625, %v3411_v48 }
 0xdc2   : > { %v3435_v20 = vadd.f32 1e-05, %v3427_v25 }
 0xdc3   : > { %v3414_v2 = vpop.xlane.xlu1 %3413  ;;  %v3417_v8 = vpop.xlane.xlu0 %3416 }
 0xdc4   : > { %11331 = vrsqrt.f32 %v3435_v20  ;;  %v3428_v63 = vmul.f32 0.015625, %v3414_v2  ;;  %v3429_v13 = vmul.f32 0.015625, %v3417_v8  ;;  %v10969_v8 = vld [vmem:[%s11872_s28 + $0x40] ss:$8 sps:$4 sm:$0xff]  }
 0xdc6   : > { %v11326_v9 = vpop.eup %11325  ;;  %v3436_v27 = vadd.f32 1e-05, %v3428_v63  ;;  %v3437_v37 = vadd.f32 1e-05, %v3429_v13 }
 0xdc7   : > { %v3448_v40 = vmul.f32 %v11326_v9, %v12677_v6  ;;  %v3420_v46 = vpop.xlane.xlu1 %3419  ;;  %v3423_v18 = vpop.xlane.xlu0 %3422 }
 0xdc8   : > { %v11328_v17 = vpop.eup %11327  ;;  %11333 = vrsqrt.f32 %v3436_v27  ;;  %v3430_v59 = vmul.f32 0.015625, %v3420_v46  ;;  %v3431_v26 = vmul.f32 0.015625, %v3423_v18  ;;  %v10974_v27 = vld [vmem:[%s11872_s28 + $0x54] ss:$8 sps:$4 sm:$0xff]   ;;  %v10972_v46 = vld [vmem:[%s11872_s28 + $0x50] ss:$8 sps:$4 sm:$0xff]  }
 0xdc9   : > { %v3462_v15 = vmul.f32 %v9343_v53, %v3448_v40  ;;  %v3449_v55 = vmul.f32 %v11328_v17, %v12679_v28  ;;  %11335 = vrsqrt.f32 %v3437_v37  ;;  %v14584_v18 = vld [vmem:[#allocation30_spill] sm:$0xff] }
 0xdca   : > { %v11330_v16 = vpop.eup %11329  ;;  %v3438_v23 = vadd.f32 1e-05, %v3430_v59  ;;  %v3439_v14 = vadd.f32 1e-05, %v3431_v26  ;;  %v14585_v59 = vld [vmem:[#allocation31_spill] sm:$0xff] }
 0xdcb   : > { %v12733_v10 = vadd.f32 %v9344_v12, %v3462_v15  ;;  %v3463_v58 = vmul.f32 %v9343_v53, %v3449_v55  ;;  %v3450_v51 = vmul.f32 %v11330_v16, %v12683_v0  ;;  %v10975_v55 = vld [vmem:[%s11872_s28 + $0x60] ss:$8 sps:$4 sm:$0xff]  }
 0xdcc   : > { %11337 = vrsqrt.f32 %v3438_v23  ;;  %v10980_v23 = vld [vmem:[%s11872_s28 + $0x74] ss:$8 sps:$4 sm:$0xff]  }
 0xdcd   : > { %v3484_v6 = vmul.f32 %v12733_v10, %v11976_v41  ;;  %v12738_v3 = vadd.f32 %v9344_v12, %v3463_v58  ;;  %v3464_v30 = vmul.f32 %v9343_v53, %v3450_v51  ;;  %11339 = vrsqrt.f32 %v3439_v14  ;;  %v10978_v14 = vld [vmem:[%s11872_s28 + $0x70] ss:$8 sps:$4 sm:$0xff]   ;;  %v10983_v58 = vld [vmem:[%s11872_s28 + $0x84] ss:$8 sps:$4 sm:$0xff]  }
 0xdce   : > { %v11332_v31 = vpop.eup %11331 }
 0xdcf   : > { %3492 = vst.msk [vmem:[#allocation3 + $0x8] sm:$0xff] %vm1131_vm4, %v3484_v6  ;;  %v3485_v28 = vmul.f32 %v12738_v3, %v11985_v44  ;;  %v12743_v29 = vadd.f32 %v9344_v12, %v3464_v30  ;;  %v3451_v50 = vmul.f32 %v11332_v31, %v12691_v33 }
 0xdd1   : > { %3493 = vst.msk [vmem:[#allocation3 + $0x10] sm:$0xff] %vm1131_vm4, %v3485_v28  ;;  %v3486_v0 = vmul.f32 %v12743_v29, %v11978_v42  ;;  %v3465_v62 = vmul.f32 %v9343_v53, %v3451_v50 }
 0xdd2   : > { %v11334_v4 = vpop.eup %11333 }
 0xdd3   : > { %v11336_v49 = vpop.eup %11335  ;;  %3494 = vst.msk [vmem:[#allocation3 + $0x18] sm:$0xff] %vm1131_vm4, %v3486_v0  ;;  %v12750_v19 = vadd.f32 %v9344_v12, %v3465_v62  ;;  %v3452_v39 = vmul.f32 %v11334_v4, %v12698_v52  ;;  %v10981_v4 = vld [vmem:[%s11872_s28 + $0x80] ss:$8 sps:$4 sm:$0xff]  }
 0xdd4   : > { %v3453_v61 = vmul.f32 %v11336_v49, %v12694_v32 }
 0xdd5   : > { %v3487_v33 = vmul.f32 %v12750_v19, %v11987_v45  ;;  %v3466_v5 = vmul.f32 %v9343_v53, %v3452_v39  ;;  %v10986_v39 = vld [vmem:[%s11872_s28 + $0x94] ss:$8 sps:$4 sm:$0xff]  }
 0xdd6   : > { %v11338_v34 = vpop.eup %11337  ;;  %v3467_v38 = vmul.f32 %v9343_v53, %v3453_v61  ;;  %v3514_v2 = vld [vmem:[#allocation3 + $0x6] sm:$0xff]  ;;  %v10984_v61 = vld [vmem:[%s11872_s28 + $0x90] ss:$8 sps:$4 sm:$0xff]  }
 0xdd7   : > { %v11340_v1 = vpop.eup %11339  ;;  %3495 = vst.msk [vmem:[#allocation3 + $0x20] sm:$0xff] %vm1131_vm4, %v3487_v33  ;;  %v12757_v48 = vadd.f32 %v9344_v12, %v3466_v5  ;;  %v3454_v25 = vmul.f32 %v11338_v34, %v12707_v22  ;;  %v3675_v62 = vld [vmem:[#allocation3 + $0x7] sm:$0xff] }
 0xdd8   : > { %v12760_v20 = vadd.f32 %v9344_v12, %v3467_v38  ;;  %v3455_v52 = vmul.f32 %v11340_v1, %v12703_v35  ;;  %v3515_v32 = vld [vmem:[#allocation3 + $0xe] sm:$0xff]  ;;  %v10987_v38 = vld [vmem:[%s11872_s28 + $0xa0] ss:$8 sps:$4 sm:$0xff]  }
 0xdd9   : > { %v3488_v63 = vmul.f32 %v12757_v48, %v11991_v56  ;;  %v3468_v13 = vmul.f32 %v9343_v53, %v3454_v25  ;;  %v3522_v9 = vpack.c.bf16 %v3515_v32, %v3514_v2  ;;  %v3676_v0 = vld [vmem:[#allocation3 + $0xf] sm:$0xff] }
 0xdda   : > { %v3489_v37 = vmul.f32 %v12760_v20, %v11993_v57  ;;  %v3469_v40 = vmul.f32 %v9343_v53, %v3455_v52  ;;  %v10977_v53 = vld [vmem:[%s11872_s28 + $0x64] ss:$8 sps:$4 sm:$0xff]   ;;  %v3683_v49 = vpack.c.bf16 %v3676_v0, %v3675_v62  ;;  %v3677_v34 = vld [vmem:[#allocation3 + $0x17] sm:$0xff] }
 0xddb   : > { %3496 = vst.msk [vmem:[#allocation3 + $0x28] sm:$0xff] %vm1131_vm4, %v3488_v63  ;;  %v12770_v22 = vadd.f32 %v9344_v12, %v3468_v13  ;;  %9353 = vmatmul.mubr.msk.bf16.vlgmr.msra.gmra.mrb[52].mxu1 %vm1131_vm4, %v3522_v9  ;;  %v10989_v33 = vld [vmem:[%s11872_s28 + $0xa4] ss:$8 sps:$4 sm:$0xff]   ;;  %v10992_v25 = vld [vmem:[%s11872_s28 + $0xb4] ss:$8 sps:$4 sm:$0xff]  }
 0xddc   : > { %3497 = vst.msk [vmem:[#allocation3 + $0x30] sm:$0xff] %vm1131_vm4, %v3489_v37  ;;  %v12774_v35 = vadd.f32 %v9344_v12, %v3469_v40  ;;  %3749 = vmatpush1.bf16.msra.mxu1 %v10969_v8  ;;  %3628 = vmatprep.mubr.bf16.mxu1 %v14580_v24  ;;  %v3516_v12 = vld [vmem:[#allocation3 + $0x16] sm:$0xff]  ;;  %v3837_v37 = vld [vmem:[#allocation3 + $0x8] sm:$0xff] }
 0xddd   : > { %v3490_v17 = vmul.f32 %v12770_v22, %v14584_v18  ;;  %3750 = vmatprep.subr.bf16.mxu1 %v10974_v27  ;;  %v10990_v52 = vld [vmem:[%s11872_s28 + $0xb0] ss:$8 sps:$4 sm:$0xff]   ;;  %v11003_v0 = vld [vmem:[%s14581_s23 + $0x68] sm:$0xff]  }
 0xdde   : > { %v3491_v26 = vmul.f32 %v12774_v35, %v14585_v59  ;;  %v3517_v15 = vld [vmem:[#allocation3 + $0x1e] sm:$0xff]  ;;  %v3838_v27 = vld [vmem:[#allocation3 + $0x10] sm:$0xff]  ;;  %v11004_v62 = vld [vmem:[%s14581_s23 + $0x28] sm:$0xff]  }
 0xddf   : > { %3498 = vst.msk [vmem:[#allocation3 + $0x38] sm:$0xff] %vm1131_vm4, %v3490_v17  ;;  %v3523_v16 = vpack.c.bf16 %v3517_v15, %v3516_v12  ;;  %v3678_v5 = vld [vmem:[#allocation3 + $0x1f] sm:$0xff]  ;;  %v3845_v40 = vpack.c.bf16 %v3838_v27, %v3837_v37 }
 0xde0   : > { %3499 = vst.msk [vmem:[#allocation3 + $0x40] sm:$0xff] %vm1131_vm4, %v3491_v26  ;;  %3751 = vmatpush1.bf16.msra.mxu1 %v10972_v46  ;;  %v3684_v1 = vpack.c.bf16 %v3678_v5, %v3677_v34  ;;  %v3840_v46 = vld [vmem:[#allocation3 + $0x20] sm:$0xff]  ;;  %v3839_v17 = vld [vmem:[#allocation3 + $0x18] sm:$0xff] }
 0xde1   : > { %3752 = vmatprep.subr.bf16.mxu1 %v10977_v53  ;;  %v3846_v53 = vpack.c.bf16 %v3840_v46, %v3839_v17  ;;  %v3500_v5 = vld [vmem:[%s14586_s21] sm:$0x3]  ;;  %v14587_v34 = vld [vmem:[#allocation33_spill] sm:$0xff]  ;;  %v4321_v46 = vld [vmem:[#allocation4] sm:$0x80] }
 0xde2   : > { %v3518_v51 = vld [vmem:[#allocation3 + $0x26] sm:$0xff] }
 0xde3   : > { %9354 = vmatmul.mubr.msk.bf16.gmra.mrb[56].mxu1 %vm1131_vm4, %v3523_v16  ;;  %v3519_v6 = vld [vmem:[#allocation3 + $0x2e] sm:$0xff] }
 0xde4   : > { %3638 = vmatprep.mubr.bf16.mxu1 %v14580_v24  ;;  %3753 = vmatpush1.bf16.msra.mxu1 %v10975_v55  ;;  %v3524_v30 = vpack.c.bf16 %v3519_v6, %v3518_v51  ;;  %v3679_v2 = vld [vmem:[#allocation3 + $0x27] sm:$0xff]  ;;  %v3680_v32 = vld [vmem:[#allocation3 + $0x2f] sm:$0xff] }
 0xde5   : > { %3754 = vmatprep.subr.bf16.mxu1 %v10980_v23  ;;  %v3685_v8 = vpack.c.bf16 %v3680_v32, %v3679_v2  ;;  %v3841_v26 = vld [vmem:[#allocation3 + $0x28] sm:$0xff]  ;;  %v3842_v15 = vld [vmem:[#allocation3 + $0x30] sm:$0xff] }
 0xde6   : > { %v3520_v31 = vld [vmem:[#allocation3 + $0x36] sm:$0xff]  ;;  %v3847_v12 = vpack.c.bf16 %v3842_v15, %v3841_v26 }
 0xde7   : > { %v3521_v28 = vld [vmem:[#allocation3 + $0x3e] sm:$0xff]  ;;  %v10997_v51 = vld [vmem:[%s14581_s23 + $0x50] sm:$0xff]  }
 0xde8   : > { %3755 = vmatpush1.bf16.msra.mxu1 %v10978_v14  ;;  %v3525_v50 = vpack.c.bf16 %v3521_v28, %v3520_v31  ;;  %v3681_v63 = vld [vmem:[#allocation3 + $0x37] sm:$0xff]  ;;  %v3682_v13 = vld [vmem:[#allocation3 + $0x3f] sm:$0xff]  ;;  %v10995_v14 = vld [vmem:[%s14581_s23 + $0x48] sm:$0xff]  }
 0xde9   : > { %3910 = vmatprep.subr.bf16.mxu1 %v10983_v58  ;;  %v3686_v9 = vpack.c.bf16 %v3682_v13, %v3681_v63  ;;  %v3843_v55 = vld [vmem:[#allocation3 + $0x38] sm:$0xff]  ;;  %v3844_v16 = vld [vmem:[#allocation3 + $0x40] sm:$0xff]  ;;  %v10996_v58 = vld [vmem:[%s14581_s23 + $0x8] sm:$0xff]   ;;  %9951 = vmatprep.subr.bf16.mxu0 %v10995_v14 }
 0xdea   : > { %v3848_v23 = vpack.c.bf16 %v3844_v16, %v3843_v55  ;;  %9952 = vmatpush3.bf16.msra.mxu0 %v10996_v58  ;;  %v10998_v6 = vld [vmem:[%s14581_s23 + $0x10] sm:$0xff]   ;;  %v11000_v31 = vld [vmem:[%s14581_s23 + $0x18] sm:$0xff]   ;;  %v11001_v28 = vld [vmem:[%s14581_s23 + $0x60] sm:$0xff]  }
 0xdeb   : > { %9355 = vmatmul.mubr.msk.bf16.gmra.mrb[60].mxu1 %vm1131_vm4, %v3524_v30  ;;  %9953 = vmatprep.subr.bf16.mxu0 %v10997_v51  ;;  %v10999_v30 = vld [vmem:[%s14581_s23 + $0x58] sm:$0xff]   ;;  %v4056_v55 = vld [vmem:[#allocation4 + $0x8] sm:$0xc0]  ;;  %v4055_v16 = vld [vmem:[#allocation4] sm:$0xc0] }
 0xdec   : > { %3648 = vmatprep.mubr.bf16.mxu1 %v14580_v24 }
 0xdee   : > { %9954 = vmatpush3.bf16.msra.mxu0 %v10998_v6 }
 0xdef   : > { %9955 = vmatprep.subr.bf16.mxu0 %v10999_v30 }
 0xdf2   : > { %9956 = vmatpush3.bf16.msra.mxu0 %v11000_v31 }
 0xdf3   : > { %9356 = vmatmul.mubr.msk.bf16.gmra.mrb[64].mxu1 %vm1131_vm4, %v3525_v50  ;;  %v11002_v50 = vld [vmem:[%s14581_s23 + $0x20] sm:$0xff]   ;;  %9957 = vmatprep.subr.bf16.mxu0 %v11001_v28 }
 0xdf4   : > { %3780 = vmatprep.mubr.bf16.mxu1 %v14580_v24 }
 0xdf6   : > { %9958 = vmatpush3.bf16.msra.mxu0 %v11002_v50 }
 0xdf7   : > { %9959 = vmatprep.subr.bf16.mxu0 %v11003_v0 }
 0xdfa   : > { %9960 = vmatpush3.bf16.msra.mxu0 %v11004_v62 }
 0xdfb   : > { %9373 = vmatmul.mubr.msk.bf16.vlgmr.msra.gmra.mrb[52].mxu1 %vm1131_vm4, %v3683_v49  ;;  %v11006_v49 = vld [vmem:[%s14581_s23 + $0x30] sm:$0xff]  }
 0xdfc   : > { %3911 = vmatpush1.bf16.msra.mxu1 %v10981_v4  ;;  %3790 = vmatprep.mubr.bf16.mxu1 %v14580_v24  ;;  %v11005_v4 = vld [vmem:[%s14581_s23 + $0x70] sm:$0xff]  }
 0xdfd   : > { %3912 = vmatprep.subr.bf16.mxu1 %v10986_v39  ;;  %9961 = vmatprep.subr.bf16.mxu0 %v11005_v4  ;;  %v11007_v39 = vld [vmem:[%s14581_s23 + $0x78] sm:$0xff]  }
 0xdfe   : > { %9962 = vmatpush3.bf16.msra.mxu0 %v11006_v49 }
 0xdff   : > { %9963 = vmatprep.subr.bf16.mxu0 %v11007_v39 }
 0xe00   : > { %3913 = vmatpush1.bf16.msra.mxu1 %v10984_v61  ;;  %v11008_v61 = vld [vmem:[%s14581_s23 + $0x38] sm:$0xff]  }
 0xe01   : > { %3914 = vmatprep.subr.bf16.mxu1 %v10989_v33  ;;  %v11009_v33 = vld [vmem:[%s14581_s23 + $0xc0] sm:$0xff]  }
 0xe02   : > { %9964 = vmatpush3.bf16.msra.mxu0 %v11008_v61 }
 0xe03   : > { %9374 = vmatmul.mubr.msk.bf16.gmra.mrb[56].mxu1 %vm1131_vm4, %v3684_v1  ;;  %9989 = vmatprep.subr.bf16.mxu0 %v11009_v33  ;;  %v14588_v1 = vld [vmem:[#allocation34_spill] sm:$0xff] }
 0xe04   : > { %3800 = vmatprep.mubr.bf16.mxu1 %v14580_v24  ;;  %3915 = vmatpush1.bf16.msra.mxu1 %v10987_v38  ;;  %v12834_v38 = vrot.slane %v3500_v5, %v14587_v34 }
 0xe05   : > { %3916 = vmatprep.subr.bf16.mxu1 %v10992_v25  ;;  %v12837_v25 = vrot.slane %v3500_v5, %v14588_v1 }
 0xe08   : > { %3917 = vmatpush1.bf16.msra.mxu1 %v10990_v52 }
 0xe0b   : > { %9375 = vmatmul.mubr.msk.bf16.gmra.mrb[60].mxu1 %vm1131_vm4, %v3685_v8 }
 0xe0c   : > { %3810 = vmatprep.mubr.bf16.mxu1 %v14580_v24 }
 0xe13   : > { %9376 = vmatmul.mubr.msk.bf16.gmra.mrb[64].mxu1 %vm1131_vm4, %v3686_v9 }
 0xe14   : > { %3942 = vmatprep.mubr.bf16.mxu1 %v14580_v24 }
 0xe1b   : > { %9393 = vmatmul.mubr.msk.bf16.vlgmr.msra.gmra.mrb[52].mxu1 %vm1131_vm4, %v3845_v40 }
 0xe1c   : > { %3952 = vmatprep.mubr.bf16.mxu1 %v14580_v24 }
 0xe23   : > { %9394 = vmatmul.mubr.msk.bf16.gmra.mrb[56].mxu1 %vm1131_vm4, %v3846_v53  ;;  %v4322_v53 = vld [vmem:[#allocation4 + $0x8] sm:$0x80] }
 0xe24   : > { %3962 = vmatprep.mubr.bf16.mxu1 %v14580_v24 }
 0xe2b   : > { %9395 = vmatmul.mubr.msk.bf16.gmra.mrb[60].mxu1 %vm1131_vm4, %v3847_v12 }
 0xe2c   : > { %3972 = vmatprep.mubr.bf16.mxu1 %v14580_v24 }
 0xe33   : > { %9396 = vmatmul.mubr.msk.bf16.gmra.mrb[64].mxu1 %vm1131_vm4, %v3848_v23 }
 0xeee   : > { %v3944_v52 = vpop.f32.mrb[52].mxu1 }
 0xeef   : > { %v10691_v2 = vadd.f32 %v3944_v52, %v12834_v38  ;;  %v3946_v32 = vpop.f32.mrb[53].mxu1 }
 0xef0   : > { %v10692_v8 = vadd.f32 %v3946_v32, %v12837_v25  ;;  %v3948_v63 = vpop.f32.mrb[54].mxu1 }
 0xef1   : > { %v3999_v13 = vmax.f32 %v10691_v2, 0.0  ;;  %v10693_v9 = vadd.f32 %v3948_v63, %v12834_v38  ;;  %v3950_v27 = vpop.f32.mrb[55].mxu1 }
 0xef2   : > { %v4000_v37 = vmax.f32 %v10692_v8, 0.0  ;;  %v10694_v40 = vadd.f32 %v3950_v27, %v12837_v25 }
 0xef3   : > { %v12844_v17 = vmul.f32 %v3999_v13, %v11976_v41  ;;  %v4001_v15 = vmax.f32 %v10693_v9, 0.0 }
 0xef4   : > { %v12847_v26 = vmul.f32 %v4000_v37, %v11976_v41  ;;  %v4002_v12 = vmax.f32 %v10694_v40, 0.0 }
 0xef5   : > { %v4325_v23 = vpack.c.bf16 %v12844_v17, %v4321_v46  ;;  %v12856_v50 = vmul.f32 %v4001_v15, %v11985_v44  ;;  %v4073_v49 = vpack.c.bf16 %v12844_v17, %v4055_v16 }
 0xef6   : > { %v3954_v14 = vpop.f32.mrb[56].mxu1  ;;  %v4326_v58 = vpack.c.bf16 %v12847_v26, %v4322_v53  ;;  %v12852_v51 = vmul.f32 %v4002_v12, %v11985_v44  ;;  %v4074_v4 = vpack.c.bf16 %v12847_v26, %v4056_v55 }
 0xef7   : > { %v10695_v6 = vadd.f32 %v3954_v14, %v12834_v38  ;;  %v3956_v30 = vpop.f32.mrb[57].mxu1  ;;  %v4364_v31 = vshrl.u32 %v4325_v23, 16  ;;  %v4367_v28 = vshll.u32 %v4325_v23, 16  ;;  %v4126_v46 = vrot.slane %v4073_v49, 3 }
 0xef8   : > { %v10696_v0 = vadd.f32 %v3956_v30, %v12837_v25  ;;  %v3958_v62 = vpop.f32.mrb[58].mxu1  ;;  %v4381_v5 = vshrl.u32 %v4326_v58, 16  ;;  %v4384_v52 = vshll.u32 %v4326_v58, 16  ;;  %v4129_v15 = vrot.slane %v4074_v4, 3 }
 0xef9   : > { %v4003_v39 = vmax.f32 %v10695_v6, 0.0  ;;  %v10697_v61 = vadd.f32 %v3958_v62, %v12834_v38  ;;  %v3960_v33 = vpop.f32.mrb[59].mxu1  ;;  %v12863_v8 = vrot.slane %v4364_v31, 3  ;;  %v12865_v63 = vrot.slane %v4367_v28, 4 }
 0xefa   : > { %v4004_v2 = vmax.f32 %v10696_v0, 0.0  ;;  %v10698_v32 = vadd.f32 %v3960_v33, %v12837_v25  ;;  %v4383_v55 = vrot.slane %v4381_v5, 3  ;;  %v4386_v16 = vrot.slane %v4384_v52, 4 }
 0xefb   : > { %v12868_v13 = vmul.f32 %v4003_v39, %v11978_v42  ;;  %v4005_v9 = vmax.f32 %v10697_v61, 0.0  ;;  %v4370_v30 = vor.u32 %v12865_v63, %v12863_v8  ;;  %v11010_v63 = vld [vmem:[%s14581_s23 + $0x80] sm:$0xff]  }
 0xefc   : > { %v12873_v37 = vmul.f32 %v4004_v2, %v11978_v42  ;;  %v4006_v40 = vmax.f32 %v10698_v32, 0.0 }
 0xefd   : > { %v12879_v12 = vpack.c.bf16 %v12868_v13, %v12856_v50  ;;  %v12882_v23 = vmul.f32 %v4005_v9, %v11987_v45 }
 0xefe   : > { %v12885_v14 = vmul.f32 %v4006_v40, %v11987_v45  ;;  %v3964_v58 = vpop.f32.mrb[60].mxu1  ;;  %v12889_v6 = vpack.c.bf16 %v12873_v37, %v12852_v51 }
 0xeff   : > { %v10699_v31 = vadd.f32 %v3964_v58, %v12834_v38  ;;  %v3966_v28 = vpop.f32.mrb[61].mxu1  ;;  %v4127_v0 = vrot.slane %v12879_v12, 3  ;;  %v4372_v62 = vshrl.u32 %v12879_v12, 16  ;;  %v4375_v4 = vshll.u32 %v12879_v12, 16 }
 0xf00   : > { %v10700_v49 = vadd.f32 %v3966_v28, %v12837_v25  ;;  %v3968_v39 = vpop.f32.mrb[62].mxu1  ;;  %v4130_v61 = vrot.slane %v12889_v6, 3  ;;  %v4389_v33 = vshrl.u32 %v12889_v6, 16  ;;  %v4392_v5 = vshll.u32 %v12889_v6, 16  ;;  %v11011_v28 = vld [vmem:[%s14581_s23 + $0xc8] sm:$0xff]  }
 0xf01   : > { %v4007_v52 = vmax.f32 %v10699_v31, 0.0  ;;  %v10701_v2 = vadd.f32 %v3968_v39, %v12834_v38  ;;  %v3970_v32 = vpop.f32.mrb[63].mxu1  ;;  %v4128_v8 = vsel %vm4125_vm14, %v4126_v46, %v4127_v0  ;;  %v4374_v9 = vrot.slane %v4372_v62, 3  ;;  %v11014_v62 = vld [vmem:[%s14581_s23 + $0x90] sm:$0xff]  }
 0xf02   : > { %v4008_v40 = vmax.f32 %v10700_v49, 0.0  ;;  %v10702_v12 = vadd.f32 %v3970_v32, %v12837_v25  ;;  %v4131_v58 = vsel %vm4125_vm14, %v4129_v15, %v4130_v61  ;;  %v4391_v53 = vrot.slane %v4389_v33, 3  ;;  %v11012_v49 = vld [vmem:[%s14581_s23 + $0x88] sm:$0xff]  }
 0xf03   : > { %v12908_v27 = vmul.f32 %v4007_v52, %v11991_v56  ;;  %v4009_v6 = vmax.f32 %v10701_v2, 0.0  ;;  %4280 = vmatprep.mubr.bf16.mxu0 %v4131_v58  ;;  %v4394_v31 = vrot.slane %v4392_v5, 4  ;;  %v4377_v39 = vrot.slane %v4375_v4, 4 }
 0xf04   : > { %v12911_v43 = vmul.f32 %v4008_v40, %v11991_v56  ;;  %v4010_v46 = vmax.f32 %v10702_v12, 0.0  ;;  %4281 = vmatmul.mubr.bf16.vlgmr.msra.gmra.mrb[56].mxu0 %v4128_v8  ;;  %v4387_v5 = vor.u32 %v4386_v16, %v4383_v55  ;;  %v11013_v40 = vld [vmem:[%s14581_s23 + $0xd0] sm:$0xff]  }
 0xf05   : > { %9990 = vmatpush3.bf16.msra.mxu0 %v11010_v63  ;;  %v12920_v33 = vpack.c.bf16 %v12908_v27, %v12882_v23  ;;  %v4395_v4 = vor.u32 %v4394_v31, %v4391_v53  ;;  %v12922_v52 = vor.u32 %v4377_v39, %v4374_v9  ;;  %v12925_v2 = vmul.f32 %v4009_v6, %v11993_v57 }
 0xf06   : > { %v12928_v32 = vmul.f32 %v4010_v46, %v11993_v57  ;;  %v3974_v8 = vpop.f32.mrb[64].mxu1  ;;  %9991 = vmatprep.subr.bf16.mxu0 %v11011_v28  ;;  %v12932_v63 = vpack.c.bf16 %v12911_v43, %v12885_v14 }
 0xf07   : > { %v10703_v12 = vadd.f32 %v3974_v8, %v12834_v38  ;;  %v3976_v55 = vpop.f32.mrb[65].mxu1  ;;  %v4132_v53 = vrot.slane %v12920_v33, 3  ;;  %v12938_v16 = vsel %vm4362_vm15, %v4387_v5, %v4395_v4  ;;  %v12942_v9 = vsel %vm4362_vm15, %v4370_v30, %v12922_v52 }
 0xf08   : > { %v10704_v58 = vadd.f32 %v3976_v55, %v12837_v25  ;;  %v3978_v28 = vpop.f32.mrb[66].mxu1  ;;  %v4134_v6 = vrot.slane %v12932_v63, 3  ;;  %v4407_v31 = vshrl.u32 %v12932_v63, 16  ;;  %v4410_v39 = vshll.u32 %v12932_v63, 16 }
 0xf09   : > { %v4011_v46 = vmax.f32 %v10703_v12, 0.0  ;;  %v10705_v8 = vadd.f32 %v3978_v28, %v12834_v38  ;;  %v3980_v15 = vpop.f32.mrb[67].mxu1  ;;  %9992 = vmatpush3.bf16.msra.mxu0 %v11012_v49  ;;  %v4133_v5 = vsel %vm4125_vm14, %v4127_v0, %v4132_v53  ;;  %v4398_v30 = vshrl.u32 %v12920_v33, 16 }
 0xf0a   : > { %v4012_v60 = vmax.f32 %v10704_v58, 0.0  ;;  %v10706_v55 = vadd.f32 %v3980_v15, %v12837_v25  ;;  %v4135_v7 = vsel %vm4125_vm14, %v4130_v61, %v4134_v6  ;;  %9993 = vmatprep.subr.bf16.mxu0 %v11013_v40  ;;  %v4409_v54 = vrot.slane %v4407_v31, 3  ;;  %v11016_v40 = vld [vmem:[%s14581_s23 + $0x98] sm:$0xff]  }
 0xf0b   : > { %v12956_v63 = vmul.f32 %v4011_v46, %v14584_v18  ;;  %v4013_v38 = vmax.f32 %v10705_v8, 0.0  ;;  %4288 = vmatprep.mubr.bf16.mxu0 %v4135_v7  ;;  %v4412_v49 = vrot.slane %v4410_v39, 4  ;;  %v4400_v0 = vrot.slane %v4398_v30, 3  ;;  %v11017_v39 = vld [vmem:[%s14581_s23 + $0xe0] sm:$0xff]  }
 0xf0c   : > { %v12959_v12 = vmul.f32 %v4012_v60, %v14584_v18  ;;  %v4014_v58 = vmax.f32 %v10706_v55, 0.0  ;;  %4289 = vmatmul.mubr.bf16.gmra.mrb[60].mxu0 %v4133_v5  ;;  %v4401_v25 = vshll.u32 %v12920_v33, 16 }
 0xf0d   : > { %v12965_v15 = vmul.f32 %v4013_v38, %v14585_v59  ;;  %9994 = vmatpush3.bf16.msra.mxu0 %v11014_v62  ;;  %v4079_v7 = vpack.c.bf16 %v12956_v63, %v12925_v2  ;;  %v4413_v28 = vor.u32 %v4412_v49, %v4409_v54 }
 0xf0e   : > { %v12973_v31 = vmul.f32 %v4014_v58, %v14585_v59  ;;  %9995 = vmatprep.subr.bf16.mxu0 %v11015_v47  ;;  %v4080_v33 = vpack.c.bf16 %v12959_v12, %v12928_v32  ;;  %v4403_v46 = vrot.slane %v4401_v25, 4  ;;  %v11018_v58 = vld [vmem:[%s14581_s23 + $0xa0] sm:$0xff]  }
 0xf0f   : > { %4045 = vst [vmem:[#allocation4 + $0x80] sm:$0xff] %v12965_v15  ;;  %v4136_v62 = vrot.slane %v4079_v7, 3  ;;  %v4414_v8 = vsel %vm4362_vm15, %v4395_v4, %v4413_v28  ;;  %v4416_v54 = vshrl.u32 %v4079_v7, 16  ;;  %v4419_v5 = vshll.u32 %v4079_v7, 16  ;;  %v11019_v7 = vld [vmem:[%s14581_s23 + $0xe8] sm:$0xff]  }
 0xf10   : > { %4046 = vst [vmem:[#allocation4 + $0x88] sm:$0xff] %v12973_v31  ;;  %v4138_v30 = vrot.slane %v4080_v33, 3  ;;  %v4404_v55 = vor.u32 %v4403_v46, %v4400_v0  ;;  %v4425_v38 = vshrl.u32 %v4080_v33, 16  ;;  %v4428_v47 = vshll.u32 %v4080_v33, 16 }
 0xf11   : > { %9996 = vmatpush3.bf16.msra.mxu0 %v11016_v40  ;;  %v4137_v49 = vsel %vm4125_vm14, %v4132_v53, %v4136_v62  ;;  %v4418_v25 = vrot.slane %v4416_v54, 3  ;;  %v4421_v60 = vrot.slane %v4419_v5, 4  ;;  %v4637_v61 = vpack.c.bf16 %v12973_v31, %v12959_v12  ;;  %v11021_v5 = vld [vmem:[%s14581_s23 + $0xf0] sm:$0xff]  }
 0xf12   : > { %v4139_v4 = vsel %vm4125_vm14, %v4134_v6, %v4138_v30  ;;  %9997 = vmatprep.subr.bf16.mxu0 %v11017_v39  ;;  %v4405_v0 = vsel %vm4362_vm15, %v12922_v52, %v4404_v55  ;;  %v4427_v46 = vrot.slane %v4425_v38, 3  ;;  %v4430_v33 = vrot.slane %v4428_v47, 4  ;;  %v11020_v6 = vld [vmem:[%s14581_s23 + $0xa8] sm:$0xff]  }
 0xf13   : > { %4296 = vmatprep.mubr.bf16.mxu0 %v4139_v4  ;;  %v12989_v40 = vor.u32 %v4421_v60, %v4418_v25  ;;  %v4636_v53 = vpack.c.bf16 %v12965_v15, %v12956_v63  ;;  %v11022_v4 = vld [vmem:[%s14581_s23 + $0xb0] sm:$0xff]  }
 0xf14   : > { %4297 = vmatmul.mubr.bf16.gmra.mrb[64].mxu0 %v4137_v49  ;;  %v12993_v54 = vor.u32 %v4430_v33, %v4427_v46  ;;  %v11023_v46 = vld [vmem:[%s14581_s23 + $0xf8] sm:$0xff]   ;;  %v11025_v33 = vld [vmem:[%s14581_s23 + $0x140] sm:$0xff]  }
 0xf15   : > { %9998 = vmatpush3.bf16.msra.mxu0 %v11018_v58  ;;  %v4423_v39 = vsel %vm4362_vm15, %v4404_v55, %v12989_v40 }
 0xf16   : > { %9999 = vmatprep.subr.bf16.mxu0 %v11019_v7  ;;  %v4071_v52 = vld [vmem:[#allocation4 + $0x80] sm:$0x3f]  ;;  %v4432_v60 = vsel %vm4362_vm15, %v4413_v28, %v12993_v54  ;;  %v11024_v28 = vld [vmem:[%s14581_s23 + $0xb8] sm:$0xff]  }
 0xf17   : > { %v4072_v38 = vld [vmem:[#allocation4 + $0x88] sm:$0x3f]  ;;  %v4081_v47 = vpack.c.bf16 %v4071_v52, %v4071_v52 }
 0xf18   : > { %v4082_v25 = vpack.c.bf16 %v4072_v38, %v4072_v38  ;;  %v4324_v52 = vld [vmem:[#allocation4 + $0x88] sm:$0x7f] }
 0xf19   : > { %10000 = vmatpush3.bf16.msra.mxu0 %v11020_v6  ;;  %v4140_v49 = vrot.slane %v4081_v47, 3  ;;  %v11026_v6 = vld [vmem:[%s14581_s23 + $0x100] sm:$0xff]   ;;  %v11029_v38 = vld [vmem:[%s14581_s23 + $0x150] sm:$0xff]  }
 0xf1a   : > { %v4142_v58 = vrot.slane %v4082_v25, 3  ;;  %10001 = vmatprep.subr.bf16.mxu0 %v11021_v5  ;;  %v11027_v5 = vld [vmem:[%s14581_s23 + $0x148] sm:$0xff]  }
 0xf1b   : > { %v4141_v7 = vsel %vm4125_vm14, %v4136_v62, %v4140_v49  ;;  %v11028_v62 = vld [vmem:[%s14581_s23 + $0x108] sm:$0xff]   ;;  %v11030_v49 = vld [vmem:[%s14581_s23 + $0x110] sm:$0xff]  }
 0xf1c   : > { %v4143_v55 = vsel %vm4125_vm14, %v4138_v30, %v4142_v58  ;;  %v4328_v30 = vpack.c.bf16 %v4324_v52, %v4324_v52  ;;  %v11035_v52 = vld [vmem:[%s14581_s23 + $0x168] sm:$0xff]  }
 0xf1d   : > { %4304 = vmatprep.mubr.bf16.mxu0 %v4143_v55  ;;  %10002 = vmatpush3.bf16.msra.mxu0 %v11022_v4  ;;  %v11031_v4 = vld [vmem:[%s14581_s23 + $0x158] sm:$0xff]   ;;  %v11033_v55 = vld [vmem:[%s14581_s23 + $0x160] sm:$0xff]  }
 0xf1e   : > { %4305 = vmatmul.mubr.bf16.gmra.mrb[68].mxu0 %v4141_v7  ;;  %10003 = vmatprep.subr.bf16.mxu0 %v11023_v46  ;;  %v4443_v47 = vshrl.u32 %v4328_v30, 16  ;;  %v4446_v25 = vshll.u32 %v4328_v30, 16  ;;  %v11036_v30 = vld [vmem:[%s14581_s23 + $0x128] sm:$0xff]  }
 0xf1f   : > { %4587 = vmatprep.mubr.bf16.mxu0 %v12938_v16  ;;  %v4323_v16 = vld [vmem:[#allocation4 + $0x80] sm:$0x7f] }
 0xf20   : > { %v4327_v58 = vpack.c.bf16 %v4323_v16, %v4323_v16  ;;  %v4448_v46 = vrot.slane %v4446_v25, 4  ;;  %v11039_v25 = vld [vmem:[%s14581_s23 + $0x178] sm:$0xff]  }
 0xf21   : > { %10004 = vmatpush3.bf16.msra.mxu0 %v11024_v28 }
 0xf22   : > { %10029 = vmatprep.subr.bf16.mxu0 %v11025_v33  ;;  %v4434_v7 = vshrl.u32 %v4327_v58, 16  ;;  %v4437_v28 = vshll.u32 %v4327_v58, 16  ;;  %v14593_v58 = vpack.c.bf16 %v12928_v32, %v12911_v43 }
 0xf26   : > { %4588 = vmatmul.mubr.bf16.vlgmr.msra.gmra.mrb[72].mxu0 %v12942_v9  ;;  %v4445_v9 = vrot.slane %v4443_v47, 3  ;;  %v11038_v47 = vld [vmem:[%s14581_s23 + $0x130] sm:$0xff]  }
 0xf27   : > { %4595 = vmatprep.mubr.bf16.mxu0 %v4414_v8  ;;  %10030 = vmatpush3.bf16.msra.mxu0 %v11026_v6  ;;  %v11032_v8 = vld [vmem:[%s14581_s23 + $0x118] sm:$0xff]   ;;  %v11034_v6 = vld [vmem:[%s14581_s23 + $0x120] sm:$0xff]  }
 0xf28   : > { %10031 = vmatprep.subr.bf16.mxu0 %v11027_v5  ;;  %v4449_v33 = vor.u32 %v4448_v46, %v4445_v9  ;;  %v4436_v5 = vrot.slane %v4434_v7, 3 }
 0xf2b   : > { %10032 = vmatpush3.bf16.msra.mxu0 %v11028_v62  ;;  %v11037_v62 = vld [vmem:[%s14581_s23 + $0x170] sm:$0xff]  }
 0xf2c   : > { %10033 = vmatprep.subr.bf16.mxu0 %v11029_v38 }
 0xf2e   : > { %4596 = vmatmul.mubr.bf16.gmra.mrb[76].mxu0 %v4405_v0  ;;  %v4439_v0 = vrot.slane %v4437_v28, 4 }
 0xf2f   : > { %4603 = vmatprep.mubr.bf16.mxu0 %v4432_v60  ;;  %10034 = vmatpush3.bf16.msra.mxu0 %v11030_v49  ;;  %v4450_v60 = vsel %vm4362_vm15, %v12993_v54, %v4449_v33  ;;  %v11040_v54 = vld [vmem:[%s14581_s23 + $0x138] sm:$0xff]   ;;  %v14590_v49 = vpack.c.bf16 %v12856_v50, %v12844_v17 }
 0xf30   : > { %10035 = vmatprep.subr.bf16.mxu0 %v11031_v4  ;;  %v4440_v38 = vor.u32 %v4439_v0, %v4436_v5  ;;  %v14591_v4 = vpack.c.bf16 %v12885_v14, %v12873_v37 }
 0xf32   : > { %v4441_v16 = vsel %vm4362_vm15, %v12989_v40, %v4440_v38  ;;  %v14592_v40 = vpack.c.bf16 %v12882_v23, %v12868_v13 }
 0xf33   : > { %10036 = vmatpush3.bf16.msra.mxu0 %v11032_v8 }
 0xf34   : > { %10037 = vmatprep.subr.bf16.mxu0 %v11033_v55 }
 0xf36   : > { %4604 = vmatmul.mubr.bf16.gmra.mrb[80].mxu0 %v4423_v39  ;;  %v14589_v39 = vpack.c.bf16 %v12852_v51, %v12847_v26  ;;  %v14594_v26 = vpack.c.bf16 %v12925_v2, %v12908_v27 }
 0xf37   : > { %4611 = vmatprep.mubr.bf16.mxu0 %v4450_v60  ;;  %10038 = vmatpush3.bf16.msra.mxu0 %v11034_v6  ;;  %v9397_v6 = vld [vmem:[%s14595_s27] ss:$0 sm:$0xff] }
 0xf38   : > { %10039 = vmatprep.subr.bf16.mxu0 %v11035_v52 }
 0xf3b   : > { %10040 = vmatpush3.bf16.msra.mxu0 %v11036_v30 }
 0xf3c   : > { %10041 = vmatprep.subr.bf16.mxu0 %v11037_v62 }
 0xf3e   : > { %4612 = vmatmul.mubr.bf16.gmra.mrb[84].mxu0 %v4441_v16 }
 0xf3f   : > { %10042 = vmatpush3.bf16.msra.mxu0 %v11038_v47  ;;  %4799 = vmatprep.mubr.bf16.mxu0 %v14589_v39 }
 0xf40   : > { %10043 = vmatprep.subr.bf16.mxu0 %v11039_v25 }
 0xf43   : > { %10044 = vmatpush3.bf16.msra.mxu0 %v11040_v54 }
 0xf46   : > { %4800 = vmatmul.mubr.bf16.vlgmr.msra.gmra.mrb[88].mxu0 %v14590_v49 }
 0xf47   : > { %4807 = vmatprep.mubr.bf16.mxu0 %v14591_v4 }
 0xf4e   : > { %4808 = vmatmul.mubr.bf16.gmra.mrb[92].mxu0 %v14592_v40 }
 0xf4f   : > { %4815 = vmatprep.mubr.bf16.mxu0 %v14593_v58 }
 0xf56   : > { %4816 = vmatmul.mubr.bf16.gmra.mrb[96].mxu0 %v14594_v26 }
 0xf57   : > { %4823 = vmatprep.mubr.bf16.mxu0 %v4637_v61 }
 0xf5e   : > { %4824 = vmatmul.mubr.bf16.gmra.mrb[100].mxu0 %v4636_v53 }
 0xfd7   : > { %v9965_v17 = vpop.f32.mrb[56].mxu0 }
 0xfd8   : > { %v9966_v51 = vpop.f32.mrb[57].mxu0 }
 0xfd9   : > { %v9967_v50 = vadd.f32 %v9966_v51, %v9965_v17  ;;  %v9968_v13 = vpop.f32.mrb[58].mxu0 }
 0xfda   : > { %v9969_v37 = vpop.f32.mrb[59].mxu0 }
 0xfdb   : > { %v9970_v23 = vadd.f32 %v9969_v37, %v9968_v13  ;;  %v4313_v0 = vadd.f32 %v9967_v50, %v9397_v6 }
 0xfdd   : > { %v4314_v38 = vadd.f32 %v9970_v23, %v9397_v6 }
 0xfdf   : > { %v9971_v43 = vpop.f32.mrb[60].mxu0 }
 0xfe0   : > { %v9972_v14 = vpop.f32.mrb[61].mxu0 }
 0xfe1   : > { %v9973_v32 = vadd.f32 %v9972_v14, %v9971_v43  ;;  %v9974_v27 = vpop.f32.mrb[62].mxu0 }
 0xfe2   : > { %v9975_v2 = vpop.f32.mrb[63].mxu0 }
 0xfe3   : > { %v9976_v9 = vadd.f32 %v9975_v2, %v9974_v27  ;;  %v4315_v49 = vadd.f32 %v9973_v32, %v9397_v6 }
 0xfe5   : > { %v4316_v26 = vadd.f32 %v9976_v9, %v9397_v6 }
 0xfe7   : > { %v9977_v46 = vpop.f32.mrb[64].mxu0 }
 0xfe8   : > { %v9978_v12 = vpop.f32.mrb[65].mxu0 }
 0xfe9   : > { %v9979_v61 = vadd.f32 %v9978_v12, %v9977_v46  ;;  %v9980_v31 = vpop.f32.mrb[66].mxu0 }
 0xfea   : > { %v9981_v8 = vpop.f32.mrb[67].mxu0 }
 0xfeb   : > { %v9982_v63 = vadd.f32 %v9981_v8, %v9980_v31  ;;  %v4317_v50 = vadd.f32 %v9979_v61, %v9397_v6 }
 0xfed   : > { %v4318_v23 = vadd.f32 %v9982_v63, %v9397_v6 }
 0xff1   : > { %v9983_v15 = vpop.f32.mrb[68].mxu0 }
 0xff2   : > { %v9984_v53 = vpop.f32.mrb[69].mxu0 }
 0xff3   : > { %v9985_v55 = vadd.f32 %v9984_v53, %v9983_v15  ;;  %v9986_v7 = vpop.f32.mrb[70].mxu0 }
 0xff4   : > { %v9987_v28 = vpop.f32.mrb[71].mxu0 }
 0xff5   : > { %v9988_v33 = vadd.f32 %v9987_v28, %v9986_v7  ;;  %v4319_v32 = vadd.f32 %v9985_v55, %v9397_v6 }
 0xff7   : > { %v4320_v9 = vadd.f32 %v9988_v33, %v9397_v6 }
 0xff9   : > { %v10005_v52 = vpop.f32.mrb[72].mxu0 }
 0xffa   : > { %v10006_v5 = vpop.f32.mrb[73].mxu0 }
 0xffb   : > { %v10007_v60 = vadd.f32 %v10006_v5, %v10005_v52  ;;  %v10008_v30 = vpop.f32.mrb[74].mxu0 }
 0xffc   : > { %v10009_v62 = vpop.f32.mrb[75].mxu0 }
 0xffd   : > { %v4620_v47 = vadd.f32 %v10007_v60, %v4313_v0  ;;  %v10010_v25 = vadd.f32 %v10009_v62, %v10008_v30 }
 0xfff   : > { %v4621_v16 = vadd.f32 %v10010_v25, %v4314_v38 }
0x1001   : > { %v10011_v39 = vpop.f32.mrb[76].mxu0 }
0x1002   : > { %v10012_v54 = vpop.f32.mrb[77].mxu0 }
0x1003   : > { %v10013_v4 = vadd.f32 %v10012_v54, %v10011_v39  ;;  %v10014_v40 = vpop.f32.mrb[78].mxu0 }
0x1004   : > { %v10015_v58 = vpop.f32.mrb[79].mxu0 }
0x1005   : > { %v4622_v17 = vadd.f32 %v10013_v4, %v4315_v49  ;;  %v10016_v51 = vadd.f32 %v10015_v58, %v10014_v40 }
0x1007   : > { %v4623_v13 = vadd.f32 %v10016_v51, %v4316_v26 }
0x1009   : > { %v10017_v37 = vpop.f32.mrb[80].mxu0 }
0x100a   : > { %v10018_v43 = vpop.f32.mrb[81].mxu0 }
0x100b   : > { %v10019_v14 = vadd.f32 %v10018_v43, %v10017_v37  ;;  %v10020_v27 = vpop.f32.mrb[82].mxu0 }
0x100c   : > { %v10021_v2 = vpop.f32.mrb[83].mxu0 }
0x100d   : > { %v4624_v46 = vadd.f32 %v10019_v14, %v4317_v50  ;;  %v10022_v12 = vadd.f32 %v10021_v2, %v10020_v27 }
0x100f   : > { %v4625_v31 = vadd.f32 %v10022_v12, %v4318_v23 }
0x1011   : > { %v10023_v8 = vpop.f32.mrb[84].mxu0 }
0x1012   : > { %v10024_v15 = vpop.f32.mrb[85].mxu0 }
0x1013   : > { %v10025_v53 = vadd.f32 %v10024_v15, %v10023_v8  ;;  %v10026_v7 = vpop.f32.mrb[86].mxu0 }
0x1014   : > { %v10027_v28 = vpop.f32.mrb[87].mxu0 }
0x1015   : > { %v4626_v52 = vadd.f32 %v10025_v53, %v4319_v32  ;;  %v10028_v5 = vadd.f32 %v10027_v28, %v10026_v7 }
0x1017   : > { %v4627_v0 = vadd.f32 %v10028_v5, %v4320_v9 }
0x1019   : > { %v10045_v60 = vpop.f32.mrb[88].mxu0 }
0x101a   : > { %v10046_v30 = vpop.f32.mrb[89].mxu0 }
0x101b   : > { %v10047_v61 = vadd.f32 %v10046_v30, %v10045_v60  ;;  %v10048_v62 = vpop.f32.mrb[90].mxu0 }
0x101c   : > { %v10049_v38 = vpop.f32.mrb[91].mxu0 }
0x101d   : > { %v4832_v25 = vadd.f32 %v10047_v61, %v4620_v47  ;;  %v10050_v63 = vadd.f32 %v10049_v38, %v10048_v62 }
0x101f   : > { %v4840_v39 = vmul.f32 %v4832_v25, %v11976_v41  ;;  %v4833_v54 = vadd.f32 %v10050_v63, %v4621_v16 }
0x1021   : > { %v4841_v49 = vmul.f32 %v4833_v54, %v11985_v44  ;;  %v10051_v55 = vpop.f32.mrb[92].mxu0  ;;  %v4848_v4 = vadd.f32 %v4840_v39, %v12733_v10 }
0x1022   : > { %v10052_v40 = vpop.f32.mrb[93].mxu0 }
0x1023   : > { %v10053_v33 = vadd.f32 %v10052_v40, %v10051_v55  ;;  %v10054_v6 = vpop.f32.mrb[94].mxu0  ;;  %v4858_v58 = vsel %vm1131_vm4, %v4848_v4, 0.0  ;;  %v4849_v26 = vadd.f32 %v4841_v49, %v12738_v3 }
0x1024   : > { %v10055_v51 = vpop.f32.mrb[95].mxu0  ;;  %4859 = vadd.xlane.f32.xlu1 %v4858_v58 }
0x1025   : > { %v4834_v37 = vadd.f32 %v10053_v33, %v4622_v17  ;;  %v10056_v47 = vadd.f32 %v10055_v51, %v10054_v6  ;;  %v4861_v43 = vsel %vm1131_vm4, %v4849_v26, 0.0 }
0x1026   : > { %4862 = vadd.xlane.f32.xlu0 %v4861_v43 }
0x1027   : > { %v4842_v16 = vmul.f32 %v4834_v37, %v11978_v42  ;;  %v4835_v50 = vadd.f32 %v10056_v47, %v4623_v13 }
0x1029   : > { %v4843_v14 = vmul.f32 %v4835_v50, %v11987_v45  ;;  %v10057_v10 = vpop.f32.mrb[96].mxu0  ;;  %v4850_v27 = vadd.f32 %v4842_v16, %v12743_v29 }
0x102a   : > { %v10058_v2 = vpop.f32.mrb[97].mxu0 }
0x102b   : > { %v10059_v23 = vadd.f32 %v10058_v2, %v10057_v10  ;;  %v10060_v12 = vpop.f32.mrb[98].mxu0  ;;  %v4864_v3 = vsel %vm1131_vm4, %v4850_v27, 0.0  ;;  %v4851_v8 = vadd.f32 %v4843_v14, %v12750_v19 }
0x102c   : > { %v10061_v17 = vpop.f32.mrb[99].mxu0  ;;  %4865 = vadd.xlane.f32.xlu1 %v4864_v3 }
0x102d   : > { %v4836_v15 = vadd.f32 %v10059_v23, %v4624_v46  ;;  %v10062_v32 = vadd.f32 %v10061_v17, %v10060_v12  ;;  %v4867_v53 = vsel %vm1131_vm4, %v4851_v8, 0.0 }
0x102e   : > { %4868 = vadd.xlane.f32.xlu0 %v4867_v53 }
0x102f   : > { %v4844_v13 = vmul.f32 %v4836_v15, %v11991_v56  ;;  %v4837_v7 = vadd.f32 %v10062_v32, %v4625_v31 }
0x1031   : > { %v4845_v28 = vmul.f32 %v4837_v7, %v11993_v57  ;;  %v10063_v29 = vpop.f32.mrb[100].mxu0  ;;  %v4852_v9 = vadd.f32 %v4844_v13, %v12757_v48 }
0x1032   : > { %v10064_v5 = vpop.f32.mrb[101].mxu0 }
0x1033   : > { %v10065_v60 = vadd.f32 %v10064_v5, %v10063_v29  ;;  %v10066_v30 = vpop.f32.mrb[102].mxu0  ;;  %v4870_v19 = vsel %vm1131_vm4, %v4852_v9, 0.0  ;;  %v4853_v61 = vadd.f32 %v4845_v28, %v12760_v20 }
0x1034   : > { %v10067_v46 = vpop.f32.mrb[103].mxu0  ;;  %4871 = vadd.xlane.f32.xlu1 %v4870_v19 }
0x1035   : > { %v4838_v62 = vadd.f32 %v10065_v60, %v4626_v52  ;;  %v10068_v38 = vadd.f32 %v10067_v46, %v10066_v30  ;;  %v4873_v25 = vsel %vm1131_vm4, %v4853_v61, 0.0 }
0x1036   : > { %4874 = vadd.xlane.f32.xlu0 %v4873_v25  ;;  %v11043_v25 = vld [vmem:[%s11820_s7 + $0x10] sm:$0xff]  }
0x1037   : > { %v4846_v31 = vmul.f32 %v4838_v62, %v14584_v18  ;;  %v4839_v63 = vadd.f32 %v10068_v38, %v4627_v0  ;;  %v11042_v38 = vld [vmem:[%s11820_s7 + $0x8] sm:$0xff]  }
0x1039   : > { %v4847_v39 = vmul.f32 %v4839_v63, %v14585_v59  ;;  %v4854_v48 = vadd.f32 %v4846_v31, %v12770_v22  ;;  %v11044_v31 = vld [vmem:[%s11820_s7 + $0x18] sm:$0xff]  }
0x103b   : > { %v4876_v54 = vsel %vm1131_vm4, %v4854_v48, 0.0  ;;  %v4855_v49 = vadd.f32 %v4847_v39, %v12774_v35 }
0x103c   : > { %4877 = vadd.xlane.f32.xlu1 %v4876_v54 }
0x103d   : > { %v4879_v20 = vsel %vm1131_vm4, %v4855_v49, 0.0 }
0x103e   : > { %4880 = vadd.xlane.f32.xlu0 %v4879_v20 }
0x10b1   : > { %v4860_v52 = vpop.xlane.xlu1 %4859 }
0x10b2   : > { %v4882_v55 = vmul.f32 0.015625, %v4860_v52 }
0x10b3   : > { %v4863_v40 = vpop.xlane.xlu0 %4862 }
0x10b4   : > { %v13077_v33 = vsub.f32 %v4848_v4, %v4882_v55  ;;  %v4883_v6 = vmul.f32 0.015625, %v4863_v40 }
0x10b6   : > { %v13079_v58 = vsub.f32 %v4849_v26, %v4883_v6  ;;  %v4898_v0 = vmul.f32 %v13077_v33, %v13077_v33 }
0x10b8   : > { %v4906_v22 = vsel %vm1131_vm4, %v4898_v0, 0.0  ;;  %v4899_v35 = vmul.f32 %v13079_v58, %v13079_v58 }
0x10b9   : > { %v4866_v51 = vpop.xlane.xlu1 %4865  ;;  %4907 = vadd.xlane.f32.xlu1 %v4906_v22 }
0x10ba   : > { %v4884_v37 = vmul.f32 0.015625, %v4866_v51  ;;  %v4909_v47 = vsel %vm1131_vm4, %v4899_v35, 0.0  ;;  %v9510_v51 = vld [vmem:[%s11887_s16] ss:$0 sm:$0xff] }
0x10bb   : > { %v4869_v43 = vpop.xlane.xlu0 %4868  ;;  %4910 = vadd.xlane.f32.xlu0 %v4909_v47 }
0x10bc   : > { %v13087_v4 = vsub.f32 %v4850_v27, %v4884_v37  ;;  %v4885_v16 = vmul.f32 0.015625, %v4869_v43 }
0x10be   : > { %v13089_v26 = vsub.f32 %v4851_v8, %v4885_v16  ;;  %v4900_v50 = vmul.f32 %v13087_v4, %v13087_v4 }
0x10c0   : > { %v4912_v14 = vsel %vm1131_vm4, %v4900_v50, 0.0  ;;  %v4901_v10 = vmul.f32 %v13089_v26, %v13089_v26 }
0x10c1   : > { %v4872_v2 = vpop.xlane.xlu1 %4871  ;;  %4913 = vadd.xlane.f32.xlu1 %v4912_v14 }
0x10c2   : > { %v4886_v23 = vmul.f32 0.015625, %v4872_v2  ;;  %v4915_v12 = vsel %vm1131_vm4, %v4901_v10, 0.0  ;;  %v9511_v2 = vld [vmem:[%s11892_s10] ss:$0 sm:$0xff] }
0x10c3   : > { %v4875_v3 = vpop.xlane.xlu0 %4874  ;;  %4916 = vadd.xlane.f32.xlu0 %v4915_v12 }
0x10c4   : > { %v13097_v27 = vsub.f32 %v4852_v9, %v4886_v23  ;;  %v4887_v8 = vmul.f32 0.015625, %v4875_v3  ;;  %v11041_v9 = vld [vmem:[%s11820_s7] sm:$0xff]  }
0x10c5   : > { %10483 = vmatprep.subr.bf16.mxu1 %v11041_v9 }
0x10c6   : > { %v13099_v17 = vsub.f32 %v4853_v61, %v4887_v8  ;;  %v4902_v15 = vmul.f32 %v13097_v27, %v13097_v27  ;;  %10484 = vmatpush3.bf16.msra.mxu1 %v11041_v9 }
0x10c7   : > { %10485 = vmatprep.subr.bf16.mxu1 %v11042_v38 }
0x10c8   : > { %v4918_v32 = vsel %vm1131_vm4, %v4902_v15, 0.0  ;;  %v4903_v53 = vmul.f32 %v13099_v17, %v13099_v17 }
0x10c9   : > { %4919 = vadd.xlane.f32.xlu1 %v4918_v32  ;;  %v4878_v13 = vpop.xlane.xlu1 %4877 }
0x10ca   : > { %v4888_v7 = vmul.f32 0.015625, %v4878_v13  ;;  %v4921_v28 = vsel %vm1131_vm4, %v4903_v53, 0.0  ;;  %10486 = vmatpush3.bf16.msra.mxu1 %v11042_v38 }
0x10cb   : > { %4922 = vadd.xlane.f32.xlu0 %v4921_v28  ;;  %v4881_v29 = vpop.xlane.xlu0 %4880  ;;  %10487 = vmatprep.subr.bf16.mxu1 %v11043_v25 }
0x10cc   : > { %v13108_v5 = vsub.f32 %v4854_v48, %v4888_v7  ;;  %v4889_v60 = vmul.f32 0.015625, %v4881_v29 }
0x10ce   : > { %v13110_v30 = vsub.f32 %v4855_v49, %v4889_v60  ;;  %v4904_v19 = vmul.f32 %v13108_v5, %v13108_v5  ;;  %10488 = vmatpush3.bf16.msra.mxu1 %v11043_v25 }
0x10cf   : > { %10489 = vmatprep.subr.bf16.mxu1 %v11044_v31 }
0x10d0   : > { %v4924_v61 = vsel %vm1131_vm4, %v4904_v19, 0.0  ;;  %v4905_v46 = vmul.f32 %v13110_v30, %v13110_v30 }
0x10d1   : > { %4925 = vadd.xlane.f32.xlu1 %v4924_v61 }
0x10d2   : > { %v4927_v62 = vsel %vm1131_vm4, %v4905_v46, 0.0  ;;  %10490 = vmatpush3.bf16.msra.mxu1 %v11044_v31 }
0x10d3   : > { %4928 = vadd.xlane.f32.xlu0 %v4927_v62 }
0x1146   : > { %v4908_v63 = vpop.xlane.xlu1 %4907 }
0x1147   : > { %v4930_v39 = vmul.f32 0.015625, %v4908_v63 }
0x1148   : > { %v4911_v48 = vpop.xlane.xlu0 %4910 }
0x1149   : > { %v4938_v54 = vadd.f32 1e-05, %v4930_v39  ;;  %v4931_v49 = vmul.f32 0.015625, %v4911_v48 }
0x114b   : > { %11341 = vrsqrt.f32 %v4938_v54  ;;  %v4939_v20 = vadd.f32 1e-05, %v4931_v49 }
0x114d   : > { %11343 = vrsqrt.f32 %v4939_v20 }
0x114e   : > { %v4914_v52 = vpop.xlane.xlu1 %4913 }
0x114f   : > { %v4932_v55 = vmul.f32 0.015625, %v4914_v52 }
0x1150   : > { %v4917_v40 = vpop.xlane.xlu0 %4916 }
0x1151   : > { %v4940_v6 = vadd.f32 1e-05, %v4932_v55  ;;  %v4933_v0 = vmul.f32 0.015625, %v4917_v40 }
0x1153   : > { %11345 = vrsqrt.f32 %v4940_v6  ;;  %v4941_v22 = vadd.f32 1e-05, %v4933_v0 }
0x1155   : > { %v11342_v35 = vpop.eup %11341  ;;  %11347 = vrsqrt.f32 %v4941_v22 }
0x1156   : > { %v4920_v37 = vpop.xlane.xlu1 %4919  ;;  %v4954_v47 = vmul.f32 %v11342_v35, %v13077_v33 }
0x1157   : > { %v11344_v43 = vpop.eup %11343  ;;  %v4934_v16 = vmul.f32 0.015625, %v4920_v37 }
0x1158   : > { %v4923_v50 = vpop.xlane.xlu0 %4922  ;;  %v4955_v14 = vmul.f32 %v11344_v43, %v13079_v58  ;;  %v4968_v10 = vmul.f32 %v9510_v51, %v4954_v47  ;;  %v11047_v47 = vld [vmem:[%s11832_s25 + $0x44] ss:$8 sps:$4 sm:$0xff]   ;;  %v11050_v43 = vld [vmem:[%s11832_s25 + $0x54] ss:$8 sps:$4 sm:$0xff]  }
0x1159   : > { %v4942_v23 = vadd.f32 1e-05, %v4934_v16  ;;  %v4935_v12 = vmul.f32 0.015625, %v4923_v50  ;;  %5296 = vmatprep.subr.bf16.mxu1 %v11047_v47  ;;  %v11048_v16 = vld [vmem:[%s11832_s25 + $0x50] ss:$8 sps:$4 sm:$0xff]  }
0x115a   : > { %v4969_v3 = vmul.f32 %v9510_v51, %v4955_v14  ;;  %v4982_v15 = vadd.f32 %v9511_v2, %v4968_v10  ;;  %v11051_v50 = vld [vmem:[%s11832_s25 + $0x60] ss:$8 sps:$4 sm:$0xff]   ;;  %v14596_v10 = vld [vmem:[#allocation32_spill] sm:$0xff] }
0x115b   : > { %11349 = vrsqrt.f32 %v4942_v23  ;;  %v4943_v8 = vadd.f32 1e-05, %v4935_v12  ;;  %v9512_v23 = vld [vmem:[%s11826_s3] ss:$0 sm:$0xff]  ;;  %v11056_v47 = vld [vmem:[%s11832_s25 + $0x74] ss:$8 sps:$4 sm:$0xff]  }
0x115c   : > { %v4983_v32 = vadd.f32 %v9511_v2, %v4969_v3 }
0x115d   : > { %v11346_v53 = vpop.eup %11345  ;;  %11351 = vrsqrt.f32 %v4943_v8 }
0x115e   : > { %v4956_v13 = vmul.f32 %v11346_v53, %v13087_v4  ;;  %v4926_v7 = vpop.xlane.xlu1 %4925  ;;  %v4990_v33 = vpack.c.bf16 %v4983_v32, %v4982_v15 }
0x115f   : > { %v11348_v28 = vpop.eup %11347  ;;  %v4936_v29 = vmul.f32 0.015625, %v4926_v7 }
0x1160   : > { %v4970_v9 = vmul.f32 %v9510_v51, %v4956_v13  ;;  %v4957_v58 = vmul.f32 %v11348_v28, %v13089_v26  ;;  %v4929_v60 = vpop.xlane.xlu0 %4928  ;;  %10491 = vmatprep.mubr.msk.bf16.mxu1 %vm1131_vm4, %v4990_v33 }
0x1161   : > { %v4944_v19 = vadd.f32 1e-05, %v4936_v29  ;;  %v4937_v61 = vmul.f32 0.015625, %v4929_v60 }
0x1162   : > { %v4971_v46 = vmul.f32 %v9510_v51, %v4957_v58  ;;  %v4984_v38 = vadd.f32 %v9511_v2, %v4970_v9 }
0x1163   : > { %11353 = vrsqrt.f32 %v4944_v19  ;;  %v4945_v62 = vadd.f32 1e-05, %v4937_v61 }
0x1164   : > { %v4985_v25 = vadd.f32 %v9511_v2, %v4971_v46 }
0x1165   : > { %v11350_v31 = vpop.eup %11349  ;;  %11355 = vrsqrt.f32 %v4945_v62 }
0x1166   : > { %v4991_v4 = vpack.c.bf16 %v4985_v25, %v4984_v38  ;;  %v4958_v63 = vmul.f32 %v11350_v31, %v13097_v27 }
0x1167   : > { %v11352_v39 = vpop.eup %11351 }
0x1168   : > { %10492 = vmatmul.mubr.msk.bf16.vlgmr.msra.gmra.mrb[68].mxu1 %vm1131_vm4, %v4991_v4  ;;  %v4959_v26 = vmul.f32 %v11352_v39, %v13099_v17  ;;  %v4972_v48 = vmul.f32 %v9510_v51, %v4958_v63 }
0x116a   : > { %v4973_v54 = vmul.f32 %v9510_v51, %v4959_v26  ;;  %v4986_v49 = vadd.f32 %v9511_v2, %v4972_v48 }
0x116c   : > { %v4987_v20 = vadd.f32 %v9511_v2, %v4973_v54 }
0x116d   : > { %v11354_v52 = vpop.eup %11353 }
0x116e   : > { %v4992_v55 = vpack.c.bf16 %v4987_v20, %v4986_v49  ;;  %v4960_v40 = vmul.f32 %v11354_v52, %v13108_v5  ;;  %v11045_v5 = vld [vmem:[%s11832_s25 + $0x40] ss:$8 sps:$4 sm:$0xff]  }
0x116f   : > { %v11356_v6 = vpop.eup %11355  ;;  %5297 = vmatpush1.bf16.msra.mxu1 %v11045_v5  ;;  %v11054_v5 = vld [vmem:[%s11832_s25 + $0x70] ss:$8 sps:$4 sm:$0xff]  }
0x1170   : > { %10495 = vmatprep.mubr.msk.bf16.mxu1 %vm1131_vm4, %v4992_v55  ;;  %v4961_v27 = vmul.f32 %v11356_v6, %v13110_v30  ;;  %v4974_v0 = vmul.f32 %v9510_v51, %v4960_v40  ;;  %5298 = vmatprep.subr.bf16.mxu1 %v11050_v43  ;;  %v11053_v30 = vld [vmem:[%s11832_s25 + $0x64] ss:$8 sps:$4 sm:$0xff]  }
0x1172   : > { %v4975_v17 = vmul.f32 %v9510_v51, %v4961_v27  ;;  %v4988_v22 = vadd.f32 %v9511_v2, %v4974_v0  ;;  %v11565_v51 = vld [vmem:[%s11815_s22] sm:$0x3] }
0x1173   : > { %5299 = vmatpush1.bf16.msra.mxu1 %v11048_v16  ;;  %v1328_v14 = vrot.slane %v11565_v51, %v14588_v1 }
0x1174   : > { %v4989_v35 = vadd.f32 %v9511_v2, %v4975_v17  ;;  %5300 = vmatprep.subr.bf16.mxu1 %v11053_v30 }
0x1175   : > { %v1372_v2 = vadd.f32 %v14596_v10, %v1328_v14 }
0x1176   : > { %v4993_v37 = vpack.c.bf16 %v4989_v35, %v4988_v22 }
0x1177   : > { %5301 = vmatpush1.bf16.msra.mxu1 %v11051_v50  ;;  %v5113_v3 = vrot.slane %v1372_v2, %v14587_v34 }
0x1178   : > { %10496 = vmatmul.mubr.msk.bf16.gmra.mrb[72].mxu1 %vm1131_vm4, %v4993_v37  ;;  %5302 = vmatprep.subr.bf16.mxu1 %v11056_v47 }
0x1179   : > { %5328 = vmatprep.mubr.bf16.mxu1 %v14580_v24 }
0x117b   : > { %5303 = vmatpush1.bf16.msra.mxu1 %v11054_v5 }
0x123b   : > { %v10493_v12 = vpop.f32.mrb[68].mxu1 }
0x123c   : > { %v5088_v8 = vadd.f32 %v10493_v12, %v9512_v23  ;;  %v5079_v15 = vpop.f32.mrb[69].mxu1 }
0x123d   : > { %v5080_v32 = vadd.f32 %v9512_v23, %v5079_v15  ;;  %v10494_v53 = vpop.f32.mrb[70].mxu1 }
0x123e   : > { %v13147_v13 = vadd.f32 %v5113_v3, %v5088_v8  ;;  %v5091_v7 = vadd.f32 %v10494_v53, %v9512_v23  ;;  %v5082_v33 = vpop.f32.mrb[71].mxu1 }
0x123f   : > { %v13149_v28 = vadd.f32 %v5113_v3, %v5080_v32  ;;  %v5083_v29 = vadd.f32 %v9512_v23, %v5082_v33 }
0x1240   : > { %v9523_v9 = vmul.f32 -1.442695, %v13147_v13  ;;  %v13152_v58 = vadd.f32 %v5113_v3, %v5091_v7 }
0x1241   : > { %v9521_v60 = vmul.f32 -1.442695, %v13149_v28  ;;  %v13155_v19 = vadd.f32 %v5113_v3, %v5083_v29 }
0x1242   : > { %11357 = vpow2.f32 %v9523_v9  ;;  %v9524_v61 = vmul.f32 -1.442695, %v13152_v58 }
0x1243   : > { %11359 = vpow2.f32 %v9521_v60  ;;  %v9522_v46 = vmul.f32 -1.442695, %v13155_v19 }
0x1244   : > { %11361 = vpow2.f32 %v9524_v61 }
0x1245   : > { %11363 = vpow2.f32 %v9522_v46 }
0x124b   : > { %v10497_v62 = vpop.f32.mrb[72].mxu1 }
0x124c   : > { %v11358_v38 = vpop.eup %11357  ;;  %v5104_v25 = vadd.f32 %v10497_v62, %v9512_v23  ;;  %v5095_v31 = vpop.f32.mrb[73].mxu1 }
0x124d   : > { %v11360_v4 = vpop.eup %11359  ;;  %v5096_v63 = vadd.f32 %v9512_v23, %v5095_v31  ;;  %v10498_v39 = vpop.f32.mrb[74].mxu1  ;;  %v5156_v20 = vadd.f32 1.0, %v11358_v38 }
0x124e   : > { %v5154_v26 = vadd.f32 1.0, %v11360_v4  ;;  %v13159_v48 = vadd.f32 %v5113_v3, %v5104_v25  ;;  %v5107_v54 = vadd.f32 %v10498_v39, %v9512_v23  ;;  %v5098_v49 = vpop.f32.mrb[75].mxu1  ;;  %v11362_v40 = vpop.eup %11361 }
0x124f   : > { %v13161_v52 = vadd.f32 %v5113_v3, %v5096_v63  ;;  %v5099_v55 = vadd.f32 %v9512_v23, %v5098_v49  ;;  %v11364_v27 = vpop.eup %11363  ;;  %v5157_v37 = vadd.f32 1.0, %v11362_v40 }
0x1250   : > { %11365 = vrcp.f32 %v5154_v26  ;;  %v13163_v6 = vadd.f32 %v5113_v3, %v5107_v54  ;;  %v9527_v0 = vmul.f32 -1.442695, %v13159_v48  ;;  %v5155_v22 = vadd.f32 1.0, %v11364_v27 }
0x1251   : > { %v13166_v17 = vadd.f32 %v5113_v3, %v5099_v55  ;;  %v9525_v35 = vmul.f32 -1.442695, %v13161_v52  ;;  %11367 = vrcp.f32 %v5156_v20 }
0x1252   : > { %11369 = vrcp.f32 %v5155_v22  ;;  %v9528_v43 = vmul.f32 -1.442695, %v13163_v6 }
0x1253   : > { %11371 = vpow2.f32 %v9527_v0  ;;  %v9526_v16 = vmul.f32 -1.442695, %v13166_v17 }
0x1254   : > { %11373 = vpow2.f32 %v9525_v35  ;;  %v9537_v35 = vld [vmem:[%s14557_s1 + $0x2] sm:$0x3] }
0x1255   : > { %11375 = vrcp.f32 %v5157_v37  ;;  %v5237_v37 = vrot.slane %v9537_v35, %v14587_v34  ;;  %v5241_v47 = vrot.slane %v9537_v35, %v14588_v1 }
0x1256   : > { %11377 = vpow2.f32 %v9528_v43 }
0x1257   : > { %11379 = vpow2.f32 %v9526_v16 }
0x125a   : > { %v11366_v30 = vpop.eup %11365 }
0x125b   : > { %5186 = vrot.lane.b32.xlu1 %v11366_v30, %s11607_s4  ;;  %v11368_v50 = vpop.eup %11367 }
0x125c   : > { %v11370_v51 = vpop.eup %11369 }
0x125d   : > { %v11372_v14 = vpop.eup %11371  ;;  %5188 = vrot.lane.b32.xlu0 %v11370_v51, %s11607_s4 }
0x125e   : > { %v11374_v10 = vpop.eup %11373  ;;  %v5160_v12 = vadd.f32 1.0, %v11372_v14 }
0x125f   : > { %5190 = vrot.lane.b32.xlu1 %v11368_v50, %s11607_s4  ;;  %v5158_v2 = vadd.f32 1.0, %v11374_v10  ;;  %v11376_v23 = vpop.eup %11375 }
0x1260   : > { %v11378_v3 = vpop.eup %11377 }
0x1261   : > { %11381 = vrcp.f32 %v5158_v2  ;;  %v11380_v8 = vpop.eup %11379  ;;  %v5161_v32 = vadd.f32 1.0, %v11378_v3 }
0x1262   : > { %v5159_v15 = vadd.f32 1.0, %v11380_v8  ;;  %11383 = vrcp.f32 %v5160_v12 }
0x1263   : > { %5192 = vrot.lane.b32.xlu1 %v11376_v23, %s11607_s4 }
0x1264   : > { %11385 = vrcp.f32 %v5159_v15 }
0x1265   : > { %11387 = vrcp.f32 %v5161_v32 }
0x1266   : > { %11389 = vtanh.f32 %v13149_v28 }
0x1267   : > { %11391 = vtanh.f32 %v13155_v19 }
0x1268   : > { %11393 = vtanh.f32 %v13152_v58 }
0x1269   : > { %11395 = vtanh.f32 %v13147_v13 }
0x126a   : > { %11397 = vtanh.f32 %v13161_v52 }
0x126b   : > { %v11382_v53 = vpop.eup %11381  ;;  %11399 = vtanh.f32 %v13166_v17 }
0x126c   : > { %5194 = vrot.lane.b32.xlu0 %v11382_v53, %s11607_s4  ;;  %v11384_v7 = vpop.eup %11383  ;;  %11401 = vtanh.f32 %v13163_v6 }
0x126d   : > { %11403 = vtanh.f32 %v13159_v48 }
0x126e   : > { %v11386_v33 = vpop.eup %11385 }
0x126f   : > { %5196 = vrot.lane.b32.xlu1 %v11386_v33, %s11607_s4  ;;  %v11388_v29 = vpop.eup %11387 }
0x1270   : > { %5198 = vrot.lane.b32.xlu0 %v11384_v7, %s11607_s4  ;;  %v11390_v60 = vpop.eup %11389 }
0x1271   : > { %v11392_v61 = vpop.eup %11391 }
0x1272   : > { %v11394_v28 = vpop.eup %11393 }
0x1273   : > { %5200 = vrot.lane.b32.xlu1 %v11388_v29, %s11607_s4  ;;  %v11396_v13 = vpop.eup %11395 }
0x1274   : > { %v11398_v26 = vpop.eup %11397 }
0x1275   : > { %v11400_v54 = vpop.eup %11399 }
0x1276   : > { %v11402_v27 = vpop.eup %11401 }
0x1277   : > { %v11404_v6 = vpop.eup %11403 }
0x12cd   : > { %v5187_v9 = vpop.permute.xlu1 %5186 }
0x12ce   : > { %v13185_v38 = vmul.f32 %v11390_v60, %v5187_v9 }
0x12cf   : > { %v5189_v46 = vpop.permute.xlu0 %5188 }
0x12d0   : > { %v13187_v25 = vmul.f32 %v11392_v61, %v5189_v46 }
0x12d1   : > { %v5191_v62 = vpop.permute.xlu1 %5190 }
0x12d2   : > { %v5218_v31 = vpack.c.bf16 %v13187_v25, %v13185_v38  ;;  %v13197_v19 = vmul.f32 %v11396_v13, %v5191_v62 }
0x12d4   : > { %9546 = vmatmul.mubr.msk.bf16.vlgmr.msra.gmra.mrb[76].mxu1 %vm1131_vm4, %v5218_v31 }
0x12d5   : > { %v5193_v4 = vpop.permute.xlu1 %5192  ;;  %5338 = vmatprep.mubr.bf16.mxu1 %v14580_v24 }
0x12d6   : > { %v13193_v58 = vmul.f32 %v11394_v28, %v5193_v4 }
0x12d8   : > { %v5219_v63 = vpack.c.bf16 %v13193_v58, %v13197_v19 }
0x12dc   : > { %9547 = vmatmul.mubr.msk.bf16.gmra.mrb[80].mxu1 %vm1131_vm4, %v5219_v63 }
0x12dd   : > { %5348 = vmatprep.mubr.bf16.mxu1 %v14580_v24 }
0x12de   : > { %v5195_v39 = vpop.permute.xlu0 %5194 }
0x12df   : > { %v13205_v20 = vmul.f32 %v11398_v26, %v5195_v39 }
0x12e1   : > { %v5197_v49 = vpop.permute.xlu1 %5196 }
0x12e2   : > { %v13207_v52 = vmul.f32 %v11400_v54, %v5197_v49  ;;  %v5199_v0 = vpop.permute.xlu0 %5198 }
0x12e3   : > { %v13215_v17 = vmul.f32 %v11404_v6, %v5199_v0 }
0x12e4   : > { %v5220_v55 = vpack.c.bf16 %v13207_v52, %v13205_v20 }
0x12e5   : > { %v5201_v40 = vpop.permute.xlu1 %5200 }
0x12e6   : > { %9548 = vmatmul.mubr.msk.bf16.gmra.mrb[84].mxu1 %vm1131_vm4, %v5220_v55  ;;  %v13213_v48 = vmul.f32 %v11402_v27, %v5201_v40 }
0x12e7   : > { %5358 = vmatprep.mubr.bf16.mxu1 %v14580_v24 }
0x12e8   : > { %v5221_v22 = vpack.c.bf16 %v13213_v48, %v13215_v17 }
0x12ee   : > { %9549 = vmatmul.mubr.msk.bf16.gmra.mrb[88].mxu1 %vm1131_vm4, %v5221_v22 }
0x13a7   : > { %v5330_v5 = vpop.f32.mrb[76].mxu1 }
0x13a8   : > { %v5332_v43 = vpop.f32.mrb[77].mxu1  ;;  %v5331_v30 = vadd.f32 %v5330_v5, %v5237_v37 }
0x13a9   : > { %v5334_v16 = vpop.f32.mrb[78].mxu1  ;;  %v5333_v14 = vadd.f32 %v5332_v43, %v5241_v47 }
0x13aa   : > { %v5335_v50 = vadd.f32 %v5334_v16, %v5237_v37  ;;  %v5336_v51 = vpop.f32.mrb[79].mxu1 }
0x13ab   : > { %v5337_v10 = vadd.f32 %v5336_v51, %v5241_v47 }
0x13ac   : > { %v13223_v2 = vpack.c.bf16 %v5335_v50, %v5331_v30 }
0x13ad   : > { %v13225_v23 = vpack.c.bf16 %v5337_v10, %v5333_v14 }
0x13ae   : > { %5399 = vrot.lane.b32.xlu0 %v13223_v2, %s11607_s4  ;;  %10507 = vmatprep.mubr.msk.bf16.mxu0 %vm1808_vm5, %v13223_v2 }
0x13af   : > { %v5340_v12 = vpop.f32.mrb[80].mxu1 }
0x13b0   : > { %v5342_v3 = vpop.f32.mrb[81].mxu1  ;;  %v5341_v15 = vadd.f32 %v5340_v12, %v5237_v37 }
0x13b1   : > { %v5344_v8 = vpop.f32.mrb[82].mxu1  ;;  %v5343_v7 = vadd.f32 %v5342_v3, %v5241_v47 }
0x13b2   : > { %v5345_v32 = vadd.f32 %v5344_v8, %v5237_v37  ;;  %v5346_v53 = vpop.f32.mrb[83].mxu1 }
0x13b3   : > { %v5347_v33 = vadd.f32 %v5346_v53, %v5241_v47 }
0x13b4   : > { %v13231_v29 = vpack.c.bf16 %v5345_v32, %v5341_v15 }
0x13b5   : > { %v13233_v9 = vpack.c.bf16 %v5347_v33, %v5343_v7 }
0x13b6   : > { %5401 = vrot.lane.b32.xlu1 %v13231_v29, %s11607_s4 }
0x13b9   : > { %v5350_v60 = vpop.f32.mrb[84].mxu1 }
0x13ba   : > { %v5352_v61 = vpop.f32.mrb[85].mxu1  ;;  %v5351_v62 = vadd.f32 %v5350_v60, %v5237_v37 }
0x13bb   : > { %v5354_v46 = vpop.f32.mrb[86].mxu1  ;;  %v5353_v28 = vadd.f32 %v5352_v61, %v5241_v47 }
0x13bc   : > { %v5355_v31 = vadd.f32 %v5354_v46, %v5237_v37  ;;  %v5356_v4 = vpop.f32.mrb[87].mxu1 }
0x13bd   : > { %v5357_v13 = vadd.f32 %v5356_v4, %v5241_v47 }
0x13be   : > { %v13237_v63 = vpack.c.bf16 %v5355_v31, %v5351_v62 }
0x13bf   : > { %v13239_v39 = vpack.c.bf16 %v5357_v13, %v5353_v28 }
0x13c0   : > { %5403 = vrot.lane.b32.xlu0 %v13237_v63, %s11607_s4 }
0x13c1   : > { %v5360_v26 = vpop.f32.mrb[88].mxu1 }
0x13c2   : > { %v5362_v54 = vpop.f32.mrb[89].mxu1  ;;  %v5361_v55 = vadd.f32 %v5360_v26, %v5237_v37 }
0x13c3   : > { %v5364_v49 = vpop.f32.mrb[90].mxu1  ;;  %v5363_v0 = vadd.f32 %v5362_v54, %v5241_v47 }
0x13c4   : > { %v5365_v40 = vadd.f32 %v5364_v49, %v5237_v37  ;;  %v5366_v27 = vpop.f32.mrb[91].mxu1 }
0x13c5   : > { %v5367_v6 = vadd.f32 %v5366_v27, %v5241_v47 }
0x13c6   : > { %v13243_v22 = vpack.c.bf16 %v5365_v40, %v5361_v55 }
0x13c7   : > { %v13245_v35 = vpack.c.bf16 %v5367_v6, %v5363_v0 }
0x13c8   : > { %5405 = vrot.lane.b32.xlu1 %v13243_v22, %s11607_s4 }
0x1420   : > { %v5400_v5 = vpop.permute.xlu0 %5399 }
0x1421   : > { %10860 = vmatprep.subr.msk.bf16.mxu0 %vm1808_vm5, %v5400_v5  ;;  %v5420_v43 = vsel %vm1808_vm5, %v5400_v5, 0 }
0x1422   : > { %10500 = vmatpush3.bf16.xpose.msra.mxu0 %v5420_v43 }
0x1428   : > { %v5402_v16 = vpop.permute.xlu1 %5401 }
0x1429   : > { %10861 = vmatprep.subr.msk.bf16.mxu0 %vm1808_vm5, %v5402_v16  ;;  %v5423_v37 = vsel %vm1808_vm5, %v5402_v16, 0 }
0x142a   : > { %10502 = vmatpush3.bf16.xpose.msra.mxu0 %v5423_v37 }
0x1432   : > { %v5404_v47 = vpop.permute.xlu0 %5403 }
0x1433   : > { %10862 = vmatprep.subr.msk.bf16.mxu0 %vm1808_vm5, %v5404_v47  ;;  %v5426_v30 = vsel %vm1808_vm5, %v5404_v47, 0 }
0x1434   : > { %10504 = vmatpush3.bf16.xpose.msra.mxu0 %v5426_v30 }
0x143a   : > { %v5406_v50 = vpop.permute.xlu1 %5405 }
0x143b   : > { %10863 = vmatprep.subr.msk.bf16.mxu0 %vm1808_vm5, %v5406_v50  ;;  %v5429_v51 = vsel %vm1808_vm5, %v5406_v50, 0 }
0x143c   : > { %10506 = vmatpush3.bf16.xpose.msra.mxu0 %v5429_v51 }
0x143d   : > { %10515 = vmatprep.subr.bf16.mxu0 %v13225_v23 }
0x1443   : > { %10508 = vmatmul.mubr.msk.bf16.vlgmr.msra.gmra.mrb[104].mxu0 %vm1808_vm5, %v13231_v29 }
0x1444   : > { %10511 = vmatprep.mubr.msk.bf16.mxu0 %vm1808_vm5, %v13237_v63  ;;  %10516 = vmatpush3.bf16.msra.mxu0 %v13225_v23 }
0x1445   : > { %10517 = vmatprep.subr.bf16.mxu0 %v13233_v9 }
0x1448   : > { %10518 = vmatpush3.bf16.msra.mxu0 %v13233_v9 }
0x1449   : > { %10519 = vmatprep.subr.bf16.mxu0 %v13239_v39 }
0x144b   : > { %10512 = vmatmul.mubr.msk.bf16.gmra.mrb[108].mxu0 %vm1808_vm5, %v13243_v22 }
0x144c   : > { %10520 = vmatpush3.bf16.msra.mxu0 %v13239_v39 }
0x144d   : > { %10521 = vmatprep.subr.bf16.mxu0 %v13245_v35 }
0x1450   : > { %10522 = vmatpush3.bf16.msra.mxu0 %v13245_v35 }
0x1516   : > { %v10509_v14 = vpop.f32.mrb[104].mxu0 }
0x1517   : > { %v5465_v10 = vpop.f32.mrb[105].mxu0  ;;  %v5498_v32 = vsel %vm12162_vm7, %v10509_v14, -10000.0 }
0x1518   : > { %v5496_v12 = vsel %vm12158_vm6, %v5465_v10, -10000.0  ;;  %v10510_v3 = vpop.f32.mrb[106].mxu0  ;;  %v5510_v33 = vsel %vm1131_vm4, %v5498_v32, -inf }
0x1519   : > { %v5504_v8 = vsel %vm1131_vm4, %v5496_v12, -inf  ;;  %v5468_v15 = vpop.f32.mrb[107].mxu0  ;;  %v5499_v61 = vsel %vm12179_vm9, %v10510_v3, -10000.0 }
0x151a   : > { %v5497_v53 = vsel %vm12167_vm8, %v5468_v15, -10000.0  ;;  %5505 = vmax.xlane.f32.xlu0 %v5504_v8  ;;  %v5513_v13 = vsel %vm1131_vm4, %v5499_v61, -inf }
0x151b   : > { %v5507_v7 = vsel %vm1131_vm4, %v5497_v53, -inf }
0x151c   : > { %5508 = vmax.xlane.f32.xlu1 %v5507_v7 }
0x151e   : > { %5511 = vmax.xlane.f32.xlu0 %v5510_v33  ;;  %v10513_v46 = vpop.f32.mrb[108].mxu0 }
0x151f   : > { %v5481_v62 = vpop.f32.mrb[109].mxu0  ;;  %v5502_v55 = vsel %vm12193_vm11, %v10513_v46, -10000.0 }
0x1520   : > { %v13284_v4 = vsel %vm12187_vm10, %v5481_v62, -10000.0  ;;  %v10514_v28 = vpop.f32.mrb[110].mxu0  ;;  %v5522_v0 = vsel %vm1131_vm4, %v5502_v55, -inf }
0x1521   : > { %v5516_v26 = vsel %vm1131_vm4, %v13284_v4, -inf  ;;  %v5484_v54 = vpop.f32.mrb[111].mxu0  ;;  %v5503_v43 = vsel %vm12213_vm13, %v10514_v28, -10000.0 }
0x1522   : > { %v5501_v27 = vsel %vm12198_vm12, %v5484_v54, -10000.0  ;;  %5514 = vmax.xlane.f32.xlu0 %v5513_v13  ;;  %5517 = vmax.xlane.f32.xlu1 %v5516_v26  ;;  %v5525_v16 = vsel %vm1131_vm4, %v5503_v43, -inf }
0x1523   : > { %v5519_v6 = vsel %vm1131_vm4, %v5501_v27, -inf }
0x1526   : > { %5523 = vmax.xlane.f32.xlu1 %v5522_v0  ;;  %5520 = vmax.xlane.f32.xlu0 %v5519_v6 }
0x152a   : > { %5526 = vmax.xlane.f32.xlu0 %v5525_v16 }
0x15a7   : > { %v5506_v37 = vpop.xlane.xlu0 %5505 }
0x15a8   : > { %v5528_v47 = vsub.f32 %v5496_v12, %v5506_v37 }
0x15a9   : > { %v5509_v30 = vpop.xlane.xlu1 %5508 }
0x15aa   : > { %v5536_v14 = vmul.f32 1.442695, %v5528_v47  ;;  %v5529_v10 = vsub.f32 %v5497_v53, %v5509_v30 }
0x15ab   : > { %v5512_v50 = vpop.xlane.xlu0 %5511 }
0x15ac   : > { %v5530_v51 = vsub.f32 %v5498_v32, %v5512_v50  ;;  %v5538_v7 = vmul.f32 1.442695, %v5529_v10 }
0x15ae   : > { %v5540_v3 = vmul.f32 1.442695, %v5530_v51 }
0x15af   : > { %v5515_v8 = vpop.xlane.xlu0 %5514  ;;  %v5518_v50 = vpop.xlane.xlu1 %5517 }
0x15b0   : > { %11405 = vpow2.f32 %v5540_v3  ;;  %v5531_v15 = vsub.f32 %v5499_v61, %v5515_v8  ;;  %v5532_v10 = vsub.f32 %v13284_v4, %v5518_v50 }
0x15b1   : > { %11407 = vpow2.f32 %v5536_v14 }
0x15b2   : > { %v5542_v33 = vmul.f32 1.442695, %v5531_v15  ;;  %v5544_v8 = vmul.f32 1.442695, %v5532_v10 }
0x15b3   : > { %v5521_v46 = vpop.xlane.xlu0 %5520  ;;  %v5524_v51 = vpop.xlane.xlu1 %5523 }
0x15b4   : > { %11409 = vpow2.f32 %v5542_v33  ;;  %v5533_v62 = vsub.f32 %v5501_v27, %v5521_v46  ;;  %v5534_v14 = vsub.f32 %v5502_v55, %v5524_v51 }
0x15b5   : > { %11411 = vpow2.f32 %v5538_v7 }
0x15b6   : > { %v5546_v12 = vmul.f32 1.442695, %v5533_v62  ;;  %v5548_v3 = vmul.f32 1.442695, %v5534_v14 }
0x15b7   : > { %v5527_v28 = vpop.xlane.xlu0 %5526 }
0x15b8   : > { %v5535_v13 = vsub.f32 %v5503_v43, %v5527_v28 }
0x15ba   : > { %v13298_v26 = vpop.eup %11405  ;;  %v5550_v54 = vmul.f32 1.442695, %v5535_v13 }
0x15bb   : > { %v5558_v32 = vsel %vm1131_vm4, %v13298_v26, 0.0  ;;  %v13302_v53 = vpop.eup %11407 }
0x15bc   : > { %11413 = vpow2.f32 %v5550_v54  ;;  %5559 = vadd.xlane.f32.xlu1 %v5558_v32  ;;  %v5552_v0 = vsel %vm1131_vm4, %v13302_v53, 0.0 }
0x15bd   : > { %11415 = vpow2.f32 %v5546_v12 }
0x15be   : > { %v11410_v61 = vpop.eup %11409  ;;  %11417 = vpow2.f32 %v5548_v3 }
0x15bf   : > { %v5561_v27 = vsel %vm1131_vm4, %v11410_v61, 0.0  ;;  %v11412_v6 = vpop.eup %11411  ;;  %11419 = vpow2.f32 %v5544_v8 }
0x15c0   : > { %5553 = vadd.xlane.f32.xlu1 %v5552_v0  ;;  %5562 = vadd.xlane.f32.xlu0 %v5561_v27  ;;  %v5555_v43 = vsel %vm1131_vm4, %v11412_v6, 0.0 }
0x15c4   : > { %5556 = vadd.xlane.f32.xlu0 %v5555_v43 }
0x15c6   : > { %v13308_v16 = vpop.eup %11413 }
0x15c7   : > { %v5573_v37 = vsel %vm1131_vm4, %v13308_v16, 0.0  ;;  %v13312_v47 = vpop.eup %11415 }
0x15c8   : > { %5574 = vadd.xlane.f32.xlu0 %v5573_v37  ;;  %v5567_v30 = vsel %vm1131_vm4, %v13312_v47, 0.0  ;;  %v13327_v15 = vpop.eup %11417 }
0x15c9   : > { %v5570_v4 = vsel %vm1131_vm4, %v13327_v15, 0.0  ;;  %v13333_v55 = vpop.eup %11419 }
0x15ca   : > { %v5564_v7 = vsel %vm1131_vm4, %v13333_v55, 0.0 }
0x15cc   : > { %5568 = vadd.xlane.f32.xlu0 %v5567_v30 }
0x15d1   : > { %5776 = vrot.lane.b32.xlu1 %v13223_v2, %s11608_s24 }
0x15e2   : > { %5778 = vrot.lane.b32.xlu0 %v13231_v29, %s11608_s24 }
0x15e6   : > { %5768 = vrot.lane.b32.xlu0 %v13223_v2, %s11609_s11 }
0x15ea   : > { %5772 = vrot.lane.b32.xlu0 %v13237_v63, %s11609_s11 }
0x15ee   : > { %6169 = vrot.lane.b32.xlu0 %v13223_v2, %s11610_s14 }
0x15f2   : > { %6173 = vrot.lane.b32.xlu0 %v13237_v63, %s11610_s14 }
0x15f5   : > { %5571 = vadd.xlane.f32.xlu1 %v5570_v4 }
0x15f6   : > { %6161 = vrot.lane.b32.xlu0 %v13223_v2, %s11611_s15 }
0x15f9   : > { %5565 = vadd.xlane.f32.xlu1 %v5564_v7 }
0x15fa   : > { %6165 = vrot.lane.b32.xlu0 %v13237_v63, %s11611_s15 }
0x160a   : > { %5780 = vrot.lane.b32.xlu1 %v13237_v63, %s11608_s24 }
0x160e   : > { %5782 = vrot.lane.b32.xlu1 %v13243_v22, %s11608_s24 }
0x1612   : > { %5770 = vrot.lane.b32.xlu1 %v13231_v29, %s11609_s11 }
0x1616   : > { %5774 = vrot.lane.b32.xlu1 %v13243_v22, %s11609_s11 }
0x161a   : > { %6171 = vrot.lane.b32.xlu1 %v13231_v29, %s11610_s14 }
0x161e   : > { %6175 = vrot.lane.b32.xlu1 %v13243_v22, %s11610_s14 }
0x1622   : > { %6163 = vrot.lane.b32.xlu1 %v13231_v29, %s11611_s15 }
0x1626   : > { %6167 = vrot.lane.b32.xlu1 %v13243_v22, %s11611_s15 }
0x1649   : > { %v5560_v33 = vpop.xlane.xlu1 %5559 }
0x164d   : > { %v5554_v46 = vpop.xlane.xlu1 %5553  ;;  %v5563_v62 = vpop.xlane.xlu0 %5562 }
0x164e   : > { %11421 = vrcp.f32 %v5563_v62 }
0x164f   : > { %11423 = vrcp.f32 %v5554_v46 }
0x1650   : > { %11425 = vrcp.f32 %v5560_v33 }
0x1651   : > { %v5777_v28 = vpop.permute.xlu1 %5776  ;;  %v5557_v13 = vpop.xlane.xlu0 %5556 }
0x1652   : > { %11427 = vrcp.f32 %v5557_v13  ;;  %10864 = vmatprep.subr.msk.bf16.mxu0 %vm1808_vm5, %v5777_v28  ;;  %v5797_v3 = vsel %vm1808_vm5, %v5777_v28, 0 }
0x1655   : > { %v5575_v12 = vpop.xlane.xlu0 %5574 }
0x1658   : > { %v11422_v54 = vpop.eup %11421 }
0x1659   : > { %v11424_v32 = vpop.eup %11423  ;;  %v5587_v43 = vmul.f32 %v11422_v54, %v11410_v61  ;;  %v5569_v37 = vpop.xlane.xlu0 %5568 }
0x165a   : > { %v11426_v0 = vpop.eup %11425  ;;  %v5584_v30 = vmul.f32 %v11424_v32, %v13302_v53 }
0x165b   : > { %v5586_v51 = vmul.f32 %v11426_v0, %v13298_v26 }
0x165c   : > { %v11428_v27 = vpop.eup %11427 }
0x165d   : > { %v5585_v50 = vmul.f32 %v11428_v27, %v11412_v6  ;;  %v5593_v10 = vpack.c.bf16 %v5587_v43, %v5586_v51  ;;  %v5779_v8 = vpop.permute.xlu0 %5778 }
0x165e   : > { %v5800_v61 = vsel %vm1808_vm5, %v5779_v8, 0 }
0x165f   : > { %v5592_v14 = vpack.c.bf16 %v5585_v50, %v5584_v30 }
0x1661   : > { %10523 = vmatprep.mubr.msk.bf16.mxu0 %vm1131_vm4, %v5592_v14  ;;  %v5769_v53 = vpop.permute.xlu0 %5768 }
0x1662   : > { %10524 = vmatmul.mubr.msk.bf16.vlgmr.msra.gmra.mrb[112].mxu0 %vm1131_vm4, %v5593_v10 }
0x1663   : > { %10542 = vmatpush3.bf16.xpose.msra.mxu0 %v5797_v3 }
0x1664   : > { %10865 = vmatprep.subr.msk.bf16.mxu0 %vm1808_vm5, %v5779_v8 }
0x1665   : > { %v5773_v46 = vpop.permute.xlu0 %5772 }
0x166b   : > { %10544 = vmatpush3.bf16.xpose.msra.mxu0 %v5800_v61 }
0x1682   : > { %v5572_v4 = vpop.xlane.xlu1 %5571 }
0x1683   : > { %11429 = vrcp.f32 %v5572_v4  ;;  %v11057_v4 = vld [vmem:[%s11849_s8 + $0x20] sm:$0xff]  }
0x1684   : > { %11431 = vrcp.f32 %v5569_v37  ;;  %v6170_v37 = vpop.permute.xlu0 %6169  ;;  %10531 = vmatprep.subr.bf16.mxu1 %v11057_v4 }
0x1685   : > { %11433 = vrcp.f32 %v5575_v12  ;;  %10532 = vmatpush3.bf16.msra.mxu1 %v11057_v4 }
0x1686   : > { %v5566_v26 = vpop.xlane.xlu1 %5565 }
0x1687   : > { %11435 = vrcp.f32 %v5566_v26 }
0x168a   : > { %v5781_v6 = vpop.permute.xlu1 %5780 }
0x168b   : > { %10866 = vmatprep.subr.msk.bf16.mxu0 %vm1808_vm5, %v5781_v6  ;;  %v5803_v7 = vsel %vm1808_vm5, %v5781_v6, 0 }
0x168c   : > { %10546 = vmatpush3.bf16.xpose.msra.mxu0 %v5803_v7 }
0x168d   : > { %v11430_v33 = vpop.eup %11429 }
0x168e   : > { %v5783_v62 = vpop.permute.xlu1 %5782  ;;  %v11432_v28 = vpop.eup %11431  ;;  %v5590_v32 = vmul.f32 %v11430_v33, %v13327_v15 }
0x168f   : > { %10867 = vmatprep.subr.msk.bf16.mxu0 %vm1808_vm5, %v5783_v62  ;;  %v11434_v13 = vpop.eup %11433  ;;  %v5589_v0 = vmul.f32 %v11432_v28, %v13312_v47  ;;  %v5806_v27 = vsel %vm1808_vm5, %v5783_v62, 0  ;;  %v6190_v47 = vsel %vm1808_vm5, %v6170_v37, 0 }
0x1690   : > { %v5591_v43 = vmul.f32 %v11434_v13, %v13308_v16  ;;  %v6174_v16 = vpop.permute.xlu0 %6173 }
0x1691   : > { %v11436_v54 = vpop.eup %11435  ;;  %v6196_v3 = vsel %vm1808_vm5, %v6174_v16, 0 }
0x1692   : > { %v5588_v12 = vmul.f32 %v11436_v54, %v13333_v55  ;;  %v5771_v30 = vpop.permute.xlu1 %5770  ;;  %v5595_v51 = vpack.c.bf16 %v5591_v43, %v5590_v32 }
0x1694   : > { %10548 = vmatpush3.bf16.xpose.msra.mxu0 %v5806_v27  ;;  %v5594_v50 = vpack.c.bf16 %v5589_v0, %v5588_v12  ;;  %v6162_v14 = vpop.permute.xlu0 %6161 }
0x1695   : > { %10868 = vmatprep.subr.msk.bf16.mxu0 %vm1808_vm5, %v6170_v37 }
0x1696   : > { %10527 = vmatprep.mubr.msk.bf16.mxu0 %vm1131_vm4, %v5594_v50  ;;  %v5775_v15 = vpop.permute.xlu1 %5774 }
0x1697   : > { %10528 = vmatmul.mubr.msk.bf16.gmra.mrb[116].mxu0 %vm1131_vm4, %v5595_v51 }
0x1698   : > { %10549 = vmatprep.mubr.msk.bf16.mxu0 %vm1808_vm5, %v5769_v53  ;;  %v6166_v53 = vpop.permute.xlu0 %6165 }
0x169a   : > { %v6172_v55 = vpop.permute.xlu1 %6171 }
0x169b   : > { %v6193_v10 = vsel %vm1808_vm5, %v6172_v55, 0 }
0x169e   : > { %v6176_v8 = vpop.permute.xlu1 %6175 }
0x169f   : > { %10550 = vmatmul.mubr.msk.bf16.vlgmr.msra.gmra.mrb[120].mxu0 %vm1808_vm5, %v5771_v30  ;;  %v6199_v61 = vsel %vm1808_vm5, %v6176_v8, 0 }
0x16a0   : > { %10584 = vmatpush3.bf16.xpose.msra.mxu0 %v6190_v47  ;;  %10553 = vmatprep.mubr.msk.bf16.mxu0 %vm1808_vm5, %v5773_v46 }
0x16a1   : > { %10869 = vmatprep.subr.msk.bf16.mxu0 %vm1808_vm5, %v6172_v55 }
0x16a2   : > { %v6164_v26 = vpop.permute.xlu1 %6163 }
0x16a6   : > { %v6168_v6 = vpop.permute.xlu1 %6167 }
0x16a7   : > { %10554 = vmatmul.mubr.msk.bf16.gmra.mrb[124].mxu0 %vm1808_vm5, %v5775_v15 }
0x16a8   : > { %10586 = vmatpush3.bf16.xpose.msra.mxu0 %v6193_v10  ;;  %10591 = vmatprep.mubr.msk.bf16.mxu0 %vm1808_vm5, %v6162_v14 }
0x16a9   : > { %10870 = vmatprep.subr.msk.bf16.mxu0 %vm1808_vm5, %v6174_v16 }
0x16b0   : > { %10588 = vmatpush3.bf16.xpose.msra.mxu0 %v6196_v3 }
0x16b1   : > { %10871 = vmatprep.subr.msk.bf16.mxu0 %vm1808_vm5, %v6176_v8 }
0x16b8   : > { %10590 = vmatpush3.bf16.xpose.msra.mxu0 %v6199_v61 }
0x16bf   : > { %10592 = vmatmul.mubr.msk.bf16.vlgmr.msra.gmra.mrb[128].mxu0 %vm1808_vm5, %v6164_v26 }
0x16c0   : > { %10595 = vmatprep.mubr.msk.bf16.mxu0 %vm1808_vm5, %v6166_v53 }
0x16c7   : > { %10596 = vmatmul.mubr.msk.bf16.gmra.mrb[132].mxu0 %vm1808_vm5, %v6168_v6 }
0x1735   : > { %v10525_v7 = vpop.f32.mrb[112].mxu0 }
0x1736   : > { %v5642_v33 = vpop.f32.mrb[113].mxu0 }
0x1737   : > { %v10526_v46 = vpop.f32.mrb[114].mxu0 }
0x1738   : > { %v5674_v62 = vpack.c.bf16 %v10526_v46, %v10525_v7  ;;  %v5645_v28 = vpop.f32.mrb[115].mxu0 }
0x1739   : > { %v5673_v13 = vpack.c.bf16 %v5645_v28, %v5642_v33 }
0x173b   : > { %10533 = vmatprep.mubr.msk.bf16.mxu1 %vm1808_vm5, %v5673_v13 }
0x173c   : > { %10534 = vmatmul.mubr.msk.bf16.vlgmr.msra.gmra.mrb[92].mxu1 %vm1808_vm5, %v5674_v62 }
0x176a   : > { %v10529_v54 = vpop.f32.mrb[116].mxu0 }
0x176b   : > { %v5658_v32 = vpop.f32.mrb[117].mxu0 }
0x176c   : > { %v10530_v12 = vpop.f32.mrb[118].mxu0 }
0x176d   : > { %v5676_v0 = vpack.c.bf16 %v10530_v12, %v10529_v54  ;;  %v5661_v27 = vpop.f32.mrb[119].mxu0 }
0x176e   : > { %v5675_v43 = vpack.c.bf16 %v5661_v27, %v5658_v32 }
0x1770   : > { %10537 = vmatprep.mubr.msk.bf16.mxu1 %vm1808_vm5, %v5675_v43 }
0x1771   : > { %10538 = vmatmul.mubr.msk.bf16.gmra.mrb[96].mxu1 %vm1808_vm5, %v5676_v0 }
0x1772   : > { %v10551_v37 = vpop.f32.mrb[120].mxu0 }
0x1773   : > { %v5842_v30 = vpop.f32.mrb[121].mxu0  ;;  %v5875_v55 = vsel %vm12162_vm7, %v10551_v37, -10000.0 }
0x1774   : > { %v5873_v50 = vsel %vm12158_vm6, %v5842_v30, -10000.0  ;;  %v10552_v51 = vpop.f32.mrb[122].mxu0  ;;  %v5887_v10 = vsel %vm1131_vm4, %v5875_v55, -inf }
0x1775   : > { %v5881_v15 = vsel %vm1131_vm4, %v5873_v50, -inf  ;;  %v5845_v47 = vpop.f32.mrb[123].mxu0  ;;  %v5876_v3 = vsel %vm12179_vm9, %v10552_v51, -10000.0 }
0x1776   : > { %v5874_v16 = vsel %vm12167_vm8, %v5845_v47, -10000.0  ;;  %5882 = vmax.xlane.f32.xlu0 %v5881_v15  ;;  %v5890_v53 = vsel %vm1131_vm4, %v5876_v3, -inf }
0x1777   : > { %v5884_v14 = vsel %vm1131_vm4, %v5874_v16, -inf }
0x1778   : > { %5885 = vmax.xlane.f32.xlu1 %v5884_v14 }
0x177a   : > { %5888 = vmax.xlane.f32.xlu0 %v5887_v10  ;;  %v10555_v8 = vpop.f32.mrb[124].mxu0 }
0x177b   : > { %v5858_v61 = vpop.f32.mrb[125].mxu0  ;;  %v5879_v33 = vsel %vm12193_vm11, %v10555_v8, -10000.0 }
0x177c   : > { %v5877_v4 = vsel %vm12187_vm10, %v5858_v61, -10000.0  ;;  %v10556_v26 = vpop.f32.mrb[126].mxu0  ;;  %v5899_v62 = vsel %vm1131_vm4, %v5879_v33, -inf }
0x177d   : > { %v5893_v6 = vsel %vm1131_vm4, %v5877_v4, -inf  ;;  %v5861_v7 = vpop.f32.mrb[127].mxu0  ;;  %v5880_v13 = vsel %vm12213_vm13, %v10556_v26, -10000.0 }
0x177e   : > { %v5878_v46 = vsel %vm12198_vm12, %v5861_v7, -10000.0  ;;  %5891 = vmax.xlane.f32.xlu0 %v5890_v53  ;;  %5894 = vmax.xlane.f32.xlu1 %v5893_v6  ;;  %v5902_v54 = vsel %vm1131_vm4, %v5880_v13, -inf }
0x177f   : > { %v5896_v28 = vsel %vm1131_vm4, %v5878_v46, -inf }
0x1782   : > { %5900 = vmax.xlane.f32.xlu1 %v5899_v62  ;;  %5897 = vmax.xlane.f32.xlu0 %v5896_v28 }
0x1786   : > { %5903 = vmax.xlane.f32.xlu0 %v5902_v54 }
0x1792   : > { %v13420_v32 = vpop.f32.mrb[128].mxu0 }
0x1793   : > { %v13422_v12 = vpop.f32.mrb[129].mxu0  ;;  %5977 = vrot.lane.b32.xlu1 %v13225_v23, %s11609_s11 }
0x1794   : > { %v13426_v0 = vpop.f32.mrb[130].mxu0 }
0x1795   : > { %v13428_v27 = vpop.f32.mrb[131].mxu0 }
0x179a   : > { %v13430_v43 = vpop.f32.mrb[132].mxu0 }
0x179b   : > { %v13432_v37 = vpop.f32.mrb[133].mxu0 }
0x179c   : > { %v13434_v30 = vpop.f32.mrb[134].mxu0 }
0x179d   : > { %v13436_v51 = vpop.f32.mrb[135].mxu0 }
0x1803   : > { %v5883_v15 = vpop.xlane.xlu0 %5882 }
0x1804   : > { %v5905_v47 = vsub.f32 %v5873_v50, %v5883_v15 }
0x1805   : > { %v5886_v14 = vpop.xlane.xlu1 %5885 }
0x1806   : > { %v5913_v61 = vmul.f32 1.442695, %v5905_v47  ;;  %v5906_v53 = vsub.f32 %v5874_v16, %v5886_v14 }
0x1807   : > { %v5889_v10 = vpop.xlane.xlu0 %5888 }
0x1808   : > { %v5907_v8 = vsub.f32 %v5875_v55, %v5889_v10  ;;  %v5915_v1 = vmul.f32 1.442695, %v5906_v53 }
0x180a   : > { %v5917_v26 = vmul.f32 1.442695, %v5907_v8 }
0x180b   : > { %v5895_v6 = vpop.xlane.xlu1 %5894  ;;  %v5892_v7 = vpop.xlane.xlu0 %5891 }
0x180c   : > { %11437 = vpow2.f32 %v5917_v26  ;;  %v5908_v62 = vsub.f32 %v5876_v3, %v5892_v7  ;;  %v5909_v28 = vsub.f32 %v5877_v4, %v5895_v6 }
0x180d   : > { %11439 = vpow2.f32 %v5913_v61 }
0x180e   : > { %v5919_v54 = vmul.f32 1.442695, %v5908_v62  ;;  %v5921_v57 = vmul.f32 1.442695, %v5909_v28  ;;  %v13495_v62 = vsel %vm12167_vm8, %v13428_v27, -10000.0 }
0x180f   : > { %v5901_v34 = vpop.xlane.xlu1 %5900  ;;  %v5898_v59 = vpop.xlane.xlu0 %5897  ;;  %v6277_v28 = vsel %vm1131_vm4, %v13495_v62, -inf }
0x1810   : > { %v5911_v18 = vsub.f32 %v5879_v33, %v5901_v34  ;;  %11441 = vpow2.f32 %v5919_v54  ;;  %v5910_v15 = vsub.f32 %v5878_v46, %v5898_v59  ;;  %v13523_v54 = vsel %vm12193_vm11, %v13430_v43, -10000.0 }
0x1811   : > { %11443 = vpow2.f32 %v5915_v1 }
0x1812   : > { %v5925_v50 = vmul.f32 1.442695, %v5911_v18  ;;  %v5923_v4 = vmul.f32 1.442695, %v5910_v15  ;;  %v13537_v15 = vsel %vm12198_vm12, %v13436_v51, -10000.0 }
0x1813   : > { %v5978_v55 = vpop.permute.xlu1 %5977  ;;  %v5904_v47 = vpop.xlane.xlu0 %5903  ;;  %v6289_v43 = vsel %vm1131_vm4, %v13537_v15, -inf }
0x1814   : > { %11445 = vpow2.f32 %v5925_v50  ;;  %v5912_v16 = vsub.f32 %v5880_v13, %v5904_v47  ;;  %10557 = vmatprep.subr.bf16.mxu1 %v5978_v55 }
0x1815   : > { %10558 = vmatpush3.bf16.msra.mxu1 %v5978_v55  ;;  %11447 = vpow2.f32 %v5921_v57 }
0x1816   : > { %v13438_v14 = vpop.eup %11437  ;;  %v5927_v3 = vmul.f32 1.442695, %v5912_v16 }
0x1817   : > { %v5935_v10 = vsel %vm1131_vm4, %v13438_v14, 0.0  ;;  %v13442_v34 = vpop.eup %11439 }
0x1818   : > { %11449 = vpow2.f32 %v5927_v3  ;;  %5936 = vadd.xlane.f32.xlu1 %v5935_v10  ;;  %v5929_v59 = vsel %vm1131_vm4, %v13442_v34, 0.0 }
0x1819   : > { %11451 = vpow2.f32 %v5923_v4 }
0x181a   : > { %v13444_v18 = vpop.eup %11441 }
0x181b   : > { %v5938_v1 = vsel %vm1131_vm4, %v13444_v18, 0.0  ;;  %v13450_v57 = vpop.eup %11443 }
0x181c   : > { %5930 = vadd.xlane.f32.xlu1 %v5929_v59  ;;  %5939 = vadd.xlane.f32.xlu0 %v5938_v1  ;;  %v5932_v8 = vsel %vm1131_vm4, %v13450_v57, 0.0 }
0x181e   : > { %v13452_v33 = vpop.eup %11445 }
0x181f   : > { %v5947_v46 = vsel %vm1131_vm4, %v13452_v33, 0.0  ;;  %v13456_v13 = vpop.eup %11447 }
0x1820   : > { %5948 = vadd.xlane.f32.xlu1 %v5947_v46  ;;  %5933 = vadd.xlane.f32.xlu0 %v5932_v8  ;;  %v5941_v26 = vsel %vm1131_vm4, %v13456_v13, 0.0 }
0x1822   : > { %v13460_v61 = vpop.eup %11449 }
0x1823   : > { %v5950_v53 = vsel %vm1131_vm4, %v13460_v61, 0.0  ;;  %v13466_v6 = vpop.eup %11451 }
0x1824   : > { %5942 = vadd.xlane.f32.xlu1 %v5941_v26  ;;  %5951 = vadd.xlane.f32.xlu0 %v5950_v53  ;;  %v5944_v7 = vsel %vm1131_vm4, %v13466_v6, 0.0 }
0x1828   : > { %5945 = vadd.xlane.f32.xlu0 %v5944_v7 }
0x1835   : > { %5981 = vrot.lane.b32.xlu1 %v13239_v39, %s11609_s11 }
0x1839   : > { %5983 = vrot.lane.b32.xlu1 %v13245_v35, %s11609_s11 }
0x183d   : > { %6560 = vrot.lane.b32.xlu1 %v13231_v29, %s11612_s18 }
0x183e   : > { %5979 = vrot.lane.b32.xlu0 %v13233_v9, %s11609_s11 }
0x1841   : > { %6564 = vrot.lane.b32.xlu1 %v13243_v22, %s11612_s18 }
0x1842   : > { %6558 = vrot.lane.b32.xlu0 %v13223_v2, %s11612_s18 }
0x1845   : > { %6552 = vrot.lane.b32.xlu1 %v13231_v29, %s11613_s6  ;;  %v13500_v29 = vsel %vm12158_vm6, %v13422_v12, -10000.0 }
0x1846   : > { %6562 = vrot.lane.b32.xlu0 %v13237_v63, %s11612_s18 }
0x1849   : > { %6556 = vrot.lane.b32.xlu1 %v13243_v22, %s11613_s6  ;;  %v6274_v22 = vsel %vm1131_vm4, %v13500_v29, -inf }
0x184a   : > { %6550 = vrot.lane.b32.xlu0 %v13223_v2, %s11613_s6  ;;  %v13509_v2 = vsel %vm12187_vm10, %v13432_v37, -10000.0  ;;  %v13528_v37 = vsel %vm12179_vm9, %v13426_v0, -10000.0  ;;  %v13544_v0 = vsel %vm12213_vm13, %v13434_v30, -10000.0 }
0x184b   : > { %v6286_v12 = vsel %vm1131_vm4, %v13509_v2, -inf  ;;  %v6283_v50 = vsel %vm1131_vm4, %v13528_v37, -inf  ;;  %v6295_v55 = vsel %vm1131_vm4, %v13544_v0, -inf }
0x184e   : > { %6554 = vrot.lane.b32.xlu0 %v13237_v63, %s11613_s6  ;;  %v13514_v63 = vsel %vm12162_vm7, %v13420_v32, -10000.0  ;;  %v6292_v32 = vsel %vm1131_vm4, %v13523_v54, -inf }
0x184f   : > { %v6280_v27 = vsel %vm1131_vm4, %v13514_v63, -inf }
0x186d   : > { %6278 = vmax.xlane.f32.xlu1 %v6277_v28  ;;  %6275 = vmax.xlane.f32.xlu0 %v6274_v22 }
0x1871   : > { %6287 = vmax.xlane.f32.xlu1 %v6286_v12  ;;  %6281 = vmax.xlane.f32.xlu0 %v6280_v27 }
0x1875   : > { %6293 = vmax.xlane.f32.xlu1 %v6292_v32  ;;  %6284 = vmax.xlane.f32.xlu0 %v6283_v50 }
0x1879   : > { %6290 = vmax.xlane.f32.xlu0 %v6289_v43 }
0x187d   : > { %6296 = vmax.xlane.f32.xlu0 %v6295_v55 }
0x1886   : > { %6366 = vrot.lane.b32.xlu1 %v13225_v23, %s11611_s15 }
0x18a5   : > { %v5937_v47 = vpop.xlane.xlu1 %5936 }
0x18a9   : > { %v5931_v51 = vpop.xlane.xlu1 %5930  ;;  %v5940_v16 = vpop.xlane.xlu0 %5939 }
0x18aa   : > { %11453 = vrcp.f32 %v5931_v51 }
0x18ad   : > { %v5949_v3 = vpop.xlane.xlu1 %5948  ;;  %v5934_v4 = vpop.xlane.xlu0 %5933 }
0x18ae   : > { %11455 = vrcp.f32 %v5934_v4 }
0x18af   : > { %11457 = vrcp.f32 %v5940_v16 }
0x18b0   : > { %11459 = vrcp.f32 %v5937_v47  ;;  %v11058_v47 = vld [vmem:[%s11849_s8 + $0x28] sm:$0xff]  }
0x18b1   : > { %v5943_v10 = vpop.xlane.xlu1 %5942  ;;  %v5952_v59 = vpop.xlane.xlu0 %5951 }
0x18b2   : > { %11461 = vrcp.f32 %v5943_v10 }
0x18b4   : > { %v11454_v46 = vpop.eup %11453 }
0x18b5   : > { %v5982_v30 = vpop.permute.xlu1 %5981  ;;  %v5946_v1 = vpop.xlane.xlu0 %5945  ;;  %v5961_v7 = vmul.f32 %v11454_v46, %v13442_v34 }
0x18b6   : > { %11463 = vrcp.f32 %v5946_v1 }
0x18b7   : > { %11465 = vrcp.f32 %v5952_v59 }
0x18b8   : > { %v11456_v8 = vpop.eup %11455  ;;  %11467 = vrcp.f32 %v5949_v3 }
0x18b9   : > { %v5984_v26 = vpop.permute.xlu1 %5983  ;;  %v5980_v53 = vpop.permute.xlu0 %5979  ;;  %v5962_v28 = vmul.f32 %v11456_v8, %v13450_v57 }
0x18ba   : > { %10559 = vmatprep.subr.bf16.mxu1 %v5980_v53  ;;  %v11458_v12 = vpop.eup %11457 }
0x18bb   : > { %10560 = vmatpush3.bf16.msra.mxu1 %v5980_v53  ;;  %v5969_v22 = vpack.c.bf16 %v5962_v28, %v5961_v7  ;;  %v11460_v32 = vpop.eup %11459  ;;  %v5964_v55 = vmul.f32 %v11458_v12, %v13444_v18 }
0x18bc   : > { %10561 = vmatprep.subr.bf16.mxu1 %v5982_v30  ;;  %v11462_v43 = vpop.eup %11461  ;;  %v5963_v3 = vmul.f32 %v11460_v32, %v13438_v14 }
0x18bd   : > { %10565 = vmatprep.mubr.msk.bf16.mxu1 %vm1131_vm4, %v5969_v22  ;;  %v6559_v27 = vpop.permute.xlu0 %6558  ;;  %v6561_v34 = vpop.permute.xlu1 %6560  ;;  %v5965_v4 = vmul.f32 %v11462_v43, %v13456_v13 }
0x18be   : > { %v6579_v50 = vsel %vm1808_vm5, %v6559_v27, 0  ;;  %10872 = vmatprep.subr.msk.bf16.mxu0 %vm1808_vm5, %v6559_v27  ;;  %v5970_v10 = vpack.c.bf16 %v5964_v55, %v5963_v3  ;;  %v6582_v46 = vsel %vm1808_vm5, %v6561_v34, 0 }
0x18bf   : > { %10562 = vmatpush3.bf16.msra.mxu1 %v5982_v30  ;;  %10626 = vmatpush3.bf16.xpose.msra.mxu0 %v6579_v50 }
0x18c0   : > { %v11464_v57 = vpop.eup %11463  ;;  %10563 = vmatprep.subr.bf16.mxu1 %v5984_v26  ;;  %10873 = vmatprep.subr.msk.bf16.mxu0 %vm1808_vm5, %v6561_v34 }
0x18c1   : > { %v6563_v51 = vpop.permute.xlu0 %6562  ;;  %v5966_v16 = vmul.f32 %v11464_v57, %v13466_v6  ;;  %v11466_v59 = vpop.eup %11465 }
0x18c2   : > { %v11468_v18 = vpop.eup %11467  ;;  %v5968_v14 = vmul.f32 %v11466_v59, %v13460_v61  ;;  %v6585_v8 = vsel %vm1808_vm5, %v6563_v51, 0 }
0x18c3   : > { %10564 = vmatpush3.bf16.msra.mxu1 %v5984_v26  ;;  %v5971_v1 = vpack.c.bf16 %v5966_v16, %v5965_v4  ;;  %v5967_v13 = vmul.f32 %v11468_v18, %v13452_v33  ;;  %v6565_v26 = vpop.permute.xlu1 %6564 }
0x18c4   : > { %10573 = vmatprep.subr.bf16.mxu1 %v11058_v47  ;;  %v6588_v53 = vsel %vm1808_vm5, %v6565_v26, 0 }
0x18c5   : > { %v6551_v30 = vpop.permute.xlu0 %6550  ;;  %v5972_v6 = vpack.c.bf16 %v5968_v14, %v5967_v13 }
0x18c6   : > { %10566 = vmatmul.mubr.msk.bf16.vlgmr.msra.gmra.mrb[100].mxu1 %vm1131_vm4, %v5970_v10  ;;  %10633 = vmatprep.mubr.msk.bf16.mxu0 %vm1808_vm5, %v6551_v30 }
0x18c7   : > { %10569 = vmatprep.mubr.msk.bf16.mxu1 %vm1131_vm4, %v5971_v1  ;;  %10628 = vmatpush3.bf16.xpose.msra.mxu0 %v6582_v46  ;;  %v6553_v7 = vpop.permute.xlu1 %6552 }
0x18c8   : > { %10874 = vmatprep.subr.msk.bf16.mxu0 %vm1808_vm5, %v6563_v51  ;;  %10574 = vmatpush3.bf16.msra.mxu1 %v11058_v47 }
0x18c9   : > { %v6555_v28 = vpop.permute.xlu0 %6554 }
0x18cb   : > { %v6557_v61 = vpop.permute.xlu1 %6556 }
0x18ce   : > { %10570 = vmatmul.mubr.msk.bf16.gmra.mrb[104].mxu1 %vm1131_vm4, %v5972_v6 }
0x18cf   : > { %10630 = vmatpush3.bf16.xpose.msra.mxu0 %v6585_v8 }
0x18d0   : > { %10875 = vmatprep.subr.msk.bf16.mxu0 %vm1808_vm5, %v6565_v26 }
0x18d7   : > { %10632 = vmatpush3.bf16.xpose.msra.mxu0 %v6588_v53 }
0x18de   : > { %10634 = vmatmul.mubr.msk.bf16.vlgmr.msra.gmra.mrb[136].mxu0 %vm1808_vm5, %v6553_v7 }
0x18df   : > { %10637 = vmatprep.mubr.msk.bf16.mxu0 %vm1808_vm5, %v6555_v28 }
0x18e6   : > { %10638 = vmatmul.mubr.msk.bf16.gmra.mrb[140].mxu0 %vm1808_vm5, %v6557_v61 }
0x18e7   : > { %7219 = vmatprep.mubr.bf16.mxu0 %v14580_v24 }
0x18fa   : > { %v6279_v33 = vpop.xlane.xlu1 %6278  ;;  %v6276_v22 = vpop.xlane.xlu0 %6275 }
0x18fb   : > { %v6298_v12 = vsub.f32 %v13500_v29, %v6276_v22  ;;  %v6299_v43 = vsub.f32 %v13495_v62, %v6279_v33 }
0x18fd   : > { %v6306_v34 = vmul.f32 1.442695, %v6298_v12  ;;  %v6308_v3 = vmul.f32 1.442695, %v6299_v43 }
0x18fe   : > { %v6288_v27 = vpop.xlane.xlu1 %6287  ;;  %v6282_v32 = vpop.xlane.xlu0 %6281 }
0x18ff   : > { %v6300_v50 = vsub.f32 %v13514_v63, %v6282_v32  ;;  %v6302_v4 = vsub.f32 %v13509_v2, %v6288_v27 }
0x1901   : > { %v6310_v57 = vmul.f32 1.442695, %v6300_v50  ;;  %v6314_v62 = vmul.f32 1.442695, %v6302_v4 }
0x1902   : > { %v6294_v55 = vpop.xlane.xlu1 %6293  ;;  %v6285_v51 = vpop.xlane.xlu0 %6284 }
0x1903   : > { %v6304_v47 = vsub.f32 %v13523_v54, %v6294_v55  ;;  %11469 = vpow2.f32 %v6310_v57  ;;  %v6301_v16 = vsub.f32 %v13528_v37, %v6285_v51 }
0x1904   : > { %11471 = vpow2.f32 %v6306_v34 }
0x1905   : > { %v6318_v29 = vmul.f32 1.442695, %v6304_v47  ;;  %v6312_v10 = vmul.f32 1.442695, %v6301_v16 }
0x1906   : > { %v6367_v59 = vpop.permute.xlu1 %6366  ;;  %v6291_v30 = vpop.xlane.xlu0 %6290 }
0x1907   : > { %10599 = vmatprep.subr.bf16.mxu1 %v6367_v59  ;;  %11473 = vpow2.f32 %v6312_v10  ;;  %v6303_v63 = vsub.f32 %v13537_v15, %v6291_v30 }
0x1908   : > { %11475 = vpow2.f32 %v6308_v3 }
0x1909   : > { %11477 = vpow2.f32 %v6318_v29  ;;  %v6316_v37 = vmul.f32 1.442695, %v6303_v63 }
0x190a   : > { %v6297_v54 = vpop.xlane.xlu0 %6296  ;;  %11479 = vpow2.f32 %v6314_v62 }
0x190b   : > { %v6305_v1 = vsub.f32 %v13544_v0, %v6297_v54 }
0x190d   : > { %v13584_v46 = vpop.eup %11469  ;;  %v6320_v18 = vmul.f32 1.442695, %v6305_v1 }
0x190e   : > { %v6328_v2 = vsel %vm1131_vm4, %v13584_v46, 0.0  ;;  %v13588_v14 = vpop.eup %11471 }
0x190f   : > { %11481 = vpow2.f32 %v6320_v18  ;;  %6329 = vadd.xlane.f32.xlu1 %v6328_v2  ;;  %v6322_v15 = vsel %vm1131_vm4, %v13588_v14, 0.0 }
0x1910   : > { %11483 = vpow2.f32 %v6316_v37 }
0x1911   : > { %v13590_v13 = vpop.eup %11473 }
0x1912   : > { %v11476_v6 = vpop.eup %11475  ;;  %v6331_v0 = vsel %vm1131_vm4, %v13590_v13, 0.0 }
0x1913   : > { %v13596_v8 = vpop.eup %11477  ;;  %6323 = vadd.xlane.f32.xlu1 %v6322_v15  ;;  %6332 = vadd.xlane.f32.xlu0 %v6331_v0  ;;  %v6325_v53 = vsel %vm1131_vm4, %v11476_v6, 0.0 }
0x1914   : > { %v6340_v26 = vsel %vm1131_vm4, %v13596_v8, 0.0  ;;  %v13601_v7 = vpop.eup %11479 }
0x1915   : > { %v6334_v61 = vsel %vm1131_vm4, %v13601_v7, 0.0 }
0x1917   : > { %6341 = vadd.xlane.f32.xlu1 %v6340_v26  ;;  %6326 = vadd.xlane.f32.xlu0 %v6325_v53 }
0x1919   : > { %v13603_v28 = vpop.eup %11481 }
0x191a   : > { %v6343_v33 = vsel %vm1131_vm4, %v13603_v28, 0.0  ;;  %v13609_v22 = vpop.eup %11483 }
0x191b   : > { %6335 = vadd.xlane.f32.xlu1 %v6334_v61  ;;  %6344 = vadd.xlane.f32.xlu0 %v6343_v33  ;;  %v6337_v12 = vsel %vm1131_vm4, %v13609_v22, 0.0 }
0x191f   : > { %6338 = vadd.xlane.f32.xlu0 %v6337_v12 }
0x192c   : > { %6370 = vrot.lane.b32.xlu1 %v13239_v39, %s11611_s15 }
0x1930   : > { %6372 = vrot.lane.b32.xlu1 %v13245_v35, %s11611_s15 }
0x1935   : > { %6368 = vrot.lane.b32.xlu0 %v13233_v9, %s11611_s15 }
0x1999   : > { %v10567_v27 = vpop.f32.mrb[100].mxu1 }
0x199a   : > { %v6035_v32 = vpop.f32.mrb[101].mxu1 }
0x199b   : > { %v10568_v50 = vpop.f32.mrb[102].mxu1 }
0x199c   : > { %v6067_v43 = vpack.c.bf16 %v10568_v50, %v10567_v27  ;;  %v6038_v34 = vpop.f32.mrb[103].mxu1  ;;  %v6330_v57 = vpop.xlane.xlu1 %6329 }
0x199d   : > { %v6066_v55 = vpack.c.bf16 %v6038_v34, %v6035_v32 }
0x199f   : > { %10575 = vmatprep.mubr.msk.bf16.mxu1 %vm1808_vm5, %v6066_v55 }
0x19a0   : > { %10576 = vmatmul.mubr.msk.bf16.vlgmr.msra.gmra.mrb[92].mxu1 %vm1808_vm5, %v6067_v43  ;;  %v6324_v47 = vpop.xlane.xlu1 %6323  ;;  %v6333_v51 = vpop.xlane.xlu0 %6332 }
0x19a1   : > { %10600 = vmatpush3.bf16.msra.mxu1 %v6367_v59  ;;  %v10571_v16 = vpop.f32.mrb[104].mxu1  ;;  %11485 = vrcp.f32 %v6324_v47 }
0x19a2   : > { %v6051_v3 = vpop.f32.mrb[105].mxu1 }
0x19a3   : > { %v10572_v4 = vpop.f32.mrb[106].mxu1 }
0x19a4   : > { %v6069_v29 = vpack.c.bf16 %v10572_v4, %v10571_v16  ;;  %v6054_v10 = vpop.f32.mrb[107].mxu1  ;;  %v6342_v30 = vpop.xlane.xlu1 %6341 }
0x19a5   : > { %v6068_v62 = vpack.c.bf16 %v6054_v10, %v6051_v3  ;;  %v6327_v63 = vpop.xlane.xlu0 %6326 }
0x19a6   : > { %11487 = vrcp.f32 %v6327_v63 }
0x19a7   : > { %10579 = vmatprep.mubr.msk.bf16.mxu1 %vm1808_vm5, %v6068_v62  ;;  %11489 = vrcp.f32 %v6333_v51 }
0x19a8   : > { %10580 = vmatmul.mubr.msk.bf16.gmra.mrb[96].mxu1 %vm1808_vm5, %v6069_v29  ;;  %v6336_v1 = vpop.xlane.xlu1 %6335  ;;  %11491 = vrcp.f32 %v6330_v57 }
0x19a9   : > { %v6345_v54 = vpop.xlane.xlu0 %6344  ;;  %11493 = vrcp.f32 %v6336_v1 }
0x19ab   : > { %v11486_v37 = vpop.eup %11485 }
0x19ac   : > { %v6371_v2 = vpop.permute.xlu1 %6370  ;;  %v6354_v26 = vmul.f32 %v11486_v37, %v13588_v14 }
0x19ad   : > { %v6339_v59 = vpop.xlane.xlu0 %6338 }
0x19ae   : > { %11495 = vrcp.f32 %v6339_v59 }
0x19af   : > { %11497 = vrcp.f32 %v6345_v54 }
0x19b0   : > { %v11488_v18 = vpop.eup %11487  ;;  %11499 = vrcp.f32 %v6342_v30  ;;  %v6373_v55 = vpop.permute.xlu1 %6372 }
0x19b1   : > { %v6369_v15 = vpop.permute.xlu0 %6368  ;;  %v10635_v0 = vpop.f32.mrb[136].mxu0  ;;  %v6355_v53 = vmul.f32 %v11488_v18, %v11476_v6 }
0x19b2   : > { %10601 = vmatprep.subr.bf16.mxu1 %v6369_v15  ;;  %v6624_v61 = vpop.f32.mrb[137].mxu0  ;;  %v11490_v43 = vpop.eup %11489  ;;  %v6657_v14 = vsel %vm12162_vm7, %v10635_v0, -10000.0  ;;  %v11059_v0 = vld [vmem:[%s11849_s8 + $0x30] sm:$0xff]  }
0x19b3   : > { %10602 = vmatpush3.bf16.msra.mxu1 %v6369_v15  ;;  %v13626_v33 = vsel %vm12158_vm6, %v6624_v61, -10000.0  ;;  %v10636_v12 = vpop.f32.mrb[138].mxu0  ;;  %v6362_v27 = vpack.c.bf16 %v6355_v53, %v6354_v26  ;;  %v11492_v21 = vpop.eup %11491  ;;  %v6357_v51 = vmul.f32 %v11490_v43, %v13590_v13  ;;  %v6669_v11 = vsel %vm1131_vm4, %v6657_v14, -inf }
0x19b4   : > { %v6663_v32 = vsel %vm1131_vm4, %v13626_v33, -inf  ;;  %10603 = vmatprep.subr.bf16.mxu1 %v6371_v2  ;;  %v6627_v50 = vpop.f32.mrb[139].mxu0  ;;  %v11494_v57 = vpop.eup %11493  ;;  %v6658_v36 = vsel %vm12179_vm9, %v10636_v12, -10000.0  ;;  %v6356_v4 = vmul.f32 %v11492_v21, %v13584_v46 }
0x19b5   : > { %10607 = vmatprep.mubr.msk.bf16.mxu1 %vm1131_vm4, %v6362_v27  ;;  %v13635_v6 = vsel %vm12167_vm8, %v6627_v50, -10000.0  ;;  %6664 = vmax.xlane.f32.xlu0 %v6663_v32  ;;  %v6358_v13 = vmul.f32 %v11494_v57, %v13601_v7  ;;  %v6672_v63 = vsel %vm1131_vm4, %v6658_v36, -inf }
0x19b6   : > { %v6666_v34 = vsel %vm1131_vm4, %v13635_v6, -inf  ;;  %v6363_v62 = vpack.c.bf16 %v6357_v51, %v6356_v4 }
0x19b7   : > { %10604 = vmatpush3.bf16.msra.mxu1 %v6371_v2  ;;  %6667 = vmax.xlane.f32.xlu1 %v6666_v34 }
0x19b8   : > { %v11496_v47 = vpop.eup %11495  ;;  %10605 = vmatprep.subr.bf16.mxu1 %v6373_v55 }
0x19b9   : > { %v10639_v16 = vpop.f32.mrb[140].mxu0  ;;  %6670 = vmax.xlane.f32.xlu0 %v6669_v11  ;;  %v6359_v3 = vmul.f32 %v11496_v47, %v13609_v22  ;;  %v11498_v1 = vpop.eup %11497 }
0x19ba   : > { %v6640_v29 = vpop.f32.mrb[141].mxu0  ;;  %v6661_v22 = vsel %vm12193_vm11, %v10639_v16, -10000.0  ;;  %v11500_v7 = vpop.eup %11499  ;;  %v6361_v49 = vmul.f32 %v11498_v1, %v13603_v28 }
0x19bb   : > { %10606 = vmatpush3.bf16.msra.mxu1 %v6373_v55  ;;  %v6659_v10 = vsel %vm12187_vm10, %v6640_v29, -10000.0  ;;  %v10640_v30 = vpop.f32.mrb[142].mxu0  ;;  %v6364_v31 = vpack.c.bf16 %v6359_v3, %v6358_v13  ;;  %v6681_v59 = vsel %vm1131_vm4, %v6661_v22, -inf  ;;  %v6360_v18 = vmul.f32 %v11500_v7, %v13596_v8 }
0x19bc   : > { %v6675_v60 = vsel %vm1131_vm4, %v6659_v10, -inf  ;;  %v6643_v54 = vpop.f32.mrb[143].mxu0  ;;  %v6662_v40 = vsel %vm12213_vm13, %v10640_v30, -10000.0  ;;  %10615 = vmatprep.subr.bf16.mxu1 %v11059_v0 }
0x19bd   : > { %v13654_v46 = vsel %vm12198_vm12, %v6643_v54, -10000.0  ;;  %6676 = vmax.xlane.f32.xlu1 %v6675_v60  ;;  %6673 = vmax.xlane.f32.xlu0 %v6672_v63  ;;  %v6684_v2 = vsel %vm1131_vm4, %v6662_v40, -inf  ;;  %v6365_v15 = vpack.c.bf16 %v6361_v49, %v6360_v18 }
0x19be   : > { %10608 = vmatmul.mubr.msk.bf16.vlgmr.msra.gmra.mrb[108].mxu1 %vm1131_vm4, %v6363_v62  ;;  %v6678_v37 = vsel %vm1131_vm4, %v13654_v46, -inf }
0x19bf   : > { %10611 = vmatprep.mubr.msk.bf16.mxu1 %vm1131_vm4, %v6364_v31  ;;  %10616 = vmatpush3.bf16.msra.mxu1 %v11059_v0 }
0x19c1   : > { %6682 = vmax.xlane.f32.xlu1 %v6681_v59  ;;  %6679 = vmax.xlane.f32.xlu0 %v6678_v37 }
0x19c5   : > { %6685 = vmax.xlane.f32.xlu0 %v6684_v2 }
0x19c6   : > { %10612 = vmatmul.mubr.msk.bf16.gmra.mrb[112].mxu1 %vm1131_vm4, %v6365_v15 }
0x19d2   : > { %6755 = vrot.lane.b32.xlu1 %v13225_v23, %s11613_s6 }
0x19d6   : > { %6757 = vrot.lane.b32.xlu1 %v13233_v9, %s11613_s6 }
0x1a42   : > { %v6665_v5 = vpop.xlane.xlu0 %6664 }
0x1a43   : > { %v6687_v28 = vsub.f32 %v13626_v33, %v6665_v5 }
0x1a44   : > { %v6668_v26 = vpop.xlane.xlu1 %6667 }
0x1a45   : > { %v6695_v61 = vmul.f32 1.442695, %v6687_v28  ;;  %v6688_v27 = vsub.f32 %v13635_v6, %v6668_v26 }
0x1a46   : > { %v6671_v8 = vpop.xlane.xlu0 %6670 }
0x1a47   : > { %v6689_v53 = vsub.f32 %v6657_v14, %v6671_v8  ;;  %v6697_v21 = vmul.f32 1.442695, %v6688_v27 }
0x1a49   : > { %v6699_v12 = vmul.f32 1.442695, %v6689_v53 }
0x1a4a   : > { %v6677_v32 = vpop.xlane.xlu1 %6676  ;;  %v6674_v50 = vpop.xlane.xlu0 %6673 }
0x1a4b   : > { %11501 = vpow2.f32 %v6699_v12  ;;  %v6690_v43 = vsub.f32 %v6658_v36, %v6674_v50  ;;  %v6691_v33 = vsub.f32 %v6659_v10, %v6677_v32 }
0x1a4c   : > { %11503 = vpow2.f32 %v6695_v61 }
0x1a4d   : > { %v6701_v23 = vmul.f32 1.442695, %v6690_v43  ;;  %v6703_v6 = vmul.f32 1.442695, %v6691_v33 }
0x1a4e   : > { %v6683_v34 = vpop.xlane.xlu1 %6682  ;;  %v6680_v57 = vpop.xlane.xlu0 %6679 }
0x1a4f   : > { %v6693_v9 = vsub.f32 %v6661_v22, %v6683_v34  ;;  %11505 = vpow2.f32 %v6701_v23  ;;  %v6692_v4 = vsub.f32 %v13654_v46, %v6680_v57 }
0x1a50   : > { %11507 = vpow2.f32 %v6697_v21 }
0x1a51   : > { %v6707_v55 = vmul.f32 1.442695, %v6693_v9  ;;  %v6705_v62 = vmul.f32 1.442695, %v6692_v4 }
0x1a52   : > { %v6756_v47 = vpop.permute.xlu1 %6755  ;;  %v6686_v14 = vpop.xlane.xlu0 %6685 }
0x1a53   : > { %10641 = vmatprep.subr.bf16.mxu1 %v6756_v47  ;;  %11509 = vpow2.f32 %v6707_v55  ;;  %v6694_v11 = vsub.f32 %v6662_v40, %v6686_v14 }
0x1a54   : > { %11511 = vpow2.f32 %v6703_v6 }
0x1a55   : > { %v13674_v51 = vpop.eup %11501  ;;  %v6709_v29 = vmul.f32 1.442695, %v6694_v11 }
0x1a56   : > { %v6717_v36 = vsel %vm1131_vm4, %v13674_v51, 0.0  ;;  %v13678_v16 = vpop.eup %11503  ;;  %v6758_v0 = vpop.permute.xlu1 %6757 }
0x1a57   : > { %6718 = vadd.xlane.f32.xlu1 %v6717_v36  ;;  %v6711_v10 = vsel %vm1131_vm4, %v13678_v16, 0.0  ;;  %11513 = vpow2.f32 %v6709_v29  ;;  %v11060_v36 = vld [vmem:[%s11849_s8 + $0x38] sm:$0xff]   ;;  %s14607_s8 = sld [smem:[#allocation5_spill]] }
0x1a58   : > { %11515 = vpow2.f32 %v6705_v62 }
0x1a59   : > { %v13680_v3 = vpop.eup %11505 }
0x1a5a   : > { %v6720_v30 = vsel %vm1131_vm4, %v13680_v3, 0.0  ;;  %v11508_v13 = vpop.eup %11507 }
0x1a5b   : > { %6712 = vadd.xlane.f32.xlu1 %v6711_v10  ;;  %6721 = vadd.xlane.f32.xlu0 %v6720_v30  ;;  %v6714_v63 = vsel %vm1131_vm4, %v11508_v13, 0.0 }
0x1a5d   : > { %v13688_v60 = vpop.eup %11509  ;;  %p8729_p8 = scmp.lt.s32.totalorder %s14607_s8, 0 }
0x1a5e   : > { %v6729_v54 = vsel %vm1131_vm4, %v13688_v60, 0.0  ;;  %v13692_v1 = vpop.eup %11511 }
0x1a5f   : > { %6715 = vadd.xlane.f32.xlu0 %v6714_v63  ;;  %v6723_v22 = vsel %vm1131_vm4, %v13692_v1, 0.0 }
0x1a61   : > { %v13696_v46 = vpop.eup %11513 }
0x1a62   : > { %v6732_v31 = vsel %vm1131_vm4, %v13696_v46, 0.0  ;;  %v13700_v7 = vpop.eup %11515 }
0x1a63   : > { %6730 = vadd.xlane.f32.xlu0 %v6729_v54  ;;  %v6726_v59 = vsel %vm1131_vm4, %v13700_v7, 0.0 }
0x1a67   : > { %6724 = vadd.xlane.f32.xlu0 %v6723_v22 }
0x1a6b   : > { %6733 = vadd.xlane.f32.xlu0 %v6732_v31 }
0x1a6c   : > { %6761 = vrot.lane.b32.xlu1 %v13245_v35, %s11613_s6 }
0x1a6f   : > { %6727 = vadd.xlane.f32.xlu0 %v6726_v59 }
0x1a85   : > { %6759 = vrot.lane.b32.xlu0 %v13239_v39, %s11613_s6 }
0x1a91   : > { %v10609_v37 = vpop.f32.mrb[108].mxu1 }
0x1a92   : > { %v6424_v49 = vpop.f32.mrb[109].mxu1 }
0x1a93   : > { %v10610_v40 = vpop.f32.mrb[110].mxu1 }
0x1a94   : > { %v6456_v18 = vpack.c.bf16 %v10610_v40, %v10609_v37  ;;  %v6427_v2 = vpop.f32.mrb[111].mxu1 }
0x1a95   : > { %v6455_v15 = vpack.c.bf16 %v6427_v2, %v6424_v49 }
0x1a97   : > { %10617 = vmatprep.mubr.msk.bf16.mxu1 %vm1808_vm5, %v6455_v15 }
0x1a98   : > { %10618 = vmatmul.mubr.msk.bf16.vlgmr.msra.gmra.mrb[92].mxu1 %vm1808_vm5, %v6456_v18 }
0x1a99   : > { %10642 = vmatpush3.bf16.msra.mxu1 %v6756_v47  ;;  %v10613_v35 = vpop.f32.mrb[112].mxu1 }
0x1a9a   : > { %10643 = vmatprep.subr.bf16.mxu1 %v6758_v0  ;;  %v6440_v5 = vpop.f32.mrb[113].mxu1 }
0x1a9b   : > { %v10614_v28 = vpop.f32.mrb[114].mxu1 }
0x1a9c   : > { %v6458_v26 = vpack.c.bf16 %v10614_v28, %v10613_v35  ;;  %v6443_v8 = vpop.f32.mrb[115].mxu1 }
0x1a9d   : > { %v6457_v53 = vpack.c.bf16 %v6443_v8, %v6440_v5  ;;  %10644 = vmatpush3.bf16.msra.mxu1 %v6758_v0  ;;  %v9559_v0 = vld [vmem:[%s11844_s20 + $0x1] ss:$0 sm:$0xff] }
0x1a9f   : > { %10621 = vmatprep.mubr.msk.bf16.mxu1 %vm1808_vm5, %v6457_v53 }
0x1aa0   : > { %10622 = vmatmul.mubr.msk.bf16.gmra.mrb[96].mxu1 %vm1808_vm5, %v6458_v26 }
0x1ae4   : > { %v6719_v39 = vpop.xlane.xlu1 %6718 }
0x1ae8   : > { %v6713_v61 = vpop.xlane.xlu1 %6712  ;;  %v6722_v12 = vpop.xlane.xlu0 %6721 }
0x1ae9   : > { %11517 = vrcp.f32 %v6713_v61 }
0x1aec   : > { %v6716_v27 = vpop.xlane.xlu0 %6715  ;;  %v6762_v6 = vpop.permute.xlu1 %6761 }
0x1aed   : > { %11519 = vrcp.f32 %v6716_v27 }
0x1aee   : > { %11521 = vrcp.f32 %v6722_v12 }
0x1aef   : > { %11523 = vrcp.f32 %v6719_v39 }
0x1af0   : > { %v6731_v32 = vpop.xlane.xlu0 %6730 }
0x1af3   : > { %v11518_v43 = vpop.eup %11517 }
0x1af4   : > { %v6725_v50 = vpop.xlane.xlu0 %6724  ;;  %v6743_v34 = vmul.f32 %v11518_v43, %v13678_v16 }
0x1af5   : > { %11525 = vrcp.f32 %v6725_v50 }
0x1af7   : > { %v11520_v23 = vpop.eup %11519 }
0x1af8   : > { %v6734_v21 = vpop.xlane.xlu0 %6733  ;;  %v6744_v57 = vmul.f32 %v11520_v23, %v11508_v13  ;;  %v11522_v55 = vpop.eup %11521 }
0x1af9   : > { %v11524_v14 = vpop.eup %11523  ;;  %v6746_v11 = vmul.f32 %v11522_v55, %v13680_v3 }
0x1afa   : > { %v6751_v9 = vpack.c.bf16 %v6744_v57, %v6743_v34  ;;  %v6745_v4 = vmul.f32 %v11524_v14, %v13674_v51 }
0x1afc   : > { %10649 = vmatprep.mubr.msk.bf16.mxu1 %vm1131_vm4, %v6751_v9  ;;  %v6728_v33 = vpop.xlane.xlu0 %6727  ;;  %v6752_v10 = vpack.c.bf16 %v6746_v11, %v6745_v4 }
0x1afd   : > { %11527 = vrcp.f32 %v6728_v33 }
0x1afe   : > { %11529 = vrcp.f32 %v6734_v21 }
0x1aff   : > { %11531 = vrcp.f32 %v6731_v32  ;;  %v11526_v16 = vpop.eup %11525 }
0x1b00   : > { %v6760_v47 = vpop.permute.xlu0 %6759  ;;  %v6747_v13 = vmul.f32 %v11526_v16, %v13692_v1 }
0x1b01   : > { %10645 = vmatprep.subr.bf16.mxu1 %v6760_v47 }
0x1b02   : > { %10646 = vmatpush3.bf16.msra.mxu1 %v6760_v47 }
0x1b03   : > { %10647 = vmatprep.subr.bf16.mxu1 %v6762_v6 }
0x1b06   : > { %10648 = vmatpush3.bf16.msra.mxu1 %v6762_v6 }
0x1b07   : > { %v11528_v29 = vpop.eup %11527  ;;  %10657 = vmatprep.subr.bf16.mxu1 %v11060_v36 }
0x1b08   : > { %v11530_v30 = vpop.eup %11529  ;;  %v6748_v62 = vmul.f32 %v11528_v29, %v13700_v7 }
0x1b09   : > { %10650 = vmatmul.mubr.msk.bf16.vlgmr.msra.gmra.mrb[116].mxu1 %vm1131_vm4, %v6752_v10  ;;  %v11532_v63 = vpop.eup %11531  ;;  %v6750_v3 = vmul.f32 %v11530_v30, %v13696_v46 }
0x1b0a   : > { %v6753_v54 = vpack.c.bf16 %v6748_v62, %v6747_v13  ;;  %10658 = vmatpush3.bf16.msra.mxu1 %v11060_v36  ;;  %v6749_v51 = vmul.f32 %v11532_v63, %v13688_v60 }
0x1b0c   : > { %10653 = vmatprep.mubr.msk.bf16.mxu1 %vm1131_vm4, %v6753_v54  ;;  %v6754_v22 = vpack.c.bf16 %v6750_v3, %v6749_v51 }
0x1b11   : > { %10654 = vmatmul.mubr.msk.bf16.gmra.mrb[120].mxu1 %vm1131_vm4, %v6754_v22 }
0x1bdc   : > { %v10651_v31 = vpop.f32.mrb[116].mxu1 }
0x1bdd   : > { %v6813_v59 = vpop.f32.mrb[117].mxu1 }
0x1bde   : > { %v10652_v1 = vpop.f32.mrb[118].mxu1 }
0x1bdf   : > { %v6845_v37 = vpack.c.bf16 %v10652_v1, %v10651_v31  ;;  %v6816_v7 = vpop.f32.mrb[119].mxu1 }
0x1be0   : > { %v6844_v49 = vpack.c.bf16 %v6816_v7, %v6813_v59 }
0x1be2   : > { %10659 = vmatprep.mubr.msk.bf16.mxu1 %vm1808_vm5, %v6844_v49 }
0x1be3   : > { %10660 = vmatmul.mubr.msk.bf16.vlgmr.msra.gmra.mrb[92].mxu1 %vm1808_vm5, %v6845_v37 }
0x1be4   : > { %v10655_v40 = vpop.f32.mrb[120].mxu1 }
0x1be5   : > { %v6829_v46 = vpop.f32.mrb[121].mxu1 }
0x1be6   : > { %v10656_v18 = vpop.f32.mrb[122].mxu1 }
0x1be7   : > { %v6847_v2 = vpack.c.bf16 %v10656_v18, %v10655_v40  ;;  %v6832_v15 = vpop.f32.mrb[123].mxu1 }
0x1be8   : > { %v6846_v60 = vpack.c.bf16 %v6832_v15, %v6829_v46 }
0x1bea   : > { %10663 = vmatprep.mubr.msk.bf16.mxu1 %vm1808_vm5, %v6846_v60 }
0x1beb   : > { %10664 = vmatmul.mubr.msk.bf16.gmra.mrb[96].mxu1 %vm1808_vm5, %v6847_v2 }
0x1cb6   : > { %v10661_v35 = vpop.f32.mrb[92].mxu1 }
0x1cb7   : > { %v6900_v5 = vpop.f32.mrb[93].mxu1  ;;  %v10707_v28 = vadd.f32 %v10661_v35, %v9559_v0 }
0x1cb8   : > { %v10708_v26 = vadd.f32 %v9559_v0, %v6900_v5  ;;  %v10662_v8 = vpop.f32.mrb[94].mxu1 }
0x1cb9   : > { %v6903_v53 = vpop.f32.mrb[95].mxu1  ;;  %v6941_v12 = vadd.f32 %v10707_v28, %v13197_v19  ;;  %v10709_v27 = vadd.f32 %v10662_v8, %v9559_v0 }
0x1cba   : > { %v6939_v39 = vadd.f32 %v10708_v26, %v13185_v38  ;;  %v10710_v61 = vadd.f32 %v9559_v0, %v6903_v53 }
0x1cbb   : > { %v6942_v34 = vadd.f32 %v10709_v27, %v13193_v58  ;;  %v6957_v38 = vsel %vm1131_vm4, %v6941_v12, 0.0 }
0x1cbc   : > { %v6940_v32 = vadd.f32 %v10710_v61, %v13187_v25  ;;  %v6951_v50 = vsel %vm1131_vm4, %v6939_v39, 0.0 }
0x1cbd   : > { %6952 = vadd.xlane.f32.xlu1 %v6951_v50  ;;  %v6960_v6 = vsel %vm1131_vm4, %v6942_v34, 0.0 }
0x1cbe   : > { %v10665_v43 = vpop.f32.mrb[96].mxu1  ;;  %v6954_v23 = vsel %vm1131_vm4, %v6940_v32, 0.0 }
0x1cbf   : > { %6955 = vadd.xlane.f32.xlu0 %v6954_v23  ;;  %v6916_v21 = vpop.f32.mrb[97].mxu1  ;;  %v10711_v47 = vadd.f32 %v10665_v43, %v9559_v0 }
0x1cc0   : > { %v10712_v57 = vadd.f32 %v9559_v0, %v6916_v21  ;;  %v10666_v9 = vpop.f32.mrb[98].mxu1  ;;  %v11063_v21 = vld [vmem:[%s11872_s28 + $0xc4] ss:$8 sps:$4 sm:$0xff]  }
0x1cc1   : > { %6958 = vadd.xlane.f32.xlu1 %v6957_v38  ;;  %v6919_v33 = vpop.f32.mrb[99].mxu1  ;;  %v10713_v19 = vadd.f32 %v10666_v9, %v9559_v0  ;;  %v6945_v36 = vadd.f32 %v10711_v47, %v13215_v17  ;;  %7187 = vmatprep.subr.bf16.mxu0 %v11063_v21  ;;  %v11064_v9 = vld [vmem:[%s11872_s28 + $0xd0] ss:$8 sps:$4 sm:$0xff]   ;;  %v11069_v38 = vld [vmem:[%s11872_s28 + $0xe4] ss:$8 sps:$4 sm:$0xff]  }
0x1cc2   : > { %v10714_v55 = vadd.f32 %v9559_v0, %v6919_v33  ;;  %v6943_v25 = vadd.f32 %v10712_v57, %v13205_v20  ;;  %v11066_v57 = vld [vmem:[%s11872_s28 + $0xd4] ss:$8 sps:$4 sm:$0xff]   ;;  %v11067_v33 = vld [vmem:[%s11872_s28 + $0xe0] ss:$8 sps:$4 sm:$0xff]   ;;  %v11075_v47 = vld [vmem:[%s11872_s28 + $0x104] ss:$8 sps:$4 sm:$0xff]  }
0x1cc3   : > { %v6946_v11 = vadd.f32 %v10713_v19, %v13213_v48  ;;  %v6969_v20 = vsel %vm1131_vm4, %v6945_v36, 0.0  ;;  %v11072_v19 = vld [vmem:[%s11872_s28 + $0xf4] ss:$8 sps:$4 sm:$0xff]  }
0x1cc4   : > { %v6944_v14 = vadd.f32 %v10714_v55, %v13207_v52  ;;  %v6963_v16 = vsel %vm1131_vm4, %v6943_v25, 0.0  ;;  %v11070_v55 = vld [vmem:[%s11872_s28 + $0xf0] ss:$8 sps:$4 sm:$0xff]  }
0x1cc5   : > { %6961 = vadd.xlane.f32.xlu1 %v6960_v6  ;;  %v6972_v4 = vsel %vm1131_vm4, %v6946_v11, 0.0 }
0x1cc6   : > { %v6966_v58 = vsel %vm1131_vm4, %v6944_v14, 0.0 }
0x1cc7   : > { %6967 = vadd.xlane.f32.xlu0 %v6966_v58 }
0x1cc9   : > { %6964 = vadd.xlane.f32.xlu1 %v6963_v16 }
0x1ccb   : > { %6973 = vadd.xlane.f32.xlu0 %v6972_v4 }
0x1ccd   : > { %6970 = vadd.xlane.f32.xlu1 %v6969_v20 }
0x1d4a   : > { %v6953_v52 = vpop.xlane.xlu1 %6952 }
0x1d4b   : > { %v6975_v29 = vmul.f32 0.015625, %v6953_v52 }
0x1d4c   : > { %v6956_v10 = vpop.xlane.xlu0 %6955 }
0x1d4d   : > { %v13745_v30 = vsub.f32 %v6939_v39, %v6975_v29  ;;  %v6976_v48 = vmul.f32 0.015625, %v6956_v10 }
0x1d4e   : > { %v6959_v13 = vpop.xlane.xlu1 %6958 }
0x1d4f   : > { %v13747_v62 = vsub.f32 %v6940_v32, %v6976_v48  ;;  %v6977_v63 = vmul.f32 0.015625, %v6959_v13  ;;  %v6991_v17 = vmul.f32 %v13745_v30, %v13745_v30 }
0x1d51   : > { %v13751_v54 = vsub.f32 %v6941_v12, %v6977_v63  ;;  %v6999_v3 = vsel %vm1131_vm4, %v6991_v17, 0.0  ;;  %v6992_v51 = vmul.f32 %v13747_v62, %v13747_v62 }
0x1d52   : > { %v6962_v22 = vpop.xlane.xlu1 %6961  ;;  %7000 = vadd.xlane.f32.xlu1 %v6999_v3 }
0x1d53   : > { %v6978_v31 = vmul.f32 0.015625, %v6962_v22  ;;  %v7002_v59 = vsel %vm1131_vm4, %v6992_v51, 0.0  ;;  %v6993_v1 = vmul.f32 %v13751_v54, %v13751_v54 }
0x1d54   : > { %7003 = vadd.xlane.f32.xlu0 %v7002_v59  ;;  %v6968_v37 = vpop.xlane.xlu0 %6967 }
0x1d55   : > { %v13759_v7 = vsub.f32 %v6942_v34, %v6978_v31  ;;  %v6980_v49 = vmul.f32 0.015625, %v6968_v37  ;;  %v7005_v40 = vsel %vm1131_vm4, %v6993_v1, 0.0  ;;  %v11061_v34 = vld [vmem:[%s11872_s28 + $0xc0] ss:$8 sps:$4 sm:$0xff]  }
0x1d56   : > { %7006 = vadd.xlane.f32.xlu1 %v7005_v40  ;;  %v6965_v46 = vpop.xlane.xlu1 %6964  ;;  %7188 = vmatpush1.bf16.msra.mxu0 %v11061_v34  ;;  %v9614_v31 = vld [vmem:[%s14582_s26 + $0x1] ss:$0 sm:$0xff] }
0x1d57   : > { %v13762_v18 = vsub.f32 %v6944_v14, %v6980_v49  ;;  %v6979_v2 = vmul.f32 0.015625, %v6965_v46  ;;  %v6994_v15 = vmul.f32 %v13759_v7, %v13759_v7  ;;  %7189 = vmatprep.subr.bf16.mxu0 %v11066_v57  ;;  %v11098_v14 = vld [vmem:[%s14581_s23 + $0x180] sm:$0xff]  }
0x1d58   : > { %v6974_v60 = vpop.xlane.xlu0 %6973 }
0x1d59   : > { %v13766_v0 = vsub.f32 %v6943_v25, %v6979_v2  ;;  %v6982_v35 = vmul.f32 0.015625, %v6974_v60  ;;  %v7008_v5 = vsel %vm1131_vm4, %v6994_v15, 0.0  ;;  %v6996_v28 = vmul.f32 %v13762_v18, %v13762_v18  ;;  %v11097_v25 = vld [vmem:[%s14581_s23 + $0x1c0] sm:$0xff]  }
0x1d5a   : > { %v6971_v26 = vpop.xlane.xlu1 %6970  ;;  %7009 = vadd.xlane.f32.xlu0 %v7008_v5  ;;  %7190 = vmatpush1.bf16.msra.mxu0 %v11064_v9  ;;  %v9615_v2 = vld [vmem:[%s14583_s5 + $0x1] ss:$0 sm:$0xff] }
0x1d5b   : > { %v13771_v8 = vsub.f32 %v6946_v11, %v6982_v35  ;;  %v6981_v53 = vmul.f32 0.015625, %v6971_v26  ;;  %v6995_v39 = vmul.f32 %v13766_v0, %v13766_v0  ;;  %v7014_v27 = vsel %vm1131_vm4, %v6996_v28, 0.0  ;;  %7191 = vmatprep.subr.bf16.mxu0 %v11069_v38  ;;  %10161 = vmatprep.subr.bf16.mxu1 %v11097_v25 }
0x1d5c   : > { %10162 = vmatpush3.bf16.msra.mxu1 %v11098_v14 }
0x1d5d   : > { %v13775_v61 = vsub.f32 %v6945_v36, %v6981_v53  ;;  %v7011_v12 = vsel %vm1131_vm4, %v6995_v39, 0.0  ;;  %v6998_v32 = vmul.f32 %v13771_v8, %v13771_v8 }
0x1d5e   : > { %7012 = vadd.xlane.f32.xlu1 %v7011_v12  ;;  %7015 = vadd.xlane.f32.xlu0 %v7014_v27 }
0x1d5f   : > { %v6997_v50 = vmul.f32 %v13775_v61, %v13775_v61  ;;  %v7020_v23 = vsel %vm1131_vm4, %v6998_v32, 0.0  ;;  %7192 = vmatpush1.bf16.msra.mxu0 %v11067_v33 }
0x1d60   : > { %7193 = vmatprep.subr.bf16.mxu0 %v11072_v19 }
0x1d61   : > { %v7017_v43 = vsel %vm1131_vm4, %v6997_v50, 0.0 }
0x1d62   : > { %7018 = vadd.xlane.f32.xlu1 %v7017_v43  ;;  %7021 = vadd.xlane.f32.xlu0 %v7020_v23 }
0x1d63   : > { %7194 = vmatpush1.bf16.msra.mxu0 %v11070_v55 }
0x1d64   : > { %7349 = vmatprep.subr.bf16.mxu0 %v11075_v47 }
0x1ddf   : > { %v7001_v6 = vpop.xlane.xlu1 %7000 }
0x1de0   : > { %v7023_v11 = vmul.f32 0.015625, %v7001_v6 }
0x1de1   : > { %v7004_v58 = vpop.xlane.xlu0 %7003 }
0x1de2   : > { %v7031_v36 = vadd.f32 1e-05, %v7023_v11  ;;  %v7024_v16 = vmul.f32 0.015625, %v7004_v58 }
0x1de3   : > { %v7007_v4 = vpop.xlane.xlu1 %7006 }
0x1de4   : > { %11533 = vrsqrt.f32 %v7031_v36  ;;  %v7032_v20 = vadd.f32 1e-05, %v7024_v16  ;;  %v7025_v52 = vmul.f32 0.015625, %v7007_v4  ;;  %v11073_v16 = vld [vmem:[%s11872_s28 + $0x100] ss:$8 sps:$4 sm:$0xff]  }
0x1de6   : > { %11535 = vrsqrt.f32 %v7032_v20  ;;  %v7033_v29 = vadd.f32 1e-05, %v7025_v52 }
0x1de7   : > { %v7010_v10 = vpop.xlane.xlu0 %7009 }
0x1de8   : > { %11537 = vrsqrt.f32 %v7033_v29  ;;  %v7026_v48 = vmul.f32 0.015625, %v7010_v10  ;;  %v11078_v29 = vld [vmem:[%s11872_s28 + $0x114] ss:$8 sps:$4 sm:$0xff]  }
0x1de9   : > { %v14602_v10 = vld [vmem:[#allocation29_spill] sm:$0xff] }
0x1dea   : > { %v7034_v13 = vadd.f32 1e-05, %v7026_v48 }
0x1deb   : > { %v7013_v63 = vpop.xlane.xlu1 %7012  ;;  %v7016_v17 = vpop.xlane.xlu0 %7015 }
0x1dec   : > { %11539 = vrsqrt.f32 %v7034_v13  ;;  %v7027_v3 = vmul.f32 0.015625, %v7013_v63  ;;  %v7028_v51 = vmul.f32 0.015625, %v7016_v17  ;;  %v11076_v63 = vld [vmem:[%s11872_s28 + $0x110] ss:$8 sps:$4 sm:$0xff]   ;;  %v14603_v17 = vld [vmem:[#allocation30_spill] sm:$0xff] }
0x1dee   : > { %v11534_v22 = vpop.eup %11533  ;;  %v7035_v59 = vadd.f32 1e-05, %v7027_v3  ;;  %v7036_v1 = vadd.f32 1e-05, %v7028_v51  ;;  %v11081_v51 = vld [vmem:[%s11872_s28 + $0x124] ss:$8 sps:$4 sm:$0xff]  }
0x1def   : > { %v7047_v37 = vmul.f32 %v11534_v22, %v13745_v30  ;;  %v7019_v49 = vpop.xlane.xlu1 %7018  ;;  %v7022_v40 = vpop.xlane.xlu0 %7021  ;;  %v14604_v22 = vld [vmem:[#allocation31_spill] sm:$0xff] }
0x1df0   : > { %v11536_v46 = vpop.eup %11535  ;;  %11541 = vrsqrt.f32 %v7035_v59  ;;  %v7029_v15 = vmul.f32 0.015625, %v7019_v49  ;;  %v7030_v60 = vmul.f32 0.015625, %v7022_v40  ;;  %v11084_v40 = vld [vmem:[%s11872_s28 + $0x134] ss:$8 sps:$4 sm:$0xff]  }
0x1df1   : > { %v7061_v35 = vmul.f32 %v9614_v31, %v7047_v37  ;;  %v7048_v5 = vmul.f32 %v11536_v46, %v13747_v62  ;;  %11543 = vrsqrt.f32 %v7036_v1  ;;  %v11079_v37 = vld [vmem:[%s11872_s28 + $0x120] ss:$8 sps:$4 sm:$0xff]   ;;  %v11082_v46 = vld [vmem:[%s11872_s28 + $0x130] ss:$8 sps:$4 sm:$0xff]  }
0x1df2   : > { %v11538_v28 = vpop.eup %11537  ;;  %v7037_v26 = vadd.f32 1e-05, %v7029_v15  ;;  %v7038_v53 = vadd.f32 1e-05, %v7030_v60 }
0x1df3   : > { %v13800_v39 = vadd.f32 %v9615_v2, %v7061_v35  ;;  %v7062_v12 = vmul.f32 %v9614_v31, %v7048_v5  ;;  %v7049_v27 = vmul.f32 %v11538_v28, %v13751_v54 }
0x1df4   : > { %11545 = vrsqrt.f32 %v7037_v26 }
0x1df5   : > { %v7083_v30 = vmul.f32 %v13800_v39, %v11976_v41  ;;  %v13805_v32 = vadd.f32 %v9615_v2, %v7062_v12  ;;  %v7063_v50 = vmul.f32 %v9614_v31, %v7049_v27  ;;  %11547 = vrsqrt.f32 %v7038_v53  ;;  %v11085_v27 = vld [vmem:[%s11872_s28 + $0x140] ss:$8 sps:$4 sm:$0xff]  }
0x1df6   : > { %v11540_v43 = vpop.eup %11539 }
0x1df7   : > { %7091 = vst.msk [vmem:[#allocation3 + $0x8] sm:$0xff] %vm1131_vm4, %v7083_v30  ;;  %v7084_v62 = vmul.f32 %v13805_v32, %v11985_v44  ;;  %v13810_v23 = vadd.f32 %v9615_v2, %v7063_v50  ;;  %v7050_v21 = vmul.f32 %v11540_v43, %v13759_v7  ;;  %v11090_v50 = vld [vmem:[%s11872_s28 + $0x154] ss:$8 sps:$4 sm:$0xff]   ;;  %v11088_v43 = vld [vmem:[%s11872_s28 + $0x150] ss:$8 sps:$4 sm:$0xff]  }
0x1df9   : > { %7092 = vst.msk [vmem:[#allocation3 + $0x10] sm:$0xff] %vm1131_vm4, %v7084_v62  ;;  %v7085_v54 = vmul.f32 %v13810_v23, %v11978_v42  ;;  %v7064_v34 = vmul.f32 %v9614_v31, %v7050_v21  ;;  %v11093_v62 = vld [vmem:[%s11872_s28 + $0x164] ss:$8 sps:$4 sm:$0xff]  }
0x1dfa   : > { %v11542_v57 = vpop.eup %11541 }
0x1dfb   : > { %v11544_v9 = vpop.eup %11543  ;;  %7093 = vst.msk [vmem:[#allocation3 + $0x18] sm:$0xff] %vm1131_vm4, %v7085_v54  ;;  %v13817_v38 = vadd.f32 %v9615_v2, %v7064_v34  ;;  %v7051_v33 = vmul.f32 %v11542_v57, %v13766_v0  ;;  %v11091_v34 = vld [vmem:[%s11872_s28 + $0x160] ss:$8 sps:$4 sm:$0xff]  }
0x1dfc   : > { %v7052_v19 = vmul.f32 %v11544_v9, %v13762_v18  ;;  %v11096_v9 = vld [vmem:[%s11872_s28 + $0x174] ss:$8 sps:$4 sm:$0xff]  }
0x1dfd   : > { %v7086_v7 = vmul.f32 %v13817_v38, %v11987_v45  ;;  %v7065_v55 = vmul.f32 %v9614_v31, %v7051_v33  ;;  %v11094_v33 = vld [vmem:[%s11872_s28 + $0x170] ss:$8 sps:$4 sm:$0xff]  }
0x1dfe   : > { %v11546_v47 = vpop.eup %11545  ;;  %v7066_v25 = vmul.f32 %v9614_v31, %v7052_v19  ;;  %v7114_v36 = vld [vmem:[#allocation3 + $0x6] sm:$0xff] }
0x1dff   : > { %v11548_v14 = vpop.eup %11547  ;;  %7094 = vst.msk [vmem:[#allocation3 + $0x20] sm:$0xff] %vm1131_vm4, %v7086_v7  ;;  %v13824_v6 = vadd.f32 %v9615_v2, %v7065_v55  ;;  %v7053_v11 = vmul.f32 %v11546_v47, %v13775_v61  ;;  %v7276_v12 = vld [vmem:[#allocation3 + $0x7] sm:$0xff] }
0x1e00   : > { %v13827_v58 = vadd.f32 %v9615_v2, %v7066_v25  ;;  %v7054_v0 = vmul.f32 %v11548_v14, %v13771_v8  ;;  %v7115_v18 = vld [vmem:[#allocation3 + $0xe] sm:$0xff] }
0x1e01   : > { %v7087_v4 = vmul.f32 %v13824_v6, %v11991_v56  ;;  %v7067_v20 = vmul.f32 %v9614_v31, %v7053_v11  ;;  %v7122_v52 = vpack.c.bf16 %v7115_v18, %v7114_v36  ;;  %v7277_v53 = vld [vmem:[#allocation3 + $0xf] sm:$0xff] }
0x1e02   : > { %v7088_v48 = vmul.f32 %v13827_v58, %v14602_v10  ;;  %v7068_v13 = vmul.f32 %v9614_v31, %v7054_v0  ;;  %v7116_v1 = vld [vmem:[#allocation3 + $0x16] sm:$0xff]  ;;  %v7284_v30 = vpack.c.bf16 %v7277_v53, %v7276_v12  ;;  %v7438_v0 = vld [vmem:[#allocation3 + $0x8] sm:$0xff]  ;;  %v14606_v12 = vld [vmem:[#allocation34_spill] sm:$0xff] }
0x1e03   : > { %7095 = vst.msk [vmem:[#allocation3 + $0x28] sm:$0xff] %vm1131_vm4, %v7087_v4  ;;  %v13837_v61 = vadd.f32 %v9615_v2, %v7067_v20  ;;  %9633 = vmatmul.mubr.msk.bf16.vlgmr.msra.gmra.mrb[144].mxu0 %vm1131_vm4, %v7122_v52  ;;  %v7278_v54 = vld [vmem:[#allocation3 + $0x17] sm:$0xff] }
0x1e04   : > { %7096 = vst.msk [vmem:[#allocation3 + $0x30] sm:$0xff] %vm1131_vm4, %v7088_v48  ;;  %v13841_v8 = vadd.f32 %v9615_v2, %v7068_v13  ;;  %7350 = vmatpush1.bf16.msra.mxu0 %v11073_v16  ;;  %7229 = vmatprep.mubr.bf16.mxu0 %v14580_v24  ;;  %v11087_v2 = vld [vmem:[%s11872_s28 + $0x144] ss:$8 sps:$4 sm:$0xff]   ;;  %v7439_v11 = vld [vmem:[#allocation3 + $0x10] sm:$0xff]  ;;  %v7440_v16 = vld [vmem:[#allocation3 + $0x18] sm:$0xff] }
0x1e05   : > { %v7089_v3 = vmul.f32 %v13837_v61, %v14603_v17  ;;  %7351 = vmatprep.subr.bf16.mxu0 %v11078_v29  ;;  %v7446_v36 = vpack.c.bf16 %v7439_v11, %v7438_v0  ;;  %v7657_v11 = vld [vmem:[#allocation4] sm:$0xc0] }
0x1e06   : > { %v7090_v31 = vmul.f32 %v13841_v8, %v14604_v22  ;;  %v7117_v59 = vld [vmem:[#allocation3 + $0x1e] sm:$0xff] }
0x1e07   : > { %7097 = vst.msk [vmem:[#allocation3 + $0x38] sm:$0xff] %vm1131_vm4, %v7089_v3  ;;  %v7123_v49 = vpack.c.bf16 %v7117_v59, %v7116_v1  ;;  %v7279_v21 = vld [vmem:[#allocation3 + $0x1f] sm:$0xff]  ;;  %v11099_v3 = vld [vmem:[%s14581_s23 + $0x1c8] sm:$0xff]   ;;  %v11102_v59 = vld [vmem:[%s14581_s23 + $0x190] sm:$0xff]  }
0x1e08   : > { %7098 = vst.msk [vmem:[#allocation3 + $0x40] sm:$0xff] %vm1131_vm4, %v7090_v31  ;;  %7352 = vmatpush1.bf16.msra.mxu0 %v11076_v63  ;;  %v7285_v57 = vpack.c.bf16 %v7279_v21, %v7278_v54  ;;  %v7441_v18 = vld [vmem:[#allocation3 + $0x20] sm:$0xff]  ;;  %10163 = vmatprep.subr.bf16.mxu1 %v11099_v3  ;;  %v11101_v31 = vld [vmem:[%s14581_s23 + $0x1d0] sm:$0xff]   ;;  %v11104_v1 = vld [vmem:[%s14581_s23 + $0x198] sm:$0xff]  }
0x1e09   : > { %7353 = vmatprep.subr.bf16.mxu0 %v11081_v51  ;;  %v7447_v4 = vpack.c.bf16 %v7441_v18, %v7440_v16  ;;  %v11100_v51 = vld [vmem:[%s14581_s23 + $0x188] sm:$0xff]  }
0x1e0a   : > { %v7118_v15 = vld [vmem:[#allocation3 + $0x26] sm:$0xff]  ;;  %10164 = vmatpush3.bf16.msra.mxu1 %v11100_v51 }
0x1e0b   : > { %9634 = vmatmul.mubr.msk.bf16.gmra.mrb[148].mxu0 %vm1131_vm4, %v7123_v49  ;;  %v7119_v60 = vld [vmem:[#allocation3 + $0x2e] sm:$0xff]  ;;  %10165 = vmatprep.subr.bf16.mxu1 %v11101_v31  ;;  %v11106_v49 = vld [vmem:[%s14581_s23 + $0x1a0] sm:$0xff]  }
0x1e0c   : > { %7239 = vmatprep.mubr.bf16.mxu0 %v14580_v24  ;;  %7354 = vmatpush1.bf16.msra.mxu0 %v11079_v37  ;;  %v7124_v35 = vpack.c.bf16 %v7119_v60, %v7118_v15  ;;  %v7280_v19 = vld [vmem:[#allocation3 + $0x27] sm:$0xff]  ;;  %v7281_v7 = vld [vmem:[#allocation3 + $0x2f] sm:$0xff]  ;;  %v11111_v60 = vld [vmem:[%s14581_s23 + $0x1f8] sm:$0xff]  }
0x1e0d   : > { %7355 = vmatprep.subr.bf16.mxu0 %v11084_v40  ;;  %v7286_v55 = vpack.c.bf16 %v7281_v7, %v7280_v19  ;;  %v7442_v20 = vld [vmem:[#allocation3 + $0x28] sm:$0xff]  ;;  %v7443_v52 = vld [vmem:[#allocation3 + $0x30] sm:$0xff]  ;;  %v11105_v37 = vld [vmem:[%s14581_s23 + $0x1e0] sm:$0xff]  }
0x1e0e   : > { %v7120_v5 = vld [vmem:[#allocation3 + $0x36] sm:$0xff]  ;;  %v7448_v29 = vpack.c.bf16 %v7443_v52, %v7442_v20  ;;  %10166 = vmatpush3.bf16.msra.mxu1 %v11102_v59  ;;  %v11107_v40 = vld [vmem:[%s14581_s23 + $0x1e8] sm:$0xff]  }
0x1e0f   : > { %v7121_v28 = vld [vmem:[#allocation3 + $0x3e] sm:$0xff]  ;;  %v11110_v15 = vld [vmem:[%s14581_s23 + $0x1b0] sm:$0xff]   ;;  %v7923_v19 = vld [vmem:[#allocation4] sm:$0x80] }
0x1e10   : > { %7356 = vmatpush1.bf16.msra.mxu0 %v11082_v46  ;;  %v7125_v26 = vpack.c.bf16 %v7121_v28, %v7120_v5  ;;  %v7282_v47 = vld [vmem:[#allocation3 + $0x37] sm:$0xff]  ;;  %v7283_v25 = vld [vmem:[#allocation3 + $0x3f] sm:$0xff]  ;;  %v11108_v46 = vld [vmem:[%s14581_s23 + $0x1a8] sm:$0xff]  }
0x1e11   : > { %7511 = vmatprep.subr.bf16.mxu0 %v11087_v2  ;;  %v7287_v14 = vpack.c.bf16 %v7283_v25, %v7282_v47  ;;  %v7444_v48 = vld [vmem:[#allocation3 + $0x38] sm:$0xff]  ;;  %v7445_v13 = vld [vmem:[#allocation3 + $0x40] sm:$0xff]  ;;  %v11109_v2 = vld [vmem:[%s14581_s23 + $0x1f0] sm:$0xff]  }
0x1e12   : > { %v7449_v63 = vpack.c.bf16 %v7445_v13, %v7444_v48  ;;  %v11113_v5 = vld [vmem:[%s14581_s23 + $0x240] sm:$0xff]   ;;  %v7924_v47 = vld [vmem:[#allocation4 + $0x8] sm:$0x80] }
0x1e13   : > { %9635 = vmatmul.mubr.msk.bf16.gmra.mrb[152].mxu0 %vm1131_vm4, %v7124_v35  ;;  %v11112_v35 = vld [vmem:[%s14581_s23 + $0x1b8] sm:$0xff]   ;;  %v9616_v28 = vld [vmem:[%s14586_s21 + $0x2] sm:$0x3] }
0x1e14   : > { %7249 = vmatprep.mubr.bf16.mxu0 %v14580_v24 }
0x1e1b   : > { %9636 = vmatmul.mubr.msk.bf16.gmra.mrb[156].mxu0 %vm1131_vm4, %v7125_v26  ;;  %v14605_v26 = vld [vmem:[#allocation33_spill] sm:$0xff] }
0x1e1c   : > { %7381 = vmatprep.mubr.bf16.mxu0 %v14580_v24  ;;  %v13901_v53 = vrot.slane %v9616_v28, %v14605_v26 }
0x1e23   : > { %9653 = vmatmul.mubr.msk.bf16.vlgmr.msra.gmra.mrb[144].mxu0 %vm1131_vm4, %v7284_v30 }
0x1e24   : > { %7512 = vmatpush1.bf16.msra.mxu0 %v11085_v27  ;;  %7391 = vmatprep.mubr.bf16.mxu0 %v14580_v24  ;;  %v13904_v27 = vrot.slane %v9616_v28, %v14606_v12 }
0x1e25   : > { %7513 = vmatprep.subr.bf16.mxu0 %v11090_v50 }
0x1e28   : > { %7514 = vmatpush1.bf16.msra.mxu0 %v11088_v43 }
0x1e29   : > { %7515 = vmatprep.subr.bf16.mxu0 %v11093_v62 }
0x1e2b   : > { %9654 = vmatmul.mubr.msk.bf16.gmra.mrb[148].mxu0 %vm1131_vm4, %v7285_v57 }
0x1e2c   : > { %7401 = vmatprep.mubr.bf16.mxu0 %v14580_v24  ;;  %7516 = vmatpush1.bf16.msra.mxu0 %v11091_v34 }
0x1e2d   : > { %7517 = vmatprep.subr.bf16.mxu0 %v11096_v9 }
0x1e30   : > { %7518 = vmatpush1.bf16.msra.mxu0 %v11094_v33 }
0x1e33   : > { %9655 = vmatmul.mubr.msk.bf16.gmra.mrb[152].mxu0 %vm1131_vm4, %v7286_v55 }
0x1e34   : > { %7411 = vmatprep.mubr.bf16.mxu0 %v14580_v24 }
0x1e3b   : > { %9656 = vmatmul.mubr.msk.bf16.gmra.mrb[156].mxu0 %vm1131_vm4, %v7287_v14 }
0x1e3c   : > { %7543 = vmatprep.mubr.bf16.mxu0 %v14580_v24 }
0x1e43   : > { %9673 = vmatmul.mubr.msk.bf16.vlgmr.msra.gmra.mrb[144].mxu0 %vm1131_vm4, %v7446_v36  ;;  %v7658_v36 = vld [vmem:[#allocation4 + $0x8] sm:$0xc0] }
0x1e44   : > { %7553 = vmatprep.mubr.bf16.mxu0 %v14580_v24 }
0x1e4b   : > { %9674 = vmatmul.mubr.msk.bf16.gmra.mrb[148].mxu0 %vm1131_vm4, %v7447_v4 }
0x1e4c   : > { %7563 = vmatprep.mubr.bf16.mxu0 %v14580_v24 }
0x1e53   : > { %9675 = vmatmul.mubr.msk.bf16.gmra.mrb[152].mxu0 %vm1131_vm4, %v7448_v29 }
0x1e54   : > { %7573 = vmatprep.mubr.bf16.mxu0 %v14580_v24  ;;  %v11103_v24 = vld [vmem:[%s14581_s23 + $0x1d8] sm:$0xff]  }
0x1e55   : > { %10167 = vmatprep.subr.bf16.mxu1 %v11103_v24 }
0x1e56   : > { %10168 = vmatpush3.bf16.msra.mxu1 %v11104_v1 }
0x1e57   : > { %10169 = vmatprep.subr.bf16.mxu1 %v11105_v37 }
0x1e5a   : > { %10170 = vmatpush3.bf16.msra.mxu1 %v11106_v49 }
0x1e5b   : > { %9676 = vmatmul.mubr.msk.bf16.gmra.mrb[156].mxu0 %vm1131_vm4, %v7449_v63  ;;  %10171 = vmatprep.subr.bf16.mxu1 %v11107_v40 }
0x1e5e   : > { %10172 = vmatpush3.bf16.msra.mxu1 %v11108_v46 }
0x1e5f   : > { %10173 = vmatprep.subr.bf16.mxu1 %v11109_v2 }
0x1e62   : > { %10174 = vmatpush3.bf16.msra.mxu1 %v11110_v15 }
0x1e63   : > { %10175 = vmatprep.subr.bf16.mxu1 %v11111_v60 }
0x1e66   : > { %10176 = vmatpush3.bf16.msra.mxu1 %v11112_v35 }
0x1e67   : > { %10201 = vmatprep.subr.bf16.mxu1 %v11113_v5 }
0x1f16   : > { %v7545_v30 = vpop.f32.mrb[144].mxu0 }
0x1f17   : > { %v10715_v50 = vadd.f32 %v7545_v30, %v13901_v53  ;;  %v7547_v43 = vpop.f32.mrb[145].mxu0 }
0x1f18   : > { %v10716_v62 = vadd.f32 %v7547_v43, %v13904_v27  ;;  %v7549_v21 = vpop.f32.mrb[146].mxu0 }
0x1f19   : > { %v7600_v54 = vmax.f32 %v10715_v50, 0.0  ;;  %v10717_v34 = vadd.f32 %v7549_v21, %v13901_v53  ;;  %v7551_v57 = vpop.f32.mrb[147].mxu0 }
0x1f1a   : > { %v7601_v9 = vmax.f32 %v10716_v62, 0.0  ;;  %v10718_v33 = vadd.f32 %v7551_v57, %v13904_v27 }
0x1f1b   : > { %v13911_v7 = vmul.f32 %v7600_v54, %v11976_v41  ;;  %v7602_v55 = vmax.f32 %v10717_v34, 0.0 }
0x1f1c   : > { %v13914_v25 = vmul.f32 %v7601_v9, %v11976_v41  ;;  %v7603_v14 = vmax.f32 %v10718_v33, 0.0 }
0x1f1d   : > { %v13917_v0 = vmul.f32 %v7602_v55, %v11985_v44  ;;  %v7927_v18 = vpack.c.bf16 %v13911_v7, %v7923_v19  ;;  %v7675_v48 = vpack.c.bf16 %v13911_v7, %v7657_v11 }
0x1f1e   : > { %v13921_v16 = vmul.f32 %v7603_v14, %v11985_v44  ;;  %v7555_v4 = vpop.f32.mrb[148].mxu0  ;;  %v7928_v20 = vpack.c.bf16 %v13914_v25, %v7924_v47  ;;  %v7676_v31 = vpack.c.bf16 %v13914_v25, %v7658_v36 }
0x1f1f   : > { %v10719_v52 = vadd.f32 %v7555_v4, %v13901_v53  ;;  %v7557_v29 = vpop.f32.mrb[149].mxu0  ;;  %v7965_v13 = vshrl.u32 %v7927_v18, 16  ;;  %v7968_v63 = vshll.u32 %v7927_v18, 16  ;;  %v8231_v50 = vpack.c.bf16 %v13917_v0, %v13911_v7 }
0x1f20   : > { %v10720_v3 = vadd.f32 %v7557_v29, %v13904_v27  ;;  %v7559_v51 = vpop.f32.mrb[150].mxu0  ;;  %v7982_v59 = vshrl.u32 %v7928_v20, 16  ;;  %v7985_v24 = vshll.u32 %v7928_v20, 16  ;;  %v8232_v26 = vpack.c.bf16 %v13921_v16, %v13914_v25 }
0x1f21   : > { %v7604_v1 = vmax.f32 %v10719_v52, 0.0  ;;  %v10721_v37 = vadd.f32 %v7559_v51, %v13901_v53  ;;  %v7561_v49 = vpop.f32.mrb[151].mxu0  ;;  %v13929_v40 = vrot.slane %v7965_v13, 3  ;;  %v13931_v46 = vrot.slane %v7968_v63, 4  ;;  %v11114_v51 = vld [vmem:[%s14581_s23 + $0x200] sm:$0xff]  }
0x1f22   : > { %v7605_v2 = vmax.f32 %v10720_v3, 0.0  ;;  %v10722_v15 = vadd.f32 %v7561_v49, %v13904_v27  ;;  %v13934_v60 = vrot.slane %v7982_v59, 3  ;;  %v13936_v35 = vrot.slane %v7985_v24, 4 }
0x1f23   : > { %v13939_v5 = vmul.f32 %v7604_v1, %v11978_v42  ;;  %v7606_v28 = vmax.f32 %v10721_v37, 0.0  ;;  %v7731_v62 = vrot.slane %v7676_v31, 3  ;;  %v7728_v54 = vrot.slane %v7675_v48, 3  ;;  %v11115_v37 = vld [vmem:[%s14581_s23 + $0x248] sm:$0xff]  }
0x1f24   : > { %v13944_v12 = vmul.f32 %v7605_v2, %v11978_v42  ;;  %v7607_v30 = vmax.f32 %v10722_v15, 0.0  ;;  %v7988_v33 = vor.u32 %v13936_v35, %v13934_v60  ;;  %v7971_v19 = vor.u32 %v13931_v46, %v13929_v40 }
0x1f25   : > { %v13949_v43 = vmul.f32 %v7606_v28, %v11987_v45  ;;  %v13953_v21 = vpack.c.bf16 %v13939_v5, %v13917_v0 }
0x1f26   : > { %v13956_v34 = vmul.f32 %v7607_v30, %v11987_v45  ;;  %v7565_v57 = vpop.f32.mrb[152].mxu0  ;;  %v13960_v9 = vpack.c.bf16 %v13944_v12, %v13921_v16 }
0x1f27   : > { %v10723_v55 = vadd.f32 %v7565_v57, %v13901_v53  ;;  %v7567_v47 = vpop.f32.mrb[153].mxu0  ;;  %v7729_v14 = vrot.slane %v13953_v21, 3  ;;  %v7973_v11 = vshrl.u32 %v13953_v21, 16  ;;  %v7976_v36 = vshll.u32 %v13953_v21, 16  ;;  %v11116_v21 = vld [vmem:[%s14581_s23 + $0x208] sm:$0xff]  }
0x1f28   : > { %v10724_v18 = vadd.f32 %v7567_v47, %v13904_v27  ;;  %v7569_v4 = vpop.f32.mrb[154].mxu0  ;;  %v7732_v20 = vrot.slane %v13960_v9, 3  ;;  %v7990_v52 = vshrl.u32 %v13960_v9, 16  ;;  %v7993_v29 = vshll.u32 %v13960_v9, 16 }
0x1f29   : > { %v7608_v48 = vmax.f32 %v10723_v55, 0.0  ;;  %v10725_v13 = vadd.f32 %v7569_v4, %v13901_v53  ;;  %v7571_v63 = vpop.f32.mrb[155].mxu0  ;;  %v7730_v3 = vsel %vm4125_vm14, %v7728_v54, %v7729_v14  ;;  %v7975_v31 = vrot.slane %v7973_v11, 3 }
0x1f2a   : > { %v7609_v59 = vmax.f32 %v10724_v18, 0.0  ;;  %v10726_v24 = vadd.f32 %v7571_v63, %v13904_v27  ;;  %v7733_v1 = vsel %vm4125_vm14, %v7731_v62, %v7732_v20  ;;  %v7992_v49 = vrot.slane %v7990_v52, 3 }
0x1f2b   : > { %v13981_v40 = vmul.f32 %v7608_v48, %v11991_v56  ;;  %v7610_v46 = vmax.f32 %v10725_v13, 0.0  ;;  %7882 = vmatprep.mubr.bf16.mxu1 %v7733_v1  ;;  %v7995_v2 = vrot.slane %v7993_v29, 4  ;;  %v7978_v15 = vrot.slane %v7976_v36, 4  ;;  %v11117_v36 = vld [vmem:[%s14581_s23 + $0x250] sm:$0xff]  }
0x1f2c   : > { %v13984_v60 = vmul.f32 %v7609_v59, %v11991_v56  ;;  %v7611_v35 = vmax.f32 %v10726_v24, 0.0  ;;  %7883 = vmatmul.mubr.bf16.vlgmr.msra.gmra.mrb[124].mxu1 %v7730_v3  ;;  %v8234_v28 = vpack.c.bf16 %v13956_v34, %v13944_v12  ;;  %v8233_v30 = vpack.c.bf16 %v13949_v43, %v13939_v5 }
0x1f2d   : > { %v13991_v62 = vmul.f32 %v7610_v46, %v14602_v10  ;;  %10202 = vmatpush3.bf16.msra.mxu1 %v11114_v51  ;;  %v13996_v54 = vpack.c.bf16 %v13981_v40, %v13949_v43  ;;  %v7996_v57 = vor.u32 %v7995_v2, %v7992_v49  ;;  %v13998_v9 = vor.u32 %v7978_v15, %v7975_v31  ;;  %v11119_v15 = vld [vmem:[%s14581_s23 + $0x258] sm:$0xff]  }
0x1f2e   : > { %v14001_v55 = vmul.f32 %v7611_v35, %v14602_v10  ;;  %v7575_v47 = vpop.f32.mrb[156].mxu0  ;;  %10203 = vmatprep.subr.bf16.mxu1 %v11115_v37  ;;  %v14005_v11 = vpack.c.bf16 %v13984_v60, %v13956_v34  ;;  %v11118_v37 = vld [vmem:[%s14581_s23 + $0x210] sm:$0xff]  }
0x1f2f   : > { %v10727_v18 = vadd.f32 %v7575_v47, %v13901_v53  ;;  %v7577_v4 = vpop.f32.mrb[157].mxu0  ;;  %v7734_v52 = vrot.slane %v13996_v54, 3  ;;  %v14011_v29 = vsel %vm4362_vm15, %v7988_v33, %v7996_v57  ;;  %v14015_v48 = vsel %vm4362_vm15, %v7971_v19, %v13998_v9 }
0x1f30   : > { %v10728_v13 = vadd.f32 %v7577_v4, %v13904_v27  ;;  %v7579_v63 = vpop.f32.mrb[158].mxu0  ;;  %v7736_v3 = vrot.slane %v14005_v11, 3  ;;  %v8008_v51 = vshrl.u32 %v14005_v11, 16  ;;  %v8011_v31 = vshll.u32 %v14005_v11, 16  ;;  %v11120_v4 = vld [vmem:[%s14581_s23 + $0x218] sm:$0xff]  }
0x1f31   : > { %v7612_v59 = vmax.f32 %v10727_v18, 0.0  ;;  %v10729_v24 = vadd.f32 %v7579_v63, %v13901_v53  ;;  %v7581_v1 = vpop.f32.mrb[159].mxu0  ;;  %10204 = vmatpush3.bf16.msra.mxu1 %v11116_v21  ;;  %v7735_v33 = vsel %vm4125_vm14, %v7729_v14, %v7734_v52  ;;  %v7999_v19 = vshrl.u32 %v13996_v54, 16 }
0x1f32   : > { %v7613_v49 = vmax.f32 %v10728_v13, 0.0  ;;  %v10730_v46 = vadd.f32 %v7581_v1, %v13904_v27  ;;  %v7737_v2 = vsel %vm4125_vm14, %v7732_v20, %v7736_v3  ;;  %10205 = vmatprep.subr.bf16.mxu1 %v11117_v36  ;;  %v8010_v35 = vrot.slane %v8008_v51, 3 }
0x1f33   : > { %v14029_v47 = vmul.f32 %v7612_v59, %v14603_v17  ;;  %v7614_v53 = vmax.f32 %v10729_v24, 0.0  ;;  %7890 = vmatprep.mubr.bf16.mxu1 %v7737_v2  ;;  %v8013_v21 = vrot.slane %v8011_v31, 4  ;;  %v8001_v14 = vrot.slane %v7999_v19, 3  ;;  %v11121_v59 = vld [vmem:[%s14581_s23 + $0x260] sm:$0xff]  }
0x1f34   : > { %v14032_v11 = vmul.f32 %v7613_v49, %v14603_v17  ;;  %v7615_v18 = vmax.f32 %v10730_v46, 0.0  ;;  %7891 = vmatmul.mubr.bf16.gmra.mrb[128].mxu1 %v7735_v33  ;;  %v8002_v27 = vshll.u32 %v13996_v54, 16  ;;  %v8236_v20 = vpack.c.bf16 %v14001_v55, %v13984_v60 }
0x1f35   : > { %v14038_v36 = vmul.f32 %v7614_v53, %v14604_v22  ;;  %10206 = vmatpush3.bf16.msra.mxu1 %v11118_v37  ;;  %v7681_v13 = vpack.c.bf16 %v14029_v47, %v13991_v62  ;;  %v8014_v63 = vor.u32 %v8013_v21, %v8010_v35  ;;  %v8235_v51 = vpack.c.bf16 %v13991_v62, %v13981_v40  ;;  %v11122_v53 = vld [vmem:[%s14581_s23 + $0x220] sm:$0xff]  }
0x1f36   : > { %v14046_v31 = vmul.f32 %v7615_v18, %v14604_v22  ;;  %10207 = vmatprep.subr.bf16.mxu1 %v11119_v15  ;;  %v7682_v54 = vpack.c.bf16 %v14032_v11, %v14001_v55  ;;  %v8004_v24 = vrot.slane %v8002_v27, 4 }
0x1f37   : > { %7646 = vst [vmem:[#allocation4 + $0x80] sm:$0xff] %v14038_v36  ;;  %v7738_v1 = vrot.slane %v7681_v13, 3  ;;  %v8015_v33 = vsel %vm4362_vm15, %v7996_v57, %v8014_v63  ;;  %v8017_v37 = vshrl.u32 %v7681_v13, 16  ;;  %v8020_v19 = vshll.u32 %v7681_v13, 16  ;;  %v11123_v13 = vld [vmem:[%s14581_s23 + $0x268] sm:$0xff]  }
0x1f38   : > { %7647 = vst [vmem:[#allocation4 + $0x88] sm:$0xff] %v14046_v31  ;;  %v7740_v49 = vrot.slane %v7682_v54, 3  ;;  %v8005_v46 = vor.u32 %v8004_v24, %v8001_v14  ;;  %v8026_v2 = vshrl.u32 %v7682_v54, 16  ;;  %v8029_v15 = vshll.u32 %v7682_v54, 16 }
0x1f39   : > { %10208 = vmatpush3.bf16.msra.mxu1 %v11120_v4  ;;  %v7739_v35 = vsel %vm4125_vm14, %v7734_v52, %v7738_v1  ;;  %v8019_v21 = vrot.slane %v8017_v37, 3  ;;  %v8022_v18 = vrot.slane %v8020_v19, 4  ;;  %v8238_v27 = vpack.c.bf16 %v14046_v31, %v14032_v11  ;;  %v11125_v19 = vld [vmem:[%s14581_s23 + $0x270] sm:$0xff]  }
0x1f3a   : > { %v7741_v57 = vsel %vm4125_vm14, %v7736_v3, %v7740_v49  ;;  %10209 = vmatprep.subr.bf16.mxu1 %v11121_v59  ;;  %v8006_v14 = vsel %vm4362_vm15, %v13998_v9, %v8005_v46  ;;  %v8028_v24 = vrot.slane %v8026_v2, 3  ;;  %v8031_v54 = vrot.slane %v8029_v15, 4  ;;  %v11124_v3 = vld [vmem:[%s14581_s23 + $0x228] sm:$0xff]  }
0x1f3b   : > { %7898 = vmatprep.mubr.bf16.mxu1 %v7741_v57  ;;  %v14062_v4 = vor.u32 %v8022_v18, %v8019_v21  ;;  %v8237_v52 = vpack.c.bf16 %v14038_v36, %v14029_v47  ;;  %v11126_v57 = vld [vmem:[%s14581_s23 + $0x230] sm:$0xff]  }
0x1f3c   : > { %7899 = vmatmul.mubr.bf16.gmra.mrb[132].mxu1 %v7739_v35  ;;  %v14066_v37 = vor.u32 %v8031_v54, %v8028_v24  ;;  %v11127_v24 = vld [vmem:[%s14581_s23 + $0x278] sm:$0xff]   ;;  %v11129_v54 = vld [vmem:[%s14581_s23 + $0x2c0] sm:$0xff]  }
0x1f3d   : > { %10210 = vmatpush3.bf16.msra.mxu1 %v11122_v53  ;;  %v8024_v59 = vsel %vm4362_vm15, %v8005_v46, %v14062_v4 }
0x1f3e   : > { %10211 = vmatprep.subr.bf16.mxu1 %v11123_v13  ;;  %v7673_v9 = vld [vmem:[#allocation4 + $0x80] sm:$0x3f]  ;;  %v8033_v2 = vsel %vm4362_vm15, %v8014_v63, %v14066_v37  ;;  %v11128_v63 = vld [vmem:[%s14581_s23 + $0x238] sm:$0xff]  }
0x1f3f   : > { %v7674_v15 = vld [vmem:[#allocation4 + $0x88] sm:$0x3f]  ;;  %v7683_v21 = vpack.c.bf16 %v7673_v9, %v7673_v9 }
0x1f40   : > { %v7684_v18 = vpack.c.bf16 %v7674_v15, %v7674_v15  ;;  %v7926_v9 = vld [vmem:[#allocation4 + $0x88] sm:$0x7f] }
0x1f41   : > { %10212 = vmatpush3.bf16.msra.mxu1 %v11124_v3  ;;  %v7742_v35 = vrot.slane %v7683_v21, 3  ;;  %v11130_v3 = vld [vmem:[%s14581_s23 + $0x280] sm:$0xff]   ;;  %v11133_v15 = vld [vmem:[%s14581_s23 + $0x2d0] sm:$0xff]  }
0x1f42   : > { %v7744_v53 = vrot.slane %v7684_v18, 3  ;;  %10213 = vmatprep.subr.bf16.mxu1 %v11125_v19  ;;  %v11131_v19 = vld [vmem:[%s14581_s23 + $0x2c8] sm:$0xff]  }
0x1f43   : > { %v7743_v13 = vsel %vm4125_vm14, %v7738_v1, %v7742_v35  ;;  %v11132_v1 = vld [vmem:[%s14581_s23 + $0x288] sm:$0xff]   ;;  %v11134_v35 = vld [vmem:[%s14581_s23 + $0x290] sm:$0xff]  }
0x1f44   : > { %v7745_v46 = vsel %vm4125_vm14, %v7740_v49, %v7744_v53  ;;  %v7930_v49 = vpack.c.bf16 %v7926_v9, %v7926_v9  ;;  %v11139_v9 = vld [vmem:[%s14581_s23 + $0x2e8] sm:$0xff]  }
0x1f45   : > { %7906 = vmatprep.mubr.bf16.mxu1 %v7745_v46  ;;  %10214 = vmatpush3.bf16.msra.mxu1 %v11126_v57  ;;  %v11135_v57 = vld [vmem:[%s14581_s23 + $0x2d8] sm:$0xff]   ;;  %v11137_v46 = vld [vmem:[%s14581_s23 + $0x2e0] sm:$0xff]  }
0x1f46   : > { %7907 = vmatmul.mubr.bf16.gmra.mrb[136].mxu1 %v7743_v13  ;;  %10215 = vmatprep.subr.bf16.mxu1 %v11127_v24  ;;  %v8044_v21 = vshrl.u32 %v7930_v49, 16  ;;  %v8047_v18 = vshll.u32 %v7930_v49, 16  ;;  %v11140_v49 = vld [vmem:[%s14581_s23 + $0x2a8] sm:$0xff]  }
0x1f47   : > { %8188 = vmatprep.mubr.bf16.mxu1 %v14011_v29  ;;  %v7925_v29 = vld [vmem:[#allocation4 + $0x80] sm:$0x7f] }
0x1f48   : > { %v7929_v53 = vpack.c.bf16 %v7925_v29, %v7925_v29  ;;  %v8049_v24 = vrot.slane %v8047_v18, 4  ;;  %v11143_v18 = vld [vmem:[%s14581_s23 + $0x2f8] sm:$0xff]  }
0x1f49   : > { %10216 = vmatpush3.bf16.msra.mxu1 %v11128_v63 }
0x1f4a   : > { %10241 = vmatprep.subr.bf16.mxu1 %v11129_v54  ;;  %v8035_v13 = vshrl.u32 %v7929_v53, 16  ;;  %v8038_v63 = vshll.u32 %v7929_v53, 16 }
0x1f4e   : > { %8189 = vmatmul.mubr.bf16.vlgmr.msra.gmra.mrb[140].mxu1 %v14015_v48  ;;  %v8046_v48 = vrot.slane %v8044_v21, 3  ;;  %v11142_v21 = vld [vmem:[%s14581_s23 + $0x2b0] sm:$0xff]  }
0x1f4f   : > { %8196 = vmatprep.mubr.bf16.mxu1 %v8015_v33  ;;  %10242 = vmatpush3.bf16.msra.mxu1 %v11130_v3  ;;  %v11136_v33 = vld [vmem:[%s14581_s23 + $0x298] sm:$0xff]   ;;  %v11138_v3 = vld [vmem:[%s14581_s23 + $0x2a0] sm:$0xff]  }
0x1f50   : > { %10243 = vmatprep.subr.bf16.mxu1 %v11131_v19  ;;  %v8050_v54 = vor.u32 %v8049_v24, %v8046_v48  ;;  %v8037_v19 = vrot.slane %v8035_v13, 3 }
0x1f53   : > { %10244 = vmatpush3.bf16.msra.mxu1 %v11132_v1  ;;  %v11141_v1 = vld [vmem:[%s14581_s23 + $0x2f0] sm:$0xff]  }
0x1f54   : > { %10245 = vmatprep.subr.bf16.mxu1 %v11133_v15 }
0x1f56   : > { %8197 = vmatmul.mubr.bf16.gmra.mrb[144].mxu1 %v8006_v14  ;;  %v8040_v14 = vrot.slane %v8038_v63, 4 }
0x1f57   : > { %8204 = vmatprep.mubr.bf16.mxu1 %v8033_v2  ;;  %10246 = vmatpush3.bf16.msra.mxu1 %v11134_v35  ;;  %v8051_v2 = vsel %vm4362_vm15, %v14066_v37, %v8050_v54  ;;  %v11144_v37 = vld [vmem:[%s14581_s23 + $0x2b8] sm:$0xff]  }
0x1f58   : > { %10247 = vmatprep.subr.bf16.mxu1 %v11135_v57  ;;  %v8041_v15 = vor.u32 %v8040_v14, %v8037_v19 }
0x1f5a   : > { %v8042_v29 = vsel %vm4362_vm15, %v14062_v4, %v8041_v15 }
0x1f5b   : > { %10248 = vmatpush3.bf16.msra.mxu1 %v11136_v33 }
0x1f5c   : > { %10249 = vmatprep.subr.bf16.mxu1 %v11137_v46 }
0x1f5e   : > { %8205 = vmatmul.mubr.bf16.gmra.mrb[148].mxu1 %v8024_v59 }
0x1f5f   : > { %8212 = vmatprep.mubr.bf16.mxu1 %v8051_v2  ;;  %10250 = vmatpush3.bf16.msra.mxu1 %v11138_v3 }
0x1f60   : > { %10251 = vmatprep.subr.bf16.mxu1 %v11139_v9 }
0x1f63   : > { %10252 = vmatpush3.bf16.msra.mxu1 %v11140_v49 }
0x1f64   : > { %10253 = vmatprep.subr.bf16.mxu1 %v11141_v1 }
0x1f66   : > { %8213 = vmatmul.mubr.bf16.gmra.mrb[152].mxu1 %v8042_v29 }
0x1f67   : > { %10254 = vmatpush3.bf16.msra.mxu1 %v11142_v21  ;;  %8400 = vmatprep.mubr.bf16.mxu1 %v8232_v26 }
0x1f68   : > { %10255 = vmatprep.subr.bf16.mxu1 %v11143_v18 }
0x1f6b   : > { %10256 = vmatpush3.bf16.msra.mxu1 %v11144_v37 }
0x1f6e   : > { %8401 = vmatmul.mubr.bf16.vlgmr.msra.gmra.mrb[156].mxu1 %v8231_v50 }
0x1f6f   : > { %8408 = vmatprep.mubr.bf16.mxu1 %v8234_v28 }
0x1f76   : > { %8409 = vmatmul.mubr.bf16.gmra.mrb[160].mxu1 %v8233_v30 }
0x1f77   : > { %8416 = vmatprep.mubr.bf16.mxu1 %v8236_v20 }
0x1f7e   : > { %8417 = vmatmul.mubr.bf16.gmra.mrb[164].mxu1 %v8235_v51 }
0x1f7f   : > { %8424 = vmatprep.mubr.bf16.mxu1 %v8238_v27 }
0x1f86   : > { %8425 = vmatmul.mubr.bf16.gmra.mrb[168].mxu1 %v8237_v52  ;;  %v9678_v52 = vld [vmem:[%s14595_s27 + $0x1] ss:$0 sm:$0xff] }
0x1fff   : > { %v10177_v7 = vpop.f32.mrb[124].mxu1 }
0x2000   : > { %v10178_v25 = vpop.f32.mrb[125].mxu1 }
0x2001   : > { %v10179_v0 = vadd.f32 %v10178_v25, %v10177_v7  ;;  %v10180_v16 = vpop.f32.mrb[126].mxu1 }
0x2002   : > { %v10181_v5 = vpop.f32.mrb[127].mxu1 }
0x2003   : > { %v10182_v26 = vadd.f32 %v10181_v5, %v10180_v16  ;;  %v7915_v57 = vadd.f32 %v10179_v0, %v9678_v52 }
0x2005   : > { %v7916_v33 = vadd.f32 %v10182_v26, %v9678_v52 }
0x2007   : > { %v10183_v12 = vpop.f32.mrb[128].mxu1 }
0x2008   : > { %v10184_v50 = vpop.f32.mrb[129].mxu1 }
0x2009   : > { %v10185_v43 = vadd.f32 %v10184_v50, %v10183_v12  ;;  %v10186_v34 = vpop.f32.mrb[130].mxu1 }
0x200a   : > { %v10187_v40 = vpop.f32.mrb[131].mxu1 }
0x200b   : > { %v10188_v60 = vadd.f32 %v10187_v40, %v10186_v34  ;;  %v7917_v9 = vadd.f32 %v10185_v43, %v9678_v52 }
0x200d   : > { %v7918_v49 = vadd.f32 %v10188_v60, %v9678_v52 }
0x200f   : > { %v10189_v28 = vpop.f32.mrb[132].mxu1 }
0x2010   : > { %v10190_v30 = vpop.f32.mrb[133].mxu1 }
0x2011   : > { %v10191_v62 = vadd.f32 %v10190_v30, %v10189_v28  ;;  %v10192_v55 = vpop.f32.mrb[134].mxu1 }
0x2012   : > { %v10193_v11 = vpop.f32.mrb[135].mxu1 }
0x2013   : > { %v10194_v47 = vadd.f32 %v10193_v11, %v10192_v55  ;;  %v7919_v37 = vadd.f32 %v10191_v62, %v9678_v52 }
0x2015   : > { %v7920_v16 = vadd.f32 %v10194_v47, %v9678_v52 }
0x2019   : > { %v10195_v20 = vpop.f32.mrb[136].mxu1 }
0x201a   : > { %v10196_v36 = vpop.f32.mrb[137].mxu1 }
0x201b   : > { %v10197_v51 = vadd.f32 %v10196_v36, %v10195_v20  ;;  %v10198_v31 = vpop.f32.mrb[138].mxu1 }
0x201c   : > { %v10199_v27 = vpop.f32.mrb[139].mxu1 }
0x201d   : > { %v10200_v4 = vadd.f32 %v10199_v27, %v10198_v31  ;;  %v7921_v43 = vadd.f32 %v10197_v51, %v9678_v52 }
0x201f   : > { %v7922_v60 = vadd.f32 %v10200_v4, %v9678_v52 }
0x2021   : > { %v10217_v59 = vpop.f32.mrb[140].mxu1 }
0x2022   : > { %v10218_v35 = vpop.f32.mrb[141].mxu1 }
0x2023   : > { %v10219_v53 = vadd.f32 %v10218_v35, %v10217_v59  ;;  %v10220_v48 = vpop.f32.mrb[142].mxu1 }
0x2024   : > { %v10221_v24 = vpop.f32.mrb[143].mxu1 }
0x2025   : > { %v8221_v46 = vadd.f32 %v10219_v53, %v7915_v57  ;;  %v10222_v13 = vadd.f32 %v10221_v24, %v10220_v48 }
0x2027   : > { %v8222_v63 = vadd.f32 %v10222_v13, %v7916_v33 }
0x2029   : > { %v10223_v54 = vpop.f32.mrb[144].mxu1 }
0x202a   : > { %v10224_v3 = vpop.f32.mrb[145].mxu1 }
0x202b   : > { %v10225_v19 = vadd.f32 %v10224_v3, %v10223_v54  ;;  %v10226_v14 = vpop.f32.mrb[146].mxu1 }
0x202c   : > { %v10227_v2 = vpop.f32.mrb[147].mxu1 }
0x202d   : > { %v8223_v1 = vadd.f32 %v10225_v19, %v7917_v9  ;;  %v10228_v15 = vadd.f32 %v10227_v2, %v10226_v14 }
0x202f   : > { %v8224_v21 = vadd.f32 %v10228_v15, %v7918_v49 }
0x2031   : > { %v10229_v18 = vpop.f32.mrb[148].mxu1 }
0x2032   : > { %v10230_v29 = vpop.f32.mrb[149].mxu1 }
0x2033   : > { %v10231_v7 = vadd.f32 %v10230_v29, %v10229_v18  ;;  %v10232_v25 = vpop.f32.mrb[150].mxu1 }
0x2034   : > { %v10233_v0 = vpop.f32.mrb[151].mxu1 }
0x2035   : > { %v8225_v5 = vadd.f32 %v10231_v7, %v7919_v37  ;;  %v10234_v26 = vadd.f32 %v10233_v0, %v10232_v25 }
0x2037   : > { %v8226_v12 = vadd.f32 %v10234_v26, %v7920_v16 }
0x2039   : > { %v10235_v50 = vpop.f32.mrb[152].mxu1 }
0x203a   : > { %v10236_v34 = vpop.f32.mrb[153].mxu1 }
0x203b   : > { %v10237_v40 = vadd.f32 %v10236_v34, %v10235_v50  ;;  %v10238_v28 = vpop.f32.mrb[154].mxu1 }
0x203c   : > { %v10239_v30 = vpop.f32.mrb[155].mxu1 }
0x203d   : > { %v8227_v55 = vadd.f32 %v10237_v40, %v7921_v43  ;;  %v10240_v11 = vadd.f32 %v10239_v30, %v10238_v28 }
0x203f   : > { %v8228_v20 = vadd.f32 %v10240_v11, %v7922_v60 }
0x2041   : > { %v10257_v36 = vpop.f32.mrb[156].mxu1 }
0x2042   : > { %v10258_v31 = vpop.f32.mrb[157].mxu1 }
0x2043   : > { %v10259_v62 = vadd.f32 %v10258_v31, %v10257_v36  ;;  %v10260_v27 = vpop.f32.mrb[158].mxu1 }
0x2044   : > { %v10261_v59 = vpop.f32.mrb[159].mxu1 }
0x2045   : > { %v8433_v35 = vadd.f32 %v10259_v62, %v8221_v46  ;;  %v10262_v47 = vadd.f32 %v10261_v59, %v10260_v27 }
0x2047   : > { %v8441_v57 = vmul.f32 %v8433_v35, %v11976_v41  ;;  %v8434_v53 = vadd.f32 %v10262_v47, %v8222_v63 }
0x2049   : > { %v8442_v48 = vmul.f32 %v8434_v53, %v11985_v44  ;;  %v10263_v51 = vpop.f32.mrb[160].mxu1  ;;  %v8449_v24 = vadd.f32 %v8441_v57, %v13800_v39 }
0x204a   : > { %v10264_v33 = vpop.f32.mrb[161].mxu1 }
0x204b   : > { %v10265_v4 = vadd.f32 %v10264_v33, %v10263_v51  ;;  %v10266_v52 = vpop.f32.mrb[162].mxu1  ;;  %v8461_v13 = vsel %vm1131_vm4, %v8449_v24, 0.0  ;;  %v8450_v54 = vadd.f32 %v8442_v48, %v13805_v32 }
0x204c   : > { %v10267_v3 = vpop.f32.mrb[163].mxu1  ;;  %8462 = vadd.xlane.f32.xlu1 %v8461_v13 }
0x204d   : > { %v8435_v9 = vadd.f32 %v10265_v4, %v8223_v1  ;;  %v10268_v46 = vadd.f32 %v10267_v3, %v10266_v52  ;;  %v8464_v19 = vsel %vm1131_vm4, %v8450_v54, 0.0 }
0x204e   : > { %8465 = vadd.xlane.f32.xlu0 %v8464_v19 }
0x204f   : > { %v8443_v63 = vmul.f32 %v8435_v9, %v11978_v42  ;;  %v8436_v14 = vadd.f32 %v10268_v46, %v8224_v21 }
0x2051   : > { %v8444_v2 = vmul.f32 %v8436_v14, %v11987_v45  ;;  %v10269_v39 = vpop.f32.mrb[164].mxu1  ;;  %v8451_v49 = vadd.f32 %v8443_v63, %v13810_v23 }
0x2052   : > { %v10270_v15 = vpop.f32.mrb[165].mxu1 }
0x2053   : > { %v10271_v18 = vadd.f32 %v10270_v15, %v10269_v39  ;;  %v10272_v29 = vpop.f32.mrb[166].mxu1  ;;  %v8467_v32 = vsel %vm1131_vm4, %v8451_v49, 0.0  ;;  %v8452_v37 = vadd.f32 %v8444_v2, %v13817_v38 }
0x2054   : > { %v10273_v1 = vpop.f32.mrb[167].mxu1  ;;  %8468 = vadd.xlane.f32.xlu1 %v8467_v32 }
0x2055   : > { %v8437_v7 = vadd.f32 %v10271_v18, %v8225_v5  ;;  %v10274_v25 = vadd.f32 %v10273_v1, %v10272_v29  ;;  %v8470_v0 = vsel %vm1131_vm4, %v8452_v37, 0.0 }
0x2056   : > { %8471 = vadd.xlane.f32.xlu0 %v8470_v0 }
0x2057   : > { %v8445_v21 = vmul.f32 %v8437_v7, %v11991_v56  ;;  %v8438_v16 = vadd.f32 %v10274_v25, %v8226_v12 }
0x2059   : > { %v8446_v26 = vmul.f32 %v8438_v16, %v14602_v10  ;;  %v10275_v23 = vpop.f32.mrb[168].mxu1  ;;  %v8453_v50 = vadd.f32 %v8445_v21, %v13824_v6 }
0x205a   : > { %v10276_v34 = vpop.f32.mrb[169].mxu1 }
0x205b   : > { %v10277_v43 = vadd.f32 %v10276_v34, %v10275_v23  ;;  %v10278_v40 = vpop.f32.mrb[170].mxu1  ;;  %v8473_v38 = vsel %vm1131_vm4, %v8453_v50, 0.0  ;;  %v8454_v28 = vadd.f32 %v8446_v26, %v13827_v58  ;;  %v11145_v34 = vld [vmem:[%s11897_s0] sm:$0xff]  }
0x205c   : > { %v10279_v5 = vpop.f32.mrb[171].mxu1  ;;  %8474 = vadd.xlane.f32.xlu1 %v8473_v38  ;;  %10667 = vmatprep.subr.bf16.mxu0 %v11145_v34  ;;  %v11148_v38 = vld [vmem:[%s11897_s0 + $0x18] sm:$0xff]  }
0x205d   : > { %v8439_v30 = vadd.f32 %v10277_v43, %v8227_v55  ;;  %v10280_v60 = vadd.f32 %v10279_v5, %v10278_v40  ;;  %v8476_v11 = vsel %vm1131_vm4, %v8454_v28, 0.0  ;;  %10668 = vmatpush3.bf16.msra.mxu0 %v11145_v34  ;;  %v11146_v43 = vld [vmem:[%s11897_s0 + $0x8] sm:$0xff]   ;;  %v11147_v40 = vld [vmem:[%s11897_s0 + $0x10] sm:$0xff]  }
0x205e   : > { %8477 = vadd.xlane.f32.xlu0 %v8476_v11  ;;  %10669 = vmatprep.subr.bf16.mxu0 %v11146_v43 }
0x205f   : > { %v8447_v12 = vmul.f32 %v8439_v30, %v14603_v17  ;;  %v8440_v36 = vadd.f32 %v10280_v60, %v8228_v20 }
0x2061   : > { %v8448_v31 = vmul.f32 %v8440_v36, %v14604_v22  ;;  %v8455_v6 = vadd.f32 %v8447_v12, %v13837_v61  ;;  %10670 = vmatpush3.bf16.msra.mxu0 %v11146_v43 }
0x2062   : > { %10671 = vmatprep.subr.bf16.mxu0 %v11147_v40 }
0x2063   : > { %v8479_v62 = vsel %vm1131_vm4, %v8455_v6, 0.0  ;;  %v8456_v27 = vadd.f32 %v8448_v31, %v13841_v8 }
0x2064   : > { %8480 = vadd.xlane.f32.xlu1 %v8479_v62 }
0x2065   : > { %v8482_v58 = vsel %vm1131_vm4, %v8456_v27, 0.0  ;;  %10672 = vmatpush3.bf16.msra.mxu0 %v11147_v40 }
0x2066   : > { %8483 = vadd.xlane.f32.xlu0 %v8482_v58  ;;  %10673 = vmatprep.subr.bf16.mxu0 %v11148_v38 }
0x2069   : > { %10674 = vmatpush3.bf16.msra.mxu0 %v11148_v38 }
0x20d9   : > { %v8463_v55 = vpop.xlane.xlu1 %8462 }
0x20da   : > { %v8485_v59 = vmul.f32 0.015625, %v8463_v55 }
0x20db   : > { %v8466_v35 = vpop.xlane.xlu0 %8465 }
0x20dc   : > { %v14150_v47 = vsub.f32 %v8449_v24, %v8485_v59  ;;  %v8486_v57 = vmul.f32 0.015625, %v8466_v35  ;;  %v9825_v59 = vld [vmem:[%s11887_s16 + $0x1] ss:$0 sm:$0xff]  ;;  %s8730_s16 = ssub.s32 0, %s14607_s8 }
0x20dd   : > { %s9836_s3 = smin.u32 %s14607_s8, %s8730_s16 }
0x20de   : > { %v14152_v53 = vsub.f32 %v8450_v54, %v8486_v57  ;;  %v8501_v20 = vmul.f32 %v14150_v47, %v14150_v47  ;;  %s8732_s25 = sand.u32 1, %s9836_s3  }
0x20df   : > { %s8733_s22 = ssub.s32 0, %s8732_s25 }
0x20e0   : > { %v8509_v61 = vsel %vm1131_vm4, %v8501_v20, 0.0  ;;  %v8502_v8 = vmul.f32 %v14152_v53, %v14152_v53  ;;  %s14646_s22 = smov (!%p8729_p8, %s8733_s22), %s8732_s25 }
0x20e1   : > { %v8469_v48 = vpop.xlane.xlu1 %8468  ;;  %8510 = vadd.xlane.f32.xlu1 %v8509_v61  ;;  %v9826_v61 = vld [vmem:[%s11892_s10 + $0x1] ss:$0 sm:$0xff]  ;;  %p9838_p9 = scmp.lt.s32.totalorder %s14646_s22, 0  ;;  %s8739_s7 = sadd.s32 2, %s14646_s22 }
0x20e2   : > { %v8487_v51 = vmul.f32 0.015625, %v8469_v48  ;;  %v8512_v33 = vsel %vm1131_vm4, %v8502_v8, 0.0 }
0x20e3   : > { %v8472_v4 = vpop.xlane.xlu0 %8471  ;;  %8513 = vadd.xlane.f32.xlu0 %v8512_v33  ;;  %s14648_s7 = smov (!%p9838_p9, %s8739_s7), %s14646_s22 }
0x20e4   : > { %v14160_v24 = vsub.f32 %v8451_v49, %v8487_v51  ;;  %v8488_v52 = vmul.f32 0.015625, %v8472_v4  ;;  %p9839_p10 = scmp.ne.s32.totalorder %s14648_s7, 0 }
0x20e5   : > { %s11615_s2 = smov (!%p9839_p10), 124   ;;  %s11616_s0 = smov (!%p9839_p10), 4   ;;  %vm8825_vm0 = vcmask (!%p9839_p10), 31744  }
0x20e6   : > { %v14162_v13 = vsub.f32 %v8452_v37, %v8488_v52  ;;  %v8503_v54 = vmul.f32 %v14160_v24, %v14160_v24 }
0x20e8   : > { %v8515_v3 = vsel %vm1131_vm4, %v8503_v54, 0.0  ;;  %v8504_v9 = vmul.f32 %v14162_v13, %v14162_v13 }
0x20e9   : > { %v8475_v46 = vpop.xlane.xlu1 %8474  ;;  %8516 = vadd.xlane.f32.xlu1 %v8515_v3 }
0x20ea   : > { %v8489_v19 = vmul.f32 0.015625, %v8475_v46  ;;  %v8518_v63 = vsel %vm1131_vm4, %v8504_v9, 0.0 }
0x20eb   : > { %v8478_v14 = vpop.xlane.xlu0 %8477  ;;  %8519 = vadd.xlane.f32.xlu0 %v8518_v63 }
0x20ec   : > { %v14170_v2 = vsub.f32 %v8453_v50, %v8489_v19  ;;  %v8490_v39 = vmul.f32 0.015625, %v8478_v14 }
0x20ee   : > { %v14172_v49 = vsub.f32 %v8454_v28, %v8490_v39  ;;  %v8505_v15 = vmul.f32 %v14170_v2, %v14170_v2 }
0x20f0   : > { %v8521_v18 = vsel %vm1131_vm4, %v8505_v15, 0.0  ;;  %v8506_v29 = vmul.f32 %v14172_v49, %v14172_v49 }
0x20f1   : > { %8522 = vadd.xlane.f32.xlu1 %v8521_v18  ;;  %v8481_v32 = vpop.xlane.xlu1 %8480 }
0x20f2   : > { %v8491_v37 = vmul.f32 0.015625, %v8481_v32  ;;  %v8524_v1 = vsel %vm1131_vm4, %v8506_v29, 0.0 }
0x20f3   : > { %8525 = vadd.xlane.f32.xlu0 %v8524_v1  ;;  %v8484_v7 = vpop.xlane.xlu0 %8483 }
0x20f4   : > { %v14180_v25 = vsub.f32 %v8455_v6, %v8491_v37  ;;  %v8492_v0 = vmul.f32 0.015625, %v8484_v7 }
0x20f6   : > { %v14182_v21 = vsub.f32 %v8456_v27, %v8492_v0  ;;  %v8507_v16 = vmul.f32 %v14180_v25, %v14180_v25 }
0x20f8   : > { %v8527_v26 = vsel %vm1131_vm4, %v8507_v16, 0.0  ;;  %v8508_v23 = vmul.f32 %v14182_v21, %v14182_v21 }
0x20f9   : > { %8528 = vadd.xlane.f32.xlu1 %v8527_v26 }
0x20fa   : > { %v8530_v50 = vsel %vm1131_vm4, %v8508_v23, 0.0 }
0x20fb   : > { %8531 = vadd.xlane.f32.xlu0 %v8530_v50 }
0x216e   : > { %v8511_v28 = vpop.xlane.xlu1 %8510 }
0x216f   : > { %v8533_v5 = vmul.f32 0.015625, %v8511_v28 }
0x2170   : > { %v8514_v30 = vpop.xlane.xlu0 %8513 }
0x2171   : > { %v8541_v60 = vadd.f32 1e-05, %v8533_v5  ;;  %v8534_v11 = vmul.f32 0.015625, %v8514_v30 }
0x2173   : > { %11549 = vrsqrt.f32 %v8541_v60  ;;  %v8542_v12 = vadd.f32 1e-05, %v8534_v11 }
0x2175   : > { %11551 = vrsqrt.f32 %v8542_v12 }
0x2176   : > { %v8517_v36 = vpop.xlane.xlu1 %8516 }
0x2177   : > { %v8535_v31 = vmul.f32 0.015625, %v8517_v36 }
0x2178   : > { %v8520_v6 = vpop.xlane.xlu0 %8519 }
0x2179   : > { %v8543_v62 = vadd.f32 1e-05, %v8535_v31  ;;  %v8536_v27 = vmul.f32 0.015625, %v8520_v6 }
0x217b   : > { %11553 = vrsqrt.f32 %v8543_v62  ;;  %v8544_v58 = vadd.f32 1e-05, %v8536_v27 }
0x217d   : > { %v11550_v55 = vpop.eup %11549  ;;  %11555 = vrsqrt.f32 %v8544_v58 }
0x217e   : > { %v8557_v35 = vmul.f32 %v11550_v55, %v14150_v47  ;;  %v8523_v57 = vpop.xlane.xlu1 %8522 }
0x217f   : > { %v11552_v20 = vpop.eup %11551  ;;  %v8537_v8 = vmul.f32 0.015625, %v8523_v57 }
0x2180   : > { %v8558_v48 = vmul.f32 %v11552_v20, %v14152_v53  ;;  %v8526_v51 = vpop.xlane.xlu0 %8525  ;;  %v8571_v33 = vmul.f32 %v9825_v59, %v8557_v35 }
0x2181   : > { %v8545_v4 = vadd.f32 1e-05, %v8537_v8  ;;  %v8538_v52 = vmul.f32 0.015625, %v8526_v51 }
0x2182   : > { %v8572_v54 = vmul.f32 %v9825_v59, %v8558_v48  ;;  %v8585_v3 = vadd.f32 %v9826_v61, %v8571_v33 }
0x2183   : > { %11557 = vrsqrt.f32 %v8545_v4  ;;  %v8546_v9 = vadd.f32 1e-05, %v8538_v52 }
0x2184   : > { %v8586_v46 = vadd.f32 %v9826_v61, %v8572_v54  ;;  %v8593_v14 = vmul.f32 %v8585_v3, %v11976_v41 }
0x2185   : > { %v11554_v19 = vpop.eup %11553  ;;  %11559 = vrsqrt.f32 %v8546_v9 }
0x2186   : > { %v8559_v63 = vmul.f32 %v11554_v19, %v14160_v24  ;;  %v8529_v47 = vpop.xlane.xlu1 %8528  ;;  %v8594_v39 = vmul.f32 %v8586_v46, %v11985_v44 }
0x2187   : > { %v11556_v15 = vpop.eup %11555  ;;  %v8539_v53 = vmul.f32 0.015625, %v8529_v47 }
0x2188   : > { %v8573_v18 = vmul.f32 %v9825_v59, %v8559_v63  ;;  %v8560_v29 = vmul.f32 %v11556_v15, %v14162_v13  ;;  %v8532_v32 = vpop.xlane.xlu0 %8531  ;;  %v8601_v37 = vpack.c.bf16 %v8594_v39, %v8593_v14 }
0x2189   : > { %v8547_v1 = vadd.f32 1e-05, %v8539_v53  ;;  %v8540_v7 = vmul.f32 0.015625, %v8532_v32 }
0x218a   : > { %v8587_v0 = vadd.f32 %v9826_v61, %v8573_v18  ;;  %v8574_v16 = vmul.f32 %v9825_v59, %v8560_v29  ;;  %10675 = vmatprep.mubr.msk.bf16.mxu0 %vm1131_vm4, %v8601_v37 }
0x218b   : > { %11561 = vrsqrt.f32 %v8547_v1  ;;  %v8548_v24 = vadd.f32 1e-05, %v8540_v7  ;;  %v14609_v1 = vld [vmem:[#allocation21_spill] sm:$0xff] (!%p9839_p10) }
0x218c   : > { %v8588_v26 = vadd.f32 %v9826_v61, %v8574_v16  ;;  %v8595_v50 = vmul.f32 %v8587_v0, %v11978_v42  ;;  %v8745_v7 = vmul.f32 (!%p9839_p10), %v11976_v41, %v14609_v1  ;;  %v14611_v16 = vld [vmem:[#allocation22_spill] sm:$0xff] (!%p9839_p10) }
0x218d   : > { %v11558_v23 = vpop.eup %11557  ;;  %11563 = vrsqrt.f32 %v8548_v24  ;;  %v8746_v24 = vmul.f32 (!%p9839_p10), %v11985_v44, %v14611_v16 }
0x218e   : > { %v8596_v34 = vmul.f32 %v8588_v26, %v11987_v45  ;;  %v8561_v43 = vmul.f32 %v11558_v23, %v14170_v2  ;;  %8761 = vrot.lane.b32.xlu0 (!%p9839_p10), %v8745_v7, %s11615_s2  ;;  %v14614_v23 = vld [vmem:[#allocation29_spill] sm:$0xff] (!%p9839_p10) }
0x218f   : > { %v11560_v13 = vpop.eup %11559 }
0x2190   : > { %v8562_v40 = vmul.f32 %v11560_v13, %v14172_v49  ;;  %v8602_v38 = vpack.c.bf16 %v8596_v34, %v8595_v50  ;;  %v8575_v28 = vmul.f32 %v9825_v59, %v8561_v43  ;;  %v14615_v34 = vld [vmem:[#allocation25_spill] sm:$0xff] (!%p9839_p10)  ;;  %v14616_v13 = vld [vmem:[#allocation28_spill] sm:$0xff] (!%p9839_p10) }
0x2191   : > { %v8749_v43 = vmul.f32 (!%p9839_p10), %v11991_v56, %v14615_v34 }
0x2192   : > { %10676 = vmatmul.mubr.msk.bf16.vlgmr.msra.gmra.mrb[160].mxu0 %vm1131_vm4, %v8602_v38  ;;  %v8576_v5 = vmul.f32 %v9825_v59, %v8562_v40  ;;  %v8589_v30 = vadd.f32 %v9826_v61, %v8575_v28  ;;  %8763 = vrot.lane.b32.xlu0 (!%p9839_p10), %v8746_v24, %s11615_s2  ;;  %v14617_v40 = vld [vmem:[#allocation31_spill] sm:$0xff] (!%p9839_p10) }
0x2193   : > { %v8752_v38 = vmul.f32 (!%p9839_p10), %v14617_v40, %v14616_v13  ;;  %v14618_v28 = vld [vmem:[#allocation27_spill] sm:$0xff] (!%p9839_p10) }
0x2194   : > { %v8590_v60 = vadd.f32 %v9826_v61, %v8576_v5  ;;  %v8597_v36 = vmul.f32 %v8589_v30, %v11991_v56  ;;  %v14619_v5 = vld [vmem:[#allocation30_spill] sm:$0xff] (!%p9839_p10) }
0x2195   : > { %v11562_v11 = vpop.eup %11561  ;;  %v8751_v30 = vmul.f32 (!%p9839_p10), %v14619_v5, %v14618_v28 }
0x2196   : > { %v8563_v12 = vmul.f32 %v11562_v11, %v14180_v25  ;;  %v8598_v2 = vmul.f32 %v8590_v60, %v14602_v10  ;;  %8769 = vrot.lane.b32.xlu0 (!%p9839_p10), %v8749_v43, %s11615_s2 }
0x2197   : > { %v11564_v31 = vpop.eup %11563 }
0x2198   : > { %v8564_v49 = vmul.f32 %v11564_v31, %v14182_v21  ;;  %v8603_v6 = vpack.c.bf16 %v8598_v2, %v8597_v36  ;;  %v8577_v62 = vmul.f32 %v9825_v59, %v8563_v12  ;;  %v9827_v21 = vld [vmem:[%s1103_s12] ss:$0 sm:$0xff] }
0x219a   : > { %10679 = vmatprep.mubr.msk.bf16.mxu0 %vm1131_vm4, %v8603_v6  ;;  %v8578_v27 = vmul.f32 %v9825_v59, %v8564_v49  ;;  %v8591_v58 = vadd.f32 %v9826_v61, %v8577_v62  ;;  %8773 = vrot.lane.b32.xlu0 (!%p9839_p10), %v8751_v30, %s11615_s2 }
0x219c   : > { %v8592_v55 = vadd.f32 %v9826_v61, %v8578_v27  ;;  %v8599_v35 = vmul.f32 %v8591_v58, %v14603_v17 }
0x219e   : > { %v8600_v25 = vmul.f32 %v8592_v55, %v14604_v22 }
0x21a0   : > { %v8604_v57 = vpack.c.bf16 %v8600_v25, %v8599_v35 }
0x21a2   : > { %10680 = vmatmul.mubr.msk.bf16.gmra.mrb[164].mxu0 %vm1131_vm4, %v8604_v57 }
0x2200   : > { %v8762_v60 = vpop.permute.xlu0 (!%p9839_p10), %8761 }
0x2204   : > { %v8764_v2 = vpop.permute.xlu0 (!%p9839_p10), %8763 }
0x2208   : > { %v8770_v27 = vpop.permute.xlu0 (!%p9839_p10), %8769 }
0x220c   : > { %v8774_v25 = vpop.permute.xlu0 (!%p9839_p10), %8773 }
0x2265   : > { %v10677_v59 = vpop.f32.mrb[160].mxu0 }
0x2266   : > { %v8699_v20 = vadd.f32 %v10677_v59, %v9827_v21  ;;  %v8690_v61 = vpop.f32.mrb[161].mxu0 }
0x2267   : > { %v8691_v8 = vadd.f32 %v9827_v21, %v8690_v61  ;;  %v10678_v48 = vpop.f32.mrb[162].mxu0 }
0x2268   : > { %v14227_v51 = vmul.f32 %v8699_v20, %v11978_v42  ;;  %v8702_v33 = vadd.f32 %v10678_v48, %v9827_v21  ;;  %v8693_v4 = vpop.f32.mrb[163].mxu0 }
0x2269   : > { %v14230_v52 = vmul.f32 %v8691_v8, %v11976_v41  ;;  %v8694_v54 = vadd.f32 %v9827_v21, %v8693_v4 }
0x226a   : > { %v14233_v3 = vmul.f32 %v8702_v33, %v11987_v45 }
0x226b   : > { %v14236_v9 = vmul.f32 %v8694_v54, %v11985_v44  ;;  %v8785_v12 = vadd.f32 (!%p9839_p10), %v8762_v60, %v14230_v52 }
0x226d   : > { %8801 = vrot.lane.b32.xlu0 (!%p9839_p10), %v8785_v12, %s11616_s0  ;;  %v8786_v49 = vadd.f32 (!%p9839_p10), %v8764_v2, %v14236_v9 }
0x2275   : > { %v10681_v46 = vpop.f32.mrb[164].mxu0  ;;  %8744 = sbr.rel (%p9839_p10) target bundleno = 9073 (0x2371), region = 120 }
0x2276   : > { %v8715_v19 = vadd.f32 %v10681_v46, %v9827_v21  ;;  %v8706_v63 = vpop.f32.mrb[165].mxu0 }
0x2277   : > { %v8707_v47 = vadd.f32 %v9827_v21, %v8706_v63  ;;  %v10682_v14 = vpop.f32.mrb[166].mxu0 }
0x2278   : > { %v14239_v39 = vmul.f32 %v8715_v19, %v14603_v17  ;;  %v8718_v15 = vadd.f32 %v10682_v14, %v9827_v21  ;;  %v8709_v53 = vpop.f32.mrb[167].mxu0  ;;  %v14610_v17 = vld [vmem:[#allocation23_spill] sm:$0xff] (!%p9839_p10) }
0x2279   : > { %v14242_v18 = vmul.f32 %v8707_v47, %v11991_v56  ;;  %v8710_v29 = vadd.f32 %v9827_v21, %v8709_v53  ;;  %v8747_v0 = vmul.f32 (!%p9839_p10), %v11978_v42, %v14610_v17 }
0x227a   : > { %v14245_v32 = vmul.f32 %v8718_v15, %v14604_v22  ;;  %v14612_v22 = vld [vmem:[#allocation24_spill] sm:$0xff] (!%p9839_p10)  ;;  %v8791_v57 = vadd.f32 (!%p9839_p10), %v8774_v25, %v14239_v39 }
0x227b   : > { %v14248_v37 = vmul.f32 %v8710_v29, %v14602_v10  ;;  %8765 = vrot.lane.b32.xlu1 (!%p9839_p10), %v8747_v0, %s11615_s2  ;;  %v8748_v26 = vmul.f32 (!%p9839_p10), %v11987_v45, %v14612_v22  ;;  %v14613_v10 = vld [vmem:[#allocation26_spill] sm:$0xff] (!%p9839_p10)  ;;  %v8789_v58 = vadd.f32 (!%p9839_p10), %v8770_v27, %v14242_v18 }
0x227c   : > { %v8750_v50 = vmul.f32 %v14614_v23, %v14613_v10 }
0x227f   : > { %8767 = vrot.lane.b32.xlu1 %v8748_v26, %s11615_s2 }
0x2283   : > { %8771 = vrot.lane.b32.xlu1 %v8750_v50, %s11615_s2 }
0x2287   : > { %8775 = vrot.lane.b32.xlu1 %v8752_v38, %s11615_s2 }
0x228b   : > { %8803 = vrot.lane.b32.xlu1 %v8786_v49, %s11616_s0 }
0x22df   : > { %v8802_v59 = vpop.permute.xlu0 %8801 }
0x22e0   : > { %v8826_v20 = vsel %vm8825_vm0, %v14609_v1, %v8802_v59 }
0x22e1   : > { %8834 = vst.msk [vmem:[#allocation2] sm:$0xff] %vm1163_vm2, %v8826_v20 }
0x22ed   : > { %v8766_v11 = vpop.permute.xlu1 %8765 }
0x22ee   : > { %v8787_v36 = vadd.f32 %v8766_v11, %v14227_v51 }
0x22f0   : > { %8805 = vrot.lane.b32.xlu0 %v8787_v36, %s11616_s0 }
0x22f1   : > { %v8768_v31 = vpop.permute.xlu1 %8767 }
0x22f2   : > { %v8788_v6 = vadd.f32 %v8768_v31, %v14233_v3 }
0x22f4   : > { %8807 = vrot.lane.b32.xlu1 %v8788_v6, %s11616_s0  ;;  %8809 = vrot.lane.b32.xlu0 %v8789_v58, %s11616_s0 }
0x22f5   : > { %v8772_v62 = vpop.permute.xlu1 %8771 }
0x22f6   : > { %v8790_v55 = vadd.f32 %v8772_v62, %v14248_v37 }
0x22f8   : > { %8811 = vrot.lane.b32.xlu1 %v8790_v55, %s11616_s0  ;;  %8813 = vrot.lane.b32.xlu0 %v8791_v57, %s11616_s0 }
0x22f9   : > { %v8776_v35 = vpop.permute.xlu1 %8775 }
0x22fa   : > { %v8792_v21 = vadd.f32 %v8776_v35, %v14245_v32 }
0x22fc   : > { %8815 = vrot.lane.b32.xlu1 %v8792_v21, %s11616_s0 }
0x22fd   : > { %v8804_v61 = vpop.permute.xlu1 %8803 }
0x22fe   : > { %v8827_v48 = vsel %vm8825_vm0, %v14611_v16, %v8804_v61 }
0x22ff   : > { %8835 = vst.msk [vmem:[#allocation2 + $0x8] sm:$0xff] %vm1163_vm2, %v8827_v48 }
0x2362   : > { %v8806_v8 = vpop.permute.xlu0 %8805 }
0x2363   : > { %v8828_v33 = vsel %vm8825_vm0, %v14610_v17, %v8806_v8 }
0x2364   : > { %8836 = vst.msk [vmem:[#allocation2 + $0x10] sm:$0xff] %vm1163_vm2, %v8828_v33 }
0x2366   : > { %v8808_v4 = vpop.permute.xlu1 %8807  ;;  %v8810_v54 = vpop.permute.xlu0 %8809 }
0x2367   : > { %v8829_v46 = vsel %vm8825_vm0, %v14612_v22, %v8808_v4  ;;  %v8830_v19 = vsel %vm8825_vm0, %v14615_v34, %v8810_v54 }
0x2368   : > { %8837 = vst.msk [vmem:[#allocation2 + $0x18] sm:$0xff] %vm1163_vm2, %v8829_v46  ;;  %8838 = vst.msk [vmem:[#allocation2 + $0x20] sm:$0xff] %vm1163_vm2, %v8830_v19 }
0x236a   : > { %v8812_v63 = vpop.permute.xlu1 %8811  ;;  %v8814_v47 = vpop.permute.xlu0 %8813 }
0x236b   : > { %v8831_v14 = vsel %vm8825_vm0, %v14613_v10, %v8812_v63  ;;  %v8832_v15 = vsel %vm8825_vm0, %v14618_v28, %v8814_v47 }
0x236c   : > { %8839 = vst.msk [vmem:[#allocation2 + $0x28] sm:$0xff] %vm1163_vm2, %v8831_v14  ;;  %8840 = vst.msk [vmem:[#allocation2 + $0x30] sm:$0xff] %vm1163_vm2, %v8832_v15 }
0x236e   : > { %v8816_v53 = vpop.permute.xlu1 %8815 }
0x236f   : > { %v8833_v29 = vsel %vm8825_vm0, %v14616_v13, %v8816_v53 }
0x2370   : > { %8841 = vst.msk [vmem:[#allocation2 + $0x38] sm:$0xff] %vm1163_vm2, %v8833_v29 }
0x2371 PF: > { %p9840_p11 = scmp.eq.s32.totalorder %s14648_s7, 0 }
0x2372   : > { %v14620_v1 = vld [vmem:[#allocation21_spill] sm:$0xff] (!%p9840_p11)  ;;  %vm8862_vm1 = vcmask (!%p9840_p11), 31744   ;;  %v14621_v17 = vld [vmem:[#allocation22_spill] sm:$0xff] (!%p9840_p11)  ;;  %v14622_v16 = vld [vmem:[#allocation23_spill] sm:$0xff] (!%p9840_p11) }
0x2373   : > { %8845 = sbr.rel (%p9840_p11) target bundleno = 9084 (0x237c), region = 124  ;;  %v8846_v7 = vmul.f32 (!%p9840_p11), %v11976_v41, %v14620_v1  ;;  %v8847_v0 = vmul.f32 (!%p9840_p11), %v11985_v44, %v14621_v17  ;;  %v8848_v24 = vmul.f32 (!%p9840_p11), %v11978_v42, %v14622_v16  ;;  %v14623_v22 = vld [vmem:[#allocation24_spill] sm:$0xff] (!%p9840_p11)  ;;  %v14624_v10 = vld [vmem:[#allocation25_spill] sm:$0xff] (!%p9840_p11)  ;;  %v14625_v50 = vld [vmem:[#allocation26_spill] sm:$0xff] (!%p9840_p11) }
0x2374   : > { %v8849_v26 = vmul.f32 (!%p9840_p11), %v11987_v45, %v14623_v22  ;;  %v8850_v23 = vmul.f32 (!%p9840_p11), %v11991_v56, %v14624_v10  ;;  %v14626_v34 = vld [vmem:[#allocation29_spill] sm:$0xff] (!%p9840_p11)  ;;  %v14627_v13 = vld [vmem:[#allocation27_spill] sm:$0xff] (!%p9840_p11)  ;;  %v14628_v40 = vld [vmem:[#allocation30_spill] sm:$0xff] (!%p9840_p11) }
0x2375   : > { %v8851_v43 = vmul.f32 (!%p9840_p11), %v14626_v34, %v14625_v50  ;;  %v8852_v38 = vmul.f32 (!%p9840_p11), %v14628_v40, %v14627_v13  ;;  %v8854_v41 = vadd.f32 (!%p9840_p11), %v8846_v7, %v14230_v52  ;;  %v8855_v28 = vadd.f32 (!%p9840_p11), %v8847_v0, %v14236_v9  ;;  %v14629_v5 = vld [vmem:[#allocation28_spill] sm:$0xff] (!%p9840_p11)  ;;  %v14630_v42 = vld [vmem:[#allocation31_spill] sm:$0xff] (!%p9840_p11) }
0x2376   : > { %v8856_v44 = vadd.f32 (!%p9840_p11), %v8848_v24, %v14227_v51  ;;  %v8853_v30 = vmul.f32 (!%p9840_p11), %v14630_v42, %v14629_v5  ;;  %v8857_v45 = vadd.f32 (!%p9840_p11), %v8849_v26, %v14233_v3  ;;  %v8858_v60 = vadd.f32 (!%p9840_p11), %v8850_v23, %v14242_v18 }
0x2377   : > { %v8859_v56 = vadd.f32 (!%p9840_p11), %v8851_v43, %v14248_v37  ;;  %v8860_v11 = vadd.f32 (!%p9840_p11), %v8852_v38, %v14239_v39  ;;  %v8863_v12 = vsel (!%p9840_p11), %vm8862_vm1, %v8854_v41, %v14620_v1  ;;  %v8864_v52 = vsel (!%p9840_p11), %vm8862_vm1, %v8855_v28, %v14621_v17 }
0x2378   : > { %v8865_v51 = vsel (!%p9840_p11), %vm8862_vm1, %v8856_v44, %v14622_v16  ;;  %v8861_v9 = vadd.f32 (!%p9840_p11), %v8853_v30, %v14245_v32  ;;  %8871 = vst.msk [vmem:[#allocation2] sm:$0xff] (!%p9840_p11), %vm1163_vm2, %v8863_v12  ;;  %8872 = vst.msk [vmem:[#allocation2 + $0x8] sm:$0xff] (!%p9840_p11), %vm1163_vm2, %v8864_v52  ;;  %v8866_v3 = vsel (!%p9840_p11), %vm8862_vm1, %v8857_v45, %v14623_v22 }
0x2379   : > { %8873 = vst.msk [vmem:[#allocation2 + $0x10] sm:$0xff] (!%p9840_p11), %vm1163_vm2, %v8865_v51  ;;  %v8867_v39 = vsel (!%p9840_p11), %vm8862_vm1, %v8858_v60, %v14624_v10  ;;  %v8868_v18 = vsel (!%p9840_p11), %vm8862_vm1, %v8859_v56, %v14625_v50  ;;  %v8869_v37 = vsel (!%p9840_p11), %vm8862_vm1, %v8860_v11, %v14627_v13  ;;  %8874 = vst.msk [vmem:[#allocation2 + $0x18] sm:$0xff] (!%p9840_p11), %vm1163_vm2, %v8866_v3 }
0x237a   : > { %8875 = vst.msk [vmem:[#allocation2 + $0x20] sm:$0xff] %vm1163_vm2, %v8867_v39  ;;  %8876 = vst.msk [vmem:[#allocation2 + $0x28] sm:$0xff] %vm1163_vm2, %v8868_v18  ;;  %v8870_v32 = vsel %vm8862_vm1, %v8861_v9, %v14629_v5 }
0x237b   : > { %8877 = vst.msk [vmem:[#allocation2 + $0x30] sm:$0xff] %vm1163_vm2, %v8869_v37  ;;  %8878 = vst.msk [vmem:[#allocation2 + $0x38] sm:$0xff] %vm1163_vm2, %v8870_v32 }
0x237c PF: > { %s14631_s12 = sld [smem:[#allocation5_spill]] }
0x2382   : > { %p9841_p12 = scmp.ne.s32.totalorder %s14631_s12, 3 }
0x2383   : > { %v8883_v36 = vld [vmem:[#allocation2] sm:$0xff] (!%p9841_p12)  ;;  %v8884_v2 = vld [vmem:[#allocation2 + $0x8] sm:$0xff] (!%p9841_p12)  ;;  %v8885_v31 = vld [vmem:[#allocation2 + $0x10] sm:$0xff] (!%p9841_p12) }
0x2384   : > { %8882 = sbr.rel (%p9841_p12) target bundleno = 9099 (0x238b), region = 128  ;;  %8891 = vst.msk [vmem:[%s11907_s9] sm:$0xff] (!%p9841_p12), %vm1163_vm2, %v8883_v36  ;;  %8892 = vst.msk [vmem:[%s11907_s9 + $0x8] sm:$0xff] (!%p9841_p12), %vm1163_vm2, %v8884_v2  ;;  %v8886_v49 = vld [vmem:[#allocation2 + $0x18] sm:$0xff] (!%p9841_p12)  ;;  %v8887_v6 = vld [vmem:[#allocation2 + $0x20] sm:$0xff] (!%p9841_p12) }
0x2385   : > { %8893 = vst.msk [vmem:[%s11907_s9 + $0x10] sm:$0xff] (!%p9841_p12), %vm1163_vm2, %v8885_v31  ;;  %v8888_v62 = vld [vmem:[#allocation2 + $0x28] sm:$0xff] (!%p9841_p12)  ;;  %8894 = vst.msk [vmem:[%s11907_s9 + $0x18] sm:$0xff] (!%p9841_p12), %vm1163_vm2, %v8886_v49  ;;  %v8889_v27 = vld [vmem:[#allocation2 + $0x30] sm:$0xff] (!%p9841_p12) }
0x2386   : > { %8895 = vst.msk [vmem:[%s11907_s9 + $0x20] sm:$0xff] (!%p9841_p12), %vm1163_vm2, %v8887_v6  ;;  %8896 = vst.msk [vmem:[%s11907_s9 + $0x28] sm:$0xff] (!%p9841_p12), %vm1163_vm2, %v8888_v62  ;;  %v8890_v58 = vld [vmem:[#allocation2 + $0x38] sm:$0xff] (!%p9841_p12) }
0x2387   : > { %8897 = vst.msk [vmem:[%s11907_s9 + $0x30] sm:$0xff] (!%p9841_p12), %vm1163_vm2, %v8889_v27  ;;  %8898 = vst.msk [vmem:[%s11907_s9 + $0x38] sm:$0xff] (!%p9841_p12), %vm1163_vm2, %v8890_v58 }
0x238b PF: > { %s14632_s29 = sld [smem:[#allocation8_spill]]  ;;  %s14633_s4 = sld [smem:[#allocation6_spill]] }
0x238c   : > { %s14634_s30 = sld [smem:[#allocation7_spill]]  ;;  %s14635_s24 = sld [smem:[#allocation9_spill]] }
0x238d   : > { %s14636_s25 = sld [smem:[#allocation10_spill]] }
0x2391   : > { %s33_s5 = sadd.s32 1, %s14632_s29  }
0x2392   : > { %p30_p13 = scmp.ge.s32.totalorder %s33_s5, 10  }
0x2394   :  { %32 = sbr.rel (!%p30_p13) target bundleno = 25 (0x19), region = 244 }

</bundles_post_ra>
